<compile_context>
chip_gen: v5e
topology: v5e:2x2
jax: 0.10.0
libtpu: 0.0.40
codegen_flags: <defaults>
</compile_context>

<pallas_src>
import functools

import jax
import jax.numpy as jnp
from jax.experimental import pallas as pl
from jax.experimental.pallas import tpu as pltpu


def _resblock_down_kernel(xp_ref, w1_ref, b1_ref, w2_ref, b2_ref, ws_ref, bs_ref,
                          o_ref, pad2_ref, pool_ref, *, H, W, Wp, front):
    # xp_ref:   (1, front + (H+2)*Wp + 8, Cin) bf16  zero-padded, flattened input
    # w1_ref:   (3, 3, Cin, Cout) bf16   conv1 weights (HWIO)
    # w2_ref:   (3, 3, Cout, Cout) bf16  conv2 weights (HWIO)
    # ws_ref:   (Cin, Cout) bf16         1x1 shortcut conv weights
    # b*_ref:   (1, Cout) f32
    # o_ref:    (1, (H//2)*(Wp//2), Cout) f32
    # pad2_ref: ((H+2)*Wp + 8, Cout) bf16  persistent scratch: padded relu(conv1)
    # pool_ref: ((H//2)*Wp, Cout) f32      scratch: height-pooled main+skip sum
    Cin = xp_ref.shape[-1]
    Cout = o_ref.shape[-1]
    L = H * Wp                     # rows of one conv-output block
    OH = H // 2
    Ptot2 = pad2_ref.shape[0]

    # ---- conv1 (3x3, pad=1) on relu(x): 9 contiguous-slice tap matmuls ------
    # Block layout: row r*Wp + j holds conv1(relu(x)) at spatial (r, j-1);
    # columns j == 0 and j > W are junk and are masked to zero below.
    acc1 = jnp.zeros((L, Cout), jnp.float32)
    for kh in range(3):
        for kw in range(3):
            start = front + kh * Wp + (kw - 1)
            tap = xp_ref[0, pl.ds(start, L), :]              # (L, Cin) bf16, contiguous
            tap = jnp.maximum(tap, 0)                        # relu (zero padding stays 0)
            acc1 = acc1 + jnp.dot(tap, w1_ref[kh, kw],
                                  preferred_element_type=jnp.float32)

    # ---- relu(conv1 + b1) -> pad2 scratch (zero-padded image for conv2) -----
    jj = jax.lax.broadcasted_iota(jnp.int32, (H, Wp, 1), 1)
    keep = jnp.logical_and(jj >= 1, jj <= W)                 # real image columns
    h1 = jnp.maximum(acc1 + b1_ref[...], 0.0).reshape(H, Wp, Cout)
    h1 = jnp.where(keep, h1, 0.0).astype(jnp.bfloat16).reshape(L, Cout)
    # Tiny top/bottom border strips (+ tap-overreach slop).  Rewritten every
    # step (cheap) so correctness holds even when the 'parallel' grid axis is
    # sharded across TensorCores with per-core scratch.
    pad2_ref[0:Wp, :] = jnp.zeros((Wp, Cout), jnp.bfloat16)
    pad2_ref[(H + 1) * Wp:, :] = jnp.zeros((Ptot2 - (H + 1) * Wp, Cout), jnp.bfloat16)
    # Interior rows 1..H: one contiguous, sublane-aligned store (Wp % 8 == 0).
    pad2_ref[Wp:Wp + L, :] = h1

    # ---- conv2 (3x3, pad=1) on relu(conv1 + b1) ------------------------------
    # Block layout: row r*Wp + j holds conv2 at spatial (r, j); j >= W is junk.
    acc2 = jnp.zeros((L, Cout), jnp.float32)
    for kh in range(3):
        for kw in range(3):
            tap = pad2_ref[pl.ds(kh * Wp + kw, L), :]        # (L, Cout) bf16, contiguous
            acc2 = acc2 + jnp.dot(tap, w2_ref[kh, kw],
                                  preferred_element_type=jnp.float32)

    # ---- shortcut + 2x2 avg-pool (linear, done on VPU + a tiny matmul) -------
    # Raw (pre-relu) x in the same "spatial (r, j)" block layout; junk cols = 0.
    xs = xp_ref[0, pl.ds(front + Wp + 1, L), :]              # (L, Cin) bf16
    # Height pair-sum (rows 2*oh and 2*oh+1); reshapes and the aligned sublane
    # slices below are layout-preserving because Wp is a multiple of 8.
    hy = acc2.reshape(OH, 2 * Wp, Cout)
    hy = hy[:, :Wp, :] + hy[:, Wp:, :]                       # (OH, Wp, Cout) f32
    hx = xs.reshape(OH, 2 * Wp, Cin)
    hx = hx[:, :Wp, :] + hx[:, Wp:, :]                       # (OH, Wp, Cin) bf16
    # 1x1 shortcut conv at half resolution (avg-pool and 1x1 conv commute).
    sx = jnp.dot(hx.reshape(OH * Wp, Cin), ws_ref[...],
                 preferred_element_type=jnp.float32)         # (OH*Wp, Cout) f32
    pool_ref[...] = hy.reshape(OH * Wp, Cout) + sx
    # Width pair-sum (cols 2*ow and 2*ow+1) via sublane-strided ref loads.
    half = (OH * Wp) // 2
    even = pool_ref[pl.ds(0, half, stride=2), :]
    odd = pool_ref[pl.ds(1, half, stride=2), :]
    o_ref[0] = 0.25 * (even + odd) + b2_ref[...] + bs_ref[...]


def res_block_down(x_nchw, params):
    """Pallas implementation of ResBlock_Down.forward (downsample=True)."""
    w1, b1, w2, b2, ws, bs = params
    N, Cin, H, W = x_nchw.shape
    Cout = w1.shape[-1]
    assert H % 2 == 0 and W % 2 == 0

    Wp = ((W + 2 + 7) // 8) * 8        # padded row pitch, multiple of 8
    FRONT = 8                          # slop so the (kh=0, kw=0) tap never underflows
    BACK = 8                           # slop so the (kh=2, kw=2) tap never overflows
    Ptot1 = FRONT + (H + 2) * Wp + BACK
    Ptot2 = (H + 2) * Wp + BACK
    OH, OWp = H // 2, Wp // 2

    # NCHW -> NHWC in bf16 (halves transpose HBM traffic), zero-pad the spatial
    # borders (left 1 / right Wp-W-1 / top 1 / bottom 1), flatten, add slop.
    x = jnp.transpose(x_nchw.astype(jnp.bfloat16), (0, 2, 3, 1))
    xp = jnp.pad(x, ((0, 0), (1, 1), (1, Wp - W - 1), (0, 0)))
    xp = xp.reshape(N, (H + 2) * Wp, Cin)
    xp = jnp.pad(xp, ((0, 0), (FRONT, BACK), (0, 0)))

    kernel = functools.partial(_resblock_down_kernel, H=H, W=W, Wp=Wp, front=FRONT)

    grid_spec = pltpu.PrefetchScalarGridSpec(
        num_scalar_prefetch=0,
        grid=(N,),
        in_specs=[
            pl.BlockSpec((1, Ptot1, Cin), lambda n: (n, 0, 0)),
            pl.BlockSpec((3, 3, Cin, Cout), lambda n: (0, 0, 0, 0)),
            pl.BlockSpec((1, Cout), lambda n: (0, 0)),
            pl.BlockSpec((3, 3, Cout, Cout), lambda n: (0, 0, 0, 0)),
            pl.BlockSpec((1, Cout), lambda n: (0, 0)),
            pl.BlockSpec((Cin, Cout), lambda n: (0, 0)),
            pl.BlockSpec((1, Cout), lambda n: (0, 0)),
        ],
        out_specs=pl.BlockSpec((1, OH * OWp, Cout), lambda n: (n, 0, 0)),
        scratch_shapes=[
            pltpu.VMEM((Ptot2, Cout), jnp.bfloat16),    # zero-padded relu(conv1) image
            pltpu.VMEM((OH * Wp, Cout), jnp.float32),   # height-pooled main+skip sum
        ],
    )

    flops = (2 * N * H * Wp * Cout * (9 * Cin + 9 * Cout)
             + 2 * N * OH * Wp * Cin * Cout)
    bytes_accessed = (N * Ptot1 * Cin * 2
                      + (9 * Cin * Cout + 9 * Cout * Cout + Cin * Cout) * 2
                      + 3 * Cout * 4
                      + N * OH * OWp * Cout * 4)

    out_flat = pl.pallas_call(
        kernel,
        out_shape=jax.ShapeDtypeStruct((N, OH * OWp, Cout), jnp.float32),
        grid_spec=grid_spec,
        compiler_params=pltpu.CompilerParams(
            dimension_semantics=("parallel",),
            vmem_limit_bytes=64 * 1024 * 1024,
        ),
        cost_estimate=pl.CostEstimate(flops=flops, transcendentals=0,
                                      bytes_accessed=bytes_accessed),
    )(xp,
      w1.astype(jnp.bfloat16), b1.reshape(1, Cout).astype(jnp.float32),
      w2.astype(jnp.bfloat16), b2.reshape(1, Cout).astype(jnp.float32),
      ws.astype(jnp.bfloat16), bs.reshape(1, Cout).astype(jnp.float32))

    # Drop the junk pooled columns (ow >= W//2) and go back to NCHW.
    out = out_flat.reshape(N, OH, OWp, Cout)[:, :, : W // 2, :]
    return jnp.transpose(out, (0, 3, 1, 2))


# ----------------- parameter setup (plain JAX glue) -----------------
def spectral_normalize(w, key, n_iter=3):
    # Mimics torch.nn.utils.spectral_norm: divide the weight by its largest
    # singular value (estimated by power iteration on the (out_ch, -1) matrix).
    out_ch = w.shape[0]
    w_mat = w.reshape(out_ch, -1)
    u = jax.random.normal(key, (out_ch,), dtype=w.dtype)
    u = u / (jnp.linalg.norm(u) + 1e-12)
    v = None
    for _ in range(n_iter):
        v = w_mat.T @ u
        v = v / (jnp.linalg.norm(v) + 1e-12)
        u = w_mat @ v
        u = u / (jnp.linalg.norm(u) + 1e-12)
    sigma = jnp.dot(u, w_mat @ v)
    return w / sigma


def init_params(key, in_ch, out_ch, k=3):
    keys = jax.random.split(key, 9)
    # PyTorch conv weight layout: (out, in, kh, kw); bias: (out,)
    w1 = 0.1 * jax.random.normal(keys[0], (out_ch, in_ch, k, k), jnp.float32)
    b1 = 0.1 * jax.random.normal(keys[1], (out_ch,), jnp.float32)
    w2 = 0.1 * jax.random.normal(keys[2], (out_ch, out_ch, k, k), jnp.float32)
    b2 = 0.1 * jax.random.normal(keys[3], (out_ch,), jnp.float32)
    ws = 0.1 * jax.random.normal(keys[4], (out_ch, in_ch, 1, 1), jnp.float32)
    bs = 0.1 * jax.random.normal(keys[5], (out_ch,), jnp.float32)
    # spectral norm (biases untouched, as in torch)
    w1 = spectral_normalize(w1, keys[6])
    w2 = spectral_normalize(w2, keys[7])
    ws = spectral_normalize(ws, keys[8])
    # convert to kernel layouts: HWIO for 3x3, (Cin, Cout) for the 1x1 shortcut
    w1_hwio = jnp.transpose(w1, (2, 3, 1, 0))
    w2_hwio = jnp.transpose(w2, (2, 3, 1, 0))
    ws_io = jnp.transpose(ws[:, :, 0, 0], (1, 0))
    return (w1_hwio, b1, w2_hwio, b2, ws_io, bs)


# ----------------- pure-JAX reference for validation -----------------
def ref_forward(x_nchw, params):
    w1, b1, w2, b2, ws, bs = params
    x = jnp.transpose(x_nchw, (0, 2, 3, 1)).astype(jnp.float32)

    def conv(h, w, b, pad):
        y = jax.lax.conv_general_dilated(
            h, w, window_strides=(1, 1),
            padding=[(pad, pad), (pad, pad)],
            dimension_numbers=('NHWC', 'HWIO', 'NHWC'))
        return y + b

    def avg_pool2(h):
        n, hh, ww, c = h.shape
        return h.reshape(n, hh // 2, 2, ww // 2, 2, c).mean(axis=(2, 4))

    out = jax.nn.relu(x)
    out = conv(out, w1, b1, 1)
    out = jax.nn.relu(out)
    out = conv(out, w2, b2, 1)
    out = avg_pool2(out)
    cin, cout = ws.shape
    skip = conv(x, ws.reshape(1, 1, cin, cout), bs, 0)
    skip = avg_pool2(skip)
    return jnp.transpose(out + skip, (0, 3, 1, 2))


if __name__ == "__main__":
    key = jax.random.PRNGKey(0)
    k_x, k_p = jax.random.split(key)
    N, Cin, Cout, H, W = 2, 4, 8, 16, 16

    x = jax.random.normal(k_x, (N, Cin, H, W), jnp.float32)   # NCHW like PyTorch
    params = init_params(k_p, Cin, Cout)

    fwd = jax.jit(res_block_down)
    out = jax.block_until_ready(fwd(x, params))

    ref = ref_forward(x, params)
    assert out.shape == (N, Cout, H // 2, W // 2), out.shape
    assert bool(jnp.all(jnp.isfinite(out)))
    err = float(jnp.max(jnp.abs(out - ref)))
    # bf16 MXU operands with f32 accumulation: slightly looser tolerance than f32.
    assert err < 5e-2, f"max abs err vs reference: {err}"
    print("KERNEL_OK")
</pallas_src>

<mosaic_0001>
module attributes {stable_mosaic.version = 11 : i64} {
  func.func @_resblock_down_kernel(%arg0: i32, %arg1: memref<1x448x4xbf16, #tpu.memory_space<vmem>>, %arg2: memref<3x3x4x8xbf16, #tpu.memory_space<vmem>>, %arg3: memref<1x8xf32, #tpu.memory_space<vmem>>, %arg4: memref<3x3x8x8xbf16, #tpu.memory_space<vmem>>, %arg5: memref<1x8xf32, #tpu.memory_space<vmem>>, %arg6: memref<4x8xbf16, #tpu.memory_space<vmem>>, %arg7: memref<1x8xf32, #tpu.memory_space<vmem>>, %arg8: memref<1x96x8xf32, #tpu.memory_space<vmem>>, %arg9: memref<440x8xbf16, #tpu.memory_space<vmem>>, %arg10: memref<192x8xf32, #tpu.memory_space<vmem>>) attributes {dimension_semantics = [#tpu.dimension_semantics<parallel>], iteration_bounds = array<i64: 2>, scalar_prefetch = 0 : i64, scratch_operands = 2 : i64, tpu.core_type = #tpu.core_type<tc>, window_params = [{transform_indices = @transform_0, window_bounds = array<i64: 1, 448, 4>}, {pipeline_mode = #tpu.pipeline_mode<synchronous>, transform_indices = @transform_1, window_bounds = array<i64: 3, 3, 4, 8>}, {pipeline_mode = #tpu.pipeline_mode<synchronous>, transform_indices = @transform_2, window_bounds = array<i64: 1, 8>}, {pipeline_mode = #tpu.pipeline_mode<synchronous>, transform_indices = @transform_3, window_bounds = array<i64: 3, 3, 8, 8>}, {pipeline_mode = #tpu.pipeline_mode<synchronous>, transform_indices = @transform_4, window_bounds = array<i64: 1, 8>}, {pipeline_mode = #tpu.pipeline_mode<synchronous>, transform_indices = @transform_5, window_bounds = array<i64: 4, 8>}, {pipeline_mode = #tpu.pipeline_mode<synchronous>, transform_indices = @transform_6, window_bounds = array<i64: 1, 8>}, {transform_indices = @transform_7, window_bounds = array<i64: 1, 96, 8>}]} {
    %cst = arith.constant 0.000000e+00 : f32
    %0 = vector.broadcast %cst : f32 to vector<384x8xf32>
    %c0 = arith.constant 0 : index
    %c7 = arith.constant 7 : index
    %c0_0 = arith.constant 0 : index
    %1 = vector.load %arg1[%c0, %c7, %c0_0] : memref<1x448x4xbf16, #tpu.memory_space<vmem>>, vector<1x384x4xbf16>
    %2 = vector.shape_cast %1 : vector<1x384x4xbf16> to vector<384x4xbf16>
    %cst_1 = arith.constant 0.000000e+00 : bf16
    %3 = vector.broadcast %cst_1 : bf16 to vector<384x4xbf16>
    %4 = arith.maximumf %2, %3 : vector<384x4xbf16>
    %c0_2 = arith.constant 0 : index
    %c0_3 = arith.constant 0 : index
    %c0_4 = arith.constant 0 : index
    %c0_5 = arith.constant 0 : index
    %5 = vector.load %arg2[%c0_2, %c0_3, %c0_4, %c0_5] : memref<3x3x4x8xbf16, #tpu.memory_space<vmem>>, vector<1x1x4x8xbf16>
    %6 = vector.shape_cast %5 : vector<1x1x4x8xbf16> to vector<4x8xbf16>
    %cst_6 = arith.constant dense<0.000000e+00> : vector<384x8xf32>
    %7 = tpu.matmul %4, %6, %cst_6 {dimension_numbers = #tpu.dot_dimension_numbers<[1], [0], [0], [1], [0, 0, 1, 1], [], []>} : vector<384x4xbf16>, vector<4x8xbf16>, vector<384x8xf32> -> vector<384x8xf32>
    %8 = arith.addf %0, %7 : vector<384x8xf32>
    %c0_7 = arith.constant 0 : index
    %c8 = arith.constant 8 : index
    %c0_8 = arith.constant 0 : index
    %9 = vector.load %arg1[%c0_7, %c8, %c0_8] : memref<1x448x4xbf16, #tpu.memory_space<vmem>>, vector<1x384x4xbf16>
    %10 = vector.shape_cast %9 : vector<1x384x4xbf16> to vector<384x4xbf16>
    %cst_9 = arith.constant 0.000000e+00 : bf16
    %11 = vector.broadcast %cst_9 : bf16 to vector<384x4xbf16>
    %12 = arith.maximumf %10, %11 : vector<384x4xbf16>
    %c0_10 = arith.constant 0 : index
    %c1 = arith.constant 1 : index
    %c0_11 = arith.constant 0 : index
    %c0_12 = arith.constant 0 : index
    %13 = vector.load %arg2[%c0_10, %c1, %c0_11, %c0_12] : memref<3x3x4x8xbf16, #tpu.memory_space<vmem>>, vector<1x1x4x8xbf16>
    %14 = vector.shape_cast %13 : vector<1x1x4x8xbf16> to vector<4x8xbf16>
    %cst_13 = arith.constant dense<0.000000e+00> : vector<384x8xf32>
    %15 = tpu.matmul %12, %14, %cst_13 {dimension_numbers = #tpu.dot_dimension_numbers<[1], [0], [0], [1], [0, 0, 1, 1], [], []>} : vector<384x4xbf16>, vector<4x8xbf16>, vector<384x8xf32> -> vector<384x8xf32>
    %16 = arith.addf %8, %15 : vector<384x8xf32>
    %c0_14 = arith.constant 0 : index
    %c9 = arith.constant 9 : index
    %c0_15 = arith.constant 0 : index
    %17 = vector.load %arg1[%c0_14, %c9, %c0_15] : memref<1x448x4xbf16, #tpu.memory_space<vmem>>, vector<1x384x4xbf16>
    %18 = vector.shape_cast %17 : vector<1x384x4xbf16> to vector<384x4xbf16>
    %cst_16 = arith.constant 0.000000e+00 : bf16
    %19 = vector.broadcast %cst_16 : bf16 to vector<384x4xbf16>
    %20 = arith.maximumf %18, %19 : vector<384x4xbf16>
    %c0_17 = arith.constant 0 : index
    %c2 = arith.constant 2 : index
    %c0_18 = arith.constant 0 : index
    %c0_19 = arith.constant 0 : index
    %21 = vector.load %arg2[%c0_17, %c2, %c0_18, %c0_19] : memref<3x3x4x8xbf16, #tpu.memory_space<vmem>>, vector<1x1x4x8xbf16>
    %22 = vector.shape_cast %21 : vector<1x1x4x8xbf16> to vector<4x8xbf16>
    %cst_20 = arith.constant dense<0.000000e+00> : vector<384x8xf32>
    %23 = tpu.matmul %20, %22, %cst_20 {dimension_numbers = #tpu.dot_dimension_numbers<[1], [0], [0], [1], [0, 0, 1, 1], [], []>} : vector<384x4xbf16>, vector<4x8xbf16>, vector<384x8xf32> -> vector<384x8xf32>
    %24 = arith.addf %16, %23 : vector<384x8xf32>
    %c0_21 = arith.constant 0 : index
    %c31 = arith.constant 31 : index
    %c0_22 = arith.constant 0 : index
    %25 = vector.load %arg1[%c0_21, %c31, %c0_22] : memref<1x448x4xbf16, #tpu.memory_space<vmem>>, vector<1x384x4xbf16>
    %26 = vector.shape_cast %25 : vector<1x384x4xbf16> to vector<384x4xbf16>
    %cst_23 = arith.constant 0.000000e+00 : bf16
    %27 = vector.broadcast %cst_23 : bf16 to vector<384x4xbf16>
    %28 = arith.maximumf %26, %27 : vector<384x4xbf16>
    %c1_24 = arith.constant 1 : index
    %c0_25 = arith.constant 0 : index
    %c0_26 = arith.constant 0 : index
    %c0_27 = arith.constant 0 : index
    %29 = vector.load %arg2[%c1_24, %c0_25, %c0_26, %c0_27] : memref<3x3x4x8xbf16, #tpu.memory_space<vmem>>, vector<1x1x4x8xbf16>
    %30 = vector.shape_cast %29 : vector<1x1x4x8xbf16> to vector<4x8xbf16>
    %cst_28 = arith.constant dense<0.000000e+00> : vector<384x8xf32>
    %31 = tpu.matmul %28, %30, %cst_28 {dimension_numbers = #tpu.dot_dimension_numbers<[1], [0], [0], [1], [0, 0, 1, 1], [], []>} : vector<384x4xbf16>, vector<4x8xbf16>, vector<384x8xf32> -> vector<384x8xf32>
    %32 = arith.addf %24, %31 : vector<384x8xf32>
    %c0_29 = arith.constant 0 : index
    %c32 = arith.constant 32 : index
    %c0_30 = arith.constant 0 : index
    %33 = vector.load %arg1[%c0_29, %c32, %c0_30] : memref<1x448x4xbf16, #tpu.memory_space<vmem>>, vector<1x384x4xbf16>
    %34 = vector.shape_cast %33 : vector<1x384x4xbf16> to vector<384x4xbf16>
    %cst_31 = arith.constant 0.000000e+00 : bf16
    %35 = vector.broadcast %cst_31 : bf16 to vector<384x4xbf16>
    %36 = arith.maximumf %34, %35 : vector<384x4xbf16>
    %c1_32 = arith.constant 1 : index
    %c1_33 = arith.constant 1 : index
    %c0_34 = arith.constant 0 : index
    %c0_35 = arith.constant 0 : index
    %37 = vector.load %arg2[%c1_32, %c1_33, %c0_34, %c0_35] : memref<3x3x4x8xbf16, #tpu.memory_space<vmem>>, vector<1x1x4x8xbf16>
    %38 = vector.shape_cast %37 : vector<1x1x4x8xbf16> to vector<4x8xbf16>
    %cst_36 = arith.constant dense<0.000000e+00> : vector<384x8xf32>
    %39 = tpu.matmul %36, %38, %cst_36 {dimension_numbers = #tpu.dot_dimension_numbers<[1], [0], [0], [1], [0, 0, 1, 1], [], []>} : vector<384x4xbf16>, vector<4x8xbf16>, vector<384x8xf32> -> vector<384x8xf32>
    %40 = arith.addf %32, %39 : vector<384x8xf32>
    %c0_37 = arith.constant 0 : index
    %c33 = arith.constant 33 : index
    %c0_38 = arith.constant 0 : index
    %41 = vector.load %arg1[%c0_37, %c33, %c0_38] : memref<1x448x4xbf16, #tpu.memory_space<vmem>>, vector<1x384x4xbf16>
    %42 = vector.shape_cast %41 : vector<1x384x4xbf16> to vector<384x4xbf16>
    %cst_39 = arith.constant 0.000000e+00 : bf16
    %43 = vector.broadcast %cst_39 : bf16 to vector<384x4xbf16>
    %44 = arith.maximumf %42, %43 : vector<384x4xbf16>
    %c1_40 = arith.constant 1 : index
    %c2_41 = arith.constant 2 : index
    %c0_42 = arith.constant 0 : index
    %c0_43 = arith.constant 0 : index
    %45 = vector.load %arg2[%c1_40, %c2_41, %c0_42, %c0_43] : memref<3x3x4x8xbf16, #tpu.memory_space<vmem>>, vector<1x1x4x8xbf16>
    %46 = vector.shape_cast %45 : vector<1x1x4x8xbf16> to vector<4x8xbf16>
    %cst_44 = arith.constant dense<0.000000e+00> : vector<384x8xf32>
    %47 = tpu.matmul %44, %46, %cst_44 {dimension_numbers = #tpu.dot_dimension_numbers<[1], [0], [0], [1], [0, 0, 1, 1], [], []>} : vector<384x4xbf16>, vector<4x8xbf16>, vector<384x8xf32> -> vector<384x8xf32>
    %48 = arith.addf %40, %47 : vector<384x8xf32>
    %c0_45 = arith.constant 0 : index
    %c55 = arith.constant 55 : index
    %c0_46 = arith.constant 0 : index
    %49 = vector.load %arg1[%c0_45, %c55, %c0_46] : memref<1x448x4xbf16, #tpu.memory_space<vmem>>, vector<1x384x4xbf16>
    %50 = vector.shape_cast %49 : vector<1x384x4xbf16> to vector<384x4xbf16>
    %cst_47 = arith.constant 0.000000e+00 : bf16
    %51 = vector.broadcast %cst_47 : bf16 to vector<384x4xbf16>
    %52 = arith.maximumf %50, %51 : vector<384x4xbf16>
    %c2_48 = arith.constant 2 : index
    %c0_49 = arith.constant 0 : index
    %c0_50 = arith.constant 0 : index
    %c0_51 = arith.constant 0 : index
    %53 = vector.load %arg2[%c2_48, %c0_49, %c0_50, %c0_51] : memref<3x3x4x8xbf16, #tpu.memory_space<vmem>>, vector<1x1x4x8xbf16>
    %54 = vector.shape_cast %53 : vector<1x1x4x8xbf16> to vector<4x8xbf16>
    %cst_52 = arith.constant dense<0.000000e+00> : vector<384x8xf32>
    %55 = tpu.matmul %52, %54, %cst_52 {dimension_numbers = #tpu.dot_dimension_numbers<[1], [0], [0], [1], [0, 0, 1, 1], [], []>} : vector<384x4xbf16>, vector<4x8xbf16>, vector<384x8xf32> -> vector<384x8xf32>
    %56 = arith.addf %48, %55 : vector<384x8xf32>
    %c0_53 = arith.constant 0 : index
    %c56 = arith.constant 56 : index
    %c0_54 = arith.constant 0 : index
    %57 = vector.load %arg1[%c0_53, %c56, %c0_54] : memref<1x448x4xbf16, #tpu.memory_space<vmem>>, vector<1x384x4xbf16>
    %58 = vector.shape_cast %57 : vector<1x384x4xbf16> to vector<384x4xbf16>
    %cst_55 = arith.constant 0.000000e+00 : bf16
    %59 = vector.broadcast %cst_55 : bf16 to vector<384x4xbf16>
    %60 = arith.maximumf %58, %59 : vector<384x4xbf16>
    %c2_56 = arith.constant 2 : index
    %c1_57 = arith.constant 1 : index
    %c0_58 = arith.constant 0 : index
    %c0_59 = arith.constant 0 : index
    %61 = vector.load %arg2[%c2_56, %c1_57, %c0_58, %c0_59] : memref<3x3x4x8xbf16, #tpu.memory_space<vmem>>, vector<1x1x4x8xbf16>
    %62 = vector.shape_cast %61 : vector<1x1x4x8xbf16> to vector<4x8xbf16>
    %cst_60 = arith.constant dense<0.000000e+00> : vector<384x8xf32>
    %63 = tpu.matmul %60, %62, %cst_60 {dimension_numbers = #tpu.dot_dimension_numbers<[1], [0], [0], [1], [0, 0, 1, 1], [], []>} : vector<384x4xbf16>, vector<4x8xbf16>, vector<384x8xf32> -> vector<384x8xf32>
    %64 = arith.addf %56, %63 : vector<384x8xf32>
    %c0_61 = arith.constant 0 : index
    %c57 = arith.constant 57 : index
    %c0_62 = arith.constant 0 : index
    %65 = vector.load %arg1[%c0_61, %c57, %c0_62] : memref<1x448x4xbf16, #tpu.memory_space<vmem>>, vector<1x384x4xbf16>
    %66 = vector.shape_cast %65 : vector<1x384x4xbf16> to vector<384x4xbf16>
    %cst_63 = arith.constant 0.000000e+00 : bf16
    %67 = vector.broadcast %cst_63 : bf16 to vector<384x4xbf16>
    %68 = arith.maximumf %66, %67 : vector<384x4xbf16>
    %c2_64 = arith.constant 2 : index
    %c2_65 = arith.constant 2 : index
    %c0_66 = arith.constant 0 : index
    %c0_67 = arith.constant 0 : index
    %69 = vector.load %arg2[%c2_64, %c2_65, %c0_66, %c0_67] : memref<3x3x4x8xbf16, #tpu.memory_space<vmem>>, vector<1x1x4x8xbf16>
    %70 = vector.shape_cast %69 : vector<1x1x4x8xbf16> to vector<4x8xbf16>
    %cst_68 = arith.constant dense<0.000000e+00> : vector<384x8xf32>
    %71 = tpu.matmul %68, %70, %cst_68 {dimension_numbers = #tpu.dot_dimension_numbers<[1], [0], [0], [1], [0, 0, 1, 1], [], []>} : vector<384x4xbf16>, vector<4x8xbf16>, vector<384x8xf32> -> vector<384x8xf32>
    %72 = arith.addf %64, %71 : vector<384x8xf32>
    %73 = tpu.iota {dimensions = array<i32: 1>} : vector<16x24x1xi32>
    %c1_i32 = arith.constant 1 : i32
    %74 = vector.broadcast %c1_i32 : i32 to vector<16x24x1xi32>
    %75 = arith.cmpi sge, %73, %74 : vector<16x24x1xi32>
    %c16_i32 = arith.constant 16 : i32
    %76 = vector.broadcast %c16_i32 : i32 to vector<16x24x1xi32>
    %77 = arith.cmpi sle, %73, %76 : vector<16x24x1xi32>
    %78 = arith.andi %75, %77 : vector<16x24x1xi1>
    %c0_69 = arith.constant 0 : index
    %c0_70 = arith.constant 0 : index
    %79 = vector.load %arg3[%c0_69, %c0_70] : memref<1x8xf32, #tpu.memory_space<vmem>>, vector<1x8xf32>
    %80 = vector.broadcast %79 : vector<1x8xf32> to vector<384x8xf32>
    %81 = arith.addf %72, %80 : vector<384x8xf32>
    %cst_71 = arith.constant 0.000000e+00 : f32
    %82 = vector.broadcast %cst_71 : f32 to vector<384x8xf32>
    %83 = arith.maximumf %81, %82 : vector<384x8xf32>
    %84 = vector.shape_cast %83 : vector<384x8xf32> to vector<16x24x8xf32>
    %cst_72 = arith.constant 0.000000e+00 : f32
    %85 = vector.shape_cast %78 : vector<16x24x1xi1> to vector<16x24x1xi1>
    %86 = vector.broadcast %85 : vector<16x24x1xi1> to vector<16x24x8xi1>
    %87 = vector.broadcast %cst_72 : f32 to vector<16x24x8xf32>
    %88 = arith.select %86, %84, %87 : vector<16x24x8xi1>, vector<16x24x8xf32>
    %89 = arith.truncf %88 : vector<16x24x8xf32> to vector<16x24x8xbf16>
    %90 = vector.shape_cast %89 : vector<16x24x8xbf16> to vector<384x8xbf16>
    %cst_73 = arith.constant 0.000000e+00 : bf16
    %91 = vector.broadcast %cst_73 : bf16 to vector<24x8xbf16>
    %c0_74 = arith.constant 0 : index
    %c0_75 = arith.constant 0 : index
    %92 = vector.load %arg9[%c0_74, %c0_75] : memref<440x8xbf16, #tpu.memory_space<vmem>>, vector<24x8xbf16>
    tpu.vector_store %arg9[%c0_74, %c0_75], %91 {strides = array<i32>} : memref<440x8xbf16, #tpu.memory_space<vmem>>, vector<24x8xbf16>,
    %cst_76 = arith.constant 0.000000e+00 : bf16
    %93 = vector.broadcast %cst_76 : bf16 to vector<32x8xbf16>
    %c408 = arith.constant 408 : index
    %c0_77 = arith.constant 0 : index
    %94 = vector.load %arg9[%c408, %c0_77] : memref<440x8xbf16, #tpu.memory_space<vmem>>, vector<32x8xbf16>
    tpu.vector_store %arg9[%c408, %c0_77], %93 {strides = array<i32>} : memref<440x8xbf16, #tpu.memory_space<vmem>>, vector<32x8xbf16>,
    %c24 = arith.constant 24 : index
    %c0_78 = arith.constant 0 : index
    %95 = vector.load %arg9[%c24, %c0_78] : memref<440x8xbf16, #tpu.memory_space<vmem>>, vector<384x8xbf16>
    tpu.vector_store %arg9[%c24, %c0_78], %90 {strides = array<i32>} : memref<440x8xbf16, #tpu.memory_space<vmem>>, vector<384x8xbf16>,
    %cst_79 = arith.constant 0.000000e+00 : f32
    %96 = vector.broadcast %cst_79 : f32 to vector<384x8xf32>
    %c0_80 = arith.constant 0 : index
    %c0_81 = arith.constant 0 : index
    %97 = vector.load %arg9[%c0_80, %c0_81] : memref<440x8xbf16, #tpu.memory_space<vmem>>, vector<384x8xbf16>
    %c0_82 = arith.constant 0 : index
    %c0_83 = arith.constant 0 : index
    %c0_84 = arith.constant 0 : index
    %c0_85 = arith.constant 0 : index
    %98 = vector.load %arg4[%c0_82, %c0_83, %c0_84, %c0_85] : memref<3x3x8x8xbf16, #tpu.memory_space<vmem>>, vector<1x1x8x8xbf16>
    %99 = vector.shape_cast %98 : vector<1x1x8x8xbf16> to vector<8x8xbf16>
    %cst_86 = arith.constant dense<0.000000e+00> : vector<384x8xf32>
    %100 = tpu.matmul %97, %99, %cst_86 {dimension_numbers = #tpu.dot_dimension_numbers<[1], [0], [0], [1], [0, 0, 1, 1], [], []>} : vector<384x8xbf16>, vector<8x8xbf16>, vector<384x8xf32> -> vector<384x8xf32>
    %101 = arith.addf %96, %100 : vector<384x8xf32>
    %c1_87 = arith.constant 1 : index
    %c0_88 = arith.constant 0 : index
    %102 = vector.load %arg9[%c1_87, %c0_88] : memref<440x8xbf16, #tpu.memory_space<vmem>>, vector<384x8xbf16>
    %c0_89 = arith.constant 0 : index
    %c1_90 = arith.constant 1 : index
    %c0_91 = arith.constant 0 : index
    %c0_92 = arith.constant 0 : index
    %103 = vector.load %arg4[%c0_89, %c1_90, %c0_91, %c0_92] : memref<3x3x8x8xbf16, #tpu.memory_space<vmem>>, vector<1x1x8x8xbf16>
    %104 = vector.shape_cast %103 : vector<1x1x8x8xbf16> to vector<8x8xbf16>
    %cst_93 = arith.constant dense<0.000000e+00> : vector<384x8xf32>
    %105 = tpu.matmul %102, %104, %cst_93 {dimension_numbers = #tpu.dot_dimension_numbers<[1], [0], [0], [1], [0, 0, 1, 1], [], []>} : vector<384x8xbf16>, vector<8x8xbf16>, vector<384x8xf32> -> vector<384x8xf32>
    %106 = arith.addf %101, %105 : vector<384x8xf32>
    %c2_94 = arith.constant 2 : index
    %c0_95 = arith.constant 0 : index
    %107 = vector.load %arg9[%c2_94, %c0_95] : memref<440x8xbf16, #tpu.memory_space<vmem>>, vector<384x8xbf16>
    %c0_96 = arith.constant 0 : index
    %c2_97 = arith.constant 2 : index
    %c0_98 = arith.constant 0 : index
    %c0_99 = arith.constant 0 : index
    %108 = vector.load %arg4[%c0_96, %c2_97, %c0_98, %c0_99] : memref<3x3x8x8xbf16, #tpu.memory_space<vmem>>, vector<1x1x8x8xbf16>
    %109 = vector.shape_cast %108 : vector<1x1x8x8xbf16> to vector<8x8xbf16>
    %cst_100 = arith.constant dense<0.000000e+00> : vector<384x8xf32>
    %110 = tpu.matmul %107, %109, %cst_100 {dimension_numbers = #tpu.dot_dimension_numbers<[1], [0], [0], [1], [0, 0, 1, 1], [], []>} : vector<384x8xbf16>, vector<8x8xbf16>, vector<384x8xf32> -> vector<384x8xf32>
    %111 = arith.addf %106, %110 : vector<384x8xf32>
    %c24_101 = arith.constant 24 : index
    %c0_102 = arith.constant 0 : index
    %112 = vector.load %arg9[%c24_101, %c0_102] : memref<440x8xbf16, #tpu.memory_space<vmem>>, vector<384x8xbf16>
    %c1_103 = arith.constant 1 : index
    %c0_104 = arith.constant 0 : index
    %c0_105 = arith.constant 0 : index
    %c0_106 = arith.constant 0 : index
    %113 = vector.load %arg4[%c1_103, %c0_104, %c0_105, %c0_106] : memref<3x3x8x8xbf16, #tpu.memory_space<vmem>>, vector<1x1x8x8xbf16>
    %114 = vector.shape_cast %113 : vector<1x1x8x8xbf16> to vector<8x8xbf16>
    %cst_107 = arith.constant dense<0.000000e+00> : vector<384x8xf32>
    %115 = tpu.matmul %112, %114, %cst_107 {dimension_numbers = #tpu.dot_dimension_numbers<[1], [0], [0], [1], [0, 0, 1, 1], [], []>} : vector<384x8xbf16>, vector<8x8xbf16>, vector<384x8xf32> -> vector<384x8xf32>
    %116 = arith.addf %111, %115 : vector<384x8xf32>
    %c25 = arith.constant 25 : index
    %c0_108 = arith.constant 0 : index
    %117 = vector.load %arg9[%c25, %c0_108] : memref<440x8xbf16, #tpu.memory_space<vmem>>, vector<384x8xbf16>
    %c1_109 = arith.constant 1 : index
    %c1_110 = arith.constant 1 : index
    %c0_111 = arith.constant 0 : index
    %c0_112 = arith.constant 0 : index
    %118 = vector.load %arg4[%c1_109, %c1_110, %c0_111, %c0_112] : memref<3x3x8x8xbf16, #tpu.memory_space<vmem>>, vector<1x1x8x8xbf16>
    %119 = vector.shape_cast %118 : vector<1x1x8x8xbf16> to vector<8x8xbf16>
    %cst_113 = arith.constant dense<0.000000e+00> : vector<384x8xf32>
    %120 = tpu.matmul %117, %119, %cst_113 {dimension_numbers = #tpu.dot_dimension_numbers<[1], [0], [0], [1], [0, 0, 1, 1], [], []>} : vector<384x8xbf16>, vector<8x8xbf16>, vector<384x8xf32> -> vector<384x8xf32>
    %121 = arith.addf %116, %120 : vector<384x8xf32>
    %c26 = arith.constant 26 : index
    %c0_114 = arith.constant 0 : index
    %122 = vector.load %arg9[%c26, %c0_114] : memref<440x8xbf16, #tpu.memory_space<vmem>>, vector<384x8xbf16>
    %c1_115 = arith.constant 1 : index
    %c2_116 = arith.constant 2 : index
    %c0_117 = arith.constant 0 : index
    %c0_118 = arith.constant 0 : index
    %123 = vector.load %arg4[%c1_115, %c2_116, %c0_117, %c0_118] : memref<3x3x8x8xbf16, #tpu.memory_space<vmem>>, vector<1x1x8x8xbf16>
    %124 = vector.shape_cast %123 : vector<1x1x8x8xbf16> to vector<8x8xbf16>
    %cst_119 = arith.constant dense<0.000000e+00> : vector<384x8xf32>
    %125 = tpu.matmul %122, %124, %cst_119 {dimension_numbers = #tpu.dot_dimension_numbers<[1], [0], [0], [1], [0, 0, 1, 1], [], []>} : vector<384x8xbf16>, vector<8x8xbf16>, vector<384x8xf32> -> vector<384x8xf32>
    %126 = arith.addf %121, %125 : vector<384x8xf32>
    %c48 = arith.constant 48 : index
    %c0_120 = arith.constant 0 : index
    %127 = vector.load %arg9[%c48, %c0_120] : memref<440x8xbf16, #tpu.memory_space<vmem>>, vector<384x8xbf16>
    %c2_121 = arith.constant 2 : index
    %c0_122 = arith.constant 0 : index
    %c0_123 = arith.constant 0 : index
    %c0_124 = arith.constant 0 : index
    %128 = vector.load %arg4[%c2_121, %c0_122, %c0_123, %c0_124] : memref<3x3x8x8xbf16, #tpu.memory_space<vmem>>, vector<1x1x8x8xbf16>
    %129 = vector.shape_cast %128 : vector<1x1x8x8xbf16> to vector<8x8xbf16>
    %cst_125 = arith.constant dense<0.000000e+00> : vector<384x8xf32>
    %130 = tpu.matmul %127, %129, %cst_125 {dimension_numbers = #tpu.dot_dimension_numbers<[1], [0], [0], [1], [0, 0, 1, 1], [], []>} : vector<384x8xbf16>, vector<8x8xbf16>, vector<384x8xf32> -> vector<384x8xf32>
    %131 = arith.addf %126, %130 : vector<384x8xf32>
    %c49 = arith.constant 49 : index
    %c0_126 = arith.constant 0 : index
    %132 = vector.load %arg9[%c49, %c0_126] : memref<440x8xbf16, #tpu.memory_space<vmem>>, vector<384x8xbf16>
    %c2_127 = arith.constant 2 : index
    %c1_128 = arith.constant 1 : index
    %c0_129 = arith.constant 0 : index
    %c0_130 = arith.constant 0 : index
    %133 = vector.load %arg4[%c2_127, %c1_128, %c0_129, %c0_130] : memref<3x3x8x8xbf16, #tpu.memory_space<vmem>>, vector<1x1x8x8xbf16>
    %134 = vector.shape_cast %133 : vector<1x1x8x8xbf16> to vector<8x8xbf16>
    %cst_131 = arith.constant dense<0.000000e+00> : vector<384x8xf32>
    %135 = tpu.matmul %132, %134, %cst_131 {dimension_numbers = #tpu.dot_dimension_numbers<[1], [0], [0], [1], [0, 0, 1, 1], [], []>} : vector<384x8xbf16>, vector<8x8xbf16>, vector<384x8xf32> -> vector<384x8xf32>
    %136 = arith.addf %131, %135 : vector<384x8xf32>
    %c50 = arith.constant 50 : index
    %c0_132 = arith.constant 0 : index
    %137 = vector.load %arg9[%c50, %c0_132] : memref<440x8xbf16, #tpu.memory_space<vmem>>, vector<384x8xbf16>
    %c2_133 = arith.constant 2 : index
    %c2_134 = arith.constant 2 : index
    %c0_135 = arith.constant 0 : index
    %c0_136 = arith.constant 0 : index
    %138 = vector.load %arg4[%c2_133, %c2_134, %c0_135, %c0_136] : memref<3x3x8x8xbf16, #tpu.memory_space<vmem>>, vector<1x1x8x8xbf16>
    %139 = vector.shape_cast %138 : vector<1x1x8x8xbf16> to vector<8x8xbf16>
    %cst_137 = arith.constant dense<0.000000e+00> : vector<384x8xf32>
    %140 = tpu.matmul %137, %139, %cst_137 {dimension_numbers = #tpu.dot_dimension_numbers<[1], [0], [0], [1], [0, 0, 1, 1], [], []>} : vector<384x8xbf16>, vector<8x8xbf16>, vector<384x8xf32> -> vector<384x8xf32>
    %141 = arith.addf %136, %140 : vector<384x8xf32>
    %c0_138 = arith.constant 0 : index
    %c33_139 = arith.constant 33 : index
    %c0_140 = arith.constant 0 : index
    %142 = vector.load %arg1[%c0_138, %c33_139, %c0_140] : memref<1x448x4xbf16, #tpu.memory_space<vmem>>, vector<1x384x4xbf16>
    %143 = vector.shape_cast %142 : vector<1x384x4xbf16> to vector<384x4xbf16>
    %144 = vector.shape_cast %141 : vector<384x8xf32> to vector<8x48x8xf32>
    %145 = vector.extract_strided_slice %144 {offsets = [0, 0, 0], sizes = [8, 24, 8], strides = [1, 1, 1]} : vector<8x48x8xf32> to vector<8x24x8xf32>
    %146 = vector.extract_strided_slice %144 {offsets = [0, 24, 0], sizes = [8, 24, 8], strides = [1, 1, 1]} : vector<8x48x8xf32> to vector<8x24x8xf32>
    %147 = arith.addf %145, %146 : vector<8x24x8xf32>
    %148 = vector.shape_cast %143 : vector<384x4xbf16> to vector<8x48x4xbf16>
    %149 = vector.extract_strided_slice %148 {offsets = [0, 0, 0], sizes = [8, 24, 4], strides = [1, 1, 1]} : vector<8x48x4xbf16> to vector<8x24x4xbf16>
    %150 = vector.extract_strided_slice %148 {offsets = [0, 24, 0], sizes = [8, 24, 4], strides = [1, 1, 1]} : vector<8x48x4xbf16> to vector<8x24x4xbf16>
    %151 = arith.addf %149, %150 : vector<8x24x4xbf16>
    %152 = vector.shape_cast %151 : vector<8x24x4xbf16> to vector<192x4xbf16>
    %c0_141 = arith.constant 0 : index
    %c0_142 = arith.constant 0 : index
    %153 = vector.load %arg6[%c0_141, %c0_142] : memref<4x8xbf16, #tpu.memory_space<vmem>>, vector<4x8xbf16>
    %cst_143 = arith.constant dense<0.000000e+00> : vector<192x8xf32>
    %154 = tpu.matmul %152, %153, %cst_143 {dimension_numbers = #tpu.dot_dimension_numbers<[1], [0], [0], [1], [0, 0, 1, 1], [], []>} : vector<192x4xbf16>, vector<4x8xbf16>, vector<192x8xf32> -> vector<192x8xf32>
    %155 = vector.shape_cast %147 : vector<8x24x8xf32> to vector<192x8xf32>
    %156 = arith.addf %155, %154 : vector<192x8xf32>
    %c0_144 = arith.constant 0 : index
    %c0_145 = arith.constant 0 : index
    %157 = vector.load %arg10[%c0_144, %c0_145] : memref<192x8xf32, #tpu.memory_space<vmem>>, vector<192x8xf32>
    tpu.vector_store %arg10[%c0_144, %c0_145], %156 {strides = array<i32>} : memref<192x8xf32, #tpu.memory_space<vmem>>, vector<192x8xf32>,
    %c0_146 = arith.constant 0 : index
    %c0_147 = arith.constant 0 : index
    %158 = tpu.strided_load %arg10[%c0_146, %c0_147] {strides = array<i32: 2, 1>} : memref<192x8xf32, #tpu.memory_space<vmem>>, vector<96x8xf32>
    %c1_148 = arith.constant 1 : index
    %c0_149 = arith.constant 0 : index
    %159 = tpu.strided_load %arg10[%c1_148, %c0_149] {strides = array<i32: 2, 1>} : memref<192x8xf32, #tpu.memory_space<vmem>>, vector<96x8xf32>
    %160 = arith.addf %158, %159 : vector<96x8xf32>
    %cst_150 = arith.constant 2.500000e-01 : f32
    %161 = vector.broadcast %cst_150 : f32 to vector<96x8xf32>
    %162 = arith.mulf %161, %160 : vector<96x8xf32>
    %c0_151 = arith.constant 0 : index
    %c0_152 = arith.constant 0 : index
    %163 = vector.load %arg5[%c0_151, %c0_152] : memref<1x8xf32, #tpu.memory_space<vmem>>, vector<1x8xf32>
    %164 = vector.broadcast %163 : vector<1x8xf32> to vector<96x8xf32>
    %165 = arith.addf %162, %164 : vector<96x8xf32>
    %c0_153 = arith.constant 0 : index
    %c0_154 = arith.constant 0 : index
    %166 = vector.load %arg7[%c0_153, %c0_154] : memref<1x8xf32, #tpu.memory_space<vmem>>, vector<1x8xf32>
    %167 = vector.broadcast %166 : vector<1x8xf32> to vector<96x8xf32>
    %168 = arith.addf %165, %167 : vector<96x8xf32>
    %c0_155 = arith.constant 0 : index
    %c0_156 = arith.constant 0 : index
    %c0_157 = arith.constant 0 : index
    %169 = vector.load %arg8[%c0_155, %c0_156, %c0_157] : memref<1x96x8xf32, #tpu.memory_space<vmem>>, vector<1x96x8xf32>
    %170 = vector.shape_cast %169 : vector<1x96x8xf32> to vector<96x8xf32>
    %171 = vector.shape_cast %168 : vector<96x8xf32> to vector<1x96x8xf32>
    tpu.vector_store %arg8[%c0_155, %c0_156, %c0_157], %171 {strides = array<i32>} : memref<1x96x8xf32, #tpu.memory_space<vmem>>, vector<1x96x8xf32>,
    return
  }
  func.func @transform_0(%arg0: i32) -> (i32, i32, i32) {
    %c0_i32 = arith.constant 0 : i32
    %c0_i32_0 = arith.constant 0 : i32
    %c0_i32_1 = arith.constant 0 : i32
    return %arg0, %c0_i32, %c0_i32_0 : i32, i32, i32
  }
  func.func @transform_1(%arg0: i32) -> (i32, i32, i32, i32) {
    %c0_i32 = arith.constant 0 : i32
    %c0_i32_0 = arith.constant 0 : i32
    %c0_i32_1 = arith.constant 0 : i32
    %c0_i32_2 = arith.constant 0 : i32
    %c0_i32_3 = arith.constant 0 : i32
    return %c0_i32, %c0_i32_0, %c0_i32_1, %c0_i32_2 : i32, i32, i32, i32
  }
  func.func @transform_2(%arg0: i32) -> (i32, i32) {
    %c0_i32 = arith.constant 0 : i32
    %c0_i32_0 = arith.constant 0 : i32
    %c0_i32_1 = arith.constant 0 : i32
    return %c0_i32, %c0_i32_0 : i32, i32
  }
  func.func @transform_3(%arg0: i32) -> (i32, i32, i32, i32) {
    %c0_i32 = arith.constant 0 : i32
    %c0_i32_0 = arith.constant 0 : i32
    %c0_i32_1 = arith.constant 0 : i32
    %c0_i32_2 = arith.constant 0 : i32
    %c0_i32_3 = arith.constant 0 : i32
    return %c0_i32, %c0_i32_0, %c0_i32_1, %c0_i32_2 : i32, i32, i32, i32
  }
  func.func @transform_4(%arg0: i32) -> (i32, i32) {
    %c0_i32 = arith.constant 0 : i32
    %c0_i32_0 = arith.constant 0 : i32
    %c0_i32_1 = arith.constant 0 : i32
    return %c0_i32, %c0_i32_0 : i32, i32
  }
  func.func @transform_5(%arg0: i32) -> (i32, i32) {
    %c0_i32 = arith.constant 0 : i32
    %c0_i32_0 = arith.constant 0 : i32
    %c0_i32_1 = arith.constant 0 : i32
    return %c0_i32, %c0_i32_0 : i32, i32
  }
  func.func @transform_6(%arg0: i32) -> (i32, i32) {
    %c0_i32 = arith.constant 0 : i32
    %c0_i32_0 = arith.constant 0 : i32
    %c0_i32_1 = arith.constant 0 : i32
    return %c0_i32, %c0_i32_0 : i32, i32
  }
  func.func @transform_7(%arg0: i32) -> (i32, i32, i32) {
    %c0_i32 = arith.constant 0 : i32
    %c0_i32_0 = arith.constant 0 : i32
    %c0_i32_1 = arith.constant 0 : i32
    return %arg0, %c0_i32, %c0_i32_0 : i32, i32, i32
  }
}

</mosaic_0001>

<bundles_post_ra>
// kernel: res_block_down.1
= control target key start
LH: loop header
LB: loop body
LE: loop exit
PB: predicated region body
PF: predicated region fallthrough
CT: control target
= control target key end

     0   :  { %s11830_s24 = smov 0   ;;  %s16193_s0 = inlined_call_operand.vmem [shape: bf16[2,448,4], index: 0, kind: input, shape index: {}]   ;;  %s16194_s1 = inlined_call_operand.vmem [shape: bf16[3,3,4,8], index: 1, kind: input, shape index: {}]   ;;  %s16195_s2 = inlined_call_operand.vmem [shape: f32[1,8], index: 2, kind: input, shape index: {}]   ;;  %s16196_s3 = inlined_call_operand.vmem [shape: bf16[3,3,8,8], index: 3, kind: input, shape index: {}]   ;;  %s16197_s4 = inlined_call_operand.vmem [shape: f32[1,8], index: 4, kind: input, shape index: {}]   ;;  %s16198_s5 = inlined_call_operand.vmem [shape: bf16[4,8], index: 5, kind: input, shape index: {}]   ;;  %s16199_s6 = inlined_call_operand.vmem [shape: f32[1,8], index: 6, kind: input, shape index: {}]   ;;  %s16200_s7 = inlined_call_operand.vmem [shape: f32[2,96,8], index: 7, kind: output, shape index: {}]  }
   0x1 LB: > { %s9966_s25 = sadd.s32 4294967295, %s11787_s24   ;;  %p9970_p0 = scmp.ge.s32.totalorder %s11787_s24, 1  ;;  %s11787_s24 = sphi %s11830_s24, %s17_s24  }
   0x2   : > { %p237_p1 = scmp.lt.s32.totalorder %s11787_s24, 3 }
   0x4   : > { %p238_p2 = pnand %p9970_p0, %p237_p1 }
   0x6   : > { %241 = sbr.rel (%p238_p2) target bundleno = 2101 (0x835), region = 48 }
   0xb   : > { %v9973_v0 = vld [vmem:[%s16194_s1 + $0x2] sm:$0x3]  ;;  %vm552_vm0 = vcmask 1041408   ;;  %p269_p3 = scmp.lt.s32.totalorder %s9966_s25, 1  ;;  %v452_v2 = vld [vmem:[%s16194_s1] sm:$0x3] }
   0xc   : > { %v554_v1 = vsel %vm552_vm0, %v9973_v0, 0  ;;  %v983_v3 = vsel %vm552_vm0, %v452_v2, 0  ;;  %v10072_v4 = vld [vmem:[%s16194_s1 + $0x8] sm:$0x3]  ;;  %vm479_vm1 = vcmask 31744   ;;  %vm5552_vm4 = vcmask 1043456  }
   0xd   : > { %563 = vmatpush.bf16.msra.mxu0 %v554_v1  ;;  %11735 = vmatpush.bf16.msra.mxu2 %v554_v1  ;;  %s16677_s25 = smov (!%p269_p3, %s9966_s25), 1  ;;  %v2486_v5 = vsel %vm552_vm0, %v10072_v4, 0  ;;  %vm685_vm2 = vsmask.f32 4352  ;;  %v10022_v0 = vld [vmem:[%s16194_s1 + $0x4] sm:$0x3] }
   0xe   : > { %11736 = vmatpush.bf16.msra.mxu3 %v554_v1  ;;  %992 = vmatpush.bf16.msra.mxu1 %v983_v3  ;;  %s11738_s9 = smul.u32 224, %s16677_s25  ;;  %vm1288_vm3 = vsmask.f32 7424  ;;  %vm5052_vm5 = vcmask 60416   ;;  %vm5479_vm8 = vcmask 64512   ;;  %vm5871_vm9 = vcmask 1046528  }
   0xf   : > { %vm8948_vm10 = vsmask.f32 3328  ;;  %vm8949_vm11 = vsmask.f32 7440  ;;  %s11739_s13 = smul.u32 96, %s16677_s25 }
  0x10   : > { %s11856_s12 = scalar_lea.vmem %s16193_s0, %s11738_s9  ;;  %vm15378_vm12 = vmor %vm8948_vm10, %vm8949_vm11 }
  0x11   : > { %2495 = vmatpush.bf16.msrb.mxu0 %v2486_v5  ;;  %v280_v6 = vld [vmem:[%s11856_s12] sm:$0x8]  ;;  %v281_v7 = vld [vmem:[%s11856_s12 + $0x4] sm:$0xf]  ;;  %v11588_v8 = vld [vmem:[%s11856_s12 + $0x8] sm:$0xff]   ;;  %s15855_s17 = scalar_lea.vmem %s16200_s7, %s11739_s13 }
  0x12   : > { %11737 = vmatpush.bf16.msrb.mxu3 %v983_v3  ;;  %v11022_v9 = vunpack.c.l.bf16 %v11588_v8  ;;  %v11023_v10 = vunpack.c.h.bf16 %v11588_v8  ;;  %v329_v11 = vunpack.c.l.bf16 %v280_v6  ;;  %v330_v12 = vunpack.c.l.bf16 %v281_v7  ;;  %v11862_v13 = vld [vmem:[%s11856_s12 + $0x78] sm:$0xff]   ;;  %v11603_v14 = vld [vmem:[%s11856_s12 + $0x80] sm:$0xff]   ;;  %v11866_v15 = vld [vmem:[%s11856_s12 + $0x90] sm:$0xff]  }
  0x13   : > { %v11079_v16 = vunpack.c.h.bf16 %v11862_v13  ;;  %v11082_v17 = vunpack.c.l.bf16 %v11603_v14  ;;  %v11091_v18 = vunpack.c.h.bf16 %v11866_v15  ;;  %v11606_v19 = vld [vmem:[%s11856_s12 + $0x98] sm:$0xff]   ;;  %v11589_v24 = vld [vmem:[%s11856_s12 + $0x10] sm:$0xff]   ;;  %v11604_v45 = vld [vmem:[%s11856_s12 + $0x88] sm:$0xff]   ;;  %v11083_v48 = vunpack.c.h.bf16 %v11603_v14 }
  0x14   : > { %v378_v20 = vmax.f32 %v329_v11, 0.0  ;;  %v379_v21 = vmax.f32 %v330_v12, 0.0  ;;  %v11871_v22 = vmax.f32 %v11022_v9, 0.0  ;;  %v381_v23 = vmax.f32 %v11023_v10, 0.0  ;;  %v11607_v49 = vld [vmem:[%s11856_s12 + $0xa0] sm:$0xff]   ;;  %v11590_v63 = vld [vmem:[%s11856_s12 + $0x18] sm:$0xff]  }
  0x15   : > { %v11874_v25 = vmax.f32 %v11079_v16, 0.0  ;;  %v410_v26 = vmax.f32 %v11082_v17, 0.0  ;;  %v11094_v27 = vunpack.c.l.bf16 %v11606_v19  ;;  %v415_v31 = vmax.f32 %v11091_v18, 0.0  ;;  %v11608_v9 = vld [vmem:[%s11856_s12 + $0xa8] sm:$0xff]  }
  0x16   : > { %v427_v28 = vpack.c.bf16 %v379_v21, %v378_v20  ;;  %v428_v29 = vpack.c.bf16 %v381_v23, %v11871_v22  ;;  %v453_v30 = vpack.c.bf16 %v11871_v22, %v379_v21  ;;  %v11026_v34 = vunpack.c.l.bf16 %v11589_v24 }
  0x17   : > { %v468_v32 = vpack.c.bf16 %v410_v26, %v11874_v25  ;;  %v416_v33 = vmax.f32 %v11094_v27, 0.0  ;;  %v11027_v40 = vunpack.c.h.bf16 %v11589_v24  ;;  %v11095_v52 = vunpack.c.h.bf16 %v11606_v19 }
  0x18   : > { %9974 = vmatmul.msk.bf16.vlgmr.msra.gmra.mxu0 %vm479_vm1, %v453_v30  ;;  %v687_v35 = vshrl.u32 %v427_v28, 16  ;;  %v690_v36 = vshll.u32 %v427_v28, 16  ;;  %v695_v37 = vshrl.u32 %v428_v29, 16  ;;  %v698_v38 = vshll.u32 %v428_v29, 16 }
  0x19   : > { %9989 = vmatmul.msk.bf16.vlgmr.msra.gmra.mxu2 %vm479_vm1, %v468_v32  ;;  %v471_v39 = vpack.c.bf16 %v416_v33, %v415_v31  ;;  %v382_v46 = vmax.f32 %v11026_v34, 0.0  ;;  %v383_v47 = vmax.f32 %v11027_v40, 0.0  ;;  %v11086_v54 = vunpack.c.l.bf16 %v11604_v45 }
  0x1a   : > { %v689_v41 = vrot.slane %v687_v35, 3  ;;  %v692_v42 = vrot.slane %v690_v36, 4  ;;  %v697_v43 = vrot.slane %v695_v37, 3  ;;  %v700_v44 = vrot.slane %v698_v38, 4  ;;  %v11609_v38 = vld [vmem:[%s11856_s12 + $0xb0] sm:$0xff]  }
  0x1b   : > { %9992 = vmatmul.msk.bf16.vlgmr.msra.gmra.mxu3 %vm479_vm1, %v471_v39  ;;  %v429_v53 = vpack.c.bf16 %v383_v47, %v382_v46  ;;  %v411_v55 = vmax.f32 %v11083_v48, 0.0  ;;  %v11098_v57 = vunpack.c.l.bf16 %v11607_v49  ;;  %v417_v58 = vmax.f32 %v11095_v52, 0.0  ;;  %v11591_v39 = vld [vmem:[%s11856_s12 + $0x20] sm:$0xff]  }
  0x1c   : > { %v693_v50 = vor.u32 %v692_v42, %v689_v41  ;;  %v701_v51 = vor.u32 %v700_v44, %v697_v43  ;;  %v412_v1 = vmax.f32 %v11086_v54, 0.0  ;;  %v11894_v2 = vpack.c.bf16 %v382_v46, %v381_v23 }
  0x1d   : > { %v11886_v59 = vpack.c.bf16 %v411_v55, %v410_v26  ;;  %v11888_v60 = vpack.c.bf16 %v417_v58, %v416_v33  ;;  %v704_v61 = vshrl.u32 %v429_v53, 16  ;;  %v707_v62 = vshll.u32 %v429_v53, 16 }
  0x1e   : > { %v702_v56 = vsel %vm685_vm2, %v693_v50, %v701_v51  ;;  %v418_v3 = vmax.f32 %v11098_v57, 0.0  ;;  %v11087_v4 = vunpack.c.h.bf16 %v11604_v45  ;;  %v11090_v5 = vunpack.c.l.bf16 %v11866_v15 }
  0x1f   : > { %9998 = vmatmul.msk.bf16.vlgmr.msra.gmra.mxu1 %vm479_vm1, %v702_v56  ;;  %v11030_v6 = vunpack.c.l.bf16 %v11590_v63  ;;  %v11031_v7 = vunpack.c.h.bf16 %v11590_v63  ;;  %v11099_v8 = vunpack.c.h.bf16 %v11607_v49  ;;  %v1558_v10 = vsel %vm552_vm0, %v10022_v0, 0 }
  0x20   : > { %v706_v11 = vrot.slane %v704_v61, 3  ;;  %v709_v12 = vrot.slane %v707_v62, 4  ;;  %v413_v14 = vmax.f32 %v11087_v4, 0.0  ;;  %v414_v16 = vmax.f32 %v11090_v5, 0.0  ;;  %1567 = vmatpush.bf16.msrb.mxu2 %v1558_v10  ;;  %v11592_v4 = vld [vmem:[%s11856_s12 + $0x28] sm:$0xff]  }
  0x21   : > { %v469_v17 = vpack.c.bf16 %v412_v1, %v411_v55  ;;  %v419_v18 = vmax.f32 %v11099_v8, 0.0  ;;  %v11102_v21 = vunpack.c.l.bf16 %v11608_v9  ;;  %v472_v15 = vpack.c.bf16 %v418_v3, %v417_v58 }
  0x22   : > { %v11899_v19 = vpack.c.bf16 %v413_v14, %v412_v1  ;;  %v11901_v20 = vpack.c.bf16 %v415_v31, %v414_v16  ;;  %v710_v24 = vor.u32 %v709_v12, %v706_v11  ;;  %v384_v26 = vmax.f32 %v11030_v6, 0.0  ;;  %v1114_v31 = vld [vmem:[%s11856_s12 + $0x4] sm:$0xf] }
  0x23   : > { %v11903_v23 = vpack.c.bf16 %v419_v18, %v418_v3  ;;  %v385_v27 = vmax.f32 %v11031_v7, 0.0  ;;  %v11103_v28 = vunpack.c.h.bf16 %v11608_v9  ;;  %v420_v29 = vmax.f32 %v11102_v21, 0.0  ;;  %v11610_v3 = vld [vmem:[%s11856_s12 + $0xb8] sm:$0xff]  }
  0x24   : > { %v711_v32 = vsel %vm685_vm2, %v701_v51, %v710_v24  ;;  %v1163_v35 = vunpack.c.l.bf16 %v1114_v31  ;;  %v11919_v41 = vpack.c.bf16 %v384_v26, %v383_v47  ;;  %v11106_v42 = vunpack.c.l.bf16 %v11609_v38 }
  0x25   : > { %v11908_v30 = vmax.f32 %v11103_v28, 0.0  ;;  %v430_v33 = vpack.c.bf16 %v385_v27, %v384_v26  ;;  %v11034_v45 = vunpack.c.l.bf16 %v11591_v39  ;;  %v11035_v46 = vunpack.c.h.bf16 %v11591_v39 }
  0x26   : > { %v1212_v40 = vmax.f32 %v1163_v35, 0.0  ;;  %v470_v48 = vpack.c.bf16 %v414_v16, %v413_v14  ;;  %v11107_v49 = vunpack.c.h.bf16 %v11609_v38  ;;  %v473_v51 = vpack.c.bf16 %v420_v29, %v419_v18  ;;  %v11593_v35 = vld [vmem:[%s11856_s12 + $0x30] sm:$0xff]  }
  0x27   : > { %v11914_v34 = vpack.c.bf16 %v11908_v30, %v420_v29  ;;  %v713_v36 = vshrl.u32 %v430_v33, 16  ;;  %v716_v37 = vshll.u32 %v430_v33, 16  ;;  %v422_v52 = vmax.f32 %v11106_v42, 0.0 }
  0x28   : > { %9975 = vmatmul.msk.bf16.gmra.mxu0 %vm479_vm1, %v11894_v2  ;;  %v1261_v50 = vpack.c.bf16 %v11871_v22, %v1212_v40  ;;  %v11922_v53 = vmax.f32 %v11107_v49, 0.0  ;;  %v386_v47 = vmax.f32 %v11034_v45, 0.0  ;;  %v387_v55 = vmax.f32 %v11035_v46, 0.0 }
  0x29   : > { %9990 = vmatmul.msk.bf16.gmra.mxu2 %vm479_vm1, %v469_v17  ;;  %v715_v43 = vrot.slane %v713_v36, 3  ;;  %v718_v44 = vrot.slane %v716_v37, 4  ;;  %v1297_v63 = vshll.u32 %v11894_v2, 16  ;;  %v11110_v8 = vunpack.c.l.bf16 %v11610_v3 }
  0x2a   : > { %v11928_v56 = vpack.c.bf16 %v11922_v53, %v422_v52  ;;  %v1292_v57 = vshll.u32 %v1261_v50, 16  ;;  %v431_v58 = vpack.c.bf16 %v387_v55, %v386_v47  ;;  %v1290_v61 = vshrl.u32 %v1261_v50, 16  ;;  %v328_v50 = vld [vmem:[%s11856_s12 + $0xc0] sm:$0xf] }
  0x2b   : > { %9993 = vmatmul.msk.bf16.gmra.mxu3 %vm479_vm1, %v472_v15  ;;  %v719_v54 = vor.u32 %v718_v44, %v715_v43  ;;  %v1299_v6 = vrot.slane %v1297_v63, 1  ;;  %v11936_v7 = vpack.c.bf16 %v386_v47, %v385_v27  ;;  %v11038_v11 = vunpack.c.l.bf16 %v11592_v4  ;;  %v11594_v63 = vld [vmem:[%s11856_s12 + $0x38] sm:$0xff]  }
  0x2c   : > { %v1294_v62 = vrot.slane %v1292_v57, 1  ;;  %v722_v0 = vshrl.u32 %v431_v58, 16  ;;  %v725_v1 = vshll.u32 %v431_v58, 16  ;;  %v11039_v12 = vunpack.c.h.bf16 %v11592_v4 }
  0x2d   : > { %v720_v22 = vsel %vm685_vm2, %v710_v24, %v719_v54  ;;  %v11111_v14 = vunpack.c.h.bf16 %v11610_v3  ;;  %v474_v17 = vpack.c.bf16 %v422_v52, %v11908_v30  ;;  %v424_v18 = vmax.f32 %v11110_v8, 0.0 }
  0x2e   : > { %v1295_v5 = vor.u32 %v1294_v62, %v1290_v61  ;;  %v724_v9 = vrot.slane %v722_v0, 3  ;;  %v727_v10 = vrot.slane %v725_v1, 4  ;;  %v388_v24 = vmax.f32 %v11038_v11, 0.0 }
  0x2f   : > { %9999 = vmatmul.msk.bf16.gmra.mxu1 %vm479_vm1, %v711_v32  ;;  %v11940_v21 = vmax.f32 %v11111_v14, 0.0  ;;  %v389_v26 = vmax.f32 %v11039_v12, 0.0  ;;  %v1301_v30 = vshrl.u32 %v11894_v2, 16  ;;  %v1305_v31 = vshll.u32 %v11919_v41, 16 }
  0x30   : > { %v1300_v16 = vsel %vm1288_vm3, %v1295_v5, %v1299_v6  ;;  %v728_v15 = vor.u32 %v727_v10, %v724_v9  ;;  %v11042_v38 = vunpack.c.l.bf16 %v11593_v35  ;;  %v11043_v39 = vunpack.c.h.bf16 %v11593_v35 }
  0x31   : > { %v11946_v27 = vpack.c.bf16 %v11940_v21, %v424_v18  ;;  %v432_v29 = vpack.c.bf16 %v389_v26, %v388_v24  ;;  %v1303_v36 = vor.u32 %v1301_v30, %v1299_v6  ;;  %v1307_v37 = vrot.slane %v1305_v31, 1 }
  0x32   : > { %v729_v28 = vsel %vm685_vm2, %v719_v54, %v728_v15  ;;  %v11954_v40 = vpack.c.bf16 %v388_v24, %v387_v55  ;;  %v475_v2 = vpack.c.bf16 %v424_v18, %v11922_v53  ;;  %v390_v45 = vmax.f32 %v11042_v38, 0.0 }
  0x33   : > { %v731_v32 = vshrl.u32 %v432_v29, 16  ;;  %v734_v33 = vshll.u32 %v432_v29, 16  ;;  %v1308_v44 = vsel %vm1288_vm3, %v1303_v36, %v1307_v37  ;;  %v391_v46 = vmax.f32 %v11043_v39, 0.0  ;;  %v11595_v39 = vld [vmem:[%s11856_s12 + $0x40] sm:$0xff]  }
  0x34   : > { %v11078_v54 = vunpack.c.l.bf16 %v11862_v13  ;;  %v377_v47 = vunpack.c.l.bf16 %v328_v50  ;;  %v1309_v55 = vshrl.u32 %v11919_v41, 16  ;;  %v1313_v57 = vshll.u32 %v11936_v7, 16 }
  0x35   : > { %v733_v42 = vrot.slane %v731_v32, 3  ;;  %v736_v43 = vrot.slane %v734_v33, 4  ;;  %v433_v49 = vpack.c.bf16 %v391_v46, %v390_v45  ;;  %v830_v61 = vshrl.u32 %v11886_v59, 16 }
  0x36   : > { %v833_v62 = vshll.u32 %v11886_v59, 16  ;;  %v11975_v0 = vmax.f32 %v11078_v54, 0.0  ;;  %v11977_v1 = vpack.c.bf16 %v390_v45, %v389_v26  ;;  %v11979_v13 = vmax.f32 %v377_v47, 0.0 }
  0x37   : > { %v743_v58 = vshll.u32 %v433_v49, 16  ;;  %v1311_v3 = vor.u32 %v1309_v55, %v1307_v37  ;;  %v1315_v4 = vrot.slane %v1313_v57, 1  ;;  %v11046_v6 = vunpack.c.l.bf16 %v11594_v63 }
  0x38   : > { %9976 = vmatmul.msk.bf16.gmra.mxu0 %vm479_vm1, %v11919_v41  ;;  %v11047_v8 = vunpack.c.h.bf16 %v11594_v63  ;;  %v832_v9 = vrot.slane %v830_v61, 3  ;;  %v835_v10 = vrot.slane %v833_v62, 4  ;;  %v839_v11 = vshrl.u32 %v11899_v19, 16 }
  0x39   : > { %9991 = vmatmul.msk.bf16.gmra.mxu2 %vm479_vm1, %v470_v48  ;;  %v737_v48 = vor.u32 %v736_v43, %v733_v42  ;;  %v745_v5 = vrot.slane %v743_v58, 4  ;;  %v842_v12 = vshll.u32 %v11899_v19, 16  ;;  %v1316_v59 = vsel %vm1288_vm3, %v1311_v3, %v1315_v4 }
  0x3a   : > { %v841_v14 = vrot.slane %v839_v11, 3  ;;  %v476_v18 = vpack.c.bf16 %v11979_v13, %v11940_v21  ;;  %v392_v24 = vmax.f32 %v11046_v6, 0.0  ;;  %v393_v26 = vmax.f32 %v11047_v8, 0.0 }
  0x3b   : > { %9994 = vmatmul.msk.bf16.gmra.mxu3 %vm479_vm1, %v473_v51  ;;  %v10047_v51 = vld [vmem:[%s16194_s1 + $0x6] sm:$0x3]  ;;  %v738_v52 = vsel %vm685_vm2, %v728_v15, %v737_v48  ;;  %v1317_v32 = vshrl.u32 %v11936_v7, 16  ;;  %v1321_v33 = vshll.u32 %v11954_v40, 16  ;;  %v11050_v45 = vunpack.c.l.bf16 %v11595_v39 }
  0x3c   : > { %v2208_v53 = vsel %vm552_vm0, %v10047_v51, 0  ;;  %v434_v21 = vpack.c.bf16 %v393_v26, %v392_v24  ;;  %v851_v51 = vshll.u32 %v11901_v20, 16  ;;  %v1325_v62 = vshrl.u32 %v11954_v40, 16 }
  0x3d   : > { %2217 = vmatpush.bf16.msra.mxu3 %v2208_v53  ;;  %v1319_v42 = vor.u32 %v1317_v32, %v1315_v4  ;;  %v1323_v43 = vrot.slane %v1321_v33, 1  ;;  %v394_v47 = vmax.f32 %v11050_v45, 0.0  ;;  %v1329_v63 = vshll.u32 %v11977_v1, 16  ;;  %v11597_v32 = vld [vmem:[%s11856_s12 + $0x50] sm:$0xff]  }
  0x3e   : > { %v749_v37 = vshrl.u32 %v434_v21, 16  ;;  %v752_v38 = vshll.u32 %v434_v21, 16  ;;  %v853_v54 = vrot.slane %v851_v51, 4 }
  0x3f   : > { %10000 = vmatmul.msk.bf16.gmra.mxu1 %vm479_vm1, %v720_v22  ;;  %v740_v22 = vshrl.u32 %v433_v49, 16  ;;  %v1331_v6 = vrot.slane %v1329_v63, 1  ;;  %v12019_v8 = vpack.c.bf16 %v394_v47, %v393_v26 }
  0x40   : > { %v751_v49 = vrot.slane %v749_v37, 3  ;;  %v754_v50 = vrot.slane %v752_v38, 4  ;;  %v11058_v37 = vunpack.c.l.bf16 %v11597_v32  ;;  %v11059_v38 = vunpack.c.h.bf16 %v11597_v32 }
  0x41   : > { %v742_v41 = vrot.slane %v740_v22, 3  ;;  %v1345_v63 = vshll.u32 %v12019_v8, 16 }
  0x42   : > { %v755_v57 = vor.u32 %v754_v50, %v751_v49  ;;  %v12045_v51 = vmax.f32 %v11059_v38, 0.0 }
  0x43   : > { %v746_v15 = vor.u32 %v745_v5, %v742_v41  ;;  %v11596_v41 = vld [vmem:[%s11856_s12 + $0x48] sm:$0xff]   ;;  %v1327_v5 = vor.u32 %v1325_v62, %v1323_v43 }
  0x44   : > { %v11054_v11 = vunpack.c.l.bf16 %v11596_v41 }
  0x45   : > { %v756_v61 = vsel %vm685_vm2, %v746_v15, %v755_v57 }
  0x48   : > { %9977 = vmatmul.msk.bf16.gmra.mxu0 %vm479_vm1, %v11936_v7  ;;  %v848_v7 = vshrl.u32 %v11901_v20, 16 }
  0x49   : > { %10023 = vmatmul.msk.bf16.vlgmr.msrb.gmra.mxu2 %vm479_vm1, %v1300_v16  ;;  %v844_v16 = vrot.slane %v842_v12, 4  ;;  %v11055_v12 = vunpack.c.h.bf16 %v11596_v41 }
  0x4a   : > { %v850_v53 = vrot.slane %v848_v7, 3  ;;  %v398_v7 = vmax.f32 %v11058_v37, 0.0 }
  0x4b   : > { %9995 = vmatmul.msk.bf16.gmra.mxu3 %vm479_vm1, %v474_v17  ;;  %v442_v17 = vpack.c.bf16 %v11874_v25, %v11975_v0  ;;  %v845_v29 = vor.u32 %v844_v16, %v841_v14  ;;  %v747_v25 = vsel %vm685_vm2, %v737_v48, %v746_v15  ;;  %v11051_v48 = vunpack.c.h.bf16 %v11595_v39 }
  0x4c   : > { %v854_v22 = vor.u32 %v853_v54, %v850_v53  ;;  %v860_v14 = vshll.u32 %v11888_v60, 16  ;;  %v396_v15 = vmax.f32 %v11054_v11, 0.0 }
  0x4d   : > { %v821_v30 = vshrl.u32 %v442_v17, 16  ;;  %v824_v31 = vshll.u32 %v442_v17, 16  ;;  %v395_v55 = vmax.f32 %v11051_v48, 0.0  ;;  %v10097_v48 = vld [vmem:[%s16194_s1 + $0xa] sm:$0x3] }
  0x4e   : > { %v855_v58 = vsel %vm685_vm2, %v845_v29, %v854_v22  ;;  %v862_v17 = vrot.slane %v860_v14, 4 }
  0x4f   : > { %10001 = vmatmul.msk.bf16.gmra.mxu1 %vm479_vm1, %v729_v28  ;;  %v836_v28 = vor.u32 %v835_v10, %v832_v9  ;;  %v823_v35 = vrot.slane %v821_v30, 3  ;;  %v826_v36 = vrot.slane %v824_v31, 4  ;;  %v435_v20 = vpack.c.bf16 %v395_v55, %v394_v47 }
  0x50   : > { %v1333_v30 = vshrl.u32 %v11977_v1, 16  ;;  %v437_v47 = vpack.c.bf16 %v12045_v51, %v398_v7 }
  0x51   : > { %v11992_v19 = vsel %vm685_vm2, %v836_v28, %v845_v29  ;;  %v758_v3 = vshrl.u32 %v435_v20, 16  ;;  %v761_v4 = vshll.u32 %v435_v20, 16 }
  0x52   : > { %v1335_v33 = vor.u32 %v1333_v30, %v1331_v6 }
  0x53   : > { %v760_v9 = vrot.slane %v758_v3, 3  ;;  %v763_v10 = vrot.slane %v761_v4, 4  ;;  %v776_v3 = vshrl.u32 %v437_v47, 16  ;;  %v11598_v4 = vld [vmem:[%s11856_s12 + $0x58] sm:$0xff]  }
  0x54   : > { %v11063_v14 = vunpack.c.h.bf16 %v11598_v4 }
  0x56   : > { %v401_v30 = vmax.f32 %v11063_v14, 0.0 }
  0x58   : > { %9978 = vmatmul.msk.bf16.gmra.mxu0 %vm479_vm1, %v11954_v40  ;;  %v1332_v40 = vsel %vm1288_vm3, %v1327_v5, %v1331_v6  ;;  %v1347_v5 = vrot.slane %v1345_v63, 1 }
  0x59   : > { %10024 = vmatmul.msk.bf16.gmra.mxu2 %vm479_vm1, %v1308_v44  ;;  %v12000_v44 = vpack.c.bf16 %v392_v24, %v391_v46  ;;  %v397_v24 = vmax.f32 %v11055_v12, 0.0 }
  0x5b   : > { %9996 = vmatmul.msk.bf16.gmra.mxu3 %vm479_vm1, %v475_v2  ;;  %v12002_v2 = vor.u32 %v826_v36, %v823_v35  ;;  %v436_v29 = vpack.c.bf16 %v397_v24, %v396_v15  ;;  %v1337_v31 = vshll.u32 %v12000_v44, 16  ;;  %v12037_v36 = vpack.c.bf16 %v396_v15, %v395_v55 }
  0x5c   : > { %v1341_v62 = vshrl.u32 %v12000_v44, 16  ;;  %v12067_v6 = vpack.c.bf16 %v398_v7, %v397_v24 }
  0x5d   : > { %v837_v46 = vsel %vm685_vm2, %v12002_v2, %v836_v28  ;;  %v770_v21 = vshll.u32 %v436_v29, 16  ;;  %v1339_v35 = vrot.slane %v1337_v31, 1 }
  0x5f   : > { %10002 = vmatmul.msk.bf16.gmra.mxu1 %vm479_vm1, %v738_v52  ;;  %v1324_v52 = vsel %vm1288_vm3, %v1319_v42, %v1323_v43  ;;  %v866_v42 = vshrl.u32 %v11903_v23, 16  ;;  %v869_v43 = vshll.u32 %v11903_v23, 16  ;;  %v1340_v45 = vsel %vm1288_vm3, %v1335_v33, %v1339_v35 }
  0x60   : > { %v1343_v41 = vor.u32 %v1341_v62, %v1339_v35 }
  0x61   : > { %v868_v49 = vrot.slane %v866_v42, 3  ;;  %v871_v50 = vrot.slane %v869_v43, 4 }
  0x62   : > { %v1348_v15 = vsel %vm1288_vm3, %v1343_v41, %v1347_v5 }
  0x63   : > { %v872_v23 = vor.u32 %v871_v50, %v868_v49 }
  0x68   : > { %9979 = vmatmul.msk.bf16.gmra.mxu0 %vm479_vm1, %v11977_v1 }
  0x69   : > { %10025 = vmatmul.msk.bf16.gmra.mxu2 %vm479_vm1, %v1316_v59  ;;  %v857_v59 = vshrl.u32 %v11888_v60, 16 }
  0x6b   : > { %9997 = vmatmul.msk.bf16.gmra.mxu3 %vm479_vm1, %v476_v18  ;;  %v859_v16 = vrot.slane %v857_v59, 3  ;;  %v764_v18 = vor.u32 %v763_v10, %v760_v9  ;;  %v778_v9 = vrot.slane %v776_v3, 3  ;;  %v11062_v59 = vunpack.c.l.bf16 %v11598_v4 }
  0x6d   : > { %v863_v26 = vor.u32 %v862_v17, %v859_v16  ;;  %v765_v60 = vsel %vm685_vm2, %v755_v57, %v764_v18 }
  0x6f   : > { %10003 = vmatmul.msk.bf16.gmra.mxu1 %vm479_vm1, %v747_v25  ;;  %v12028_v28 = vsel %vm685_vm2, %v854_v22, %v863_v26  ;;  %v767_v25 = vshrl.u32 %v436_v29, 16  ;;  %v12052_v54 = vsel %vm685_vm2, %v863_v26, %v872_v23  ;;  %v400_v29 = vmax.f32 %v11062_v59, 0.0 }
  0x71   : > { %v769_v39 = vrot.slane %v767_v25, 3  ;;  %v438_v33 = vpack.c.bf16 %v401_v30, %v400_v29  ;;  %v12100_v50 = vpack.c.bf16 %v400_v29, %v12045_v51 }
  0x73   : > { %v785_v42 = vshrl.u32 %v438_v33, 16  ;;  %v788_v43 = vshll.u32 %v438_v33, 16 }
  0x78   : > { %9980 = vmatmul.msk.bf16.gmra.mxu0 %vm479_vm1, %v12000_v44  ;;  %v875_v44 = vshrl.u32 %v11914_v34, 16 }
  0x79   : > { %10026 = vmatmul.msk.bf16.gmra.mxu2 %vm479_vm1, %v1324_v52  ;;  %v3108_v52 = vsel %vm552_vm0, %v10097_v48, 0 }
  0x7a   : > { %3117 = vmatpush.bf16.msrb.mxu1 %v3108_v52  ;;  %v877_v24 = vrot.slane %v875_v44, 3 }
  0x7b   : > { %10013 = vmatmul.msk.bf16.vlgmr.msrb.gmra.mxu3 %vm479_vm1, %v837_v46 }
  0x7f   : > { %10004 = vmatmul.msk.bf16.gmra.mxu1 %vm479_vm1, %v756_v61 }
  0x88   : > { %9981 = vmatmul.msk.bf16.gmra.mxu0 %vm479_vm1, %v12019_v8 }
  0x89   : > { %10027 = vmatmul.msk.bf16.gmra.mxu2 %vm479_vm1, %v1332_v40  ;;  %v878_v40 = vshll.u32 %v11914_v34, 16 }
  0x8b   : > { %10014 = vmatmul.msk.bf16.gmra.mxu3 %vm479_vm1, %v11992_v19  ;;  %v772_v19 = vrot.slane %v770_v21, 4  ;;  %v880_v26 = vrot.slane %v878_v40, 4  ;;  %v1357_v40 = vshrl.u32 %v12037_v36, 16 }
  0x8d   : > { %v773_v53 = vor.u32 %v772_v19, %v769_v39  ;;  %v881_v31 = vor.u32 %v880_v26, %v877_v24  ;;  %v1349_v39 = vshrl.u32 %v12019_v8, 16  ;;  %v1353_v19 = vshll.u32 %v12037_v36, 16  ;;  %v11600_v24 = vld [vmem:[%s11856_s12 + $0x68] sm:$0xff]  }
  0x8e   : > { %v787_v8 = vrot.slane %v785_v42, 3  ;;  %v893_v26 = vshrl.u32 %v11946_v27, 16 }
  0x8f   : > { %10005 = vmatmul.msk.bf16.gmra.mxu1 %vm479_vm1, %v765_v60  ;;  %v774_v57 = vsel %vm685_vm2, %v764_v18, %v773_v53  ;;  %v12082_v34 = vsel %vm685_vm2, %v872_v23, %v881_v31  ;;  %v1351_v48 = vor.u32 %v1349_v39, %v1347_v5  ;;  %v1355_v49 = vrot.slane %v1353_v19, 1 }
  0x90   : > { %v11070_v39 = vunpack.c.l.bf16 %v11600_v24  ;;  %v11071_v19 = vunpack.c.h.bf16 %v11600_v24 }
  0x91   : > { %v1356_v62 = vsel %vm1288_vm3, %v1351_v48, %v1355_v49  ;;  %v1359_v29 = vor.u32 %v1357_v40, %v1355_v49  ;;  %v11601_v40 = vld [vmem:[%s11856_s12 + $0x70] sm:$0xff]  }
  0x95   : > { %v565_v1 = vpop.f32.mrf.mxu0 }
  0x98   : > { %9982 = vmatmul.msk.bf16.gmra.mxu0 %vm479_vm1, %v12037_v36 }
  0x99   : > { %10028 = vmatmul.msk.bf16.gmra.mxu2 %vm479_vm1, %v1340_v45  ;;  %v887_v45 = vshll.u32 %v11928_v56, 16 }
  0x9b   : > { %10015 = vmatmul.msk.bf16.gmra.mxu3 %vm479_vm1, %v855_v58  ;;  %v779_v58 = vshll.u32 %v437_v47, 16  ;;  %v889_v63 = vrot.slane %v887_v45, 4 }
  0x9c   : > { %v12056_v55 = vpop.f32.mrf.mxu2  ;;  %v994_v46 = vpop.f32.mrf.mxu1 }
  0x9d   : > { %v12059_v22 = vadd.f32 %v994_v46, %v565_v1  ;;  %v567_v20 = vpop.f32.mrf.mxu0  ;;  %v781_v10 = vrot.slane %v779_v58, 4  ;;  %v884_v1 = vshrl.u32 %v11928_v56, 16 }
  0x9e   : > { %v12061_v61 = vpop.f32.mrf.mxu3 }
  0x9f   : > { %10006 = vmatmul.msk.bf16.gmra.mxu1 %vm479_vm1, %v774_v57  ;;  %v782_v60 = vor.u32 %v781_v10, %v778_v9  ;;  %v886_v56 = vrot.slane %v884_v1, 3 }
  0xa1   : > { %v783_v32 = vsel %vm685_vm2, %v773_v53, %v782_v60  ;;  %v790_v53 = vrot.slane %v788_v43, 4  ;;  %v890_v4 = vor.u32 %v889_v63, %v886_v56 }
  0xa3   : > { %v791_v51 = vor.u32 %v790_v53, %v787_v8  ;;  %v12115_v41 = vsel %vm685_vm2, %v881_v31, %v890_v4  ;;  %v12148_v8 = vmax.f32 %v11071_v19, 0.0 }
  0xa4   : > { %v12069_v11 = vpop.f32.mrf.mxu2  ;;  %v996_v12 = vpop.f32.mrf.mxu1 }
  0xa5   : > { %v12073_v16 = vadd.f32 %v996_v12, %v567_v20  ;;  %v570_v17 = vpop.f32.mrf.mxu0  ;;  %v792_v10 = vsel %vm685_vm2, %v782_v60, %v791_v51  ;;  %v896_v60 = vshll.u32 %v11946_v27, 16  ;;  %v10122_v27 = vld [vmem:[%s16194_s1 + $0xc] sm:$0x3] }
  0xa6   : > { %v12075_v18 = vpop.f32.mrf.mxu3  ;;  %v3758_v48 = vsel %vm552_vm0, %v10122_v27, 0 }
  0xa7   : > { %16249 = vst [vmem:[#allocation4_spill] sm:$0xff] %v12075_v18  ;;  %v898_v45 = vrot.slane %v896_v60, 4  ;;  %3767 = vmatpush.bf16.msra.mxu2 %v3758_v48 }
  0xa8   : > { %9983 = vmatmul.msk.bf16.gmra.mxu0 %vm479_vm1, %v12067_v6 }
  0xa9   : > { %10029 = vmatmul.msk.bf16.gmra.mxu2 %vm479_vm1, %v1348_v15 }
  0xab   : > { %10016 = vmatmul.msk.bf16.gmra.mxu3 %vm479_vm1, %v12028_v28  ;;  %v11599_v28 = vld [vmem:[%s11856_s12 + $0x60] sm:$0xff]  }
  0xac   : > { %v12086_v25 = vpop.f32.mrf.mxu2  ;;  %v999_v21 = vpop.f32.mrf.mxu1  ;;  %v11066_v23 = vunpack.c.l.bf16 %v11599_v28  ;;  %v11067_v47 = vunpack.c.h.bf16 %v11599_v28 }
  0xad   : > { %v12089_v35 = vadd.f32 %v999_v21, %v570_v17  ;;  %v572_v37 = vpop.f32.mrf.mxu0  ;;  %v1361_v17 = vshll.u32 %v12067_v6, 16 }
  0xae   : > { %v12091_v38 = vpop.f32.mrf.mxu3  ;;  %v402_v3 = vmax.f32 %v11066_v23, 0.0  ;;  %v12111_v58 = vmax.f32 %v11067_v47, 0.0 }
  0xaf   : > { %16250 = vst [vmem:[#allocation5_spill] sm:$0xff] %v12091_v38  ;;  %10007 = vmatmul.msk.bf16.gmra.mxu1 %vm479_vm1, %v783_v32  ;;  %v1363_v31 = vrot.slane %v1361_v17, 1 }
  0xb0   : > { %v439_v12 = vpack.c.bf16 %v12111_v58, %v402_v3  ;;  %v12133_v21 = vpack.c.bf16 %v402_v3, %v401_v30  ;;  %v895_v30 = vrot.slane %v893_v26, 3 }
  0xb1   : > { %v1364_v1 = vsel %vm1288_vm3, %v1359_v29, %v1363_v31 }
  0xb2   : > { %v794_v15 = vshrl.u32 %v439_v12, 16  ;;  %v899_v53 = vor.u32 %v898_v45, %v895_v30 }
  0xb4   : > { %v12102_v7 = vpop.f32.mrf.mxu2  ;;  %v1001_v52 = vpop.f32.mrf.mxu1  ;;  %v12152_v23 = vsel %vm685_vm2, %v890_v4, %v899_v53  ;;  %v451_v4 = vpack.c.bf16 %v11979_v13, %v11979_v13 }
  0xb5   : > { %v12104_v46 = vadd.f32 %v1001_v52, %v572_v37  ;;  %v575_v57 = vpop.f32.mrf.mxu0  ;;  %v796_v37 = vrot.slane %v794_v15, 3  ;;  %v404_v52 = vmax.f32 %v11070_v39, 0.0 }
  0xb6   : > { %v12106_v20 = vpop.f32.mrf.mxu3  ;;  %v902_v17 = vshrl.u32 %v451_v4, 16 }
  0xb7   : > { %16251 = vst [vmem:[#allocation6_spill] sm:$0xff] %v12106_v20  ;;  %v440_v56 = vpack.c.bf16 %v12148_v8, %v404_v52  ;;  %v12172_v24 = vpack.c.bf16 %v404_v52, %v12111_v58 }
  0xb8   : > { %9984 = vmatmul.msk.bf16.gmra.mxu0 %vm479_vm1, %v12100_v50 }
  0xb9   : > { %10030 = vmatmul.msk.bf16.gmra.mxu2 %vm479_vm1, %v1356_v62 }
  0xbb   : > { %10017 = vmatmul.msk.bf16.gmra.mxu3 %vm479_vm1, %v12052_v54  ;;  %v797_v54 = vshll.u32 %v439_v12, 16  ;;  %v1365_v12 = vshrl.u32 %v12067_v6, 16  ;;  %v11075_v6 = vunpack.c.h.bf16 %v11601_v40 }
  0xbc   : > { %v12119_v5 = vpop.f32.mrf.mxu2  ;;  %v1004_v9 = vpop.f32.mrf.mxu1 }
  0xbd   : > { %v12123_v59 = vadd.f32 %v1004_v9, %v575_v57  ;;  %v577_v14 = vpop.f32.mrf.mxu0  ;;  %v799_v36 = vrot.slane %v797_v54, 4  ;;  %v1367_v15 = vor.u32 %v1365_v12, %v1363_v31  ;;  %v12184_v30 = vmax.f32 %v11075_v6, 0.0  ;;  %v1737_v6 = vld [vmem:[%s11856_s12 + $0xc] sm:$0x8] }
  0xbe   : > { %v12125_v44 = vpop.f32.mrf.mxu3  ;;  %v1377_v12 = vshll.u32 %v12133_v21, 16 }
  0xbf   : > { %16252 = vst [vmem:[#allocation7_spill] sm:$0xff] %v12125_v44  ;;  %10008 = vmatmul.msk.bf16.gmra.mxu1 %vm479_vm1, %v792_v10  ;;  %v800_v49 = vor.u32 %v799_v36, %v796_v37 }
  0xc1   : > { %v801_v62 = vsel %vm685_vm2, %v791_v51, %v800_v49  ;;  %v803_v51 = vshrl.u32 %v440_v56, 16 }
  0xc3   : > { %v805_v60 = vrot.slane %v803_v51, 3 }
  0xc4   : > { %v12135_v32 = vpop.f32.mrf.mxu2  ;;  %v1006_v33 = vpop.f32.mrf.mxu1 }
  0xc5   : > { %v12137_v42 = vadd.f32 %v1006_v33, %v577_v14  ;;  %v580_v43 = vpop.f32.mrf.mxu0  ;;  %v806_v14 = vshll.u32 %v440_v56, 16  ;;  %v11074_v33 = vunpack.c.l.bf16 %v11601_v40 }
  0xc6   : > { %v12139_v28 = vpop.f32.mrf.mxu3 }
  0xc7   : > { %16253 = vst [vmem:[#allocation8_spill] sm:$0xff] %v12139_v28  ;;  %v808_v29 = vrot.slane %v806_v14, 4  ;;  %v406_v27 = vmax.f32 %v11074_v33, 0.0  ;;  %v11639_v28 = vld [vmem:[%s11856_s12 + $0x38] sm:$0xff]  }
  0xc8   : > { %9985 = vmatmul.msk.bf16.gmra.mxu0 %vm479_vm1, %v12133_v21 }
  0xc9   : > { %10031 = vmatmul.msk.bf16.gmra.mxu2 %vm479_vm1, %v1364_v1  ;;  %v809_v58 = vor.u32 %v808_v29, %v805_v60 }
  0xcb   : > { %10018 = vmatmul.msk.bf16.gmra.mxu3 %vm479_vm1, %v12082_v34  ;;  %v1369_v34 = vshll.u32 %v12100_v50, 16 }
  0xcc   : > { %v1569_v47 = vpop.f32.mrf.mxu2  ;;  %v1009_v57 = vpop.f32.mrf.mxu1 }
  0xcd   : > { %v12159_v63 = vadd.f32 %v1569_v47, %v12059_v22  ;;  %v12161_v3 = vadd.f32 %v1009_v57, %v580_v43  ;;  %v582_v9 = vpop.f32.mrf.mxu0  ;;  %v905_v22 = vshll.u32 %v451_v4, 16  ;;  %v1371_v54 = vrot.slane %v1369_v34, 1 }
  0xce   : > { %v12165_v10 = vpop.f32.mrf.mxu3  ;;  %v904_v43 = vrot.slane %v902_v17, 3  ;;  %v810_v47 = vsel %vm685_vm2, %v800_v49, %v809_v58  ;;  %v441_v57 = vpack.c.bf16 %v12184_v30, %v406_v27  ;;  %v1379_v49 = vrot.slane %v1377_v12, 1 }
  0xcf   : > { %16254 = vst [vmem:[#allocation9_spill] sm:$0xff] %v12165_v10  ;;  %10009 = vmatmul.msk.bf16.gmra.mxu1 %vm479_vm1, %v801_v62  ;;  %v1372_v31 = vsel %vm1288_vm3, %v1367_v15, %v1371_v54  ;;  %v907_v1 = vrot.slane %v905_v22, 4 }
  0xd0   : > { %v815_v34 = vshll.u32 %v441_v57, 16 }
  0xd1   : > { %v908_v45 = vor.u32 %v907_v1, %v904_v43 }
  0xd2   : > { %v817_v22 = vrot.slane %v815_v34, 4 }
  0xd4   : > { %v1571_v26 = vpop.f32.mrf.mxu2  ;;  %v1011_v13 = vpop.f32.mrf.mxu1 }
  0xd5   : > { %v12175_v37 = vadd.f32 %v1571_v26, %v12073_v16  ;;  %v12177_v36 = vadd.f32 %v1011_v13, %v582_v9  ;;  %v585_v39 = vpop.f32.mrf.mxu0  ;;  %v12188_v16 = vsel %vm685_vm2, %v899_v53, %v908_v45  ;;  %v1373_v53 = vshrl.u32 %v12100_v50, 16 }
  0xd6   : > { %v12179_v19 = vpop.f32.mrf.mxu3 }
  0xd7   : > { %16255 = vst [vmem:[#allocation10_spill] sm:$0xff] %v12179_v19  ;;  %v1375_v51 = vor.u32 %v1373_v53, %v1371_v54 }
  0xd8   : > { %9986 = vmatmul.msk.bf16.gmra.mxu0 %vm479_vm1, %v12172_v24 }
  0xd9   : > { %10032 = vmatmul.msk.bf16.gmra.mxu2 %vm479_vm1, %v1372_v31  ;;  %v1380_v54 = vsel %vm1288_vm3, %v1375_v51, %v1379_v49  ;;  %v11635_v31 = vld [vmem:[%s11856_s12 + $0x18] sm:$0xff]  }
  0xdb   : > { %10019 = vmatmul.msk.bf16.gmra.mxu3 %vm479_vm1, %v12115_v41  ;;  %v812_v41 = vshrl.u32 %v441_v57, 16  ;;  %v11210_v57 = vunpack.c.l.bf16 %v11635_v31 }
  0xdc   : > { %v1574_v48 = vpop.f32.mrf.mxu2  ;;  %v1014_v52 = vpop.f32.mrf.mxu1 }
  0xdd   : > { %v12195_v62 = vadd.f32 %v1574_v48, %v12089_v35  ;;  %v12197_v56 = vadd.f32 %v1014_v52, %v585_v39  ;;  %v587_v9 = vpop.f32.mrf.mxu0  ;;  %v12205_v35 = vpack.c.bf16 %v406_v27, %v12148_v8  ;;  %v814_v17 = vrot.slane %v812_v41, 3  ;;  %v11634_v39 = vld [vmem:[%s11856_s12 + $0x10] sm:$0xff]  }
  0xde   : > { %v12199_v4 = vpop.f32.mrf.mxu3  ;;  %v1381_v48 = vshrl.u32 %v12133_v21, 16  ;;  %v1385_v52 = vshll.u32 %v12172_v24, 16 }
  0xdf   : > { %16256 = vst [vmem:[#allocation11_spill] sm:$0xff] %v12199_v4  ;;  %10010 = vmatmul.msk.bf16.gmra.mxu1 %vm479_vm1, %v810_v47  ;;  %v818_v8 = vor.u32 %v817_v22, %v814_v17  ;;  %v11207_v47 = vunpack.c.h.bf16 %v11634_v39  ;;  %v467_v22 = vpack.c.bf16 %v11975_v0, %v12184_v30 }
  0xe0   : > { %v1383_v12 = vor.u32 %v1381_v48, %v1379_v49  ;;  %v1387_v41 = vrot.slane %v1385_v52, 1 }
  0xe1   : > { %v819_v33 = vsel %vm685_vm2, %v809_v58, %v818_v8  ;;  %v11206_v58 = vunpack.c.l.bf16 %v11634_v39  ;;  %v1837_v21 = vmax.f32 %v11207_v47, 0.0  ;;  %v828_v52 = vsel %vm685_vm2, %v818_v8, %v12002_v2 }
  0xe2   : > { %v1388_v49 = vsel %vm1288_vm3, %v1383_v12, %v1387_v41 }
  0xe3   : > { %v1836_v51 = vmax.f32 %v11206_v58, 0.0 }
  0xe4   : > { %v1576_v14 = vpop.f32.mrf.mxu2  ;;  %v1016_v40 = vpop.f32.mrf.mxu1 }
  0xe5   : > { %v12208_v50 = vadd.f32 %v1576_v14, %v12104_v46  ;;  %v12210_v15 = vadd.f32 %v1016_v40, %v587_v9  ;;  %v590_v26 = vpop.f32.mrf.mxu0  ;;  %v10147_v46 = vld [vmem:[%s16194_s1 + $0xe] sm:$0x3]  ;;  %v1786_v9 = vunpack.c.l.bf16 %v1737_v6  ;;  %v1838_v14 = vmax.f32 %v11210_v57, 0.0 }
  0xe6   : > { %v12212_v13 = vpop.f32.mrf.mxu3  ;;  %v4036_v43 = vsel %vm552_vm0, %v10147_v46, 0  ;;  %v11307_v6 = vunpack.c.h.bf16 %v11635_v31  ;;  %v2387_v12 = vpack.c.bf16 %v1837_v21, %v1836_v51 }
  0xe7   : > { %16257 = vst [vmem:[#allocation12_spill] sm:$0xff] %v12212_v13  ;;  %4045 = vmatpush.bf16.msrb.mxu3 %v4036_v43  ;;  %v1835_v34 = vmax.f32 %v1786_v9, 0.0  ;;  %v11636_v9 = vld [vmem:[%s11856_s12 + $0x20] sm:$0xff]  }
  0xe8   : > { %9987 = vmatmul.msk.bf16.gmra.mxu0 %vm479_vm1, %v12205_v35  ;;  %v2766_v58 = vmax.f32 %v11307_v6, 0.0 }
  0xe9   : > { %10033 = vmatmul.msk.bf16.gmra.mxu2 %vm479_vm1, %v1380_v54 }
  0xeb   : > { %10020 = vmatmul.msk.bf16.gmra.mxu3 %vm479_vm1, %v12152_v23 }
  0xec   : > { %v1579_v60 = vpop.f32.mrf.mxu2  ;;  %v1019_v29 = vpop.f32.mrf.mxu1 }
  0xed   : > { %v12229_v1 = vadd.f32 %v1579_v60, %v12123_v59  ;;  %v12231_v27 = vadd.f32 %v1019_v29, %v590_v26  ;;  %v592_v45 = vpop.f32.mrf.mxu0  ;;  %v10172_v59 = vld [vmem:[%s16194_s1 + $0x10] sm:$0x3]  ;;  %v1884_v29 = vpack.c.bf16 %v1836_v51, %v1835_v34 }
  0xee   : > { %v12233_v23 = vpop.f32.mrf.mxu3  ;;  %v4658_v53 = vsel %vm552_vm0, %v10172_v59, 0 }
  0xef   : > { %16258 = vst [vmem:[#allocation13_spill] sm:$0xff] %v12233_v23  ;;  %10011 = vmatmul.msk.bf16.gmra.mxu1 %vm479_vm1, %v819_v33  ;;  %4667 = vmatpush.bf16.msra.mxu0 %v4658_v53  ;;  %v1885_v33 = vpack.c.bf16 %v1838_v14, %v1837_v21  ;;  %v1912_v0 = vshrl.u32 %v1884_v29, 16  ;;  %v1393_v53 = vshll.u32 %v12205_v35, 16  ;;  %v2840_v21 = vshrl.u32 %v2387_v12, 16 }
  0xf1   : > { %v1920_v39 = vshrl.u32 %v1885_v33, 16  ;;  %v1923_v43 = vshll.u32 %v1885_v33, 16  ;;  %v1914_v34 = vrot.slane %v1912_v0, 3 }
  0xf3   : > { %v1922_v2 = vrot.slane %v1920_v39, 3  ;;  %v1925_v8 = vrot.slane %v1923_v43, 4 }
  0xf4   : > { %v1581_v40 = vpop.f32.mrf.mxu2  ;;  %v1021_v17 = vpop.f32.mrf.mxu1 }
  0xf5   : > { %v12245_v26 = vadd.f32 %v1581_v40, %v12137_v42  ;;  %v12247_v54 = vadd.f32 %v1021_v17, %v592_v45  ;;  %v595_v46 = vpop.f32.mrf.mxu0  ;;  %v1915_v42 = vshll.u32 %v1884_v29, 16  ;;  %v12270_v17 = vld [vmem:[%s11856_s12 + $0x78] sm:$0xff]   ;;  %v1395_v29 = vrot.slane %v1393_v53, 1 }
  0xf6   : > { %v12249_v60 = vpop.f32.mrf.mxu3  ;;  %v11170_v33 = vunpack.c.l.bf16 %v12270_v17  ;;  %v1926_v6 = vor.u32 %v1925_v8, %v1922_v2  ;;  %v11311_v8 = vunpack.c.h.bf16 %v11636_v9 }
  0xf7   : > { %16259 = vst [vmem:[#allocation14_spill] sm:$0xff] %v12249_v60  ;;  %v1917_v40 = vrot.slane %v1915_v42, 4 }
  0xf8   : > { %9988 = vmatmul.msk.bf16.gmra.mxu0 %vm479_vm1, %v467_v22  ;;  %v2842_v22 = vshll.u32 %v2387_v12, 16 }
  0xf9   : > { %10034 = vmatmul.msk.bf16.gmra.mxu2 %vm479_vm1, %v1388_v49 }
  0xfb   : > { %10021 = vmatmul.msk.bf16.gmra.mxu3 %vm479_vm1, %v12188_v16  ;;  %v1389_v16 = vshrl.u32 %v12172_v24, 16  ;;  %v1918_v24 = vor.u32 %v1917_v40, %v1914_v34 }
  0xfc   : > { %v1584_v45 = vpop.f32.mrf.mxu2  ;;  %v1024_v48 = vpop.f32.mrf.mxu1 }
  0xfd   : > { %v12259_v47 = vadd.f32 %v1584_v45, %v12161_v3  ;;  %v12261_v31 = vadd.f32 %v1024_v48, %v595_v46  ;;  %v597_v57 = vpop.f32.mrf.mxu0  ;;  %v12272_v3 = vpack.c.bf16 %v2766_v58, %v1838_v14  ;;  %v11214_v46 = vunpack.c.l.bf16 %v11636_v9 }
  0xfe   : > { %v12264_v59 = vpop.f32.mrf.mxu3  ;;  %v1391_v49 = vor.u32 %v1389_v16, %v1387_v41  ;;  %v2844_v48 = vrot.slane %v2842_v22, 1  ;;  %v1241_v16 = vmax.f32 %v11170_v33, 0.0  ;;  %v1927_v53 = vsel %vm685_vm2, %v1918_v24, %v1926_v6 }
  0xff   : > { %10012 = vmatmul.msk.bf16.gmra.mxu1 %vm479_vm1, %v828_v52  ;;  %v2847_v0 = vshll.u32 %v12272_v3, 16  ;;  %v1840_v42 = vmax.f32 %v11214_v46, 0.0  ;;  %v2768_v24 = vmax.f32 %v11311_v8, 0.0  ;;  %v2851_v60 = vshrl.u32 %v12272_v3, 16 }
 0x100   : > { %v1396_v41 = vsel %vm1288_vm3, %v1391_v49, %v1395_v29  ;;  %v2845_v34 = vor.u32 %v2844_v48, %v2840_v21  ;;  %v12304_v48 = vld [vmem:[%s11856_s12 + $0x80] sm:$0xff]  }
 0x101   : > { %v2849_v40 = vrot.slane %v2847_v0, 1  ;;  %v1886_v2 = vpack.c.bf16 %v1840_v42, %v2766_v58 }
 0x103   : > { %v2850_v46 = vsel %vm1288_vm3, %v2845_v34, %v2849_v40  ;;  %v1929_v49 = vshrl.u32 %v1886_v2, 16  ;;  %v1932_v33 = vshll.u32 %v1886_v2, 16  ;;  %v11174_v2 = vunpack.c.l.bf16 %v12304_v48 }
 0x104   : > { %v1586_v45 = vpop.f32.mrf.mxu2  ;;  %v1026_v51 = vpop.f32.mrf.mxu1 }
 0x105   : > { %v12277_v39 = vadd.f32 %v1586_v45, %v12177_v36  ;;  %v12279_v14 = vadd.f32 %v1026_v51, %v597_v57  ;;  %v600_v43 = vpop.f32.mrf.mxu0  ;;  %v12288_v36 = vpack.c.bf16 %v1241_v16, %v12184_v30  ;;  %v1397_v30 = vshrl.u32 %v12205_v35, 16 }
 0x106   : > { %v12281_v52 = vpop.f32.mrf.mxu3  ;;  %v1934_v16 = vrot.slane %v1932_v33, 4 }
 0x107   : > { %v1401_v21 = vshll.u32 %v12288_v36, 16 }
 0x108   : > { %10073 = vmatmul.msk.bf16.vlgmr.msrb.gmra.mxu0 %vm479_vm1, %v2387_v12  ;;  %v11637_v12 = vld [vmem:[%s11856_s12 + $0x28] sm:$0xff]  }
 0x109   : > { %10035 = vmatmul.msk.bf16.gmra.mxu2 %vm479_vm1, %v1396_v41  ;;  %v11218_v0 = vunpack.c.l.bf16 %v11637_v12  ;;  %v1931_v41 = vrot.slane %v1929_v49, 3  ;;  %v1403_v34 = vrot.slane %v1401_v21, 1 }
 0x10b   : > { %10048 = vmatmul.msk.bf16.vlgmr.msra.gmra.mxu3 %vm479_vm1, %v1927_v53  ;;  %v12306_v53 = vpack.c.bf16 %v2768_v24, %v1840_v42  ;;  %v1842_v8 = vmax.f32 %v11218_v0, 0.0 }
 0x10c   : > { %v1589_v57 = vpop.f32.mrf.mxu2  ;;  %v1029_v22 = vpop.f32.mrf.mxu1 }
 0x10d   : > { %v12294_v45 = vadd.f32 %v1589_v57, %v12197_v56  ;;  %v12296_v58 = vadd.f32 %v1029_v22, %v600_v43  ;;  %v602_v9 = vpop.f32.mrf.mxu0  ;;  %v1399_v56 = vor.u32 %v1397_v30, %v1395_v29  ;;  %v11171_v43 = vunpack.c.h.bf16 %v12270_v17 }
 0x10e   : > { %v12298_v51 = vpop.f32.mrf.mxu3  ;;  %v1935_v22 = vor.u32 %v1934_v16, %v1931_v41  ;;  %v1243_v30 = vmax.f32 %v11174_v2, 0.0  ;;  %v1887_v21 = vpack.c.bf16 %v1842_v8, %v2768_v24  ;;  %v2853_v41 = vor.u32 %v2851_v60, %v2849_v40 }
 0x10f   : > { %10098 = vmatmul.msk.bf16.vlgmr.msrb.gmra.mxu1 %vm479_vm1, %v2850_v46  ;;  %v2855_v46 = vshll.u32 %v12306_v53, 16  ;;  %v1404_v17 = vsel %vm1288_vm3, %v1399_v56, %v1403_v34  ;;  %v1242_v33 = vmax.f32 %v11171_v43, 0.0  ;;  %v2859_v4 = vshrl.u32 %v12306_v53, 16 }
 0x110   : > { %v1936_v0 = vsel %vm685_vm2, %v1926_v6, %v1935_v22  ;;  %v1941_v56 = vshll.u32 %v1887_v21, 16 }
 0x111   : > { %v2857_v16 = vrot.slane %v2855_v46, 1  ;;  %v1405_v46 = vshrl.u32 %v12288_v36, 16 }
 0x113   : > { %v2858_v6 = vsel %vm1288_vm3, %v2853_v41, %v2857_v16  ;;  %v1407_v41 = vor.u32 %v1405_v46, %v1403_v34 }
 0x114   : > { %v1591_v57 = vpop.f32.mrf.mxu2  ;;  %v1031_v35 = vpop.f32.mrf.mxu1 }
 0x115   : > { %v12313_v23 = vadd.f32 %v1591_v57, %v12210_v15  ;;  %v12315_v49 = vadd.f32 %v1031_v35, %v602_v9  ;;  %v605_v42 = vpop.f32.mrf.mxu0  ;;  %v11315_v15 = vunpack.c.h.bf16 %v11637_v12  ;;  %v12324_v9 = vpack.c.bf16 %v1243_v30, %v1242_v33  ;;  %v11638_v12 = vld [vmem:[%s11856_s12 + $0x30] sm:$0xff]  }
 0x116   : > { %v12317_v29 = vpop.f32.mrf.mxu3  ;;  %v1938_v57 = vshrl.u32 %v1887_v21, 16  ;;  %v1943_v30 = vrot.slane %v1941_v56, 4  ;;  %v12340_v21 = vld [vmem:[%s11856_s12 + $0x88] sm:$0xff]  }
 0x117   : > { %v2770_v2 = vmax.f32 %v11315_v15, 0.0  ;;  %v11175_v15 = vunpack.c.h.bf16 %v12304_v48 }
 0x118   : > { %10074 = vmatmul.msk.bf16.gmra.mxu0 %vm479_vm1, %v12272_v3  ;;  %v1940_v33 = vrot.slane %v1938_v57, 3 }
 0x119   : > { %10036 = vmatmul.msk.bf16.gmra.mxu2 %vm479_vm1, %v1404_v17  ;;  %v1409_v17 = vshll.u32 %v12324_v9, 16  ;;  %v1244_v46 = vmax.f32 %v11175_v15, 0.0 }
 0x11b   : > { %10049 = vmatmul.msk.bf16.gmra.mxu3 %vm479_vm1, %v1936_v0  ;;  %v12342_v0 = vpack.c.bf16 %v2770_v2, %v1842_v8 }
 0x11c   : > { %v1594_v43 = vpop.f32.mrf.mxu2  ;;  %v1034_v24 = vpop.f32.mrf.mxu1 }
 0x11d   : > { %v12329_v3 = vadd.f32 %v1594_v43, %v12231_v27  ;;  %v12331_v60 = vadd.f32 %v1034_v24, %v605_v42  ;;  %v607_v40 = vpop.f32.mrf.mxu0  ;;  %v11222_v27 = vunpack.c.l.bf16 %v11638_v12  ;;  %v1411_v42 = vrot.slane %v1409_v17, 1 }
 0x11e   : > { %v12334_v35 = vpop.f32.mrf.mxu3  ;;  %v11178_v43 = vunpack.c.l.bf16 %v12340_v21  ;;  %v1944_v24 = vor.u32 %v1943_v30, %v1940_v33  ;;  %v2861_v30 = vor.u32 %v2859_v4, %v2857_v16  ;;  %v2867_v20 = vshrl.u32 %v12342_v0, 16 }
 0x11f   : > { %10099 = vmatmul.msk.bf16.gmra.mxu1 %vm479_vm1, %v2858_v6  ;;  %v2863_v6 = vshll.u32 %v12342_v0, 16  ;;  %v1844_v57 = vmax.f32 %v11222_v27, 0.0  ;;  %v1412_v48 = vsel %vm1288_vm3, %v1407_v41, %v1411_v42 }
 0x120   : > { %v1245_v17 = vmax.f32 %v11178_v43, 0.0  ;;  %v1945_v33 = vsel %vm685_vm2, %v1935_v22, %v1944_v24 }
 0x121   : > { %v2865_v27 = vrot.slane %v2863_v6, 1  ;;  %v1888_v10 = vpack.c.bf16 %v1844_v57, %v2770_v2 }
 0x123   : > { %v2866_v15 = vsel %vm1288_vm3, %v2861_v30, %v2865_v27  ;;  %v1947_v43 = vshrl.u32 %v1888_v10, 16  ;;  %v1950_v22 = vshll.u32 %v1888_v10, 16 }
 0x124   : > { %v1596_v13 = vpop.f32.mrf.mxu2  ;;  %v1036_v36 = vpop.f32.mrf.mxu1 }
 0x125   : > { %v12349_v56 = vadd.f32 %v1596_v13, %v12247_v54  ;;  %v12351_v8 = vadd.f32 %v1036_v36, %v607_v40  ;;  %v610_v19 = vpop.f32.mrf.mxu0  ;;  %v11319_v13 = vunpack.c.h.bf16 %v11638_v12  ;;  %v12360_v54 = vpack.c.bf16 %v1245_v17, %v1244_v46 }
 0x126   : > { %v12353_v34 = vpop.f32.mrf.mxu3  ;;  %v1413_v12 = vshrl.u32 %v12324_v9, 16  ;;  %v11226_v46 = vunpack.c.l.bf16 %v11639_v28  ;;  %v1949_v10 = vrot.slane %v1947_v43, 3  ;;  %v1952_v17 = vrot.slane %v1950_v22, 4 }
 0x127   : > { %v2772_v36 = vmax.f32 %v11319_v13, 0.0  ;;  %v1417_v6 = vshll.u32 %v12360_v54, 16 }
 0x128   : > { %10075 = vmatmul.msk.bf16.gmra.mxu0 %vm479_vm1, %v12306_v53  ;;  %v1953_v44 = vor.u32 %v1952_v17, %v1949_v10  ;;  %v2869_v10 = vor.u32 %v2867_v20, %v2865_v27  ;;  %v11640_v27 = vld [vmem:[%s11856_s12 + $0x40] sm:$0xff]  }
 0x129   : > { %10037 = vmatmul.msk.bf16.gmra.mxu2 %vm479_vm1, %v1412_v48  ;;  %v12376_v48 = vld [vmem:[%s11856_s12 + $0x90] sm:$0xff]   ;;  %v1419_v30 = vrot.slane %v1417_v6, 1 }
 0x12a   : > { %v11182_v13 = vunpack.c.l.bf16 %v12376_v48 }
 0x12b   : > { %10050 = vmatmul.msk.bf16.gmra.mxu3 %vm479_vm1, %v1945_v33  ;;  %v12378_v33 = vpack.c.bf16 %v2772_v36, %v1844_v57 }
 0x12c   : > { %v1599_v40 = vpop.f32.mrf.mxu2  ;;  %v1039_v41 = vpop.f32.mrf.mxu1 }
 0x12d   : > { %v12366_v4 = vadd.f32 %v1599_v40, %v12261_v31  ;;  %v12368_v53 = vadd.f32 %v1039_v41, %v610_v19  ;;  %v612_v16 = vpop.f32.mrf.mxu0  ;;  %v1415_v31 = vor.u32 %v1413_v12, %v1411_v42  ;;  %v11179_v19 = vunpack.c.h.bf16 %v12340_v21 }
 0x12e   : > { %v12370_v2 = vpop.f32.mrf.mxu3  ;;  %v1846_v40 = vmax.f32 %v11226_v46, 0.0  ;;  %v1247_v12 = vmax.f32 %v11182_v13, 0.0  ;;  %v1954_v46 = vsel %vm685_vm2, %v1944_v24, %v1953_v44 }
 0x12f   : > { %16260 = vst [vmem:[#allocation15_spill] sm:$0xff] %v12366_v4  ;;  %10100 = vmatmul.msk.bf16.gmra.mxu1 %vm479_vm1, %v2866_v15  ;;  %v2871_v15 = vshll.u32 %v12378_v33, 16  ;;  %v1420_v21 = vsel %vm1288_vm3, %v1415_v31, %v1419_v30  ;;  %v1246_v22 = vmax.f32 %v11179_v19, 0.0 }
 0x130   : > { %v1889_v6 = vpack.c.bf16 %v1846_v40, %v2772_v36 }
 0x131   : > { %v2873_v17 = vrot.slane %v2871_v15, 1  ;;  %v1421_v15 = vshrl.u32 %v12360_v54, 16 }
 0x132   : > { %v1959_v31 = vshll.u32 %v1889_v6, 16 }
 0x133   : > { %v2874_v24 = vsel %vm1288_vm3, %v2869_v10, %v2873_v17  ;;  %v1423_v10 = vor.u32 %v1421_v15, %v1419_v30 }
 0x134   : > { %v1601_v41 = vpop.f32.mrf.mxu2  ;;  %v1041_v9 = vpop.f32.mrf.mxu1 }
 0x135   : > { %v12385_v38 = vadd.f32 %v1601_v41, %v12279_v14  ;;  %v12387_v43 = vadd.f32 %v1041_v9, %v612_v16  ;;  %v615_v57 = vpop.f32.mrf.mxu0  ;;  %v11323_v14 = vunpack.c.h.bf16 %v11639_v28  ;;  %v12396_v16 = vpack.c.bf16 %v1247_v12, %v1246_v22 }
 0x136   : > { %v12389_v42 = vpop.f32.mrf.mxu3  ;;  %v1956_v41 = vshrl.u32 %v1889_v6, 16  ;;  %v1961_v12 = vrot.slane %v1959_v31, 4  ;;  %v12412_v6 = vld [vmem:[%s11856_s12 + $0x98] sm:$0xff]  }
 0x137   : > { %16261 = vst [vmem:[#allocation16_spill] sm:$0xff] %v12385_v38  ;;  %v2774_v13 = vmax.f32 %v11323_v14, 0.0  ;;  %v11183_v14 = vunpack.c.h.bf16 %v12376_v48 }
 0x138   : > { %16262 = vst [vmem:[#allocation17_spill] sm:$0xff] %v12389_v42  ;;  %10076 = vmatmul.msk.bf16.gmra.mxu0 %vm479_vm1, %v12342_v0  ;;  %v1958_v22 = vrot.slane %v1956_v41, 3 }
 0x139   : > { %10038 = vmatmul.msk.bf16.gmra.mxu2 %vm479_vm1, %v1420_v21  ;;  %v1425_v21 = vshll.u32 %v12396_v16, 16  ;;  %v1248_v15 = vmax.f32 %v11183_v14, 0.0 }
 0x13b   : > { %10051 = vmatmul.msk.bf16.gmra.mxu3 %vm479_vm1, %v1954_v46  ;;  %v12414_v46 = vpack.c.bf16 %v2774_v13, %v1846_v40 }
 0x13c   : > { %v1604_v19 = vpop.f32.mrf.mxu2  ;;  %v1044_v36 = vpop.f32.mrf.mxu1 }
 0x13d   : > { %v12401_v0 = vadd.f32 %v1604_v19, %v12296_v58  ;;  %v12403_v20 = vadd.f32 %v1044_v36, %v615_v57  ;;  %v617_v28 = vpop.f32.mrf.mxu0  ;;  %v11230_v58 = vunpack.c.l.bf16 %v11640_v27  ;;  %v1427_v57 = vrot.slane %v1425_v21, 1 }
 0x13e   : > { %v12406_v9 = vpop.f32.mrf.mxu3  ;;  %v11186_v19 = vunpack.c.l.bf16 %v12412_v6  ;;  %v1962_v36 = vor.u32 %v1961_v12, %v1958_v22 }
 0x13f   : > { %16263 = vst [vmem:[#allocation18_spill] sm:$0xff] %v12401_v0  ;;  %10101 = vmatmul.msk.bf16.gmra.mxu1 %vm479_vm1, %v2874_v24  ;;  %v2879_v24 = vshll.u32 %v12414_v46, 16  ;;  %v1848_v41 = vmax.f32 %v11230_v58, 0.0  ;;  %v1428_v48 = vsel %vm1288_vm3, %v1423_v10, %v1427_v57 }
 0x140   : > { %16264 = vst [vmem:[#allocation19_spill] sm:$0xff] %v12406_v9  ;;  %v2875_v9 = vshrl.u32 %v12378_v33, 16  ;;  %v1249_v21 = vmax.f32 %v11186_v19, 0.0  ;;  %v1963_v22 = vsel %vm685_vm2, %v1953_v44, %v1962_v36 }
 0x141   : > { %v2881_v58 = vrot.slane %v2879_v24, 1  ;;  %v1890_v42 = vpack.c.bf16 %v1848_v41, %v2774_v13 }
 0x142   : > { %v2877_v12 = vor.u32 %v2875_v9, %v2873_v17  ;;  %v1429_v9 = vshrl.u32 %v12396_v16, 16 }
 0x143   : > { %v1965_v19 = vshrl.u32 %v1890_v42, 16  ;;  %v1968_v44 = vshll.u32 %v1890_v42, 16 }
 0x144   : > { %v1606_v0 = vpop.f32.mrf.mxu2  ;;  %v1046_v54 = vpop.f32.mrf.mxu1  ;;  %v2882_v14 = vsel %vm1288_vm3, %v2877_v12, %v2881_v58 }
 0x145   : > { %v12421_v31 = vadd.f32 %v1606_v0, %v12315_v49  ;;  %v12423_v40 = vadd.f32 %v1046_v54, %v617_v28  ;;  %v620_v38 = vpop.f32.mrf.mxu0  ;;  %v11327_v49 = vunpack.c.h.bf16 %v11640_v27  ;;  %v12432_v0 = vpack.c.bf16 %v1249_v21, %v1248_v15 }
 0x146   : > { %v12425_v30 = vpop.f32.mrf.mxu3  ;;  %v1967_v42 = vrot.slane %v1965_v19, 3  ;;  %v1970_v21 = vrot.slane %v1968_v44, 4 }
 0x147   : > { %16265 = vst [vmem:[#allocation20_spill] sm:$0xff] %v12421_v31  ;;  %v2776_v54 = vmax.f32 %v11327_v49, 0.0  ;;  %v11641_v31 = vld [vmem:[%s11856_s12 + $0x48] sm:$0xff]   ;;  %v1433_v24 = vshll.u32 %v12432_v0, 16 }
 0x148   : > { %16266 = vst [vmem:[#allocation21_spill] sm:$0xff] %v12425_v30  ;;  %10077 = vmatmul.msk.bf16.gmra.mxu0 %vm479_vm1, %v12378_v33  ;;  %v11234_v15 = vunpack.c.l.bf16 %v11641_v31 }
 0x149   : > { %10039 = vmatmul.msk.bf16.gmra.mxu2 %vm479_vm1, %v1428_v48  ;;  %v12448_v48 = vld [vmem:[%s11856_s12 + $0xa0] sm:$0xff]   ;;  %v1435_v12 = vrot.slane %v1433_v24, 1 }
 0x14a   : > { %v11190_v49 = vunpack.c.l.bf16 %v12448_v48 }
 0x14b   : > { %10052 = vmatmul.msk.bf16.gmra.mxu3 %vm479_vm1, %v1963_v22  ;;  %v12450_v22 = vpack.c.bf16 %v2776_v54, %v1848_v41 }
 0x14c   : > { %v1609_v28 = vpop.f32.mrf.mxu2  ;;  %v1049_v10 = vpop.f32.mrf.mxu1 }
 0x14d   : > { %v12438_v33 = vadd.f32 %v1609_v28, %v12331_v60  ;;  %v12440_v17 = vadd.f32 %v1049_v10, %v620_v38  ;;  %v622_v13 = vpop.f32.mrf.mxu0  ;;  %v1431_v60 = vor.u32 %v1429_v9, %v1427_v57  ;;  %v11187_v38 = vunpack.c.h.bf16 %v12412_v6 }
 0x14e   : > { %v12442_v27 = vpop.f32.mrf.mxu3  ;;  %v1850_v28 = vmax.f32 %v11234_v15, 0.0  ;;  %v1251_v9 = vmax.f32 %v11190_v49, 0.0 }
 0x14f   : > { %16267 = vst [vmem:[#allocation22_spill] sm:$0xff] %v12438_v33  ;;  %10102 = vmatmul.msk.bf16.gmra.mxu1 %vm479_vm1, %v2882_v14  ;;  %v1971_v33 = vor.u32 %v1970_v21, %v1967_v42  ;;  %v2887_v14 = vshll.u32 %v12450_v22, 16  ;;  %v1436_v6 = vsel %vm1288_vm3, %v1431_v60, %v1435_v12  ;;  %v1250_v44 = vmax.f32 %v11187_v38, 0.0 }
 0x150   : > { %16268 = vst [vmem:[#allocation23_spill] sm:$0xff] %v12442_v27  ;;  %v2883_v27 = vshrl.u32 %v12414_v46, 16  ;;  %v1891_v24 = vpack.c.bf16 %v1850_v28, %v2776_v54 }
 0x151   : > { %v1972_v15 = vsel %vm685_vm2, %v1962_v36, %v1971_v33  ;;  %v2889_v21 = vrot.slane %v2887_v14, 1  ;;  %v1437_v14 = vshrl.u32 %v12432_v0, 16 }
 0x152   : > { %v2885_v42 = vor.u32 %v2883_v27, %v2881_v58  ;;  %v1977_v60 = vshll.u32 %v1891_v24, 16  ;;  %v11642_v27 = vld [vmem:[%s11856_s12 + $0x50] sm:$0xff]  }
 0x154   : > { %v1611_v10 = vpop.f32.mrf.mxu2  ;;  %v1051_v16 = vpop.f32.mrf.mxu1  ;;  %v2890_v36 = vsel %vm1288_vm3, %v2885_v42, %v2889_v21  ;;  %v1439_v42 = vor.u32 %v1437_v14, %v1435_v12 }
 0x155   : > { %v12457_v30 = vadd.f32 %v1611_v10, %v12351_v8  ;;  %v12459_v19 = vadd.f32 %v1051_v16, %v622_v13  ;;  %v625_v41 = vpop.f32.mrf.mxu0  ;;  %v11331_v8 = vunpack.c.h.bf16 %v11641_v31  ;;  %v12468_v13 = vpack.c.bf16 %v1251_v9, %v1250_v44 }
 0x156   : > { %v12461_v57 = vpop.f32.mrf.mxu3  ;;  %v1974_v10 = vshrl.u32 %v1891_v24, 16  ;;  %v1979_v9 = vrot.slane %v1977_v60, 4  ;;  %v12484_v24 = vld [vmem:[%s11856_s12 + $0xa8] sm:$0xff]  }
 0x157   : > { %16269 = vst [vmem:[#allocation24_spill] sm:$0xff] %v12457_v30  ;;  %v2778_v49 = vmax.f32 %v11331_v8, 0.0  ;;  %v11191_v8 = vunpack.c.h.bf16 %v12448_v48 }
 0x158   : > { %16270 = vst [vmem:[#allocation25_spill] sm:$0xff] %v12461_v57  ;;  %10078 = vmatmul.msk.bf16.gmra.mxu0 %vm479_vm1, %v12414_v46  ;;  %v1976_v44 = vrot.slane %v1974_v10, 3 }
 0x159   : > { %10040 = vmatmul.msk.bf16.gmra.mxu2 %vm479_vm1, %v1436_v6  ;;  %v1441_v6 = vshll.u32 %v12468_v13, 16  ;;  %v1252_v14 = vmax.f32 %v11191_v8, 0.0 }
 0x15b   : > { %10053 = vmatmul.msk.bf16.gmra.mxu3 %vm479_vm1, %v1972_v15  ;;  %v12486_v15 = vpack.c.bf16 %v2778_v49, %v1850_v28 }
 0x15c   : > { %v1614_v38 = vpop.f32.mrf.mxu2  ;;  %v1054_v54 = vpop.f32.mrf.mxu1 }
 0x15d   : > { %v12473_v46 = vadd.f32 %v1614_v38, %v12368_v53  ;;  %v12475_v58 = vadd.f32 %v1054_v54, %v625_v41  ;;  %v627_v31 = vpop.f32.mrf.mxu0  ;;  %v11238_v53 = vunpack.c.l.bf16 %v11642_v27  ;;  %v1443_v41 = vrot.slane %v1441_v6, 1 }
 0x15e   : > { %v12478_v16 = vpop.f32.mrf.mxu3  ;;  %v11194_v38 = vunpack.c.l.bf16 %v12484_v24  ;;  %v1980_v54 = vor.u32 %v1979_v9, %v1976_v44 }
 0x15f   : > { %16271 = vst [vmem:[#allocation26_spill] sm:$0xff] %v12473_v46  ;;  %10103 = vmatmul.msk.bf16.gmra.mxu1 %vm479_vm1, %v2890_v36  ;;  %v2895_v36 = vshll.u32 %v12486_v15, 16  ;;  %v1852_v10 = vmax.f32 %v11238_v53, 0.0  ;;  %v1444_v48 = vsel %vm1288_vm3, %v1439_v42, %v1443_v41 }
 0x160   : > { %16272 = vst [vmem:[#allocation27_spill] sm:$0xff] %v12478_v16  ;;  %v2891_v16 = vshrl.u32 %v12450_v22, 16  ;;  %v1253_v6 = vmax.f32 %v11194_v38, 0.0  ;;  %v1981_v44 = vsel %vm685_vm2, %v1971_v33, %v1980_v54 }
 0x161   : > { %v2897_v53 = vrot.slane %v2895_v36, 1  ;;  %v1892_v57 = vpack.c.bf16 %v1852_v10, %v2778_v49 }
 0x162   : > { %v2893_v9 = vor.u32 %v2891_v16, %v2889_v21  ;;  %v1445_v16 = vshrl.u32 %v12468_v13, 16 }
 0x163   : > { %v1983_v38 = vshrl.u32 %v1892_v57, 16  ;;  %v1986_v33 = vshll.u32 %v1892_v57, 16 }
 0x164   : > { %v1616_v46 = vpop.f32.mrf.mxu2  ;;  %v1056_v0 = vpop.f32.mrf.mxu1  ;;  %v2898_v8 = vsel %vm1288_vm3, %v2893_v9, %v2897_v53 }
 0x165   : > { %v12493_v60 = vadd.f32 %v1616_v46, %v12387_v43  ;;  %v12495_v28 = vadd.f32 %v1056_v0, %v627_v31  ;;  %v630_v30 = vpop.f32.mrf.mxu0  ;;  %v11335_v43 = vunpack.c.h.bf16 %v11642_v27  ;;  %v12504_v46 = vpack.c.bf16 %v1253_v6, %v1252_v14 }
 0x166   : > { %v12497_v12 = vpop.f32.mrf.mxu3  ;;  %v1985_v57 = vrot.slane %v1983_v38, 3  ;;  %v1988_v6 = vrot.slane %v1986_v33, 4 }
 0x167   : > { %16273 = vst [vmem:[#allocation28_spill] sm:$0xff] %v12493_v60  ;;  %v2780_v0 = vmax.f32 %v11335_v43, 0.0  ;;  %v11643_v60 = vld [vmem:[%s11856_s12 + $0x58] sm:$0xff]   ;;  %v1449_v36 = vshll.u32 %v12504_v46, 16 }
 0x168   : > { %16274 = vst [vmem:[#allocation29_spill] sm:$0xff] %v12497_v12  ;;  %10079 = vmatmul.msk.bf16.gmra.mxu0 %vm479_vm1, %v12450_v22  ;;  %v11242_v14 = vunpack.c.l.bf16 %v11643_v60 }
 0x169   : > { %10041 = vmatmul.msk.bf16.gmra.mxu2 %vm479_vm1, %v1444_v48  ;;  %v12520_v48 = vld [vmem:[%s11856_s12 + $0xb0] sm:$0xff]   ;;  %v1451_v9 = vrot.slane %v1449_v36, 1 }
 0x16a   : > { %v11198_v43 = vunpack.c.l.bf16 %v12520_v48 }
 0x16b   : > { %10054 = vmatmul.msk.bf16.gmra.mxu3 %vm479_vm1, %v1981_v44  ;;  %v12522_v44 = vpack.c.bf16 %v2780_v0, %v1852_v10 }
 0x16c   : > { %v1619_v31 = vpop.f32.mrf.mxu2  ;;  %v1059_v42 = vpop.f32.mrf.mxu1 }
 0x16d   : > { %v12510_v22 = vadd.f32 %v1619_v31, %v12403_v20  ;;  %v12512_v21 = vadd.f32 %v1059_v42, %v630_v30  ;;  %v632_v49 = vpop.f32.mrf.mxu0  ;;  %v1447_v20 = vor.u32 %v1445_v16, %v1443_v41  ;;  %v11195_v30 = vunpack.c.h.bf16 %v12484_v24 }
 0x16e   : > { %v12514_v27 = vpop.f32.mrf.mxu3  ;;  %v1854_v31 = vmax.f32 %v11242_v14, 0.0  ;;  %v1255_v16 = vmax.f32 %v11198_v43, 0.0 }
 0x16f   : > { %16275 = vst [vmem:[#allocation30_spill] sm:$0xff] %v12510_v22  ;;  %10104 = vmatmul.msk.bf16.gmra.mxu1 %vm479_vm1, %v2898_v8  ;;  %v1989_v22 = vor.u32 %v1988_v6, %v1985_v57  ;;  %v2903_v8 = vshll.u32 %v12522_v44, 16  ;;  %v1452_v24 = vsel %vm1288_vm3, %v1447_v20, %v1451_v9  ;;  %v1254_v33 = vmax.f32 %v11195_v30, 0.0 }
 0x170   : > { %16276 = vst [vmem:[#allocation31_spill] sm:$0xff] %v12514_v27  ;;  %v2899_v27 = vshrl.u32 %v12486_v15, 16  ;;  %v1893_v36 = vpack.c.bf16 %v1854_v31, %v2780_v0 }
 0x171   : > { %v1990_v14 = vsel %vm685_vm2, %v1980_v54, %v1989_v22  ;;  %v2905_v6 = vrot.slane %v2903_v8, 1  ;;  %v1453_v8 = vshrl.u32 %v12504_v46, 16  ;;  %v2907_v46 = vshrl.u32 %v12522_v44, 16 }
 0x172   : > { %v2901_v57 = vor.u32 %v2899_v27, %v2897_v53  ;;  %v1995_v20 = vshll.u32 %v1893_v36, 16  ;;  %v11644_v27 = vld [vmem:[%s11856_s12 + $0x60] sm:$0xff]  }
 0x174   : > { %v1621_v42 = vpop.f32.mrf.mxu2  ;;  %v1061_v13 = vpop.f32.mrf.mxu1  ;;  %v2906_v54 = vsel %vm1288_vm3, %v2901_v57, %v2905_v6  ;;  %v1455_v57 = vor.u32 %v1453_v8, %v1451_v9 }
 0x175   : > { %v12529_v12 = vadd.f32 %v1621_v42, %v12423_v40  ;;  %v12531_v38 = vadd.f32 %v1061_v13, %v632_v49  ;;  %v635_v10 = vpop.f32.mrf.mxu0  ;;  %v11339_v40 = vunpack.c.h.bf16 %v11643_v60  ;;  %v12540_v49 = vpack.c.bf16 %v1255_v16, %v1254_v33 }
 0x176   : > { %v12533_v41 = vpop.f32.mrf.mxu3  ;;  %v1992_v42 = vshrl.u32 %v1893_v36, 16  ;;  %v1997_v16 = vrot.slane %v1995_v20, 4  ;;  %v12556_v36 = vld [vmem:[%s11856_s12 + $0xb8] sm:$0xff]  }
 0x177   : > { %16277 = vst [vmem:[#allocation32_spill] sm:$0xff] %v12529_v12  ;;  %v2782_v43 = vmax.f32 %v11339_v40, 0.0  ;;  %v11199_v40 = vunpack.c.h.bf16 %v12520_v48  ;;  %v2909_v12 = vor.u32 %v2907_v46, %v2905_v6 }
 0x178   : > { %16278 = vst [vmem:[#allocation33_spill] sm:$0xff] %v12533_v41  ;;  %10080 = vmatmul.msk.bf16.gmra.mxu0 %vm479_vm1, %v12486_v15  ;;  %v1994_v33 = vrot.slane %v1992_v42, 3 }
 0x179   : > { %10042 = vmatmul.msk.bf16.gmra.mxu2 %vm479_vm1, %v1452_v24  ;;  %v1457_v24 = vshll.u32 %v12540_v49, 16 }
 0x17b   : > { %10055 = vmatmul.msk.bf16.gmra.mxu3 %vm479_vm1, %v1990_v14  ;;  %v12558_v14 = vpack.c.bf16 %v2782_v43, %v1854_v31 }
 0x17c   : > { %v1624_v30 = vpop.f32.mrf.mxu2  ;;  %v1064_v0 = vpop.f32.mrf.mxu1 }
 0x17d   : > { %v12545_v15 = vadd.f32 %v1624_v30, %v12440_v17  ;;  %v12547_v53 = vadd.f32 %v1064_v0, %v635_v10  ;;  %v637_v60 = vpop.f32.mrf.mxu0  ;;  %v11246_v17 = vunpack.c.l.bf16 %v11644_v27  ;;  %v1459_v10 = vrot.slane %v1457_v24, 1 }
 0x17e   : > { %v12550_v13 = vpop.f32.mrf.mxu3  ;;  %v11202_v30 = vunpack.c.l.bf16 %v12556_v36  ;;  %v12562_v0 = vor.u32 %v1997_v16, %v1994_v33  ;;  %v2911_v42 = vshll.u32 %v12558_v14, 16  ;;  %v1256_v24 = vmax.f32 %v11199_v40, 0.0 }
 0x17f   : > { %16279 = vst [vmem:[#allocation34_spill] sm:$0xff] %v12545_v15  ;;  %10105 = vmatmul.msk.bf16.gmra.mxu1 %vm479_vm1, %v2906_v54  ;;  %v1856_v20 = vmax.f32 %v11246_v17, 0.0  ;;  %v1460_v48 = vsel %vm1288_vm3, %v1455_v57, %v1459_v10  ;;  %v10197_v17 = vld [vmem:[%s16196_s3 + $0x4] sm:$0xf] }
 0x180   : > { %16280 = vst [vmem:[#allocation35_spill] sm:$0xff] %v12550_v13  ;;  %v1257_v33 = vmax.f32 %v11202_v30, 0.0  ;;  %v1999_v16 = vsel %vm685_vm2, %v1989_v22, %v12562_v0 }
 0x182   : > { %v12583_v57 = vpack.c.bf16 %v1257_v33, %v1256_v24 }
 0x184   : > { %v1626_v15 = vpop.f32.mrf.mxu2  ;;  %v1066_v13 = vpop.f32.mrf.mxu1  ;;  %v1465_v24 = vshll.u32 %v12583_v57, 16 }
 0x185   : > { %v12567_v54 = vadd.f32 %v1626_v15, %v12459_v19  ;;  %v12569_v31 = vadd.f32 %v1066_v13, %v637_v60  ;;  %v2497_v9 = vpop.f32.mrf.mxu0  ;;  %v2913_v19 = vrot.slane %v2911_v42, 1  ;;  %v1894_v15 = vpack.c.bf16 %v1856_v20, %v2782_v43  ;;  %v11645_v42 = vld [vmem:[%s11856_s12 + $0x68] sm:$0xff]  }
 0x186   : > { %v12571_v8 = vpop.f32.mrf.mxu3  ;;  %v11343_v60 = vunpack.c.h.bf16 %v11644_v27  ;;  %v5554_v13 = vsel %vm5552_vm4, %v10197_v17, 0 }
 0x187   : > { %16281 = vst [vmem:[#allocation36_spill] sm:$0xff] %v12567_v54  ;;  %5563 = vmatpush.bf16.msra.mxu1 %v5554_v13  ;;  %v2914_v40 = vsel %vm1288_vm3, %v2909_v12, %v2913_v19  ;;  %v2001_v30 = vshrl.u32 %v1894_v15, 16  ;;  %v2004_v46 = vshll.u32 %v1894_v15, 16  ;;  %v11250_v13 = vunpack.c.l.bf16 %v11645_v42 }
 0x188   : > { %16282 = vst [vmem:[#allocation37_spill] sm:$0xff] %v12571_v8  ;;  %10081 = vmatmul.msk.bf16.gmra.mxu0 %vm479_vm1, %v12522_v44  ;;  %v2784_v44 = vmax.f32 %v11343_v60, 0.0 }
 0x189   : > { %10043 = vmatmul.msk.bf16.gmra.mxu2 %vm479_vm1, %v1460_v48  ;;  %v1461_v48 = vshrl.u32 %v12540_v49, 16  ;;  %v2003_v12 = vrot.slane %v2001_v30, 3  ;;  %v2006_v54 = vrot.slane %v2004_v46, 4  ;;  %v1858_v49 = vmax.f32 %v11250_v13, 0.0 }
 0x18a   : > { %v12596_v15 = vpack.c.bf16 %v2784_v44, %v1856_v20 }
 0x18b   : > { %10056 = vmatmul.msk.bf16.gmra.mxu3 %vm479_vm1, %v1999_v16  ;;  %v1161_v16 = vld [vmem:[%s11856_s12 + $0xc0] sm:$0xf]  ;;  %v1463_v8 = vor.u32 %v1461_v48, %v1459_v10  ;;  %v1895_v48 = vpack.c.bf16 %v1858_v49, %v2784_v44 }
 0x18c   : > { %v1629_v22 = vpop.f32.mrf.mxu2  ;;  %v3119_v6 = vpop.f32.mrf.mxu1 }
 0x18d   : > { %v12589_v43 = vadd.f32 %v1629_v22, %v12475_v58  ;;  %v2499_v27 = vpop.f32.mrf.mxu0  ;;  %v1467_v58 = vrot.slane %v1465_v24, 1  ;;  %v11203_v22 = vunpack.c.h.bf16 %v12556_v36  ;;  %v2013_v44 = vshll.u32 %v1895_v48, 16 }
 0x18e   : > { %v2219_v17 = vpop.f32.mrf.mxu3 }
 0x18f   : > { %16283 = vst [vmem:[#allocation38_spill] sm:$0xff] %v12589_v43  ;;  %v2339_v33 = vadd.f32 %v2219_v17, %v12159_v63  ;;  %10106 = vmatmul.msk.bf16.gmra.mxu1 %vm479_vm1, %v2914_v40  ;;  %v1210_v43 = vunpack.c.l.bf16 %v1161_v16  ;;  %v2007_v63 = vor.u32 %v2006_v54, %v2003_v12  ;;  %v2915_v40 = vshrl.u32 %v12558_v14, 16 }
 0x190   : > { %v2919_v17 = vshll.u32 %v12596_v15, 16  ;;  %v1468_v10 = vsel %vm1288_vm3, %v1463_v8, %v1467_v58  ;;  %v1258_v46 = vmax.f32 %v11203_v22, 0.0 }
 0x191   : > { %v2617_v60 = vadd.f32 %v2497_v9, %v2339_v33  ;;  %v1259_v36 = vmax.f32 %v1210_v43, 0.0  ;;  %v2008_v24 = vsel %vm685_vm2, %v12562_v0, %v2007_v63  ;;  %v2917_v54 = vor.u32 %v2915_v40, %v2913_v19 }
 0x192   : > { %v2921_v33 = vrot.slane %v2919_v17, 1  ;;  %v2015_v17 = vrot.slane %v2013_v44, 4 }
 0x193   : > { %v12599_v41 = vadd.f32 %v3119_v6, %v2617_v60  ;;  %v12613_v16 = vpack.c.bf16 %v1259_v36, %v1258_v46  ;;  %v1469_v60 = vshrl.u32 %v12583_v57, 16 }
 0x194   : > { %v1631_v18 = vpop.f32.mrf.mxu2  ;;  %v3121_v4 = vpop.f32.mrf.mxu1 }
 0x195   : > { %v12604_v30 = vadd.f32 %v1631_v18, %v12495_v28  ;;  %v2502_v20 = vpop.f32.mrf.mxu0  ;;  %v11347_v18 = vunpack.c.h.bf16 %v11645_v42 }
 0x196   : > { %v2221_v9 = vpop.f32.mrf.mxu3 }
 0x197   : > { %v2340_v6 = vadd.f32 %v2221_v9, %v12175_v37  ;;  %v2010_v37 = vshrl.u32 %v1895_v48, 16  ;;  %v2786_v19 = vmax.f32 %v11347_v18, 0.0  ;;  %v1162_v9 = vld [vmem:[%s11856_s12 + $0xc4] sm:$0x1] }
 0x198   : > { %10082 = vmatmul.msk.bf16.gmra.mxu0 %vm479_vm1, %v12558_v14  ;;  %v2922_v14 = vsel %vm1288_vm3, %v2917_v54, %v2921_v33  ;;  %v1211_v48 = vunpack.c.l.bf16 %v1162_v9  ;;  %v3288_v9 = vld [vmem:[%s11856_s12 + $0x1c] sm:$0xf] }
 0x199   : > { %v2618_v28 = vadd.f32 %v2499_v27, %v2340_v6  ;;  %10044 = vmatmul.msk.bf16.gmra.mxu2 %vm479_vm1, %v1468_v10  ;;  %v11646_v27 = vld [vmem:[%s11856_s12 + $0x70] sm:$0xff]   ;;  %v2012_v40 = vrot.slane %v2010_v37, 3  ;;  %v12628_v10 = vpack.c.bf16 %v2786_v19, %v1858_v49 }
 0x19a   : > { %v11254_v46 = vunpack.c.l.bf16 %v11646_v27 }
 0x19b   : > { %v12615_v8 = vadd.f32 %v3121_v4, %v2618_v28  ;;  %10057 = vmatmul.msk.bf16.gmra.mxu3 %vm479_vm1, %v2008_v24  ;;  %v1473_v4 = vshll.u32 %v12613_v16, 16  ;;  %v12632_v54 = vor.u32 %v2015_v17, %v2012_v40  ;;  %v2927_v28 = vshll.u32 %v12628_v10, 16  ;;  %v3287_v17 = vld [vmem:[%s11856_s12 + $0x18] sm:$0x8] }
 0x19c   : > { %v1634_v0 = vpop.f32.mrf.mxu2  ;;  %v3124_v43 = vpop.f32.mrf.mxu1  ;;  %v1860_v37 = vmax.f32 %v11254_v46, 0.0 }
 0x19d   : > { %v12620_v13 = vadd.f32 %v1634_v0, %v12512_v21  ;;  %v2504_v42 = vpop.f32.mrf.mxu0  ;;  %v1471_v21 = vor.u32 %v1469_v60, %v1467_v58  ;;  %v1475_v6 = vrot.slane %v1473_v4, 1  ;;  %v1260_v0 = vmax.f32 %v1211_v48, 0.0  ;;  %v11647_v48 = vld [vmem:[%s11856_s12 + $0x78] sm:$0xff]  }
 0x19e   : > { %v2224_v12 = vpop.f32.mrf.mxu3  ;;  %v2929_v60 = vrot.slane %v2927_v28, 1  ;;  %v1896_v4 = vpack.c.bf16 %v1860_v37, %v2786_v19 }
 0x19f   : > { %v2341_v22 = vadd.f32 %v2224_v12, %v12195_v62  ;;  %10107 = vmatmul.msk.bf16.gmra.mxu1 %vm479_vm1, %v2922_v14  ;;  %v2923_v62 = vshrl.u32 %v12596_v15, 16  ;;  %v1476_v44 = vsel %vm1288_vm3, %v1471_v21, %v1475_v6  ;;  %v2017_v14 = vsel %vm685_vm2, %v2007_v63, %v12632_v54 }
 0x1a0   : > { %v1285_v40 = vpack.c.bf16 %v1260_v0, %v1260_v0  ;;  %v2022_v21 = vshll.u32 %v1896_v4, 16 }
 0x1a1   : > { %v2619_v36 = vadd.f32 %v2502_v20, %v2341_v22  ;;  %v2925_v12 = vor.u32 %v2923_v62, %v2921_v33  ;;  %v2019_v33 = vshrl.u32 %v1896_v4, 16  ;;  %v3337_v62 = vunpack.c.l.bf16 %v3288_v9 }
 0x1a2   : > { %v2024_v4 = vrot.slane %v2022_v21, 4 }
 0x1a3   : > { %v12630_v24 = vadd.f32 %v3124_v43, %v2619_v36 }
 0x1a4   : > { %v1636_v57 = vpop.f32.mrf.mxu2  ;;  %v3126_v18 = vpop.f32.mrf.mxu1 }
 0x1a5   : > { %v12637_v49 = vadd.f32 %v1636_v57, %v12531_v38  ;;  %v2507_v20 = vpop.f32.mrf.mxu0  ;;  %v11351_v38 = vunpack.c.h.bf16 %v11646_v27  ;;  %v3336_v57 = vunpack.c.l.bf16 %v3287_v17 }
 0x1a6   : > { %v2226_v58 = vpop.f32.mrf.mxu3 }
 0x1a7   : > { %v2342_v43 = vadd.f32 %v2226_v58, %v12208_v50  ;;  %v11682_v50 = vld [vmem:[%s11856_s12 + $0x20] sm:$0xff]   ;;  %v2788_v19 = vmax.f32 %v11351_v38, 0.0  ;;  %v1481_v58 = vshll.u32 %v1285_v40, 16 }
 0x1a8   : > { %10083 = vmatmul.msk.bf16.gmra.mxu0 %vm479_vm1, %v12596_v15  ;;  %v2930_v15 = vsel %vm1288_vm3, %v2925_v12, %v2929_v60  ;;  %v11399_v0 = vunpack.c.h.bf16 %v11682_v50  ;;  %v2021_v12 = vrot.slane %v2019_v33, 3 }
 0x1a9   : > { %v2620_v22 = vadd.f32 %v2504_v42, %v2342_v43  ;;  %10045 = vmatmul.msk.bf16.gmra.mxu2 %vm479_vm1, %v1476_v44  ;;  %v11398_v44 = vunpack.c.l.bf16 %v11682_v50  ;;  %v12660_v38 = vpack.c.bf16 %v2788_v19, %v1860_v37  ;;  %v1483_v9 = vrot.slane %v1481_v58, 1 }
 0x1aa   : > { %v2931_v37 = vshrl.u32 %v12628_v10, 16 }
 0x1ab   : > { %v12648_v46 = vadd.f32 %v3126_v18, %v2620_v22  ;;  %10058 = vmatmul.msk.bf16.gmra.mxu3 %vm479_vm1, %v2017_v14  ;;  %v1477_v18 = vshrl.u32 %v12613_v16, 16  ;;  %v11258_v14 = vunpack.c.l.bf16 %v11647_v48  ;;  %v3385_v22 = vmax.f32 %v3336_v57, 0.0 }
 0x1ac   : > { %v1639_v63 = vpop.f32.mrf.mxu2  ;;  %v3129_v36 = vpop.f32.mrf.mxu1  ;;  %v12666_v16 = vmax.f32 %v11399_v0, 0.0 }
 0x1ad   : > { %v12655_v42 = vadd.f32 %v1639_v63, %v12547_v53  ;;  %v2509_v27 = vpop.f32.mrf.mxu0  ;;  %v12662_v63 = vmax.f32 %v3337_v62, 0.0  ;;  %v1479_v17 = vor.u32 %v1477_v18, %v1475_v6 }
 0x1ae   : > { %v2229_v28 = vpop.f32.mrf.mxu3 }
 0x1af   : > { %16284 = vst [vmem:[#allocation39_spill] sm:$0xff] %v12655_v42  ;;  %v2343_v43 = vadd.f32 %v2229_v28, %v12229_v1  ;;  %10108 = vmatmul.msk.bf16.gmra.mxu1 %vm479_vm1, %v2930_v15  ;;  %v12664_v42 = vmax.f32 %v11398_v44, 0.0  ;;  %v1862_v1 = vmax.f32 %v11258_v14, 0.0  ;;  %v12670_v28 = vor.u32 %v2024_v4, %v2021_v12 }
 0x1b0   : > { %v3434_v21 = vpack.c.bf16 %v12662_v63, %v3385_v22  ;;  %v1484_v62 = vsel %vm1288_vm3, %v1479_v17, %v1483_v9 }
 0x1b1   : > { %v2621_v53 = vadd.f32 %v2507_v20, %v2343_v43  ;;  %v2935_v20 = vshll.u32 %v12660_v38, 16  ;;  %v1897_v58 = vpack.c.bf16 %v1862_v1, %v2788_v19  ;;  %v2026_v44 = vsel %vm685_vm2, %v12632_v54, %v12670_v28 }
 0x1b2   : > { %v11355_v43 = vunpack.c.h.bf16 %v11647_v48  ;;  %v3462_v12 = vshrl.u32 %v3434_v21, 16  ;;  %v3465_v4 = vshll.u32 %v3434_v21, 16  ;;  %v1070_v19 = vadd.f32 %v12264_v59, %v12056_v55 }
 0x1b3   : > { %v12668_v40 = vadd.f32 %v3129_v36, %v2621_v53  ;;  %v3435_v36 = vpack.c.bf16 %v12666_v16, %v12664_v42  ;;  %v2937_v0 = vrot.slane %v2935_v20, 1  ;;  %v2028_v54 = vshrl.u32 %v1897_v58, 16 }
 0x1b4   : > { %v1641_v50 = vpop.f32.mrf.mxu2  ;;  %v3131_v15 = vpop.f32.mrf.mxu1  ;;  %v2790_v9 = vmax.f32 %v11355_v43, 0.0  ;;  %v3464_v20 = vrot.slane %v3462_v12, 3  ;;  %v3467_v21 = vrot.slane %v3465_v4, 4 }
 0x1b5   : > { %v12675_v33 = vadd.f32 %v1641_v50, %v12569_v31  ;;  %v2512_v6 = vpop.f32.mrf.mxu0  ;;  %v2933_v31 = vor.u32 %v2931_v37, %v2929_v60  ;;  %v3470_v53 = vshrl.u32 %v3435_v36, 16  ;;  %v11683_v60 = vld [vmem:[%s11856_s12 + $0x28] sm:$0xff]  }
 0x1b6   : > { %v2231_v57 = vpop.f32.mrf.mxu3 }
 0x1b7   : > { %v2344_v18 = vadd.f32 %v2231_v57, %v12245_v26  ;;  %v3473_v26 = vshll.u32 %v3435_v36, 16  ;;  %v11648_v57 = vld [vmem:[%s11856_s12 + $0x80] sm:$0xff]   ;;  %v3472_v55 = vrot.slane %v3470_v53, 3  ;;  %v11403_v36 = vunpack.c.h.bf16 %v11683_v60 }
 0x1b8   : > { %10084 = vmatmul.msk.bf16.gmra.mxu0 %vm479_vm1, %v12628_v10  ;;  %v2031_v10 = vshll.u32 %v1897_v58, 16  ;;  %v2030_v58 = vrot.slane %v2028_v54, 3  ;;  %v1072_v53 = vadd.f32 %v12281_v52, %v12069_v11 }
 0x1b9   : > { %v2622_v14 = vadd.f32 %v2509_v27, %v2344_v18  ;;  %10046 = vmatmul.msk.bf16.gmra.mxu2 %vm479_vm1, %v1484_v62  ;;  %v2938_v27 = vsel %vm1288_vm3, %v2933_v31, %v2937_v0  ;;  %v3475_v59 = vrot.slane %v3473_v26, 4  ;;  %v11262_v31 = vunpack.c.l.bf16 %v11648_v57 }
 0x1ba   : > { %v12706_v4 = vmax.f32 %v11403_v36, 0.0  ;;  %v11359_v36 = vunpack.c.h.bf16 %v11648_v57 }
 0x1bb   : > { %v12690_v22 = vadd.f32 %v3131_v15, %v2622_v14  ;;  %10059 = vmatmul.msk.bf16.gmra.mxu3 %vm479_vm1, %v2026_v44  ;;  %v11402_v15 = vunpack.c.l.bf16 %v11683_v60  ;;  %v2033_v44 = vrot.slane %v2031_v10, 4  ;;  %v12700_v14 = vpack.c.bf16 %v2790_v9, %v1862_v1 }
 0x1bc   : > { %v1644_v17 = vpop.f32.mrf.mxu2  ;;  %v3134_v48 = vpop.f32.mrf.mxu1  ;;  %v2939_v1 = vshrl.u32 %v12660_v38, 16  ;;  %v1864_v60 = vmax.f32 %v11262_v31, 0.0  ;;  %v2792_v57 = vmax.f32 %v11359_v36, 0.0 }
 0x1bd   : > { %v12695_v50 = vadd.f32 %v1644_v17, %v1070_v19  ;;  %v2514_v37 = vpop.f32.mrf.mxu0  ;;  %v3468_v19 = vor.u32 %v3467_v21, %v3464_v20  ;;  %v12702_v17 = vor.u32 %v3475_v59, %v3472_v55  ;;  %v12704_v12 = vmax.f32 %v11402_v15, 0.0 }
 0x1be   : > { %v2234_v62 = vpop.f32.mrf.mxu3  ;;  %v2941_v55 = vor.u32 %v2939_v1, %v2937_v0  ;;  %v1898_v15 = vpack.c.bf16 %v1864_v60, %v2790_v9 }
 0x1bf   : > { %v2345_v18 = vadd.f32 %v2234_v62, %v12259_v47  ;;  %10109 = vmatmul.msk.bf16.gmra.mxu1 %vm479_vm1, %v2938_v27  ;;  %v12712_v47 = vor.u32 %v2033_v44, %v2030_v58  ;;  %v3477_v62 = vsel %vm685_vm2, %v3468_v19, %v12702_v17  ;;  %v3436_v11 = vpack.c.bf16 %v12706_v4, %v12704_v12 }
 0x1c0   : > { %v2037_v9 = vshrl.u32 %v1898_v15, 16  ;;  %v2040_v19 = vshll.u32 %v1898_v15, 16 }
 0x1c1   : > { %v2623_v43 = vadd.f32 %v2512_v6, %v2345_v18  ;;  %v2943_v6 = vshll.u32 %v12700_v14, 16  ;;  %v3479_v58 = vshrl.u32 %v3436_v11, 16  ;;  %v3482_v44 = vshll.u32 %v3436_v11, 16 }
 0x1c2   : > { %v2039_v11 = vrot.slane %v2037_v9, 3 }
 0x1c3   : > { %v12710_v26 = vadd.f32 %v3134_v48, %v2623_v43  ;;  %v2035_v48 = vsel %vm685_vm2, %v12670_v28, %v12712_v47  ;;  %v2945_v59 = vrot.slane %v2943_v6, 1  ;;  %v11684_v28 = vld [vmem:[%s11856_s12 + $0x30] sm:$0xff]   ;;  %v3481_v6 = vrot.slane %v3479_v58, 3 }
 0x1c4   : > { %v1646_v54 = vpop.f32.mrf.mxu2  ;;  %v3136_v10 = vpop.f32.mrf.mxu1  ;;  %v1077_v58 = vadd.f32 %v12317_v29, %v12102_v7 }
 0x1c5   : > { %v12716_v27 = vadd.f32 %v1646_v54, %v1072_v53  ;;  %v2517_v20 = vpop.f32.mrf.mxu0  ;;  %v2946_v0 = vsel %vm1288_vm3, %v2941_v55, %v2945_v59 }
 0x1c6   : > { %v2236_v21 = vpop.f32.mrf.mxu3 }
 0x1c7   : > { %v2346_v52 = vadd.f32 %v2236_v21, %v12277_v39  ;;  %v1075_v39 = vadd.f32 %v12298_v51, %v12086_v25  ;;  %v3484_v21 = vrot.slane %v3482_v44, 4  ;;  %v11406_v25 = vunpack.c.l.bf16 %v11684_v28 }
 0x1c8   : > { %10085 = vmatmul.msk.bf16.gmra.mxu0 %vm479_vm1, %v12660_v38  ;;  %v11407_v51 = vunpack.c.h.bf16 %v11684_v28 }
 0x1c9   : > { %v2624_v18 = vadd.f32 %v2514_v37, %v2346_v52  ;;  %10123 = vmatmul.msk.bf16.vlgmr.msra.gmra.mxu2 %vm479_vm1, %v3477_v62  ;;  %v11649_v37 = vld [vmem:[%s11856_s12 + $0x88] sm:$0xff]   ;;  %v2042_v52 = vrot.slane %v2040_v19, 4  ;;  %v12743_v15 = vor.u32 %v3484_v21, %v3481_v6  ;;  %v12745_v36 = vmax.f32 %v11406_v25, 0.0 }
 0x1ca   : > { %v11266_v62 = vunpack.c.l.bf16 %v11649_v37 }
 0x1cb   : > { %v12731_v31 = vadd.f32 %v3136_v10, %v2624_v18  ;;  %10060 = vmatmul.msk.bf16.gmra.mxu3 %vm479_vm1, %v2035_v48  ;;  %v12741_v48 = vpack.c.bf16 %v2792_v57, %v1864_v60  ;;  %v12747_v18 = vmax.f32 %v11407_v51, 0.0  ;;  %v11363_v51 = vunpack.c.h.bf16 %v11649_v37 }
 0x1cc   : > { %v1649_v43 = vpop.f32.mrf.mxu2  ;;  %v3139_v38 = vpop.f32.mrf.mxu1 }
 0x1cd   : > { %v12737_v53 = vadd.f32 %v1649_v43, %v1075_v39  ;;  %v2519_v54 = vpop.f32.mrf.mxu0  ;;  %16285 = vst [vmem:[#allocation40_spill] sm:$0xff] %v12747_v18  ;;  %v2043_v43 = vor.u32 %v2042_v52, %v2039_v11  ;;  %v2951_v60 = vshll.u32 %v12741_v48, 16  ;;  %v3437_v7 = vpack.c.bf16 %v12747_v18, %v12745_v36  ;;  %v11685_v52 = vld [vmem:[%s11856_s12 + $0x38] sm:$0xff]  }
 0x1ce   : > { %v2239_v1 = vpop.f32.mrf.mxu3 }
 0x1cf   : > { %v2347_v10 = vadd.f32 %v2239_v1, %v12294_v45  ;;  %10110 = vmatmul.msk.bf16.gmra.mxu1 %vm479_vm1, %v2946_v0  ;;  %v1866_v45 = vmax.f32 %v11266_v62, 0.0  ;;  %v2947_v0 = vshrl.u32 %v12700_v14, 16  ;;  %v3486_v1 = vsel %vm685_vm2, %v12702_v17, %v12743_v15 }
 0x1d0   : > { %v2044_v6 = vsel %vm685_vm2, %v12712_v47, %v2043_v43  ;;  %v2953_v25 = vrot.slane %v2951_v60, 1  ;;  %v3488_v17 = vshrl.u32 %v3437_v7, 16  ;;  %v3491_v62 = vshll.u32 %v3437_v7, 16 }
 0x1d1   : > { %v2625_v55 = vadd.f32 %v2517_v20, %v2347_v10  ;;  %v2949_v21 = vor.u32 %v2947_v0, %v2945_v59 }
 0x1d2   : > { %v3490_v60 = vrot.slane %v3488_v17, 3  ;;  %v1082_v17 = vadd.f32 %v12353_v34, %v12135_v32 }
 0x1d3   : > { %v12751_v44 = vadd.f32 %v3139_v38, %v2625_v55  ;;  %v1899_v38 = vpack.c.bf16 %v1866_v45, %v2792_v57  ;;  %v2954_v37 = vsel %vm1288_vm3, %v2949_v21, %v2953_v25 }
 0x1d4   : > { %v1651_v39 = vpop.f32.mrf.mxu2  ;;  %v3141_v28 = vpop.f32.mrf.mxu1 }
 0x1d5   : > { %v12755_v20 = vadd.f32 %v1651_v39, %v1077_v58  ;;  %v2522_v9 = vpop.f32.mrf.mxu0  ;;  %v2046_v47 = vshrl.u32 %v1899_v38, 16  ;;  %v2049_v57 = vshll.u32 %v1899_v38, 16  ;;  %v11650_v39 = vld [vmem:[%s11856_s12 + $0x90] sm:$0xff]  }
 0x1d6   : > { %v2241_v19 = vpop.f32.mrf.mxu3  ;;  %v11270_v38 = vunpack.c.l.bf16 %v11650_v39 }
 0x1d7   : > { %v2348_v29 = vadd.f32 %v2241_v19, %v12313_v23  ;;  %v1080_v23 = vadd.f32 %v12334_v35, %v12119_v5  ;;  %v3493_v19 = vrot.slane %v3491_v62, 4  ;;  %v11410_v5 = vunpack.c.l.bf16 %v11685_v52 }
 0x1d8   : > { %10086 = vmatmul.msk.bf16.gmra.mxu0 %vm479_vm1, %v12700_v14  ;;  %v11411_v35 = vunpack.c.h.bf16 %v11685_v52  ;;  %v2051_v7 = vrot.slane %v2049_v57, 4 }
 0x1d9   : > { %v2626_v10 = vadd.f32 %v2519_v54, %v2348_v29  ;;  %10124 = vmatmul.msk.bf16.gmra.mxu2 %vm479_vm1, %v3486_v1  ;;  %v2794_v54 = vmax.f32 %v11363_v51, 0.0  ;;  %v2048_v1 = vrot.slane %v2046_v47, 3  ;;  %v12782_v21 = vor.u32 %v3493_v19, %v3490_v60 }
 0x1da   : > { %v12784_v51 = vmax.f32 %v11410_v5, 0.0 }
 0x1db   : > { %v12770_v11 = vadd.f32 %v3141_v28, %v2626_v10  ;;  %10061 = vmatmul.msk.bf16.gmra.mxu3 %vm479_vm1, %v2044_v6  ;;  %v12780_v29 = vpack.c.bf16 %v2794_v54, %v1866_v45  ;;  %v12786_v10 = vmax.f32 %v11411_v35, 0.0  ;;  %v2955_v45 = vshrl.u32 %v12741_v48, 16 }
 0x1dc   : > { %v1654_v14 = vpop.f32.mrf.mxu2  ;;  %v3144_v59 = vpop.f32.mrf.mxu1  ;;  %16286 = vst [vmem:[#allocation41_spill] sm:$0xff] %v12784_v51  ;;  %v11367_v35 = vunpack.c.h.bf16 %v11650_v39 }
 0x1dd   : > { %v12775_v55 = vadd.f32 %v1654_v14, %v1080_v23  ;;  %v2524_v58 = vpop.f32.mrf.mxu0  ;;  %16287 = vst [vmem:[#allocation42_spill] sm:$0xff] %v12786_v10  ;;  %v2959_v57 = vshll.u32 %v12780_v29, 16  ;;  %v3438_v32 = vpack.c.bf16 %v12786_v10, %v12784_v51  ;;  %v2957_v60 = vor.u32 %v2955_v45, %v2953_v25 }
 0x1de   : > { %v2244_v0 = vpop.f32.mrf.mxu3  ;;  %v2796_v39 = vmax.f32 %v11367_v35, 0.0 }
 0x1df   : > { %v2349_v28 = vadd.f32 %v2244_v0, %v12329_v3  ;;  %10111 = vmatmul.msk.bf16.gmra.mxu1 %vm479_vm1, %v2954_v37  ;;  %v12792_v3 = vor.u32 %v2051_v7, %v2048_v1  ;;  %v3495_v0 = vsel %vm685_vm2, %v12743_v15, %v12782_v21  ;;  %v2961_v19 = vrot.slane %v2959_v57, 1 }
 0x1e0   : > { %v3497_v15 = vshrl.u32 %v3438_v32, 16  ;;  %v3500_v1 = vshll.u32 %v3438_v32, 16  ;;  %v1085_v7 = vadd.f32 %v12370_v2, %v12061_v61 }
 0x1e1   : > { %v2627_v6 = vadd.f32 %v2522_v9, %v2349_v28  ;;  %v1868_v9 = vmax.f32 %v11270_v38, 0.0  ;;  %v2962_v25 = vsel %vm1288_vm3, %v2957_v60, %v2961_v19 }
 0x1e2   : > { %v3499_v57 = vrot.slane %v3497_v15, 3  ;;  %v16291_v15 = vld [vmem:[#allocation4_spill] sm:$0xff] }
 0x1e3   : > { %v12790_v62 = vadd.f32 %v3144_v59, %v2627_v6  ;;  %v2053_v59 = vsel %vm685_vm2, %v2043_v43, %v12792_v3  ;;  %v1900_v5 = vpack.c.bf16 %v1868_v9, %v2794_v54  ;;  %v11686_v43 = vld [vmem:[%s11856_s12 + $0x40] sm:$0xff]   ;;  %v12821_v60 = vpack.c.bf16 %v2796_v39, %v1868_v9 }
 0x1e4   : > { %v1656_v23 = vpop.f32.mrf.mxu2  ;;  %v3146_v47 = vpop.f32.mrf.mxu1  ;;  %v11414_v61 = vunpack.c.l.bf16 %v11686_v43  ;;  %v11415_v2 = vunpack.c.h.bf16 %v11686_v43 }
 0x1e5   : > { %v12796_v52 = vadd.f32 %v1656_v23, %v1082_v17  ;;  %v2527_v14 = vpop.f32.mrf.mxu0  ;;  %v2055_v54 = vshrl.u32 %v1900_v5, 16  ;;  %v2058_v6 = vshll.u32 %v1900_v5, 16  ;;  %v2967_v9 = vshll.u32 %v12821_v60, 16 }
 0x1e6   : > { %v2246_v37 = vpop.f32.mrf.mxu3 }
 0x1e7   : > { %v2350_v34 = vadd.f32 %v2246_v37, %v12349_v56  ;;  %v3502_v37 = vrot.slane %v3500_v1, 4  ;;  %v16292_v1 = vld [vmem:[#allocation17_spill] sm:$0xff] }
 0x1e8   : > { %10087 = vmatmul.msk.bf16.gmra.mxu0 %vm479_vm1, %v12741_v48 }
 0x1e9   : > { %v2628_v28 = vadd.f32 %v2524_v58, %v2350_v34  ;;  %10125 = vmatmul.msk.bf16.gmra.mxu2 %vm479_vm1, %v3495_v0  ;;  %v11651_v58 = vld [vmem:[%s11856_s12 + $0x98] sm:$0xff]   ;;  %v2057_v34 = vrot.slane %v2055_v54, 3  ;;  %v12823_v35 = vor.u32 %v3502_v37, %v3499_v57  ;;  %v2963_v54 = vshrl.u32 %v12780_v29, 16 }
 0x1ea   : > { %v11274_v32 = vunpack.c.l.bf16 %v11651_v58 }
 0x1eb   : > { %v12811_v56 = vadd.f32 %v3146_v47, %v2628_v28  ;;  %10062 = vmatmul.msk.bf16.gmra.mxu3 %vm479_vm1, %v2053_v59  ;;  %v16288_v47 = vld [vmem:[#allocation15_spill] sm:$0xff]  ;;  %v2060_v59 = vrot.slane %v2058_v6, 4  ;;  %v12825_v28 = vmax.f32 %v11414_v61, 0.0  ;;  %v3504_v37 = vsel %vm685_vm2, %v12782_v21, %v12823_v35  ;;  %v16294_v61 = vld [vmem:[#allocation16_spill] sm:$0xff] }
 0x1ec   : > { %v1659_v38 = vpop.f32.mrf.mxu2  ;;  %v3149_v48 = vpop.f32.mrf.mxu1 }
 0x1ed   : > { %v12817_v17 = vadd.f32 %v1659_v38, %v1085_v7  ;;  %v2529_v23 = vpop.f32.mrf.mxu0  ;;  %16289 = vst [vmem:[#allocation15_spill] sm:$0xff] %v12825_v28  ;;  %v12827_v7 = vmax.f32 %v11415_v2, 0.0  ;;  %v1087_v38 = vadd.f32 %v16292_v1, %v16291_v15  ;;  %v2061_v10 = vor.u32 %v2060_v59, %v2057_v34 }
 0x1ee   : > { %v2249_v45 = vpop.f32.mrf.mxu3  ;;  %v2965_v34 = vor.u32 %v2963_v54, %v2961_v19  ;;  %v2969_v59 = vrot.slane %v2967_v9, 1 }
 0x1ef   : > { %v2351_v0 = vadd.f32 %v2249_v45, %v16288_v47  ;;  %10112 = vmatmul.msk.bf16.gmra.mxu1 %vm479_vm1, %v2962_v25  ;;  %16290 = vst [vmem:[#allocation43_spill] sm:$0xff] %v12827_v7  ;;  %v1870_v45 = vmax.f32 %v11274_v32, 0.0  ;;  %v2062_v32 = vsel %vm685_vm2, %v12792_v3, %v2061_v10 }
 0x1f1   : > { %v2629_v5 = vadd.f32 %v2527_v14, %v2351_v0  ;;  %v1901_v0 = vpack.c.bf16 %v1870_v45, %v2796_v39 }
 0x1f3   : > { %v12831_v43 = vadd.f32 %v3149_v48, %v2629_v5  ;;  %v3439_v48 = vpack.c.bf16 %v12827_v7, %v12825_v28  ;;  %v11371_v5 = vunpack.c.h.bf16 %v11651_v58  ;;  %v2064_v3 = vshrl.u32 %v1901_v0, 16  ;;  %v11687_v7 = vld [vmem:[%s11856_s12 + $0x48] sm:$0xff]  }
 0x1f4   : > { %v1661_v47 = vpop.f32.mrf.mxu2  ;;  %v3151_v25 = vpop.f32.mrf.mxu1  ;;  %v2067_v39 = vshll.u32 %v1901_v0, 16  ;;  %v2970_v58 = vsel %vm1288_vm3, %v2965_v34, %v2969_v59 }
 0x1f5   : > { %v12835_v14 = vadd.f32 %v1661_v47, %v1087_v38  ;;  %v2532_v6 = vpop.f32.mrf.mxu0  ;;  %v3506_v21 = vshrl.u32 %v3439_v48, 16  ;;  %v3509_v1 = vshll.u32 %v3439_v48, 16  ;;  %v16295_v38 = vld [vmem:[#allocation5_spill] sm:$0xff]  ;;  %v16296_v47 = vld [vmem:[#allocation19_spill] sm:$0xff]  ;;  %v2066_v0 = vrot.slane %v2064_v3, 3 }
 0x1f6   : > { %v2251_v57 = vpop.f32.mrf.mxu3 }
 0x1f7   : > { %16293 = vst [vmem:[#allocation4_spill] sm:$0xff] %v12835_v14  ;;  %v2352_v2 = vadd.f32 %v2251_v57, %v16294_v61  ;;  %v1090_v57 = vadd.f32 %v16296_v47, %v16295_v38  ;;  %v3511_v28 = vrot.slane %v3509_v1, 4  ;;  %v11418_v38 = vunpack.c.l.bf16 %v11687_v7  ;;  %v16302_v1 = vld [vmem:[#allocation21_spill] sm:$0xff] }
 0x1f8   : > { %10088 = vmatmul.msk.bf16.gmra.mxu0 %vm479_vm1, %v12780_v29 }
 0x1f9   : > { %v2630_v15 = vadd.f32 %v2529_v23, %v2352_v2  ;;  %10126 = vmatmul.msk.bf16.gmra.mxu2 %vm479_vm1, %v3504_v37  ;;  %v2798_v23 = vmax.f32 %v11371_v5, 0.0  ;;  %v11652_v37 = vld [vmem:[%s11856_s12 + $0xa0] sm:$0xff]   ;;  %v3508_v2 = vrot.slane %v3506_v21, 3  ;;  %v16301_v21 = vld [vmem:[#allocation6_spill] sm:$0xff] }
 0x1fa   : > { %v11278_v18 = vunpack.c.l.bf16 %v11652_v37 }
 0x1fb   : > { %v12850_v61 = vadd.f32 %v3151_v25, %v2630_v15  ;;  %10063 = vmatmul.msk.bf16.gmra.mxu3 %vm479_vm1, %v2062_v32  ;;  %v11419_v25 = vunpack.c.h.bf16 %v11687_v7  ;;  %v16298_v15 = vld [vmem:[#allocation18_spill] sm:$0xff]  ;;  %v2069_v32 = vrot.slane %v2067_v39, 4  ;;  %v12860_v51 = vpack.c.bf16 %v2798_v23, %v1870_v45 }
 0x1fc   : > { %v1664_v29 = vpop.f32.mrf.mxu2  ;;  %v3154_v19 = vpop.f32.mrf.mxu1  ;;  %v12862_v5 = vor.u32 %v3511_v28, %v3508_v2  ;;  %v2971_v45 = vshrl.u32 %v12821_v60, 16 }
 0x1fd   : > { %v12855_v54 = vadd.f32 %v1664_v29, %v1090_v57  ;;  %v2534_v9 = vpop.f32.mrf.mxu0  ;;  %v12864_v57 = vmax.f32 %v11418_v38, 0.0  ;;  %v12866_v29 = vmax.f32 %v11419_v25, 0.0  ;;  %v2975_v39 = vshll.u32 %v12860_v51, 16 }
 0x1fe   : > { %v2254_v48 = vpop.f32.mrf.mxu3  ;;  %v3513_v25 = vsel %vm685_vm2, %v12823_v35, %v12862_v5 }
 0x1ff   : > { %16297 = vst [vmem:[#allocation17_spill] sm:$0xff] %v12855_v54  ;;  %v2353_v47 = vadd.f32 %v2254_v48, %v16298_v15  ;;  %10113 = vmatmul.msk.bf16.gmra.mxu1 %vm479_vm1, %v2970_v58  ;;  %v1092_v54 = vadd.f32 %v16302_v1, %v16301_v21  ;;  %v12872_v48 = vor.u32 %v2069_v32, %v2066_v0  ;;  %v16305_v15 = vld [vmem:[#allocation20_spill] sm:$0xff] }
 0x200   : > { %16299 = vst [vmem:[#allocation16_spill] sm:$0xff] %v12864_v57 }
 0x201   : > { %v2631_v34 = vadd.f32 %v2532_v6, %v2353_v47  ;;  %16300 = vst [vmem:[#allocation5_spill] sm:$0xff] %v12866_v29  ;;  %v1872_v6 = vmax.f32 %v11278_v18, 0.0  ;;  %v2071_v0 = vsel %vm685_vm2, %v2061_v10, %v12872_v48  ;;  %v2973_v18 = vor.u32 %v2971_v45, %v2969_v59  ;;  %v11688_v10 = vld [vmem:[%s11856_s12 + $0x50] sm:$0xff]  }
 0x203   : > { %v12870_v7 = vadd.f32 %v3154_v19, %v2631_v34  ;;  %v3440_v19 = vpack.c.bf16 %v12866_v29, %v12864_v57  ;;  %v1902_v32 = vpack.c.bf16 %v1872_v6, %v2798_v23  ;;  %v11375_v34 = vunpack.c.h.bf16 %v11652_v37  ;;  %v16307_v29 = vld [vmem:[#allocation23_spill] sm:$0xff] }
 0x204   : > { %v1666_v58 = vpop.f32.mrf.mxu2  ;;  %v3156_v3 = vpop.f32.mrf.mxu1 }
 0x205   : > { %16303 = vst [vmem:[#allocation19_spill] sm:$0xff] %v12870_v7  ;;  %v12876_v28 = vadd.f32 %v1666_v58, %v1092_v54  ;;  %v2537_v2 = vpop.f32.mrf.mxu0  ;;  %v2977_v54 = vrot.slane %v2975_v39, 1  ;;  %v3515_v35 = vshrl.u32 %v3440_v19, 16  ;;  %v3518_v1 = vshll.u32 %v3440_v19, 16  ;;  %v16306_v58 = vld [vmem:[#allocation7_spill] sm:$0xff] }
 0x206   : > { %v2256_v38 = vpop.f32.mrf.mxu3  ;;  %v1095_v57 = vadd.f32 %v16307_v29, %v16306_v58  ;;  %v2073_v23 = vshrl.u32 %v1902_v32, 16  ;;  %v2076_v45 = vshll.u32 %v1902_v32, 16  ;;  %v2800_v37 = vmax.f32 %v11375_v34, 0.0 }
 0x207   : > { %16304 = vst [vmem:[#allocation18_spill] sm:$0xff] %v12876_v28  ;;  %v2354_v47 = vadd.f32 %v2256_v38, %v16305_v15  ;;  %v2978_v59 = vsel %vm1288_vm3, %v2973_v18, %v2977_v54  ;;  %v3520_v28 = vrot.slane %v3518_v1, 4  ;;  %v11422_v29 = vunpack.c.l.bf16 %v11688_v10  ;;  %v16314_v1 = vld [vmem:[#allocation25_spill] sm:$0xff] }
 0x208   : > { %10089 = vmatmul.msk.bf16.gmra.mxu0 %vm479_vm1, %v12821_v60  ;;  %v2078_v7 = vrot.slane %v2076_v45, 4  ;;  %v12901_v18 = vpack.c.bf16 %v2800_v37, %v1872_v6 }
 0x209   : > { %v2632_v21 = vadd.f32 %v2534_v9, %v2354_v47  ;;  %10127 = vmatmul.msk.bf16.gmra.mxu2 %vm479_vm1, %v3513_v25  ;;  %v11653_v9 = vld [vmem:[%s11856_s12 + $0xa8] sm:$0xff]   ;;  %v3517_v47 = vrot.slane %v3515_v35, 3  ;;  %v16313_v35 = vld [vmem:[#allocation8_spill] sm:$0xff] }
 0x20a   : > { %v2983_v6 = vshll.u32 %v12901_v18, 16 }
 0x20b   : > { %v12891_v38 = vadd.f32 %v3156_v3, %v2632_v21  ;;  %10064 = vmatmul.msk.bf16.gmra.mxu3 %vm479_vm1, %v2071_v0  ;;  %v11423_v3 = vunpack.c.h.bf16 %v11688_v10  ;;  %v16310_v21 = vld [vmem:[#allocation22_spill] sm:$0xff]  ;;  %v11282_v0 = vunpack.c.l.bf16 %v11653_v9  ;;  %v12903_v34 = vor.u32 %v3520_v28, %v3517_v47 }
 0x20c   : > { %v1669_v15 = vpop.f32.mrf.mxu2  ;;  %v3159_v60 = vpop.f32.mrf.mxu1 }
 0x20d   : > { %16308 = vst [vmem:[#allocation6_spill] sm:$0xff] %v12891_v38  ;;  %v12897_v39 = vadd.f32 %v1669_v15, %v1095_v57  ;;  %v2539_v25 = vpop.f32.mrf.mxu0  ;;  %v2075_v38 = vrot.slane %v2073_v23, 3  ;;  %v12905_v57 = vmax.f32 %v11422_v29, 0.0  ;;  %v12907_v15 = vmax.f32 %v11423_v3, 0.0  ;;  %v16317_v29 = vld [vmem:[#allocation24_spill] sm:$0xff] }
 0x20e   : > { %v2259_v19 = vpop.f32.mrf.mxu3  ;;  %v2979_v23 = vshrl.u32 %v12860_v51, 16  ;;  %v3522_v47 = vsel %vm685_vm2, %v12862_v5, %v12903_v34 }
 0x20f   : > { %16309 = vst [vmem:[#allocation21_spill] sm:$0xff] %v12897_v39  ;;  %v2355_v58 = vadd.f32 %v2259_v19, %v16310_v21  ;;  %10114 = vmatmul.msk.bf16.gmra.mxu1 %vm479_vm1, %v2978_v59  ;;  %v1097_v39 = vadd.f32 %v16314_v1, %v16313_v35  ;;  %v1874_v19 = vmax.f32 %v11282_v0, 0.0  ;;  %v2079_v14 = vor.u32 %v2078_v7, %v2075_v38  ;;  %v16318_v1 = vld [vmem:[#allocation9_spill] sm:$0xff] }
 0x210   : > { %16311 = vst [vmem:[#allocation20_spill] sm:$0xff] %v12905_v57  ;;  %v2981_v38 = vor.u32 %v2979_v23, %v2977_v54  ;;  %v11379_v0 = vunpack.c.h.bf16 %v11653_v9 }
 0x211   : > { %v2633_v32 = vadd.f32 %v2537_v2, %v2355_v58  ;;  %16312 = vst [vmem:[#allocation7_spill] sm:$0xff] %v12907_v15  ;;  %v1903_v58 = vpack.c.bf16 %v1874_v19, %v2800_v37  ;;  %v2080_v7 = vsel %vm685_vm2, %v12872_v48, %v2079_v14 }
 0x213   : > { %v12911_v10 = vadd.f32 %v3159_v60, %v2633_v32  ;;  %v3441_v60 = vpack.c.bf16 %v12907_v15, %v12905_v57  ;;  %v2082_v48 = vshrl.u32 %v1903_v58, 16  ;;  %v2085_v37 = vshll.u32 %v1903_v58, 16  ;;  %v11689_v15 = vld [vmem:[%s11856_s12 + $0x58] sm:$0xff]  }
 0x214   : > { %v1671_v21 = vpop.f32.mrf.mxu2  ;;  %v3161_v59 = vpop.f32.mrf.mxu1 }
 0x215   : > { %16315 = vst [vmem:[#allocation23_spill] sm:$0xff] %v12911_v10  ;;  %v12915_v2 = vadd.f32 %v1671_v21, %v1097_v39  ;;  %v2542_v28 = vpop.f32.mrf.mxu0  ;;  %v2985_v39 = vrot.slane %v2983_v6, 1  ;;  %v3524_v5 = vshrl.u32 %v3441_v60, 16  ;;  %v3527_v35 = vshll.u32 %v3441_v60, 16  ;;  %v16319_v21 = vld [vmem:[#allocation27_spill] sm:$0xff] }
 0x216   : > { %v2261_v45 = vpop.f32.mrf.mxu3  ;;  %v2084_v58 = vrot.slane %v2082_v48, 3 }
 0x217   : > { %16316 = vst [vmem:[#allocation22_spill] sm:$0xff] %v12915_v2  ;;  %v2356_v3 = vadd.f32 %v2261_v45, %v16317_v29  ;;  %v1100_v45 = vadd.f32 %v16319_v21, %v16318_v1  ;;  %v2986_v9 = vsel %vm1288_vm3, %v2981_v38, %v2985_v39  ;;  %v3529_v57 = vrot.slane %v3527_v35, 4  ;;  %v16326_v35 = vld [vmem:[#allocation29_spill] sm:$0xff] }
 0x218   : > { %10090 = vmatmul.msk.bf16.gmra.mxu0 %vm479_vm1, %v12860_v51  ;;  %v11426_v1 = vunpack.c.l.bf16 %v11689_v15 }
 0x219   : > { %v2634_v32 = vadd.f32 %v2539_v25, %v2356_v3  ;;  %10128 = vmatmul.msk.bf16.gmra.mxu2 %vm479_vm1, %v3522_v47  ;;  %v2802_v25 = vmax.f32 %v11379_v0, 0.0  ;;  %v11654_v47 = vld [vmem:[%s11856_s12 + $0xb0] sm:$0xff]   ;;  %v3526_v3 = vrot.slane %v3524_v5, 3 }
 0x21a   : > { %v16325_v5 = vld [vmem:[#allocation10_spill] sm:$0xff] }
 0x21b   : > { %v12930_v29 = vadd.f32 %v3161_v59, %v2634_v32  ;;  %10065 = vmatmul.msk.bf16.gmra.mxu3 %vm479_vm1, %v2080_v7  ;;  %v11427_v59 = vunpack.c.h.bf16 %v11689_v15  ;;  %v16322_v32 = vld [vmem:[#allocation26_spill] sm:$0xff]  ;;  %v2087_v7 = vrot.slane %v2085_v37, 4  ;;  %v12940_v2 = vpack.c.bf16 %v2802_v25, %v1874_v19 }
 0x21c   : > { %v1674_v51 = vpop.f32.mrf.mxu2  ;;  %v3164_v54 = vpop.f32.mrf.mxu1  ;;  %v12942_v0 = vor.u32 %v3529_v57, %v3526_v3  ;;  %v2987_v19 = vshrl.u32 %v12901_v18, 16 }
 0x21d   : > { %16320 = vst [vmem:[#allocation8_spill] sm:$0xff] %v12930_v29  ;;  %v12935_v23 = vadd.f32 %v1674_v51, %v1100_v45  ;;  %v2544_v6 = vpop.f32.mrf.mxu0  ;;  %v11286_v29 = vunpack.c.l.bf16 %v11654_v47  ;;  %v12944_v45 = vmax.f32 %v11426_v1, 0.0  ;;  %v12946_v51 = vmax.f32 %v11427_v59, 0.0 }
 0x21e   : > { %v2264_v60 = vpop.f32.mrf.mxu3  ;;  %v2991_v37 = vshll.u32 %v12940_v2, 16  ;;  %v3531_v59 = vsel %vm685_vm2, %v12903_v34, %v12942_v0 }
 0x21f   : > { %16321 = vst [vmem:[#allocation25_spill] sm:$0xff] %v12935_v23  ;;  %v2357_v21 = vadd.f32 %v2264_v60, %v16322_v32  ;;  %10115 = vmatmul.msk.bf16.gmra.mxu1 %vm479_vm1, %v2986_v9  ;;  %v1102_v23 = vadd.f32 %v16326_v35, %v16325_v5  ;;  %v12952_v60 = vor.u32 %v2087_v7, %v2084_v58  ;;  %v16329_v32 = vld [vmem:[#allocation28_spill] sm:$0xff] }
 0x220   : > { %16323 = vst [vmem:[#allocation24_spill] sm:$0xff] %v12944_v45 }
 0x221   : > { %v2635_v38 = vadd.f32 %v2542_v28, %v2357_v21  ;;  %16324 = vst [vmem:[#allocation9_spill] sm:$0xff] %v12946_v51  ;;  %v1876_v28 = vmax.f32 %v11286_v29, 0.0  ;;  %v2089_v58 = vsel %vm685_vm2, %v2079_v14, %v12952_v60  ;;  %v2989_v29 = vor.u32 %v2987_v19, %v2985_v39  ;;  %v11690_v14 = vld [vmem:[%s11856_s12 + $0x60] sm:$0xff]  }
 0x223   : > { %v12950_v15 = vadd.f32 %v3164_v54, %v2635_v38  ;;  %v3442_v54 = vpack.c.bf16 %v12946_v51, %v12944_v45  ;;  %v1904_v7 = vpack.c.bf16 %v1876_v28, %v2802_v25  ;;  %v11383_v38 = vunpack.c.h.bf16 %v11654_v47  ;;  %v16331_v51 = vld [vmem:[#allocation31_spill] sm:$0xff] }
 0x224   : > { %v1676_v9 = vpop.f32.mrf.mxu2  ;;  %v3166_v48 = vpop.f32.mrf.mxu1 }
 0x225   : > { %16327 = vst [vmem:[#allocation27_spill] sm:$0xff] %v12950_v15  ;;  %v12956_v57 = vadd.f32 %v1676_v9, %v1102_v23  ;;  %v2547_v3 = vpop.f32.mrf.mxu0  ;;  %v2993_v23 = vrot.slane %v2991_v37, 1  ;;  %v3533_v34 = vshrl.u32 %v3442_v54, 16  ;;  %v3536_v35 = vshll.u32 %v3442_v54, 16  ;;  %v16330_v9 = vld [vmem:[#allocation11_spill] sm:$0xff] }
 0x226   : > { %v2266_v1 = vpop.f32.mrf.mxu3  ;;  %v1105_v45 = vadd.f32 %v16331_v51, %v16330_v9  ;;  %v2091_v25 = vshrl.u32 %v1904_v7, 16  ;;  %v2094_v19 = vshll.u32 %v1904_v7, 16  ;;  %v2804_v47 = vmax.f32 %v11383_v38, 0.0 }
 0x227   : > { %16328 = vst [vmem:[#allocation26_spill] sm:$0xff] %v12956_v57  ;;  %v2358_v21 = vadd.f32 %v2266_v1, %v16329_v32  ;;  %v2994_v39 = vsel %vm1288_vm3, %v2989_v29, %v2993_v23  ;;  %v3538_v57 = vrot.slane %v3536_v35, 4  ;;  %v11430_v51 = vunpack.c.l.bf16 %v11690_v14  ;;  %v16338_v35 = vld [vmem:[#allocation33_spill] sm:$0xff] }
 0x228   : > { %10091 = vmatmul.msk.bf16.gmra.mxu0 %vm479_vm1, %v12901_v18  ;;  %v2096_v15 = vrot.slane %v2094_v19, 4  ;;  %v12981_v29 = vpack.c.bf16 %v2804_v47, %v1876_v28 }
 0x229   : > { %v2636_v5 = vadd.f32 %v2544_v6, %v2358_v21  ;;  %10129 = vmatmul.msk.bf16.gmra.mxu2 %vm479_vm1, %v3531_v59  ;;  %v11655_v6 = vld [vmem:[%s11856_s12 + $0xb8] sm:$0xff]   ;;  %v3535_v21 = vrot.slane %v3533_v34, 3 }
 0x22a   : > { %v16337_v34 = vld [vmem:[#allocation12_spill] sm:$0xff]  ;;  %v2999_v28 = vshll.u32 %v12981_v29, 16 }
 0x22b   : > { %v12971_v1 = vadd.f32 %v3166_v48, %v2636_v5  ;;  %10066 = vmatmul.msk.bf16.gmra.mxu3 %vm479_vm1, %v2089_v58  ;;  %v11431_v48 = vunpack.c.h.bf16 %v11690_v14  ;;  %v16334_v5 = vld [vmem:[#allocation30_spill] sm:$0xff]  ;;  %v11290_v58 = vunpack.c.l.bf16 %v11655_v6  ;;  %v12983_v38 = vor.u32 %v3538_v57, %v3535_v21 }
 0x22c   : > { %v1679_v32 = vpop.f32.mrf.mxu2  ;;  %v3169_v18 = vpop.f32.mrf.mxu1 }
 0x22d   : > { %16332 = vst [vmem:[#allocation10_spill] sm:$0xff] %v12971_v1  ;;  %v12977_v37 = vadd.f32 %v1679_v32, %v1105_v45  ;;  %v2549_v59 = vpop.f32.mrf.mxu0  ;;  %v2093_v1 = vrot.slane %v2091_v25, 3  ;;  %v12985_v45 = vmax.f32 %v11430_v51, 0.0  ;;  %v12987_v32 = vmax.f32 %v11431_v48, 0.0  ;;  %v16340_v51 = vld [vmem:[#allocation32_spill] sm:$0xff] }
 0x22e   : > { %v2269_v54 = vpop.f32.mrf.mxu3  ;;  %v2995_v25 = vshrl.u32 %v12940_v2, 16  ;;  %v3540_v21 = vsel %vm685_vm2, %v12942_v0, %v12983_v38 }
 0x22f   : > { %16333 = vst [vmem:[#allocation29_spill] sm:$0xff] %v12977_v37  ;;  %v2359_v9 = vadd.f32 %v2269_v54, %v16334_v5  ;;  %10116 = vmatmul.msk.bf16.gmra.mxu1 %vm479_vm1, %v2994_v39  ;;  %v1107_v37 = vadd.f32 %v16338_v35, %v16337_v34  ;;  %v1878_v54 = vmax.f32 %v11290_v58, 0.0  ;;  %v2097_v10 = vor.u32 %v2096_v15, %v2093_v1  ;;  %v16341_v35 = vld [vmem:[#allocation13_spill] sm:$0xff] }
 0x230   : > { %16335 = vst [vmem:[#allocation28_spill] sm:$0xff] %v12985_v45  ;;  %v2997_v1 = vor.u32 %v2995_v25, %v2993_v23  ;;  %v11387_v58 = vunpack.c.h.bf16 %v11655_v6 }
 0x231   : > { %v2637_v7 = vadd.f32 %v2547_v3, %v2359_v9  ;;  %16336 = vst [vmem:[#allocation11_spill] sm:$0xff] %v12987_v32  ;;  %v1905_v9 = vpack.c.bf16 %v1878_v54, %v2804_v47  ;;  %v2098_v15 = vsel %vm685_vm2, %v12952_v60, %v2097_v10 }
 0x232   : > { %v2806_v6 = vmax.f32 %v11387_v58, 0.0 }
 0x233   : > { %v12991_v14 = vadd.f32 %v3169_v18, %v2637_v7  ;;  %v3443_v18 = vpack.c.bf16 %v12987_v32, %v12985_v45  ;;  %v2100_v60 = vshrl.u32 %v1905_v9, 16  ;;  %v2103_v47 = vshll.u32 %v1905_v9, 16  ;;  %v11691_v32 = vld [vmem:[%s11856_s12 + $0x68] sm:$0xff]  }
 0x234   : > { %v1681_v5 = vpop.f32.mrf.mxu2  ;;  %v3171_v39 = vpop.f32.mrf.mxu1 }
 0x235   : > { %v12995_v3 = vadd.f32 %v1681_v5, %v1107_v37  ;;  %v2552_v57 = vpop.f32.mrf.mxu0  ;;  %v3001_v37 = vrot.slane %v2999_v28, 1  ;;  %v3542_v0 = vshrl.u32 %v3443_v18, 16  ;;  %v3545_v34 = vshll.u32 %v3443_v18, 16  ;;  %v16342_v5 = vld [vmem:[#allocation35_spill] sm:$0xff] }
 0x236   : > { %v2271_v19 = vpop.f32.mrf.mxu3  ;;  %v2102_v9 = vrot.slane %v2100_v60, 3 }
 0x237   : > { %16339 = vst [vmem:[#allocation31_spill] sm:$0xff] %v12995_v3  ;;  %v2360_v48 = vadd.f32 %v2271_v19, %v16340_v51  ;;  %v1110_v19 = vadd.f32 %v16342_v5, %v16341_v35  ;;  %v3002_v25 = vsel %vm1288_vm3, %v2997_v1, %v3001_v37  ;;  %v3547_v45 = vrot.slane %v3545_v34, 4  ;;  %v16349_v34 = vld [vmem:[#allocation37_spill] sm:$0xff] }
 0x238   : > { %10092 = vmatmul.msk.bf16.gmra.mxu0 %vm479_vm1, %v12940_v2  ;;  %v11434_v35 = vunpack.c.l.bf16 %v11691_v32 }
 0x239   : > { %v2638_v7 = vadd.f32 %v2549_v59, %v2360_v48  ;;  %10130 = vmatmul.msk.bf16.gmra.mxu2 %vm479_vm1, %v3540_v21  ;;  %v11656_v59 = vld [vmem:[%s11856_s12 + $0xc0] sm:$0xff]   ;;  %v3544_v48 = vrot.slane %v3542_v0, 3  ;;  %v16348_v0 = vld [vmem:[#allocation14_spill] sm:$0xff] }
 0x23a   : > { %v11294_v3 = vunpack.c.l.bf16 %v11656_v59 }
 0x23b   : > { %v13010_v51 = vadd.f32 %v3171_v39, %v2638_v7  ;;  %10067 = vmatmul.msk.bf16.gmra.mxu3 %vm479_vm1, %v2098_v15  ;;  %v11435_v39 = vunpack.c.h.bf16 %v11691_v32  ;;  %v16345_v7 = vld [vmem:[#allocation34_spill] sm:$0xff]  ;;  %v2105_v15 = vrot.slane %v2103_v47, 4  ;;  %v13022_v58 = vor.u32 %v3547_v45, %v3544_v48 }
 0x23c   : > { %v1684_v2 = vpop.f32.mrf.mxu2  ;;  %v3174_v23 = vpop.f32.mrf.mxu1 }
 0x23d   : > { %16343 = vst [vmem:[#allocation30_spill] sm:$0xff] %v13010_v51  ;;  %v13016_v28 = vadd.f32 %v1684_v2, %v1110_v19  ;;  %v2554_v21 = vpop.f32.mrf.mxu0  ;;  %v13020_v51 = vpack.c.bf16 %v2806_v6, %v1878_v54  ;;  %v13024_v19 = vmax.f32 %v11434_v35, 0.0  ;;  %v13026_v2 = vmax.f32 %v11435_v39, 0.0 }
 0x23e   : > { %v2274_v18 = vpop.f32.mrf.mxu3  ;;  %v3003_v54 = vshrl.u32 %v12981_v29, 16  ;;  %v3549_v39 = vsel %vm685_vm2, %v12983_v38, %v13022_v58  ;;  %v11391_v38 = vunpack.c.h.bf16 %v11656_v59 }
 0x23f   : > { %16344 = vst [vmem:[#allocation12_spill] sm:$0xff] %v13016_v28  ;;  %v2361_v5 = vadd.f32 %v2274_v18, %v16345_v7  ;;  %10117 = vmatmul.msk.bf16.gmra.mxu1 %vm479_vm1, %v3002_v25  ;;  %v1112_v28 = vadd.f32 %v16349_v34, %v16348_v0  ;;  %v13032_v18 = vor.u32 %v2105_v15, %v2102_v9  ;;  %v1880_v25 = vmax.f32 %v11294_v3, 0.0  ;;  %v16351_v7 = vld [vmem:[#allocation36_spill] sm:$0xff] }
 0x240   : > { %16346 = vst [vmem:[#allocation33_spill] sm:$0xff] %v13024_v19  ;;  %v3005_v15 = vor.u32 %v3003_v54, %v3001_v37  ;;  %v2808_v54 = vmax.f32 %v11391_v38, 0.0 }
 0x241   : > { %v2639_v1 = vadd.f32 %v2552_v57, %v2361_v5  ;;  %16347 = vst [vmem:[#allocation32_spill] sm:$0xff] %v13026_v2  ;;  %v3007_v57 = vshll.u32 %v13020_v51, 16  ;;  %v2107_v3 = vsel %vm685_vm2, %v2097_v10, %v13032_v18  ;;  %v1906_v9 = vpack.c.bf16 %v1880_v25, %v2806_v6 }
 0x243   : > { %v13030_v32 = vadd.f32 %v3174_v23, %v2639_v1  ;;  %v3444_v23 = vpack.c.bf16 %v13026_v2, %v13024_v19  ;;  %v3009_v1 = vrot.slane %v3007_v57, 1  ;;  %v11692_v2 = vld [vmem:[%s11856_s12 + $0x70] sm:$0xff]  }
 0x244   : > { %v1686_v60 = vpop.f32.mrf.mxu2  ;;  %v3176_v47 = vpop.f32.mrf.mxu1 }
 0x245   : > { %v13036_v45 = vadd.f32 %v1686_v60, %v1112_v28  ;;  %v2557_v48 = vpop.f32.mrf.mxu0  ;;  %v5156_v28 = vld [vmem:[%s16196_s3] sm:$0xf]  ;;  %v3551_v60 = vshrl.u32 %v3444_v23, 16  ;;  %v3554_v10 = vshll.u32 %v3444_v23, 16  ;;  %v3010_v59 = vsel %vm1288_vm3, %v3005_v15, %v3009_v1 }
 0x246   : > { %v2276_v35 = vpop.f32.mrf.mxu3  ;;  %v5734_v0 = vsel %vm5552_vm4, %v5156_v28, 0 }
 0x247   : > { %16350 = vst [vmem:[#allocation13_spill] sm:$0xff] %v13036_v45  ;;  %v2362_v5 = vadd.f32 %v2276_v35, %v16351_v7  ;;  %5743 = vmatpush.bf16.msrb.mxu2 %v5734_v0  ;;  %v2109_v35 = vshrl.u32 %v1906_v9, 16  ;;  %v2112_v7 = vshll.u32 %v1906_v9, 16  ;;  %v3553_v23 = vrot.slane %v3551_v60, 3 }
 0x248   : > { %10093 = vmatmul.msk.bf16.gmra.mxu0 %vm479_vm1, %v12981_v29  ;;  %v3556_v28 = vrot.slane %v3554_v10, 4  ;;  %v11439_v0 = vunpack.c.h.bf16 %v11692_v2  ;;  %v13064_v45 = vpack.c.bf16 %v2808_v54, %v1880_v25 }
 0x249   : > { %v2640_v34 = vadd.f32 %v2554_v21, %v2362_v5  ;;  %10131 = vmatmul.msk.bf16.gmra.mxu2 %vm479_vm1, %v3549_v39  ;;  %v11657_v39 = vld [vmem:[%s11856_s12 + $0xc8] sm:$0xff]   ;;  %v2111_v9 = vrot.slane %v2109_v35, 3  ;;  %v2114_v19 = vrot.slane %v2112_v7, 4 }
 0x24a   : > { %v11298_v15 = vunpack.c.l.bf16 %v11657_v39  ;;  %v3015_v35 = vshll.u32 %v13064_v45, 16 }
 0x24b   : > { %v13053_v6 = vadd.f32 %v3176_v47, %v2640_v34  ;;  %10068 = vmatmul.msk.bf16.gmra.mxu3 %vm479_vm1, %v2107_v3  ;;  %v11438_v47 = vunpack.c.l.bf16 %v11692_v2  ;;  %v16354_v34 = vld [vmem:[#allocation38_spill] sm:$0xff]  ;;  %v2115_v60 = vor.u32 %v2114_v19, %v2111_v9 }
 0x24c   : > { %v3769_v29 = vpop.f32.mrf.mxu2  ;;  %v3179_v37 = vpop.f32.mrf.mxu1  ;;  %v1882_v7 = vmax.f32 %v11298_v15, 0.0  ;;  %v11693_v15 = vld [vmem:[%s11856_s12 + $0x78] sm:$0xff]  }
 0x24d   : > { %16352 = vst [vmem:[#allocation35_spill] sm:$0xff] %v13053_v6  ;;  %v13059_v21 = vadd.f32 %v3769_v29, %v12599_v41  ;;  %v2559_v57 = vpop.f32.mrf.mxu0  ;;  %v3557_v6 = vor.u32 %v3556_v28, %v3553_v23  ;;  %v13066_v41 = vmax.f32 %v11438_v47, 0.0  ;;  %v13068_v29 = vmax.f32 %v11439_v0, 0.0 }
 0x24e   : > { %v2279_v5 = vpop.f32.mrf.mxu3  ;;  %v2116_v28 = vsel %vm685_vm2, %v13032_v18, %v2115_v60  ;;  %v1907_v0 = vpack.c.bf16 %v1882_v7, %v2808_v54 }
 0x24f   : > { %16353 = vst [vmem:[#allocation34_spill] sm:$0xff] %v13059_v21  ;;  %v2363_v3 = vadd.f32 %v2279_v5, %v16354_v34  ;;  %10118 = vmatmul.msk.bf16.gmra.mxu1 %vm479_vm1, %v3010_v59  ;;  %v3011_v5 = vshrl.u32 %v13020_v51, 16  ;;  %v3558_v23 = vsel %vm685_vm2, %v13022_v58, %v3557_v6  ;;  %v3445_v19 = vpack.c.bf16 %v13068_v29, %v13066_v41 }
 0x250   : > { %16355 = vst [vmem:[#allocation14_spill] sm:$0xff] %v13066_v41  ;;  %v11395_v34 = vunpack.c.h.bf16 %v11657_v39 }
 0x251   : > { %v2641_v38 = vadd.f32 %v2557_v48, %v2363_v3  ;;  %16356 = vst [vmem:[#allocation37_spill] sm:$0xff] %v13068_v29  ;;  %v3013_v47 = vor.u32 %v3011_v5, %v3009_v1  ;;  %v3560_v58 = vshrl.u32 %v3445_v19, 16  ;;  %v3563_v9 = vshll.u32 %v3445_v19, 16 }
 0x253   : > { %v13070_v21 = vadd.f32 %v3179_v37, %v2641_v38  ;;  %v3562_v39 = vrot.slane %v3560_v58, 3  ;;  %v3565_v5 = vrot.slane %v3563_v9, 4 }
 0x254   : > { %v3771_v10 = vpop.f32.mrf.mxu2  ;;  %v13072_v2 = vpop.f32.mrf.mxu1 }
 0x255   : > { %v13077_v25 = vadd.f32 %v3771_v10, %v12615_v8  ;;  %v2562_v48 = vpop.f32.mrf.mxu0  ;;  %v3017_v8 = vrot.slane %v3015_v35, 1  ;;  %v2118_v10 = vshrl.u32 %v1907_v0, 16  ;;  %v11442_v35 = vunpack.c.l.bf16 %v11693_v15 }
 0x256   : > { %v2281_v59 = vpop.f32.mrf.mxu3 }
 0x257   : > { %v2364_v37 = vadd.f32 %v2281_v59, %v12604_v30  ;;  %v3018_v18 = vsel %vm1288_vm3, %v3013_v47, %v3017_v8  ;;  %v2121_v59 = vshll.u32 %v1907_v0, 16 }
 0x258   : > { %10094 = vmatmul.msk.bf16.gmra.mxu0 %vm479_vm1, %v13020_v51  ;;  %v2810_v51 = vmax.f32 %v11395_v34, 0.0  ;;  %v13101_v34 = vor.u32 %v3565_v5, %v3562_v39 }
 0x259   : > { %v13088_v3 = vadd.f32 %v2559_v57, %v2364_v37  ;;  %10132 = vmatmul.msk.bf16.gmra.mxu2 %vm479_vm1, %v3558_v23  ;;  %v11443_v23 = vunpack.c.h.bf16 %v11693_v15  ;;  %v2120_v37 = vrot.slane %v2118_v10, 3 }
 0x25a   : > { %v13099_v47 = vpack.c.bf16 %v2810_v51, %v1882_v7 }
 0x25b   : > { %10069 = vmatmul.msk.bf16.gmra.mxu3 %vm479_vm1, %v2116_v28  ;;  %v2123_v28 = vrot.slane %v2121_v59, 4  ;;  %v2713_v59 = vld [vmem:[%s11856_s12 + $0xd0] sm:$0x1] }
 0x25c   : > { %v3774_v30 = vpop.f32.mrf.mxu2  ;;  %v3184_v38 = vpop.f32.mrf.mxu1  ;;  %v3023_v10 = vshll.u32 %v13099_v47, 16 }
 0x25d   : > { %v13095_v1 = vadd.f32 %v3774_v30, %v12630_v24  ;;  %v2564_v54 = vpop.f32.mrf.mxu0  ;;  %v13103_v24 = vmax.f32 %v11442_v35, 0.0  ;;  %v13105_v30 = vmax.f32 %v11443_v23, 0.0  ;;  %v1908_v35 = vpack.c.bf16 %v2810_v51, %v2810_v51 }
 0x25e   : > { %v2284_v57 = vpop.f32.mrf.mxu3 }
 0x25f   : > { %16357 = vst [vmem:[#allocation36_spill] sm:$0xff] %v13095_v1  ;;  %v2365_v19 = vadd.f32 %v2284_v57, %v12620_v13  ;;  %10119 = vmatmul.msk.bf16.gmra.mxu1 %vm479_vm1, %v3018_v18  ;;  %v13111_v13 = vor.u32 %v2123_v28, %v2120_v37  ;;  %v3019_v18 = vshrl.u32 %v13064_v45, 16  ;;  %v3446_v39 = vpack.c.bf16 %v13105_v30, %v13103_v24 }
 0x260   : > { %16358 = vst [vmem:[#allocation38_spill] sm:$0xff] %v13103_v24  ;;  %v2762_v37 = vunpack.c.l.bf16 %v2713_v59  ;;  %v2127_v51 = vshrl.u32 %v1908_v35, 16  ;;  %v13140_v59 = vld [vmem:[%s11856_s12 + $0x28] sm:$0xff]  }
 0x261   : > { %v2643_v0 = vadd.f32 %v2562_v48, %v2365_v19  ;;  %16359 = vst [vmem:[#allocation44_spill] sm:$0xff] %v13105_v30  ;;  %v2125_v23 = vsel %vm685_vm2, %v2115_v60, %v13111_v13  ;;  %v3025_v19 = vrot.slane %v3023_v10, 1  ;;  %v11694_v60 = vld [vmem:[%s11856_s12 + $0x80] sm:$0xff]  }
 0x262   : > { %v11447_v41 = vunpack.c.h.bf16 %v11694_v60 }
 0x263   : > { %v13107_v58 = vadd.f32 %v3184_v38, %v2643_v0  ;;  %v3567_v38 = vsel %vm685_vm2, %v3557_v6, %v13101_v34  ;;  %v3569_v6 = vshrl.u32 %v3446_v39, 16  ;;  %v3572_v0 = vshll.u32 %v3446_v39, 16 }
 0x264   : > { %v3776_v9 = vpop.f32.mrf.mxu2  ;;  %v13109_v15 = vpop.f32.mrf.mxu1 }
 0x265   : > { %16360 = vst [vmem:[#allocation45_spill] sm:$0xff] %v13107_v58  ;;  %v13116_v7 = vadd.f32 %v3776_v9, %v12648_v46  ;;  %v2567_v48 = vpop.f32.mrf.mxu0  ;;  %v3021_v46 = vor.u32 %v3019_v18, %v3017_v8  ;;  %v4215_v9 = vld [vmem:[%s11856_s12 + $0x1c] sm:$0xf]  ;;  %v2811_v8 = vmax.f32 %v2762_v37, 0.0  ;;  %v3574_v29 = vrot.slane %v3572_v0, 4 }
 0x266   : > { %16361 = vst [vmem:[#allocation46_spill] sm:$0xff] %v13109_v15  ;;  %v2286_v57 = vpop.f32.mrf.mxu3  ;;  %v2129_v15 = vrot.slane %v2127_v51, 3  ;;  %v3027_v51 = vshrl.u32 %v13099_v47, 16 }
 0x267   : > { %16362 = vst [vmem:[#allocation47_spill] sm:$0xff] %v13116_v7  ;;  %v2366_v5 = vadd.f32 %v2286_v57, %v12637_v49  ;;  %v11705_v49 = vld [vmem:[%s11856_s12 + $0x20] sm:$0xff]   ;;  %v2130_v57 = vshll.u32 %v1908_v35, 16  ;;  %v16365_v35 = vld [vmem:[#allocation39_spill] sm:$0xff]  ;;  %v2836_v37 = vpack.c.bf16 %v2811_v8, %v2811_v8 }
 0x268   : > { %10095 = vmatmul.msk.bf16.gmra.mxu0 %vm479_vm1, %v13064_v45  ;;  %v3026_v45 = vsel %vm1288_vm3, %v3021_v46, %v3025_v19  ;;  %v11490_v10 = vunpack.c.l.bf16 %v11705_v49 }
 0x269   : > { %v13128_v28 = vadd.f32 %v2564_v54, %v2366_v5  ;;  %10133 = vmatmul.msk.bf16.gmra.mxu2 %vm479_vm1, %v3567_v38  ;;  %v4264_v38 = vunpack.c.l.bf16 %v4215_v9  ;;  %v3571_v5 = vrot.slane %v3569_v6, 3  ;;  %v2132_v46 = vrot.slane %v2130_v57, 4 }
 0x26a   : > { %v4314_v1 = vmax.f32 %v11490_v10, 0.0  ;;  %v13149_v6 = vmax.f32 %v11447_v41, 0.0 }
 0x26b   : > { %16363 = vst [vmem:[#allocation48_spill] sm:$0xff] %v13128_v28  ;;  %10070 = vmatmul.msk.bf16.gmra.mxu3 %vm479_vm1, %v2125_v23  ;;  %v11446_v23 = vunpack.c.l.bf16 %v11694_v60  ;;  %v11491_v28 = vunpack.c.h.bf16 %v11705_v49  ;;  %v13145_v58 = vor.u32 %v3574_v29, %v3571_v5  ;;  %v2133_v60 = vor.u32 %v2132_v46, %v2129_v15 }
 0x26c   : > { %v3779_v30 = vpop.f32.mrf.mxu2  ;;  %v3189_v24 = vpop.f32.mrf.mxu1  ;;  %v3031_v49 = vshll.u32 %v2836_v37, 16 }
 0x26d   : > { %v13137_v54 = vadd.f32 %v3779_v30, %v12668_v40  ;;  %v2569_v18 = vpop.f32.mrf.mxu0  ;;  %v11494_v40 = vunpack.c.l.bf16 %v13140_v59  ;;  %v13147_v9 = vmax.f32 %v11446_v23, 0.0  ;;  %v4315_v57 = vmax.f32 %v11491_v28, 0.0 }
 0x26e   : > { %v2289_v39 = vpop.f32.mrf.mxu3  ;;  %v3576_v41 = vsel %vm685_vm2, %v13101_v34, %v13145_v58  ;;  %v2134_v28 = vsel %vm685_vm2, %v13111_v13, %v2133_v60 }
 0x26f   : > { %16364 = vst [vmem:[#allocation49_spill] sm:$0xff] %v13137_v54  ;;  %v2367_v7 = vadd.f32 %v2289_v39, %v16365_v35  ;;  %10120 = vmatmul.msk.bf16.gmra.mxu1 %vm479_vm1, %v3026_v45  ;;  %v4313_v54 = vmax.f32 %v4264_v38, 0.0  ;;  %v4316_v8 = vmax.f32 %v11494_v40, 0.0  ;;  %v3033_v38 = vrot.slane %v3031_v49, 1 }
 0x271   : > { %v2645_v30 = vadd.f32 %v2567_v48, %v2367_v7  ;;  %v4362_v48 = vpack.c.bf16 %v4314_v1, %v4313_v54  ;;  %v13169_v1 = vpack.c.bf16 %v4316_v8, %v4315_v57  ;;  %v11707_v57 = vld [vmem:[%s11856_s12 + $0x30] sm:$0xff]  }
 0x273   : > { %v13151_v0 = vadd.f32 %v3189_v24, %v2645_v30  ;;  %v3447_v24 = vpack.c.bf16 %v13149_v6, %v13147_v9  ;;  %v4392_v34 = vshll.u32 %v4362_v48, 16  ;;  %v4390_v37 = vshrl.u32 %v4362_v48, 16 }
 0x274   : > { %v3781_v39 = vpop.f32.mrf.mxu2  ;;  %v13153_v45 = vpop.f32.mrf.mxu1 }
 0x275   : > { %v13157_v7 = vadd.f32 %v3781_v39, %v12690_v22  ;;  %v2572_v29 = vpop.f32.mrf.mxu0  ;;  %v3029_v22 = vor.u32 %v3027_v51, %v3025_v19  ;;  %v3578_v5 = vshrl.u32 %v3447_v24, 16  ;;  %v3581_v23 = vshll.u32 %v3447_v24, 16 }
 0x276   : > { %v2291_v10 = vpop.f32.mrf.mxu3  ;;  %v4394_v40 = vrot.slane %v4392_v34, 1 }
 0x277   : > { %v2368_v15 = vadd.f32 %v2291_v10, %v12675_v33  ;;  %v11695_v33 = vld [vmem:[%s11856_s12 + $0x88] sm:$0xff]   ;;  %v3034_v46 = vsel %vm1288_vm3, %v3029_v22, %v3033_v38  ;;  %v3580_v60 = vrot.slane %v3578_v5, 3  ;;  %v3583_v39 = vrot.slane %v3581_v23, 4 }
 0x278   : > { %10096 = vmatmul.msk.bf16.gmra.mxu0 %vm479_vm1, %v13099_v47  ;;  %v4397_v47 = vshll.u32 %v13169_v1, 16  ;;  %v11450_v51 = vunpack.c.l.bf16 %v11695_v33  ;;  %v11451_v49 = vunpack.c.h.bf16 %v11695_v33  ;;  %v4395_v24 = vor.u32 %v4394_v40, %v4390_v37 }
 0x279   : > { %v13171_v54 = vadd.f32 %v2569_v18, %v2368_v15  ;;  %10134 = vmatmul.msk.bf16.gmra.mxu2 %vm479_vm1, %v3576_v41  ;;  %v11495_v15 = vunpack.c.h.bf16 %v13140_v59  ;;  %v3937_v37 = vpack.c.bf16 %v12664_v42, %v12662_v63 }
 0x27a   : > { %v4399_v10 = vrot.slane %v4397_v47, 1  ;;  %v13185_v22 = vmax.f32 %v11450_v51, 0.0  ;;  %v13187_v48 = vmax.f32 %v11451_v49, 0.0 }
 0x27b   : > { %10071 = vmatmul.msk.bf16.gmra.mxu3 %vm479_vm1, %v2134_v28  ;;  %v3584_v28 = vor.u32 %v3583_v39, %v3580_v60  ;;  %v4317_v33 = vmax.f32 %v11495_v15, 0.0 }
 0x27c   : > { %v3784_v35 = vpop.f32.mrf.mxu2  ;;  %v3194_v13 = vpop.f32.mrf.mxu1 }
 0x27d   : > { %v13179_v19 = vadd.f32 %v3784_v35, %v12710_v26  ;;  %v2574_v18 = vpop.f32.mrf.mxu0  ;;  %v11498_v26 = vunpack.c.l.bf16 %v11707_v57 }
 0x27e   : > { %v2294_v30 = vpop.f32.mrf.mxu3 }
 0x27f   : > { %v2369_v8 = vadd.f32 %v2294_v30, %v12695_v50  ;;  %10121 = vmatmul.msk.bf16.gmra.mxu1 %vm479_vm1, %v3034_v46  ;;  %v4318_v59 = vmax.f32 %v11498_v26, 0.0  ;;  %v3585_v46 = vsel %vm685_vm2, %v13145_v58, %v3584_v28  ;;  %v11696_v58 = vld [vmem:[%s11856_s12 + $0x90] sm:$0xff]   ;;  %v11708_v26 = vld [vmem:[%s11856_s12 + $0x38] sm:$0xff]  }
 0x280   : > { %v11455_v15 = vunpack.c.h.bf16 %v11696_v58 }
 0x281   : > { %v2647_v41 = vadd.f32 %v2572_v29, %v2369_v8  ;;  %v4400_v29 = vsel %vm1288_vm3, %v4395_v24, %v4399_v10  ;;  %v4364_v40 = vpack.c.bf16 %v4318_v59, %v4317_v33  ;;  %v11454_v24 = vunpack.c.l.bf16 %v11696_v58 }
 0x283   : > { %v13189_v38 = vadd.f32 %v3194_v13, %v2647_v41  ;;  %v3448_v13 = vpack.c.bf16 %v13187_v48, %v13185_v22  ;;  %v4405_v63 = vshll.u32 %v4364_v40, 16 }
 0x284   : > { %v3786_v34 = vpop.f32.mrf.mxu2  ;;  %v13191_v5 = vpop.f32.mrf.mxu1 }
 0x285   : > { %v13194_v50 = vadd.f32 %v3786_v34, %v12731_v31  ;;  %v2577_v23 = vpop.f32.mrf.mxu0  ;;  %v3587_v30 = vshrl.u32 %v3448_v13, 16  ;;  %v3590_v60 = vshll.u32 %v3448_v13, 16  ;;  %v4407_v59 = vrot.slane %v4405_v63, 1 }
 0x286   : > { %v2296_v35 = vpop.f32.mrf.mxu3  ;;  %v3938_v63 = vpack.c.bf16 %v12704_v12, %v12666_v16 }
 0x287   : > { %v2370_v47 = vadd.f32 %v2296_v35, %v12716_v27  ;;  %v4401_v27 = vshrl.u32 %v13169_v1, 16  ;;  %v3589_v8 = vrot.slane %v3587_v30, 3  ;;  %v3592_v41 = vrot.slane %v3590_v60, 4 }
 0x288   : > { %10173 = vmatmul.msk.bf16.vlgmr.msra.gmra.mxu0 %vm479_vm1, %v4400_v29  ;;  %v11499_v35 = vunpack.c.h.bf16 %v11707_v57  ;;  %v13216_v1 = vmax.f32 %v11454_v24, 0.0 }
 0x289   : > { %v13205_v31 = vadd.f32 %v2574_v18, %v2370_v47  ;;  %10135 = vmatmul.msk.bf16.gmra.mxu2 %vm479_vm1, %v3585_v46  ;;  %v4403_v29 = vor.u32 %v4401_v27, %v4399_v10  ;;  %v11502_v46 = vunpack.c.l.bf16 %v11708_v26  ;;  %v3593_v13 = vor.u32 %v3592_v41, %v3589_v8 }
 0x28a   : > { %v4319_v10 = vmax.f32 %v11499_v35, 0.0 }
 0x28b   : > { %10148 = vmatmul.msk.bf16.vlgmr.msrb.gmra.mxu3 %vm479_vm1, %v3937_v37  ;;  %v4320_v57 = vmax.f32 %v11502_v46, 0.0 }
 0x28c   : > { %v3789_v39 = vpop.f32.mrf.mxu2  ;;  %v3199_v51 = vpop.f32.mrf.mxu1 }
 0x28d   : > { %v13212_v49 = vadd.f32 %v3789_v39, %v12751_v44  ;;  %v2579_v42 = vpop.f32.mrf.mxu0  ;;  %v13218_v44 = vmax.f32 %v11455_v15, 0.0  ;;  %v3594_v39 = vsel %vm685_vm2, %v3584_v28, %v3593_v13  ;;  %v11697_v28 = vld [vmem:[%s11856_s12 + $0x98] sm:$0xff]  }
 0x28e   : > { %v2299_v18 = vpop.f32.mrf.mxu3  ;;  %v11458_v35 = vunpack.c.l.bf16 %v11697_v28  ;;  %v11459_v46 = vunpack.c.h.bf16 %v11697_v28 }
 0x28f   : > { %v2371_v34 = vadd.f32 %v2299_v18, %v12737_v53  ;;  %16366 = vst [vmem:[#allocation39_spill] sm:$0xff] %v13218_v44  ;;  %v4408_v53 = vsel %vm1288_vm3, %v4403_v29, %v4407_v59  ;;  %v3449_v27 = vpack.c.bf16 %v13218_v44, %v13216_v1  ;;  %v4365_v18 = vpack.c.bf16 %v4320_v57, %v4319_v10 }
 0x291   : > { %v2649_v33 = vadd.f32 %v2577_v23, %v2371_v34  ;;  %v3596_v8 = vshrl.u32 %v3449_v27, 16  ;;  %v3599_v41 = vshll.u32 %v3449_v27, 16  ;;  %v4409_v34 = vshrl.u32 %v4364_v40, 16 }
 0x292   : > { %v4413_v12 = vshll.u32 %v4365_v18, 16  ;;  %v13245_v40 = vmax.f32 %v11458_v35, 0.0 }
 0x293   : > { %v13220_v47 = vadd.f32 %v3199_v51, %v2649_v33  ;;  %v3601_v33 = vrot.slane %v3599_v41, 4  ;;  %v4411_v10 = vor.u32 %v4409_v34, %v4407_v59 }
 0x294   : > { %v3791_v37 = vpop.f32.mrf.mxu2  ;;  %v13222_v30 = vpop.f32.mrf.mxu1  ;;  %16367 = vst [vmem:[#allocation50_spill] sm:$0xff] %v13245_v40 }
 0x295   : > { %v13225_v60 = vadd.f32 %v3791_v37, %v12770_v11  ;;  %v2582_v58 = vpop.f32.mrf.mxu0  ;;  %v11709_v37 = vld [vmem:[%s11856_s12 + $0x40] sm:$0xff]  }
 0x296   : > { %v2301_v23 = vpop.f32.mrf.mxu3  ;;  %v11506_v27 = vunpack.c.l.bf16 %v11709_v37 }
 0x297   : > { %v2372_v51 = vadd.f32 %v2301_v23, %v12755_v20  ;;  %v4415_v23 = vrot.slane %v4413_v12, 1 }
 0x298   : > { %10174 = vmatmul.msk.bf16.gmra.mxu0 %vm479_vm1, %v4408_v53 }
 0x299   : > { %v13235_v11 = vadd.f32 %v2579_v42, %v2372_v51  ;;  %10136 = vmatmul.msk.bf16.gmra.mxu2 %vm479_vm1, %v3594_v39  ;;  %v3598_v42 = vrot.slane %v3596_v8, 3  ;;  %v11503_v39 = vunpack.c.h.bf16 %v11708_v26  ;;  %v4322_v26 = vmax.f32 %v11506_v27, 0.0 }
 0x29b   : > { %10149 = vmatmul.msk.bf16.gmra.mxu3 %vm479_vm1, %v3938_v63  ;;  %v3602_v51 = vor.u32 %v3601_v33, %v3598_v42  ;;  %v4321_v59 = vmax.f32 %v11503_v39, 0.0 }
 0x29c   : > { %v3794_v24 = vpop.f32.mrf.mxu2  ;;  %v3204_v15 = vpop.f32.mrf.mxu1 }
 0x29d   : > { %v13241_v20 = vadd.f32 %v3794_v24, %v12790_v62  ;;  %v2584_v16 = vpop.f32.mrf.mxu0  ;;  %v13247_v62 = vmax.f32 %v11459_v46, 0.0  ;;  %v3603_v34 = vsel %vm685_vm2, %v3593_v13, %v3602_v51  ;;  %v4366_v42 = vpack.c.bf16 %v4322_v26, %v4321_v59  ;;  %v11698_v13 = vld [vmem:[%s11856_s12 + $0xa0] sm:$0xff]  }
 0x29e   : > { %v2304_v29 = vpop.f32.mrf.mxu3  ;;  %v11462_v27 = vunpack.c.l.bf16 %v11698_v13 }
 0x29f   : > { %v2373_v53 = vadd.f32 %v2304_v29, %v12775_v55  ;;  %16368 = vst [vmem:[#allocation51_spill] sm:$0xff] %v13247_v62  ;;  %v4416_v55 = vsel %vm1288_vm3, %v4411_v10, %v4415_v23  ;;  %v3450_v12 = vpack.c.bf16 %v13247_v62, %v13245_v40  ;;  %v3939_v29 = vpack.c.bf16 %v12745_v36, %v12706_v4 }
 0x2a0   : > { %v4417_v10 = vshrl.u32 %v4365_v18, 16  ;;  %v4421_v36 = vshll.u32 %v4366_v42, 16  ;;  %v13274_v18 = vmax.f32 %v11462_v27, 0.0 }
 0x2a1   : > { %v2651_v57 = vadd.f32 %v2582_v58, %v2373_v53  ;;  %v3605_v33 = vshrl.u32 %v3450_v12, 16  ;;  %v3608_v35 = vshll.u32 %v3450_v12, 16  ;;  %v11507_v12 = vunpack.c.h.bf16 %v11709_v37 }
 0x2a2   : > { %v4419_v26 = vor.u32 %v4417_v10, %v4415_v23  ;;  %16369 = vst [vmem:[#allocation52_spill] sm:$0xff] %v13274_v18 }
 0x2a3   : > { %v13249_v63 = vadd.f32 %v3204_v15, %v2651_v57  ;;  %v3610_v39 = vrot.slane %v3608_v35, 4  ;;  %v4323_v23 = vmax.f32 %v11507_v12, 0.0  ;;  %v4425_v12 = vshrl.u32 %v4366_v42, 16 }
 0x2a4   : > { %v3796_v24 = vpop.f32.mrf.mxu2  ;;  %v13251_v8 = vpop.f32.mrf.mxu1 }
 0x2a5   : > { %v13254_v41 = vadd.f32 %v3796_v24, %v12811_v56  ;;  %v2587_v28 = vpop.f32.mrf.mxu0  ;;  %v11463_v24 = vunpack.c.h.bf16 %v11698_v13 }
 0x2a6   : > { %v2306_v58 = vpop.f32.mrf.mxu3 }
 0x2a7   : > { %v2374_v15 = vadd.f32 %v2306_v58, %v12796_v52 }
 0x2a8   : > { %10175 = vmatmul.msk.bf16.gmra.mxu0 %vm479_vm1, %v4416_v55  ;;  %v11710_v55 = vld [vmem:[%s11856_s12 + $0x48] sm:$0xff]  }
 0x2a9   : > { %v13264_v56 = vadd.f32 %v2584_v16, %v2374_v15  ;;  %10137 = vmatmul.msk.bf16.gmra.mxu2 %vm479_vm1, %v3603_v34  ;;  %v3607_v16 = vrot.slane %v3605_v33, 3  ;;  %v4423_v34 = vrot.slane %v4421_v36, 1  ;;  %v11510_v15 = vunpack.c.l.bf16 %v11710_v55 }
 0x2aa   : > { %v11511_v40 = vunpack.c.h.bf16 %v11710_v55 }
 0x2ab   : > { %10150 = vmatmul.msk.bf16.gmra.mxu3 %vm479_vm1, %v3939_v29  ;;  %v3611_v29 = vor.u32 %v3610_v39, %v3607_v16  ;;  %v4324_v37 = vmax.f32 %v11510_v15, 0.0  ;;  %v16374_v16 = vld [vmem:[#allocation40_spill] sm:$0xff]  ;;  %v16375_v39 = vld [vmem:[#allocation41_spill] sm:$0xff]  ;;  %v16376_v15 = vld [vmem:[#allocation19_spill] sm:$0xff] }
 0x2ac   : > { %v3799_v46 = vpop.f32.mrf.mxu2  ;;  %v3209_v53 = vpop.f32.mrf.mxu1  ;;  %v3940_v27 = vpack.c.bf16 %v16375_v39, %v16374_v16 }
 0x2ad   : > { %v13270_v52 = vadd.f32 %v3799_v46, %v12831_v43  ;;  %v2589_v4 = vpop.f32.mrf.mxu0  ;;  %v13276_v43 = vmax.f32 %v11463_v24, 0.0  ;;  %v3612_v10 = vsel %vm685_vm2, %v3602_v51, %v3611_v29  ;;  %v11699_v51 = vld [vmem:[%s11856_s12 + $0xa8] sm:$0xff]  }
 0x2ae   : > { %v2309_v57 = vpop.f32.mrf.mxu3  ;;  %v11466_v39 = vunpack.c.l.bf16 %v11699_v51 }
 0x2af   : > { %v2375_v59 = vadd.f32 %v2309_v57, %v12817_v17  ;;  %16370 = vst [vmem:[#allocation53_spill] sm:$0xff] %v13276_v43  ;;  %v4424_v17 = vsel %vm1288_vm3, %v4419_v26, %v4423_v34  ;;  %v3451_v36 = vpack.c.bf16 %v13276_v43, %v13274_v18 }
 0x2b0   : > { %v13303_v42 = vmax.f32 %v11466_v39, 0.0 }
 0x2b1   : > { %v2653_v58 = vadd.f32 %v2587_v28, %v2375_v59  ;;  %v3614_v24 = vshrl.u32 %v3451_v36, 16  ;;  %v3617_v59 = vshll.u32 %v3451_v36, 16  ;;  %v4427_v36 = vor.u32 %v4425_v12, %v4423_v34 }
 0x2b2   : > { %16379 = vst [vmem:[#allocation40_spill] sm:$0xff] %v13303_v42 }
 0x2b3   : > { %v13278_v46 = vadd.f32 %v3209_v53, %v2653_v58  ;;  %v16373_v53 = vld [vmem:[#allocation4_spill] sm:$0xff] }
 0x2b4   : > { %v3801_v62 = vpop.f32.mrf.mxu2  ;;  %v13280_v33 = vpop.f32.mrf.mxu1 }
 0x2b5   : > { %16371 = vst [vmem:[#allocation54_spill] sm:$0xff] %v13280_v33  ;;  %v13283_v35 = vadd.f32 %v3801_v62, %v12850_v61  ;;  %v2592_v13 = vpop.f32.mrf.mxu0  ;;  %v4367_v62 = vpack.c.bf16 %v4324_v37, %v4323_v23  ;;  %v11711_v23 = vld [vmem:[%s11856_s12 + $0x50] sm:$0xff]   ;;  %v16378_v37 = vld [vmem:[#allocation17_spill] sm:$0xff] }
 0x2b6   : > { %v2311_v28 = vpop.f32.mrf.mxu3  ;;  %v11514_v44 = vunpack.c.l.bf16 %v11711_v23 }
 0x2b7   : > { %16372 = vst [vmem:[#allocation55_spill] sm:$0xff] %v13283_v35  ;;  %v2376_v57 = vadd.f32 %v2311_v28, %v16373_v53  ;;  %v4429_v16 = vshll.u32 %v4367_v62, 16 }
 0x2b8   : > { %10176 = vmatmul.msk.bf16.gmra.mxu0 %vm479_vm1, %v4424_v17  ;;  %v4326_v55 = vmax.f32 %v11514_v44, 0.0 }
 0x2b9   : > { %v13293_v61 = vadd.f32 %v2589_v4, %v2376_v57  ;;  %10138 = vmatmul.msk.bf16.gmra.mxu2 %vm479_vm1, %v3612_v10  ;;  %v3616_v4 = vrot.slane %v3614_v24, 3  ;;  %v3619_v57 = vrot.slane %v3617_v59, 4  ;;  %v11467_v10 = vunpack.c.h.bf16 %v11699_v51  ;;  %v16383_v59 = vld [vmem:[#allocation6_spill] sm:$0xff] }
 0x2bb   : > { %10151 = vmatmul.msk.bf16.gmra.mxu3 %vm479_vm1, %v3940_v27  ;;  %v4431_v27 = vrot.slane %v4429_v16, 1  ;;  %v3620_v35 = vor.u32 %v3619_v57, %v3616_v4  ;;  %v16387_v4 = vld [vmem:[#allocation15_spill] sm:$0xff] }
 0x2bc   : > { %v3804_v26 = vpop.f32.mrf.mxu2  ;;  %v3214_v58 = vpop.f32.mrf.mxu1 }
 0x2bd   : > { %v13299_v28 = vadd.f32 %v3804_v26, %v16376_v15  ;;  %v2594_v53 = vpop.f32.mrf.mxu0  ;;  %v13305_v26 = vmax.f32 %v11467_v10, 0.0  ;;  %v4432_v34 = vsel %vm1288_vm3, %v4427_v36, %v4431_v27  ;;  %v3621_v12 = vsel %vm685_vm2, %v3611_v29, %v3620_v35  ;;  %v11700_v29 = vld [vmem:[%s11856_s12 + $0xb0] sm:$0xff]  }
 0x2be   : > { %v2314_v17 = vpop.f32.mrf.mxu3  ;;  %v4433_v36 = vshrl.u32 %v4367_v62, 16 }
 0x2bf   : > { %16377 = vst [vmem:[#allocation4_spill] sm:$0xff] %v13299_v28  ;;  %v2377_v43 = vadd.f32 %v2314_v17, %v16378_v37  ;;  %v3452_v16 = vpack.c.bf16 %v13305_v26, %v13303_v42  ;;  %v16386_v17 = vld [vmem:[#allocation42_spill] sm:$0xff] }
 0x2c0   : > { %16380 = vst [vmem:[#allocation41_spill] sm:$0xff] %v13305_v26  ;;  %v3941_v57 = vpack.c.bf16 %v16387_v4, %v16386_v17  ;;  %v11470_v4 = vunpack.c.l.bf16 %v11700_v29 }
 0x2c1   : > { %v2655_v18 = vadd.f32 %v2592_v13, %v2377_v43  ;;  %v4325_v43 = vmax.f32 %v11511_v40, 0.0  ;;  %v3623_v44 = vshrl.u32 %v3452_v16, 16  ;;  %v3626_v40 = vshll.u32 %v3452_v16, 16 }
 0x2c2   : > { %v4435_v16 = vor.u32 %v4433_v36, %v4431_v27  ;;  %v13332_v62 = vmax.f32 %v11470_v4, 0.0 }
 0x2c3   : > { %v13307_v15 = vadd.f32 %v3214_v58, %v2655_v18  ;;  %v16385_v18 = vld [vmem:[#allocation18_spill] sm:$0xff]  ;;  %v4368_v39 = vpack.c.bf16 %v4326_v55, %v4325_v43  ;;  %v11712_v43 = vld [vmem:[%s11856_s12 + $0x58] sm:$0xff]   ;;  %v16391_v55 = vld [vmem:[#allocation21_spill] sm:$0xff] }
 0x2c4   : > { %v3806_v28 = vpop.f32.mrf.mxu2  ;;  %v13309_v24 = vpop.f32.mrf.mxu1  ;;  %16392 = vst [vmem:[#allocation15_spill] sm:$0xff] %v13332_v62 }
 0x2c5   : > { %16381 = vst [vmem:[#allocation19_spill] sm:$0xff] %v13307_v15  ;;  %v13312_v51 = vadd.f32 %v3806_v28, %v16383_v59  ;;  %v2597_v33 = vpop.f32.mrf.mxu0  ;;  %v16389_v59 = vld [vmem:[#allocation23_spill] sm:$0xff]  ;;  %v4437_v17 = vshll.u32 %v4368_v39, 16 }
 0x2c6   : > { %16382 = vst [vmem:[#allocation17_spill] sm:$0xff] %v13309_v24  ;;  %v2316_v13 = vpop.f32.mrf.mxu3  ;;  %v11518_v24 = vunpack.c.l.bf16 %v11712_v43 }
 0x2c7   : > { %16384 = vst [vmem:[#allocation6_spill] sm:$0xff] %v13312_v51  ;;  %v2378_v58 = vadd.f32 %v2316_v13, %v16385_v18  ;;  %v11515_v51 = vunpack.c.h.bf16 %v11711_v23 }
 0x2c8   : > { %10177 = vmatmul.msk.bf16.gmra.mxu0 %vm479_vm1, %v4432_v34  ;;  %v4328_v23 = vmax.f32 %v11518_v24, 0.0 }
 0x2c9   : > { %v13322_v28 = vadd.f32 %v2594_v53, %v2378_v58  ;;  %10139 = vmatmul.msk.bf16.gmra.mxu2 %vm479_vm1, %v3621_v12  ;;  %v3625_v53 = vrot.slane %v3623_v44, 3  ;;  %v3628_v58 = vrot.slane %v3626_v40, 4  ;;  %v11471_v12 = vunpack.c.h.bf16 %v11700_v29  ;;  %v16396_v40 = vld [vmem:[#allocation8_spill] sm:$0xff] }
 0x2ca   : > { %v4327_v27 = vmax.f32 %v11515_v51, 0.0 }
 0x2cb   : > { %16388 = vst [vmem:[#allocation18_spill] sm:$0xff] %v13322_v28  ;;  %10152 = vmatmul.msk.bf16.gmra.mxu3 %vm479_vm1, %v3941_v57  ;;  %v4439_v57 = vrot.slane %v4437_v17, 1  ;;  %v3629_v28 = vor.u32 %v3628_v58, %v3625_v53  ;;  %v16400_v53 = vld [vmem:[#allocation16_spill] sm:$0xff] }
 0x2cc   : > { %v3809_v10 = vpop.f32.mrf.mxu2  ;;  %v3219_v37 = vpop.f32.mrf.mxu1  ;;  %v4369_v4 = vpack.c.bf16 %v4328_v23, %v4327_v27  ;;  %v11713_v27 = vld [vmem:[%s11856_s12 + $0x60] sm:$0xff]  }
 0x2cd   : > { %v13328_v13 = vadd.f32 %v3809_v10, %v16389_v59  ;;  %v2599_v18 = vpop.f32.mrf.mxu0  ;;  %v13334_v10 = vmax.f32 %v11471_v12, 0.0  ;;  %v3630_v36 = vsel %vm685_vm2, %v3620_v35, %v3629_v28  ;;  %v11701_v35 = vld [vmem:[%s11856_s12 + $0xb8] sm:$0xff]   ;;  %v16404_v23 = vld [vmem:[#allocation25_spill] sm:$0xff] }
 0x2ce   : > { %v2319_v34 = vpop.f32.mrf.mxu3 }
 0x2cf   : > { %16390 = vst [vmem:[#allocation42_spill] sm:$0xff] %v13328_v13  ;;  %v2379_v26 = vadd.f32 %v2319_v34, %v16391_v55  ;;  %v3453_v17 = vpack.c.bf16 %v13334_v10, %v13332_v62  ;;  %v16399_v34 = vld [vmem:[#allocation43_spill] sm:$0xff] }
 0x2d0   : > { %16393 = vst [vmem:[#allocation23_spill] sm:$0xff] %v13334_v10  ;;  %v3942_v58 = vpack.c.bf16 %v16400_v53, %v16399_v34  ;;  %v4445_v34 = vshll.u32 %v4369_v4, 16  ;;  %v11474_v53 = vunpack.c.l.bf16 %v11701_v35 }
 0x2d1   : > { %v2657_v42 = vadd.f32 %v2597_v33, %v2379_v26  ;;  %v4440_v33 = vsel %vm1288_vm3, %v4435_v16, %v4439_v57  ;;  %v3632_v24 = vshrl.u32 %v3453_v17, 16  ;;  %v3635_v51 = vshll.u32 %v3453_v17, 16 }
 0x2d2   : > { %v4441_v16 = vshrl.u32 %v4368_v39, 16  ;;  %v13361_v39 = vmax.f32 %v11474_v53, 0.0 }
 0x2d3   : > { %v13336_v59 = vadd.f32 %v3219_v37, %v2657_v42  ;;  %v16398_v42 = vld [vmem:[#allocation22_spill] sm:$0xff] }
 0x2d4   : > { %v3811_v13 = vpop.f32.mrf.mxu2  ;;  %v13338_v44 = vpop.f32.mrf.mxu1  ;;  %v4443_v17 = vor.u32 %v4441_v16, %v4439_v57  ;;  %16405 = vst [vmem:[#allocation16_spill] sm:$0xff] %v13361_v39 }
 0x2d5   : > { %16394 = vst [vmem:[#allocation21_spill] sm:$0xff] %v13336_v59  ;;  %v13341_v29 = vadd.f32 %v3811_v13, %v16396_v40  ;;  %v2602_v15 = vpop.f32.mrf.mxu0  ;;  %v16402_v40 = vld [vmem:[#allocation27_spill] sm:$0xff] }
 0x2d6   : > { %16395 = vst [vmem:[#allocation56_spill] sm:$0xff] %v13338_v44  ;;  %v2321_v26 = vpop.f32.mrf.mxu3  ;;  %v11522_v44 = vunpack.c.l.bf16 %v11713_v27 }
 0x2d7   : > { %16397 = vst [vmem:[#allocation8_spill] sm:$0xff] %v13341_v29  ;;  %v2380_v37 = vadd.f32 %v2321_v26, %v16398_v42  ;;  %v11519_v29 = vunpack.c.h.bf16 %v11712_v43 }
 0x2d8   : > { %10178 = vmatmul.msk.bf16.gmra.mxu0 %vm479_vm1, %v4440_v33  ;;  %v4330_v43 = vmax.f32 %v11522_v44, 0.0 }
 0x2d9   : > { %v13351_v13 = vadd.f32 %v2599_v18, %v2380_v37  ;;  %10140 = vmatmul.msk.bf16.gmra.mxu2 %vm479_vm1, %v3630_v36  ;;  %v3634_v18 = vrot.slane %v3632_v24, 3  ;;  %v3637_v37 = vrot.slane %v3635_v51, 4  ;;  %v11475_v36 = vunpack.c.h.bf16 %v11701_v35  ;;  %v16408_v51 = vld [vmem:[#allocation10_spill] sm:$0xff] }
 0x2da   : > { %v4329_v57 = vmax.f32 %v11519_v29, 0.0 }
 0x2db   : > { %16401 = vst [vmem:[#allocation22_spill] sm:$0xff] %v13351_v13  ;;  %10153 = vmatmul.msk.bf16.gmra.mxu3 %vm479_vm1, %v3942_v58  ;;  %v4447_v58 = vrot.slane %v4445_v34, 1  ;;  %v3638_v13 = vor.u32 %v3637_v37, %v3634_v18  ;;  %v16412_v18 = vld [vmem:[#allocation20_spill] sm:$0xff] }
 0x2dc   : > { %v3814_v12 = vpop.f32.mrf.mxu2  ;;  %v3224_v55 = vpop.f32.mrf.mxu1  ;;  %v13383_v53 = vpack.c.bf16 %v4330_v43, %v4329_v57 }
 0x2dd   : > { %v13357_v26 = vadd.f32 %v3814_v12, %v16402_v40  ;;  %v2604_v42 = vpop.f32.mrf.mxu0  ;;  %v13363_v12 = vmax.f32 %v11475_v36, 0.0  ;;  %v3639_v16 = vsel %vm685_vm2, %v3629_v28, %v3638_v13  ;;  %v11702_v28 = vld [vmem:[%s11856_s12 + $0xc0] sm:$0xff]  }
 0x2de   : > { %v2324_v33 = vpop.f32.mrf.mxu3  ;;  %v11478_v57 = vunpack.c.l.bf16 %v11702_v28  ;;  %v11479_v43 = vunpack.c.h.bf16 %v11702_v28  ;;  %v16417_v28 = vld [vmem:[#allocation30_spill] sm:$0xff] }
 0x2df   : > { %16403 = vst [vmem:[#allocation43_spill] sm:$0xff] %v13357_v26  ;;  %v2381_v10 = vadd.f32 %v2324_v33, %v16404_v23  ;;  %v3454_v34 = vpack.c.bf16 %v13363_v12, %v13361_v39  ;;  %v16411_v33 = vld [vmem:[#allocation5_spill] sm:$0xff]  ;;  %v11523_v39 = vunpack.c.h.bf16 %v11713_v27 }
 0x2e0   : > { %16406 = vst [vmem:[#allocation27_spill] sm:$0xff] %v13363_v12  ;;  %v3943_v37 = vpack.c.bf16 %v16412_v18, %v16411_v33 }
 0x2e1   : > { %v2659_v62 = vadd.f32 %v2602_v15, %v2381_v10  ;;  %v4448_v15 = vsel %vm1288_vm3, %v4443_v17, %v4447_v58  ;;  %v3641_v44 = vshrl.u32 %v3454_v34, 16  ;;  %v3644_v29 = vshll.u32 %v3454_v34, 16  ;;  %v16414_v34 = vld [vmem:[#allocation29_spill] sm:$0xff] }
 0x2e2   : > { %v4449_v17 = vshrl.u32 %v4369_v4, 16 }
 0x2e3   : > { %v13365_v40 = vadd.f32 %v3224_v55, %v2659_v62  ;;  %v16410_v62 = vld [vmem:[#allocation26_spill] sm:$0xff] }
 0x2e4   : > { %v3816_v26 = vpop.f32.mrf.mxu2  ;;  %v13367_v24 = vpop.f32.mrf.mxu1  ;;  %v4451_v18 = vor.u32 %v4449_v17, %v4447_v58 }
 0x2e5   : > { %16407 = vst [vmem:[#allocation25_spill] sm:$0xff] %v13367_v24  ;;  %v13370_v35 = vadd.f32 %v3816_v26, %v16408_v51  ;;  %v2607_v59 = vpop.f32.mrf.mxu0 }
 0x2e6   : > { %v2326_v10 = vpop.f32.mrf.mxu3 }
 0x2e7   : > { %16409 = vst [vmem:[#allocation10_spill] sm:$0xff] %v13370_v35  ;;  %v2382_v55 = vadd.f32 %v2326_v10, %v16410_v62  ;;  %v3643_v62 = vrot.slane %v3641_v44, 3 }
 0x2e8   : > { %10179 = vmatmul.msk.bf16.gmra.mxu0 %vm479_vm1, %v4448_v15 }
 0x2e9   : > { %v13380_v26 = vadd.f32 %v2604_v42, %v2382_v55  ;;  %10141 = vmatmul.msk.bf16.gmra.mxu2 %vm479_vm1, %v3639_v16  ;;  %v4453_v42 = vshll.u32 %v13383_v53, 16  ;;  %v3646_v16 = vrot.slane %v3644_v29, 4  ;;  %v13392_v55 = vld [vmem:[%s11856_s12 + $0x68] sm:$0xff]  }
 0x2ea   : > { %v11526_v4 = vunpack.c.l.bf16 %v13392_v55 }
 0x2eb   : > { %10154 = vmatmul.msk.bf16.gmra.mxu3 %vm479_vm1, %v3943_v37  ;;  %v4455_v12 = vrot.slane %v4453_v42, 1 }
 0x2ec   : > { %v3819_v36 = vpop.f32.mrf.mxu2  ;;  %v3229_v23 = vpop.f32.mrf.mxu1  ;;  %v4332_v17 = vmax.f32 %v11526_v4, 0.0  ;;  %v11703_v4 = vld [vmem:[%s11856_s12 + $0xc8] sm:$0xff]  }
 0x2ed   : > { %v13388_v51 = vadd.f32 %v3819_v36, %v12991_v14  ;;  %v2609_v10 = vpop.f32.mrf.mxu0  ;;  %v13396_v14 = vor.u32 %v3646_v16, %v3643_v62  ;;  %v13398_v36 = vmax.f32 %v11478_v57, 0.0  ;;  %v4456_v58 = vsel %vm1288_vm3, %v4451_v18, %v4455_v12  ;;  %v16420_v62 = vld [vmem:[#allocation31_spill] sm:$0xff] }
 0x2ee   : > { %v2329_v15 = vpop.f32.mrf.mxu3  ;;  %v16421_v57 = vld [vmem:[#allocation7_spill] sm:$0xff] }
 0x2ef   : > { %16413 = vst [vmem:[#allocation26_spill] sm:$0xff] %v13388_v51  ;;  %v2383_v33 = vadd.f32 %v2329_v15, %v16414_v34  ;;  %v13400_v51 = vmax.f32 %v11479_v43, 0.0  ;;  %v3648_v15 = vsel %vm685_vm2, %v3638_v13, %v13396_v14  ;;  %v16422_v43 = vld [vmem:[#allocation24_spill] sm:$0xff] }
 0x2f0   : > { %16415 = vst [vmem:[#allocation5_spill] sm:$0xff] %v13398_v36  ;;  %v3944_v34 = vpack.c.bf16 %v16422_v43, %v16421_v57  ;;  %v16425_v57 = vld [vmem:[#allocation12_spill] sm:$0xff] }
 0x2f1   : > { %v2661_v37 = vadd.f32 %v2607_v59, %v2383_v33  ;;  %16416 = vst [vmem:[#allocation20_spill] sm:$0xff] %v13400_v51  ;;  %v4331_v59 = vmax.f32 %v11523_v39, 0.0 }
 0x2f3   : > { %v13402_v44 = vadd.f32 %v3229_v23, %v2661_v37  ;;  %v3455_v23 = vpack.c.bf16 %v13400_v51, %v13398_v36  ;;  %v13421_v33 = vpack.c.bf16 %v4332_v17, %v4331_v59  ;;  %v11789_v37 = vmov 0   ;;  %v13434_v17 = vld [vmem:[%s11856_s12 + $0x70] sm:$0xff]  }
 0x2f4   : > { %v3821_v29 = vpop.f32.mrf.mxu2  ;;  %v13408_v42 = vpop.f32.mrf.mxu1  ;;  %5053 = vst.msk [vmem:[#allocation2] sm:$0xf] %vm5052_vm5, %v11789_v37 }
 0x2f5   : > { %v13405_v35 = vadd.f32 %v3821_v29, %v16417_v28  ;;  %v2612_v24 = vpop.f32.mrf.mxu0  ;;  %16419 = vst [vmem:[#allocation30_spill] sm:$0xff] %v13408_v42  ;;  %v3650_v18 = vshrl.u32 %v3455_v23, 16  ;;  %v3653_v13 = vshll.u32 %v3455_v23, 16  ;;  %v4461_v59 = vshll.u32 %v13421_v33, 16  ;;  %v16428_v42 = vld [vmem:[#allocation35_spill] sm:$0xff] }
 0x2f6   : > { %v2331_v27 = vpop.f32.mrf.mxu3  ;;  %5054 = vst.msk [vmem:[#allocation2 + $0x4] sm:$0xf] %vm5052_vm5, %v11789_v37 }
 0x2f7   : > { %16418 = vst [vmem:[#allocation29_spill] sm:$0xff] %v13405_v35  ;;  %v2384_v16 = vadd.f32 %v2331_v27, %v16420_v62  ;;  %v3655_v23 = vrot.slane %v3653_v13, 4  ;;  %v11482_v62 = vunpack.c.l.bf16 %v11703_v4  ;;  %v4463_v36 = vrot.slane %v4461_v59, 1  ;;  %v16430_v59 = vld [vmem:[#allocation13_spill] sm:$0xff] }
 0x2f8   : > { %10180 = vmatmul.msk.bf16.gmra.mxu0 %vm479_vm1, %v4456_v58  ;;  %5055 = vst.msk [vmem:[#allocation2 + $0x8] sm:$0xf] %vm5052_vm5, %v11789_v37  ;;  %v4457_v58 = vshrl.u32 %v13383_v53, 16  ;;  %v11527_v53 = vunpack.c.h.bf16 %v13392_v55 }
 0x2f9   : > { %v13418_v39 = vadd.f32 %v2609_v10, %v2384_v16  ;;  %10142 = vmatmul.msk.bf16.gmra.mxu2 %vm479_vm1, %v3648_v15  ;;  %5056 = vst.msk [vmem:[#allocation2 + $0xcc] sm:$0xf] %vm5052_vm5, %v11789_v37  ;;  %v3652_v15 = vrot.slane %v3650_v18, 3  ;;  %v11483_v16 = vunpack.c.h.bf16 %v11703_v4  ;;  %v13445_v13 = vmax.f32 %v11482_v62, 0.0  ;;  %v16432_v62 = vld [vmem:[#allocation28_spill] sm:$0xff] }
 0x2fa   : > { %5057 = vst.msk [vmem:[#allocation2 + $0xd0] sm:$0xf] %vm5052_vm5, %v11789_v37  ;;  %v4459_v51 = vor.u32 %v4457_v58, %v4455_v12 }
 0x2fb   : > { %16423 = vst [vmem:[#allocation31_spill] sm:$0xff] %v13418_v39  ;;  %10155 = vmatmul.msk.bf16.gmra.mxu3 %vm479_vm1, %v3944_v34  ;;  %v11530_v34 = vunpack.c.l.bf16 %v13434_v17  ;;  %v13443_v18 = vor.u32 %v3655_v23, %v3652_v15  ;;  %v13447_v4 = vmax.f32 %v11483_v16, 0.0  ;;  %v16431_v23 = vld [vmem:[#allocation9_spill] sm:$0xff] }
 0x2fc   : > { %v3824_v29 = vpop.f32.mrf.mxu2  ;;  %5058 = vst.msk [vmem:[#allocation2 + $0xd4] sm:$0xf] %vm5052_vm5, %v11789_v37  ;;  %v3945_v16 = vpack.c.bf16 %v16432_v62, %v16431_v23  ;;  %v13481_v23 = vld [vmem:[%s11856_s12 + $0x78] sm:$0xff]   ;;  %v16435_v62 = vld [vmem:[#allocation34_spill] sm:$0xff] }
 0x2fd   : > { %v13429_v10 = vadd.f32 %v3824_v29, %v13030_v32  ;;  %v2614_v28 = vpop.f32.mrf.mxu0  ;;  %v3234_v32 = vpop.f32.mrf.mxu1  ;;  %5059 = vst.msk [vmem:[#allocation2 + $0xd8] sm:$0xf] %vm5052_vm5, %v11789_v37  ;;  %v4334_v35 = vmax.f32 %v11530_v34, 0.0  ;;  %v3657_v37 = vsel %vm685_vm2, %v13396_v14, %v13443_v18  ;;  %v3456_v58 = vpack.c.bf16 %v13447_v4, %v13445_v13  ;;  %v10338_v14 = vld [vmem:[%s16196_s3 + $0x8] sm:$0xf]  ;;  %v11704_v34 = vld [vmem:[%s11856_s12 + $0xd0] sm:$0xff]  }
 0x2fe   : > { %v2334_v27 = vpop.f32.mrf.mxu3  ;;  %16426 = vst [vmem:[#allocation24_spill] sm:$0xff] %v13445_v13 }
 0x2ff   : > { %16424 = vst [vmem:[#allocation7_spill] sm:$0xff] %v13429_v10  ;;  %v2385_v43 = vadd.f32 %v2334_v27, %v16425_v57  ;;  %v4333_v57 = vmax.f32 %v11527_v53, 0.0  ;;  %v5994_v53 = vsel %vm5552_vm4, %v10338_v14, 0 }
 0x300   : > { %16427 = vst [vmem:[#allocation12_spill] sm:$0xff] %v13447_v4  ;;  %6003 = vmatpush.bf16.msra.mxu3 %v5994_v53 }
 0x301   : > { %v2663_v29 = vadd.f32 %v2612_v24, %v2385_v43  ;;  %v4464_v24 = vsel %vm1288_vm3, %v4459_v51, %v4463_v36  ;;  %v3659_v51 = vshrl.u32 %v3456_v58, 16 }
 0x303   : > { %v13449_v10 = vadd.f32 %v3234_v32, %v2663_v29  ;;  %v3662_v32 = vshll.u32 %v3456_v58, 16 }
 0x304   : > { %v3826_v27 = vpop.f32.mrf.mxu2 }
 0x305   : > { %v13452_v55 = vadd.f32 %v3826_v27, %v16428_v42  ;;  %v4669_v39 = vpop.f32.mrf.mxu0  ;;  %v13464_v42 = vpack.c.bf16 %v4334_v35, %v4333_v57  ;;  %v4837_v27 = vlaneseq  ;;  %v4465_v35 = vshrl.u32 %v13421_v33, 16  ;;  %v13487_v33 = vld [vmem:[%s16195_s2] ss:$0 sm:$0xff] }
 0x306   : > { %v2336_v12 = vpop.f32.mrf.mxu3  ;;  %v3664_v58 = vrot.slane %v3662_v32, 4  ;;  %v11534_v32 = vunpack.c.l.bf16 %v13481_v23 }
 0x307   : > { %16429 = vst [vmem:[#allocation35_spill] sm:$0xff] %v13452_v55  ;;  %v2386_v15 = vadd.f32 %v2336_v12, %v16430_v59  ;;  %v11486_v59 = vunpack.c.l.bf16 %v11704_v34  ;;  %v13489_v14 = vshrl.u32 %v4837_v27, 7  ;;  %v4467_v53 = vor.u32 %v4465_v35, %v4463_v36 }
 0x308   : > { %10181 = vmatmul.msk.bf16.gmra.mxu0 %vm479_vm1, %v4464_v24 }
 0x309   : > { %v13466_v43 = vadd.f32 %v2614_v28, %v2386_v15  ;;  %10143 = vmatmul.msk.bf16.gmra.mxu2 %vm479_vm1, %v3657_v37  ;;  %v4469_v28 = vshll.u32 %v13464_v42, 16  ;;  %v3661_v37 = vrot.slane %v3659_v51, 3  ;;  %v11487_v15 = vunpack.c.h.bf16 %v11704_v34 }
 0x30a   : > { %v11531_v51 = vunpack.c.h.bf16 %v13434_v17  ;;  %v13503_v27 = vmax.f32 %v11486_v59, 0.0  ;;  %vm4841_vm6 = vcmp.ge.s32.totalorder %v13489_v14, 1 }
 0x30b   : > { %16433 = vst [vmem:[#allocation13_spill] sm:$0xff] %v13466_v43  ;;  %10156 = vmatmul.msk.bf16.gmra.mxu3 %vm479_vm1, %v3945_v16  ;;  %v13495_v34 = vor.u32 %v3664_v58, %v3661_v37  ;;  %v13505_v36 = vmax.f32 %v11487_v15, 0.0 }
 0x30c   : > { %v3829_v29 = vpop.f32.mrf.mxu2  ;;  %16436 = vst [vmem:[#allocation28_spill] sm:$0xff] %v13503_v27  ;;  %v4335_v4 = vmax.f32 %v11531_v51, 0.0  ;;  %v13528_v51 = vld [vmem:[#allocation2] sm:$0xff]  }
 0x30d   : > { %v13478_v57 = vadd.f32 %v3829_v29, %v13070_v21  ;;  %v4671_v24 = vpop.f32.mrf.mxu0  ;;  %v13491_v21 = vrot.slane %v4469_v28, 1  ;;  %16437 = vst [vmem:[#allocation34_spill] sm:$0xff] %v13505_v36 }
 0x30e   : > { %v4047_v12 = vpop.f32.mrf.mxu3 }
 0x30f   : > { %16434 = vst [vmem:[#allocation9_spill] sm:$0xff] %v13478_v57  ;;  %v4167_v16 = vadd.f32 %v4047_v12, %v16435_v62  ;;  %v10363_v12 = vld [vmem:[%s16196_s3 + $0xc] sm:$0xf]  ;;  %v10484_v62 = vld [vmem:[%s16196_s3 + $0x10] sm:$0xf]  ;;  %v4472_v58 = vsel %vm1288_vm3, %v4467_v53, %v13491_v21 }
 0x310   : > { %v6416_v35 = vsel %vm5552_vm4, %v10363_v12, 0  ;;  %v7038_v28 = vsel %vm5552_vm4, %v10484_v62, 0  ;;  %v3457_v12 = vpack.c.bf16 %v13505_v36, %v13503_v27  ;;  %v16443_v27 = vld [vmem:[#allocation36_spill] sm:$0xff] }
 0x311   : > { %v4789_v29 = vadd.f32 %v4669_v39, %v4167_v16  ;;  %v3264_v39 = vadd.f32 %v13072_v2, %v13088_v3  ;;  %6425 = vmatpush.bf16.msrb.mxu0 %v6416_v35  ;;  %7047 = vmatpush.bf16.msrb.mxu1 %v7038_v28  ;;  %v4336_v2 = vmax.f32 %v11534_v32, 0.0 }
 0x313   : > { %v4854_v17 = vadd.f32 %v13487_v33, %v4789_v29  ;;  %v3666_v29 = vsel %vm685_vm2, %v13443_v18, %v13495_v34  ;;  %v13531_v18 = vpack.c.bf16 %v4336_v2, %v4335_v4  ;;  %v4473_v4 = vshrl.u32 %v13464_v42, 16 }
 0x314   : > { %v3831_v37 = vpop.f32.mrf.mxu2 }
 0x315   : > { %v4902_v59 = vmax.f32 %v4854_v17, 0.0  ;;  %v13515_v15 = vadd.f32 %v3831_v37, %v3264_v39  ;;  %v4674_v16 = vpop.f32.mrf.mxu0  ;;  %v16439_v17 = vld [vmem:[#allocation11_spill] sm:$0xff]  ;;  %v16440_v39 = vld [vmem:[#allocation33_spill] sm:$0xff]  ;;  %v3668_v37 = vshrl.u32 %v3457_v12, 16  ;;  %v4477_v2 = vshll.u32 %v13531_v18, 16 }
 0x316   : > { %v4049_v3 = vpop.f32.mrf.mxu3  ;;  %v3946_v35 = vpack.c.bf16 %v16440_v39, %v16439_v17  ;;  %v16441_v39 = vld [vmem:[#allocation45_spill] sm:$0xff] }
 0x317   : > { %16438 = vst [vmem:[#allocation57_spill] sm:$0xff] %v13515_v15  ;;  %v4956_v53 = vsel %vm4841_vm6, %v4902_v59, 0.0  ;;  %v4168_v62 = vadd.f32 %v4049_v3, %v13077_v25  ;;  %v3671_v59 = vshll.u32 %v3457_v12, 16  ;;  %v5286_v3 = vshll.u32 %v13528_v51, 16 }
 0x318   : > { %v5004_v28 = vpack.c.bf16 %v4956_v53, %v4956_v53  ;;  %10182 = vmatmul.msk.bf16.gmra.mxu0 %vm479_vm1, %v4472_v58  ;;  %v3335_v53 = vld [vmem:[%s11856_s12 + $0xd8] sm:$0xf]  ;;  %v5284_v15 = vshrl.u32 %v13528_v51, 16 }
 0x319   : > { %v4790_v32 = vadd.f32 %v4671_v24, %v4168_v62  ;;  %10144 = vmatmul.msk.bf16.gmra.mxu2 %vm479_vm1, %v3666_v29  ;;  %v13544_v29 = vld [vmem:[%s11856_s12 + $0x80] sm:$0xff]   ;;  %v3384_v36 = vunpack.c.l.bf16 %v3335_v53 }
 0x31a   : > { %5060 = vst.msk [vmem:[#allocation2 + $0xc] sm:$0xf] %vm5052_vm5, %v5004_v28  ;;  %v3670_v28 = vrot.slane %v3668_v37, 3  ;;  %v11538_v42 = vunpack.c.l.bf16 %v13544_v29  ;;  %v4475_v37 = vor.u32 %v4473_v4, %v13491_v21 }
 0x31b   : > { %v4855_v25 = vadd.f32 %v13487_v33, %v4790_v32  ;;  %10157 = vmatmul.msk.bf16.gmra.mxu3 %vm479_vm1, %v3946_v35  ;;  %v3673_v32 = vrot.slane %v3671_v59, 4  ;;  %v4479_v59 = vrot.slane %v4477_v2, 1 }
 0x31c   : > { %v3834_v58 = vpop.f32.mrf.mxu2 }
 0x31d   : > { %v4903_v17 = vmax.f32 %v4855_v25, 0.0  ;;  %v13539_v24 = vadd.f32 %v3834_v58, %v16441_v39  ;;  %v4676_v62 = vpop.f32.mrf.mxu0  ;;  %v5288_v25 = vrot.slane %v5286_v3, 1  ;;  %v13549_v58 = vadd.s32 16, %v13489_v14  ;;  %v16445_v3 = vld [vmem:[#allocation48_spill] sm:$0xff] }
 0x31e   : > { %v4052_v12 = vpop.f32.mrf.mxu3  ;;  %v11535_v39 = vunpack.c.h.bf16 %v13481_v23  ;;  %v13557_v53 = vor.u32 %v3673_v32, %v3670_v28  ;;  %v4480_v28 = vsel %vm1288_vm3, %v4475_v37, %v4479_v59 }
 0x31f   : > { %16442 = vst [vmem:[#allocation11_spill] sm:$0xff] %v13539_v24  ;;  %v5005_v35 = vpack.c.bf16 %v4903_v17, %v4903_v17  ;;  %v4169_v13 = vadd.f32 %v4052_v12, %v16443_v27  ;;  %v13559_v27 = vmax.f32 %v3384_v36, 0.0  ;;  %v16446_v17 = vld [vmem:[#allocation46_spill] sm:$0xff]  ;;  %v5289_v23 = vor.u32 %v5288_v25, %v5284_v15 }
 0x320   : > { %v3266_v12 = vadd.f32 %v16446_v17, %v16445_v3  ;;  %vm4846_vm7 = vcmp.le.s32.totalorder %v13549_v58, 16  ;;  %v3675_v15 = vsel %vm685_vm2, %v13495_v34, %v13557_v53  ;;  %v16448_v3 = vld [vmem:[#allocation32_spill] sm:$0xff]  ;;  %v16449_v17 = vld [vmem:[#allocation14_spill] sm:$0xff] }
 0x321   : > { %5061 = vst.msk [vmem:[#allocation2 + $0x10] sm:$0xf] %vm5052_vm5, %v5005_v35  ;;  %v4791_v24 = vadd.f32 %v4674_v16, %v4169_v13  ;;  %v13554_v57 = vld [vmem:[#allocation2 + $0x8] sm:$0xff]  ;;  %v4337_v16 = vmax.f32 %v11535_v39, 0.0  ;;  %v4338_v35 = vmax.f32 %v11538_v42, 0.0  ;;  %v16447_v39 = vld [vmem:[#allocation47_spill] sm:$0xff] }
 0x322   : > { %16444 = vst [vmem:[#allocation33_spill] sm:$0xff] %v13559_v27  ;;  %v5291_v43 = vshll.u32 %v13554_v57, 16 }
 0x323   : > { %v4856_v55 = vadd.f32 %v13487_v33, %v4791_v24  ;;  %v3458_v24 = vpack.c.bf16 %v13559_v27, %v13559_v27  ;;  %v13582_v34 = vpack.c.bf16 %v4338_v35, %v4337_v16  ;;  %v13594_v35 = vld [vmem:[%s11856_s12 + $0x88] sm:$0xff]   ;;  %v3268_v27 = vadd.f32 %v13153_v45, %v13171_v54 }
 0x324   : > { %v3836_v13 = vpop.f32.mrf.mxu2  ;;  %v5293_v36 = vrot.slane %v5291_v43, 1  ;;  %v3947_v43 = vpack.c.bf16 %v16449_v17, %v16448_v3  ;;  %v16451_v3 = vld [vmem:[#allocation49_spill] sm:$0xff] }
 0x325   : > { %v4904_v21 = vmax.f32 %v4856_v55, 0.0  ;;  %v13566_v4 = vadd.f32 %v3836_v13, %v3266_v12  ;;  %v4679_v2 = vpop.f32.mrf.mxu0  ;;  %v3677_v13 = vshrl.u32 %v3458_v24, 16 }
 0x326   : > { %v4054_v32 = vpop.f32.mrf.mxu3  ;;  %v5294_v55 = vsel %vm1288_vm3, %v5289_v23, %v5293_v36 }
 0x327   : > { %v4958_v25 = vsel %vm4846_vm7, %v4904_v21, 0.0  ;;  %v4170_v42 = vadd.f32 %v4054_v32, %v16447_v39  ;;  %10290 = vmatmul.msk.bf16.vlgmr.msra.gmra.mxu1 %vm5479_vm8, %v5294_v55  ;;  %v3680_v21 = vshll.u32 %v3458_v24, 16  ;;  %v4481_v32 = vshrl.u32 %v13531_v18, 16 }
 0x328   : > { %v5006_v12 = vpack.c.bf16 %v4958_v25, %v4958_v25  ;;  %10183 = vmatmul.msk.bf16.gmra.mxu0 %vm479_vm1, %v4480_v28  ;;  %v4485_v39 = vshll.u32 %v13582_v34, 16 }
 0x329   : > { %v4792_v37 = vadd.f32 %v4676_v62, %v4170_v42  ;;  %10145 = vmatmul.msk.bf16.gmra.mxu2 %vm479_vm1, %v3675_v15  ;;  %v3679_v15 = vrot.slane %v3677_v13, 3  ;;  %v3682_v42 = vrot.slane %v3680_v21, 4  ;;  %v5295_v13 = vshrl.u32 %v13554_v57, 16 }
 0x32a   : > { %5062 = vst.msk [vmem:[#allocation2 + $0x14] sm:$0xf] %vm5052_vm5, %v5006_v12  ;;  %v4487_v12 = vrot.slane %v4485_v39, 1 }
 0x32b   : > { %v4857_v23 = vadd.f32 %v13487_v33, %v4792_v37  ;;  %10158 = vmatmul.msk.bf16.gmra.mxu3 %vm479_vm1, %v3947_v43  ;;  %v4483_v43 = vor.u32 %v4481_v32, %v4479_v59  ;;  %v11539_v37 = vunpack.c.h.bf16 %v13544_v29  ;;  %v3683_v21 = vor.u32 %v3682_v42, %v3679_v15 }
 0x32c   : > { %v3839_v25 = vpop.f32.mrf.mxu2  ;;  %v16239_v29 = vrot.slane %v13554_v57, 1 }
 0x32d   : > { %v4905_v55 = vmax.f32 %v4857_v23, 0.0  ;;  %v13591_v16 = vadd.f32 %v3839_v25, %v13151_v0  ;;  %v4681_v62 = vpop.f32.mrf.mxu0  ;;  %v11542_v23 = vunpack.c.l.bf16 %v13594_v35 }
 0x32e   : > { %v4057_v28 = vpop.f32.mrf.mxu3 }
 0x32f   : > { %16450 = vst [vmem:[#allocation45_spill] sm:$0xff] %v13591_v16  ;;  %v4959_v24 = vsel %vm4841_vm6, %v4905_v55, 0.0  ;;  %v4171_v17 = vadd.f32 %v4057_v28, %v16451_v3  ;;  %v5297_v55 = vor.u32 %v5295_v13, %v5293_v36  ;;  %v4488_v28 = vsel %vm1288_vm3, %v4483_v43, %v4487_v12 }
 0x330   : > { %v5007_v18 = vpack.c.bf16 %v4959_v24, %v4959_v24  ;;  %v4339_v24 = vmax.f32 %v11539_v37, 0.0  ;;  %v4340_v45 = vmax.f32 %v11542_v23, 0.0  ;;  %v16452_v37 = vld [vmem:[#allocation37_spill] sm:$0xff]  ;;  %v16453_v23 = vld [vmem:[#allocation38_spill] sm:$0xff] }
 0x331   : > { %v4793_v0 = vadd.f32 %v4679_v2, %v4171_v17  ;;  %v13601_v25 = vld [vmem:[#allocation2 + $0x10] sm:$0xff] }
 0x332   : > { %5063 = vst.msk [vmem:[#allocation2 + $0x18] sm:$0xf] %vm5052_vm5, %v5007_v18  ;;  %v5299_v32 = vshll.u32 %v13601_v25, 16  ;;  %v5875_v39 = vrot.slane %v13601_v25, 1 }
 0x333   : > { %v4858_v59 = vadd.f32 %v13487_v33, %v4793_v0  ;;  %v3684_v0 = vsel %vm685_vm2, %v13557_v53, %v3683_v21 }
 0x334   : > { %v3841_v2 = vpop.f32.mrf.mxu2  ;;  %v5301_v15 = vrot.slane %v5299_v32, 1  ;;  %v13617_v42 = vsel %vm5871_vm9, %v16239_v29, %v5875_v39 }
 0x335   : > { %v4906_v54 = vmax.f32 %v4858_v59, 0.0  ;;  %v13612_v3 = vadd.f32 %v3841_v2, %v3268_v27  ;;  %v4684_v17 = vpop.f32.mrf.mxu0  ;;  %v3948_v27 = vpack.c.bf16 %v16453_v23, %v16452_v37  ;;  %v13629_v59 = vpack.c.bf16 %v4340_v45, %v4339_v24 }
 0x336   : > { %v4059_v18 = vpop.f32.mrf.mxu3  ;;  %v5302_v43 = vsel %vm1288_vm3, %v5297_v55, %v5301_v15  ;;  %v4489_v55 = vshrl.u32 %v13582_v34, 16  ;;  %v5303_v34 = vshrl.u32 %v13601_v25, 16 }
 0x337   : > { %v5008_v16 = vpack.c.bf16 %v4906_v54, %v4906_v54  ;;  %v4172_v36 = vadd.f32 %v4059_v18, %v13157_v7  ;;  %10291 = vmatmul.msk.bf16.gmra.mxu1 %vm5479_vm8, %v5302_v43 }
 0x338   : > { %10184 = vmatmul.msk.bf16.gmra.mxu0 %vm479_vm1, %v4488_v28  ;;  %v4493_v28 = vshll.u32 %v13629_v59, 16  ;;  %v4491_v43 = vor.u32 %v4489_v55, %v4487_v12 }
 0x339   : > { %5064 = vst.msk [vmem:[#allocation2 + $0x1c] sm:$0xf] %vm5052_vm5, %v5008_v16  ;;  %v4794_v13 = vadd.f32 %v4681_v62, %v4172_v36  ;;  %10146 = vmatmul.msk.bf16.gmra.mxu2 %vm479_vm1, %v3684_v0  ;;  %v11719_v16 = vld [vmem:[%s11856_s12 + $0x90] sm:$0xff]   ;;  %v11543_v0 = vunpack.c.h.bf16 %v13594_v35 }
 0x33a   : > { %v11546_v36 = vunpack.c.l.bf16 %v11719_v16  ;;  %v4495_v37 = vrot.slane %v4493_v28, 1 }
 0x33b   : > { %v4859_v53 = vadd.f32 %v13487_v33, %v4794_v13  ;;  %10159 = vmatmul.msk.bf16.gmra.mxu3 %vm479_vm1, %v3948_v27  ;;  %v3270_v27 = vadd.f32 %v13191_v5, %v13205_v31 }
 0x33c   : > { %v3844_v7 = vpop.f32.mrf.mxu2 }
 0x33d   : > { %v4907_v21 = vmax.f32 %v4859_v53, 0.0  ;;  %v13634_v32 = vadd.f32 %v3844_v7, %v13189_v38  ;;  %v4686_v2 = vpop.f32.mrf.mxu0  ;;  %v5305_v7 = vor.u32 %v5303_v34, %v5301_v15 }
 0x33e   : > { %v4062_v62 = vpop.f32.mrf.mxu3 }
 0x33f   : > { %v4961_v24 = vsel %vm4846_vm7, %v4907_v21, 0.0  ;;  %v4173_v45 = vadd.f32 %v4062_v62, %v13179_v19  ;;  %v4341_v21 = vmax.f32 %v11543_v0, 0.0  ;;  %v4496_v62 = vsel %vm1288_vm3, %v4491_v43, %v4495_v37 }
 0x340   : > { %v5009_v54 = vpack.c.bf16 %v4961_v24, %v4961_v24  ;;  %v13642_v18 = vld [vmem:[#allocation2 + $0x18] sm:$0xff] }
 0x341   : > { %v4795_v38 = vadd.f32 %v4684_v17, %v4173_v45  ;;  %v5307_v23 = vshll.u32 %v13642_v18, 16  ;;  %v5877_v13 = vrot.slane %v13642_v18, 1  ;;  %v4342_v17 = vmax.f32 %v11546_v36, 0.0 }
 0x342   : > { %5065 = vst.msk [vmem:[#allocation2 + $0x20] sm:$0xf] %vm5052_vm5, %v5009_v54  ;;  %v16454_v54 = vld [vmem:[#allocation44_spill] sm:$0xff] }
 0x343   : > { %v4860_v19 = vadd.f32 %v13487_v33, %v4795_v38  ;;  %v5309_v35 = vrot.slane %v5307_v23, 1  ;;  %v13656_v24 = vsel %vm5871_vm9, %v5875_v39, %v5877_v13  ;;  %v3949_v0 = vpack.c.bf16 %v13147_v9, %v16454_v54 }
 0x344   : > { %v3846_v53 = vpop.f32.mrf.mxu2  ;;  %v4376_v38 = vpack.c.bf16 %v4342_v17, %v4341_v21  ;;  %v4497_v9 = vshrl.u32 %v13629_v59, 16  ;;  %v5311_v59 = vshrl.u32 %v13642_v18, 16 }
 0x345   : > { %v4908_v12 = vmax.f32 %v4860_v19, 0.0  ;;  %v13652_v55 = vadd.f32 %v3846_v53, %v3270_v27  ;;  %v4689_v28 = vpop.f32.mrf.mxu0  ;;  %v5310_v31 = vsel %vm1288_vm3, %v5305_v7, %v5309_v35  ;;  %v11547_v7 = vunpack.c.h.bf16 %v11719_v16 }
 0x346   : > { %v4064_v5 = vpop.f32.mrf.mxu3  ;;  %v4501_v23 = vshll.u32 %v4376_v38, 16 }
 0x347   : > { %v4962_v45 = vsel %vm4841_vm6, %v4908_v12, 0.0  ;;  %v4174_v15 = vadd.f32 %v4064_v5, %v13194_v50  ;;  %10292 = vmatmul.msk.bf16.gmra.mxu1 %vm5479_vm8, %v5310_v31  ;;  %v13672_v50 = vld [vmem:[%s11856_s12 + $0x98] sm:$0xff]   ;;  %v4499_v12 = vor.u32 %v4497_v9, %v4495_v37 }
 0x348   : > { %v5010_v36 = vpack.c.bf16 %v4962_v45, %v4962_v45  ;;  %10185 = vmatmul.msk.bf16.gmra.mxu0 %vm479_vm1, %v4496_v62  ;;  %v4503_v62 = vrot.slane %v4501_v23, 1  ;;  %v4343_v45 = vmax.f32 %v11547_v7, 0.0 }
 0x349   : > { %v4796_v43 = vadd.f32 %v4686_v2, %v4174_v15  ;;  %10314 = vmatmul.msk.bf16.vlgmr.msrb.gmra.mxu2 %vm5479_vm8, %v13528_v51  ;;  %v11550_v51 = vunpack.c.l.bf16 %v13672_v50  ;;  %v3272_v15 = vadd.f32 %v13222_v30, %v13235_v11 }
 0x34a   : > { %5066 = vst.msk [vmem:[#allocation2 + $0x24] sm:$0xf] %vm5052_vm5, %v5010_v36  ;;  %v4504_v36 = vsel %vm1288_vm3, %v4499_v12, %v4503_v62 }
 0x34b   : > { %v4861_v39 = vadd.f32 %v13487_v33, %v4796_v43  ;;  %10160 = vmatmul.msk.bf16.gmra.mxu3 %vm479_vm1, %v3949_v0  ;;  %v5313_v0 = vor.u32 %v5311_v59, %v5309_v35 }
 0x34c   : > { %v3849_v34 = vpop.f32.mrf.mxu2 }
 0x34d   : > { %v4909_v27 = vmax.f32 %v4861_v39, 0.0  ;;  %v13676_v19 = vadd.f32 %v3849_v34, %v13220_v47  ;;  %v4691_v2 = vpop.f32.mrf.mxu0  ;;  %v4344_v47 = vmax.f32 %v11550_v51, 0.0  ;;  %v4505_v51 = vshrl.u32 %v4376_v38, 16 }
 0x34e   : > { %v4067_v53 = vpop.f32.mrf.mxu3 }
 0x34f   : > { %v5011_v21 = vpack.c.bf16 %v4909_v27, %v4909_v27  ;;  %v4175_v17 = vadd.f32 %v4067_v53, %v13212_v49  ;;  %v13695_v30 = vpack.c.bf16 %v4344_v47, %v4343_v45  ;;  %v3950_v53 = vpack.c.bf16 %v13185_v22, %v13149_v6 }
 0x350   : > { %v4507_v59 = vor.u32 %v4505_v51, %v4503_v62  ;;  %v3274_v62 = vadd.f32 %v13251_v8, %v13264_v56 }
 0x351   : > { %5067 = vst.msk [vmem:[#allocation2 + $0x28] sm:$0xf] %vm5052_vm5, %v5011_v21  ;;  %v4797_v5 = vadd.f32 %v4689_v28, %v4175_v17  ;;  %v13681_v31 = vld [vmem:[#allocation2 + $0x20] sm:$0xff] }
 0x352   : > { %v5315_v54 = vshll.u32 %v13681_v31, 16  ;;  %v5879_v49 = vrot.slane %v13681_v31, 1 }
 0x353   : > { %v4862_v16 = vadd.f32 %v13487_v33, %v4797_v5  ;;  %v13715_v5 = vld [vmem:[%s11856_s12 + $0xa0] sm:$0xff]  }
 0x354   : > { %v3851_v37 = vpop.f32.mrf.mxu2  ;;  %v5317_v34 = vrot.slane %v5315_v54, 1  ;;  %v13693_v9 = vsel %vm5871_vm9, %v5877_v13, %v5879_v49  ;;  %v11554_v54 = vunpack.c.l.bf16 %v13715_v5 }
 0x355   : > { %v4910_v28 = vmax.f32 %v4862_v16, 0.0  ;;  %v13690_v43 = vadd.f32 %v3851_v37, %v3272_v15  ;;  %v4694_v39 = vpop.f32.mrf.mxu0  ;;  %v11551_v15 = vunpack.c.h.bf16 %v13672_v50  ;;  %v13722_v37 = vld [vmem:[#allocation2 + $0x20] sm:$0xff] }
 0x356   : > { %v4069_v23 = vpop.f32.mrf.mxu3  ;;  %v5318_v35 = vsel %vm1288_vm3, %v5313_v0, %v5317_v34  ;;  %16455 = vst [vmem:[#allocation36_spill] sm:$0xff] %v13722_v37 }
 0x357   : > { %v4964_v11 = vsel %vm4846_vm7, %v4910_v28, 0.0  ;;  %v4176_v27 = vadd.f32 %v4069_v23, %v13225_v60  ;;  %10293 = vmatmul.msk.bf16.gmra.mxu1 %vm5479_vm8, %v5318_v35  ;;  %v4509_v60 = vshll.u32 %v13695_v30, 16  ;;  %v5319_v28 = vshrl.u32 %v13681_v31, 16 }
 0x358   : > { %v5012_v7 = vpack.c.bf16 %v4964_v11, %v4964_v11  ;;  %10186 = vmatmul.msk.bf16.gmra.mxu0 %vm479_vm1, %v4504_v36  ;;  %v4345_v11 = vmax.f32 %v11551_v15, 0.0 }
 0x359   : > { %v4798_v13 = vadd.f32 %v4691_v2, %v4176_v27  ;;  %10315 = vmatmul.msk.bf16.gmra.mxu2 %vm5479_vm8, %v13554_v57  ;;  %v4511_v45 = vrot.slane %v4509_v60, 1  ;;  %v5321_v35 = vor.u32 %v5319_v28, %v5317_v34 }
 0x35a   : > { %5068 = vst.msk [vmem:[#allocation2 + $0x2c] sm:$0xf] %vm5052_vm5, %v5012_v7  ;;  %v16238_v7 = vrot.slane %v13722_v37, 1 }
 0x35b   : > { %v4863_v21 = vadd.f32 %v13487_v33, %v4798_v13  ;;  %10161 = vmatmul.msk.bf16.gmra.mxu3 %vm479_vm1, %v3950_v53  ;;  %v4346_v53 = vmax.f32 %v11554_v54, 0.0  ;;  %v4513_v54 = vshrl.u32 %v13695_v30, 16 }
 0x35c   : > { %v3854_v17 = vpop.f32.mrf.mxu2 }
 0x35d   : > { %v4911_v6 = vmax.f32 %v4863_v21, 0.0  ;;  %v13712_v22 = vadd.f32 %v3854_v17, %v13249_v63  ;;  %v4696_v12 = vpop.f32.mrf.mxu0 }
 0x35e   : > { %v4072_v2 = vpop.f32.mrf.mxu3 }
 0x35f   : > { %v4965_v38 = vsel %vm4841_vm6, %v4911_v6, 0.0  ;;  %v4177_v47 = vadd.f32 %v4072_v2, %v13241_v20  ;;  %v4512_v20 = vsel %vm1288_vm3, %v4507_v59, %v4511_v45 }
 0x360   : > { %v5013_v16 = vpack.c.bf16 %v4965_v38, %v4965_v38  ;;  %v3951_v38 = vpack.c.bf16 %v13216_v1, %v13187_v48 }
 0x361   : > { %v4799_v63 = vadd.f32 %v4694_v39, %v4177_v47  ;;  %v13724_v0 = vld [vmem:[#allocation2 + $0x28] sm:$0xff]  ;;  %v13759_v47 = vpack.c.bf16 %v4346_v53, %v4345_v11 }
 0x362   : > { %v13726_v36 = vld [vmem:[#allocation2 + $0x28] sm:$0xff]  ;;  %5069 = vst.msk [vmem:[#allocation2 + $0x30] sm:$0xf] %vm5052_vm5, %v5013_v16  ;;  %v5323_v23 = vshll.u32 %v13724_v0, 16  ;;  %v5881_v39 = vrot.slane %v13724_v0, 1  ;;  %v5327_v53 = vshrl.u32 %v13724_v0, 16 }
 0x363   : > { %v4864_v50 = vadd.f32 %v13487_v33, %v4799_v63  ;;  %v8577_v8 = vrot.slane %v13726_v36, 1  ;;  %v4517_v63 = vshll.u32 %v13759_v47, 16 }
 0x364   : > { %v3856_v27 = vpop.f32.mrf.mxu2  ;;  %v5325_v60 = vrot.slane %v5323_v23, 1  ;;  %v13741_v21 = vsel %vm5871_vm9, %v5879_v49, %v5881_v39 }
 0x365   : > { %v4912_v56 = vmax.f32 %v4864_v50, 0.0  ;;  %v13738_v13 = vadd.f32 %v3856_v27, %v3274_v62  ;;  %v4699_v51 = vpop.f32.mrf.mxu0  ;;  %v13748_v34 = vsel %vm5871_vm9, %v16238_v7, %v8577_v8  ;;  %v4515_v27 = vor.u32 %v4513_v54, %v4511_v45 }
 0x366   : > { %v4074_v17 = vpop.f32.mrf.mxu3  ;;  %16456 = vst [vmem:[#allocation48_spill] sm:$0xff] %v13748_v34  ;;  %v5326_v59 = vsel %vm1288_vm3, %v5321_v35, %v5325_v60  ;;  %v4519_v35 = vrot.slane %v4517_v63, 1 }
 0x367   : > { %v5014_v6 = vpack.c.bf16 %v4912_v56, %v4912_v56  ;;  %v4178_v2 = vadd.f32 %v4074_v17, %v13254_v41  ;;  %10294 = vmatmul.msk.bf16.gmra.mxu1 %vm5479_vm8, %v5326_v59 }
 0x368   : > { %10187 = vmatmul.msk.bf16.gmra.mxu0 %vm479_vm1, %v4512_v20  ;;  %v11555_v20 = vunpack.c.h.bf16 %v13715_v5  ;;  %v4520_v54 = vsel %vm1288_vm3, %v4515_v27, %v4519_v35 }
 0x369   : > { %5070 = vst.msk [vmem:[#allocation2 + $0x34] sm:$0xf] %vm5052_vm5, %v5014_v6  ;;  %v4800_v49 = vadd.f32 %v4696_v12, %v4178_v2  ;;  %10316 = vmatmul.msk.bf16.gmra.mxu2 %vm5479_vm8, %v13601_v25  ;;  %v13769_v12 = vld [vmem:[%s11856_s12 + $0xa8] sm:$0xff]  }
 0x36a   : > { %v4347_v6 = vmax.f32 %v11555_v20, 0.0  ;;  %v16459_v20 = vld [vmem:[#allocation39_spill] sm:$0xff] }
 0x36b   : > { %v4865_v41 = vadd.f32 %v13487_v33, %v4800_v49  ;;  %10162 = vmatmul.msk.bf16.gmra.mxu3 %vm479_vm1, %v3951_v38  ;;  %v5329_v38 = vor.u32 %v5327_v53, %v5325_v60  ;;  %v16458_v60 = vld [vmem:[#allocation55_spill] sm:$0xff] }
 0x36c   : > { %v3859_v15 = vpop.f32.mrf.mxu2 }
 0x36d   : > { %v4913_v16 = vmax.f32 %v4865_v41, 0.0  ;;  %v13764_v48 = vadd.f32 %v3859_v15, %v13278_v46  ;;  %v4701_v1 = vpop.f32.mrf.mxu0  ;;  %v11558_v46 = vunpack.c.l.bf16 %v13769_v12 }
 0x36e   : > { %v4077_v62 = vpop.f32.mrf.mxu3 }
 0x36f   : > { %v4967_v25 = vsel %vm4846_vm7, %v4913_v16, 0.0  ;;  %v4179_v28 = vadd.f32 %v4077_v62, %v13270_v52  ;;  %v16457_v52 = vld [vmem:[#allocation54_spill] sm:$0xff] }
 0x370   : > { %v5015_v50 = vpack.c.bf16 %v4967_v25, %v4967_v25  ;;  %v13775_v23 = vld [vmem:[#allocation2 + $0x30] sm:$0xff]  ;;  %v3276_v17 = vadd.f32 %v16457_v52, %v13293_v61  ;;  %v4521_v52 = vshrl.u32 %v13759_v47, 16 }
 0x371   : > { %v13778_v11 = vld [vmem:[#allocation2 + $0x30] sm:$0xff]  ;;  %v4801_v30 = vadd.f32 %v4699_v51, %v4179_v28  ;;  %v5331_v56 = vshll.u32 %v13775_v23, 16  ;;  %v5883_v2 = vrot.slane %v13775_v23, 1  ;;  %v4348_v51 = vmax.f32 %v11558_v46, 0.0 }
 0x372   : > { %5071 = vst.msk [vmem:[#allocation2 + $0x38] sm:$0xf] %vm5052_vm5, %v5015_v50  ;;  %v8579_v45 = vrot.slane %v13778_v11, 1  ;;  %v16460_v50 = vld [vmem:[#allocation50_spill] sm:$0xff] }
 0x373   : > { %v4866_v5 = vadd.f32 %v13487_v33, %v4801_v30  ;;  %v5333_v49 = vrot.slane %v5331_v56, 1  ;;  %v13792_v63 = vsel %vm5871_vm9, %v5881_v39, %v5883_v2  ;;  %v3952_v46 = vpack.c.bf16 %v16460_v50, %v16459_v20  ;;  %v16465_v20 = vld [vmem:[#allocation17_spill] sm:$0xff] }
 0x374   : > { %v3861_v59 = vpop.f32.mrf.mxu2  ;;  %v13802_v30 = vpack.c.bf16 %v4348_v51, %v4347_v6  ;;  %v13807_v39 = vsel %vm5871_vm9, %v8577_v8, %v8579_v45  ;;  %v16462_v8 = vld [vmem:[#allocation19_spill] sm:$0xff]  ;;  %v16463_v51 = vld [vmem:[#allocation4_spill] sm:$0xff] }
 0x375   : > { %v4914_v41 = vmax.f32 %v4866_v5, 0.0  ;;  %v13788_v15 = vadd.f32 %v3861_v59, %v3276_v17  ;;  %v4704_v16 = vpop.f32.mrf.mxu0  ;;  %v5334_v62 = vsel %vm1288_vm3, %v5329_v38, %v5333_v49  ;;  %16461 = vst [vmem:[#allocation46_spill] sm:$0xff] %v13807_v39  ;;  %v13817_v5 = vld [vmem:[%s11856_s12 + $0xb0] sm:$0xff]  }
 0x376   : > { %v4079_v61 = vpop.f32.mrf.mxu3  ;;  %v4525_v17 = vshll.u32 %v13802_v30, 16 }
 0x377   : > { %v4968_v25 = vsel %vm4841_vm6, %v4914_v41, 0.0  ;;  %v4180_v28 = vadd.f32 %v4079_v61, %v16458_v60  ;;  %10295 = vmatmul.msk.bf16.gmra.mxu1 %vm5479_vm8, %v5334_v62  ;;  %v4523_v61 = vor.u32 %v4521_v52, %v4519_v35 }
 0x378   : > { %v5016_v11 = vpack.c.bf16 %v4968_v25, %v4968_v25  ;;  %10188 = vmatmul.msk.bf16.gmra.mxu0 %vm479_vm1, %v4520_v54  ;;  %v11562_v54 = vunpack.c.l.bf16 %v13817_v5  ;;  %v4527_v62 = vrot.slane %v4525_v17, 1 }
 0x379   : > { %v4802_v27 = vadd.f32 %v4701_v1, %v4180_v28  ;;  %10317 = vmatmul.msk.bf16.gmra.mxu2 %vm5479_vm8, %v13642_v18  ;;  %v11559_v18 = vunpack.c.h.bf16 %v13769_v12  ;;  %v16464_v28 = vld [vmem:[#allocation18_spill] sm:$0xff] }
 0x37a   : > { %5072 = vst.msk [vmem:[#allocation2 + $0x3c] sm:$0xf] %vm5052_vm5, %v5016_v11  ;;  %v3278_v50 = vadd.f32 %v16465_v20, %v16464_v28 }
 0x37b   : > { %v4867_v53 = vadd.f32 %v13487_v33, %v4802_v27  ;;  %10163 = vmatmul.msk.bf16.gmra.mxu3 %vm479_vm1, %v3952_v46  ;;  %v5335_v46 = vshrl.u32 %v13775_v23, 16  ;;  %v4349_v12 = vmax.f32 %v11559_v18, 0.0 }
 0x37c   : > { %v3864_v56 = vpop.f32.mrf.mxu2 }
 0x37d   : > { %v4915_v36 = vmax.f32 %v4867_v53, 0.0  ;;  %v13820_v6 = vadd.f32 %v3864_v56, %v16462_v8  ;;  %v4706_v1 = vpop.f32.mrf.mxu0  ;;  %v4350_v53 = vmax.f32 %v11562_v54, 0.0  ;;  %v5337_v52 = vor.u32 %v5335_v46, %v5333_v49 }
 0x37e   : > { %v4082_v59 = vpop.f32.mrf.mxu3 }
 0x37f   : > { %v5017_v38 = vpack.c.bf16 %v4915_v36, %v4915_v36  ;;  %v4181_v41 = vadd.f32 %v4082_v59, %v16463_v51 }
 0x381   : > { %5073 = vst.msk [vmem:[#allocation2 + $0x40] sm:$0xf] %vm5052_vm5, %v5017_v38  ;;  %v4803_v47 = vadd.f32 %v4704_v16, %v4181_v41  ;;  %v13826_v25 = vld [vmem:[#allocation2 + $0x38] sm:$0xff]  ;;  %v4528_v16 = vsel %vm1288_vm3, %v4523_v61, %v4527_v62  ;;  %v16469_v61 = vld [vmem:[#allocation6_spill] sm:$0xff] }
 0x382   : > { %v13828_v60 = vld [vmem:[#allocation2 + $0x38] sm:$0xff]  ;;  %v5339_v27 = vshll.u32 %v13826_v25, 16  ;;  %v5885_v35 = vrot.slane %v13826_v25, 1 }
 0x383   : > { %v4868_v11 = vadd.f32 %v13487_v33, %v4803_v47  ;;  %v8581_v17 = vrot.slane %v13828_v60, 1  ;;  %v16466_v41 = vld [vmem:[#allocation51_spill] sm:$0xff]  ;;  %v16467_v47 = vld [vmem:[#allocation52_spill] sm:$0xff] }
 0x384   : > { %v3866_v56 = vpop.f32.mrf.mxu2  ;;  %v5341_v38 = vrot.slane %v5339_v27, 1  ;;  %v13841_v18 = vsel %vm5871_vm9, %v5883_v2, %v5885_v35  ;;  %v3953_v54 = vpack.c.bf16 %v16467_v47, %v16466_v41 }
 0x385   : > { %v4916_v36 = vmax.f32 %v4868_v11, 0.0  ;;  %v13838_v8 = vadd.f32 %v3866_v56, %v3278_v50  ;;  %v4709_v59 = vpop.f32.mrf.mxu0  ;;  %v13846_v28 = vsel %vm5871_vm9, %v8579_v45, %v8581_v17  ;;  %v13852_v50 = vpack.c.bf16 %v4350_v53, %v4349_v12  ;;  %v16470_v56 = vld [vmem:[#allocation21_spill] sm:$0xff] }
 0x386   : > { %v4084_v51 = vpop.f32.mrf.mxu3  ;;  %16468 = vst [vmem:[#allocation47_spill] sm:$0xff] %v13846_v28  ;;  %v5342_v20 = vsel %vm1288_vm3, %v5337_v52, %v5341_v38  ;;  %v4529_v11 = vshrl.u32 %v13802_v30, 16  ;;  %v11563_v30 = vunpack.c.h.bf16 %v13817_v5 }
 0x387   : > { %v4970_v49 = vsel %vm4846_vm7, %v4916_v36, 0.0  ;;  %v4182_v60 = vadd.f32 %v4084_v51, %v16469_v61  ;;  %10296 = vmatmul.msk.bf16.gmra.mxu1 %vm5479_vm8, %v5342_v20  ;;  %v4533_v12 = vshll.u32 %v13852_v50, 16  ;;  %v16471_v51 = vld [vmem:[#allocation42_spill] sm:$0xff] }
 0x388   : > { %v5018_v46 = vpack.c.bf16 %v4970_v49, %v4970_v49  ;;  %10189 = vmatmul.msk.bf16.gmra.mxu0 %vm479_vm1, %v4528_v16  ;;  %v4531_v47 = vor.u32 %v4529_v11, %v4527_v62 }
 0x389   : > { %v4804_v2 = vadd.f32 %v4706_v1, %v4182_v60  ;;  %10318 = vmatmul.msk.bf16.gmra.mxu2 %vm5479_vm8, %v13681_v31  ;;  %v13867_v1 = vld [vmem:[%s11856_s12 + $0xb8] sm:$0xff]  }
 0x38a   : > { %5074 = vst.msk [vmem:[#allocation2 + $0x44] sm:$0xf] %vm5052_vm5, %v5018_v46  ;;  %v11566_v61 = vunpack.c.l.bf16 %v13867_v1 }
 0x38b   : > { %v4869_v45 = vadd.f32 %v13487_v33, %v4804_v2  ;;  %10164 = vmatmul.msk.bf16.gmra.mxu3 %vm479_vm1, %v3953_v54  ;;  %v4535_v54 = vrot.slane %v4533_v12, 1  ;;  %v16472_v2 = vld [vmem:[#allocation22_spill] sm:$0xff] }
 0x38c   : > { %v3869_v27 = vpop.f32.mrf.mxu2 }
 0x38d   : > { %v4917_v53 = vmax.f32 %v4869_v45, 0.0  ;;  %v13864_v52 = vadd.f32 %v3869_v27, %v16470_v56  ;;  %v4711_v16 = vpop.f32.mrf.mxu0  ;;  %v16473_v45 = vld [vmem:[#allocation56_spill] sm:$0xff]  ;;  %v4536_v5 = vsel %vm1288_vm3, %v4531_v47, %v4535_v54 }
 0x38e   : > { %v4087_v36 = vpop.f32.mrf.mxu3  ;;  %v3280_v27 = vadd.f32 %v16473_v45, %v16472_v2 }
 0x38f   : > { %v4971_v31 = vsel %vm4841_vm6, %v4917_v53, 0.0  ;;  %v4183_v41 = vadd.f32 %v4087_v36, %v16471_v51  ;;  %v5343_v53 = vshrl.u32 %v13826_v25, 16  ;;  %v4351_v36 = vmax.f32 %v11563_v30, 0.0 }
 0x390   : > { %v5019_v49 = vpack.c.bf16 %v4971_v31, %v4971_v31  ;;  %v4352_v31 = vmax.f32 %v11566_v61, 0.0 }
 0x391   : > { %v4805_v60 = vadd.f32 %v4709_v59, %v4183_v41  ;;  %v13874_v20 = vld [vmem:[#allocation2 + $0x40] sm:$0xff]  ;;  %v5345_v56 = vor.u32 %v5343_v53, %v5341_v38 }
 0x392   : > { %v13876_v46 = vld [vmem:[#allocation2 + $0x40] sm:$0xff]  ;;  %5075 = vst.msk [vmem:[#allocation2 + $0x48] sm:$0xf] %vm5052_vm5, %v5019_v49  ;;  %v5347_v11 = vshll.u32 %v13874_v20, 16  ;;  %v5887_v12 = vrot.slane %v13874_v20, 1 }
 0x393   : > { %v4870_v62 = vadd.f32 %v13487_v33, %v4805_v60  ;;  %v16240_v51 = vrot.slane %v13876_v46, 1  ;;  %v16476_v38 = vld [vmem:[#allocation8_spill] sm:$0xff]  ;;  %v16477_v53 = vld [vmem:[#allocation53_spill] sm:$0xff] }
 0x394   : > { %v3871_v59 = vpop.f32.mrf.mxu2  ;;  %v5349_v45 = vrot.slane %v5347_v11, 1  ;;  %v13890_v7 = vsel %vm5871_vm9, %v5885_v35, %v5887_v12 }
 0x395   : > { %v4918_v41 = vmax.f32 %v4870_v62, 0.0  ;;  %v13887_v2 = vadd.f32 %v3871_v59, %v3280_v27  ;;  %v4714_v49 = vpop.f32.mrf.mxu0  ;;  %16474 = vst [vmem:[#allocation32_spill] sm:$0xff] %v13890_v7  ;;  %v13895_v47 = vsel %vm5871_vm9, %v8581_v17, %v16240_v51  ;;  %v16478_v62 = vld [vmem:[#allocation40_spill] sm:$0xff]  ;;  %v13906_v17 = vpack.c.bf16 %v4352_v31, %v4351_v36  ;;  %v16479_v31 = vld [vmem:[#allocation43_spill] sm:$0xff] }
 0x396   : > { %v4089_v60 = vpop.f32.mrf.mxu3  ;;  %16475 = vst [vmem:[#allocation14_spill] sm:$0xff] %v13895_v47  ;;  %v5350_v61 = vsel %vm1288_vm3, %v5345_v56, %v5349_v45  ;;  %v3954_v27 = vpack.c.bf16 %v16478_v62, %v16477_v53  ;;  %v13910_v56 = vpop.f32.mrf.mxu1 }
 0x397   : > { %v5020_v29 = vpack.c.bf16 %v4918_v41, %v4918_v41  ;;  %v4184_v30 = vadd.f32 %v4089_v60, %v16476_v38  ;;  %10297 = vmatmul.msk.bf16.gmra.mxu1 %vm5479_vm8, %v5350_v61  ;;  %v13918_v38 = vld [vmem:[%s11856_s12 + $0xc0] sm:$0xff]   ;;  %v11567_v61 = vunpack.c.h.bf16 %v13867_v1 }
 0x398   : > { %10190 = vmatmul.msk.bf16.gmra.mxu0 %vm479_vm1, %v4536_v5 }
 0x399   : > { %5076 = vst.msk [vmem:[#allocation2 + $0x4c] sm:$0xf] %vm5052_vm5, %v5020_v29  ;;  %v4806_v35 = vadd.f32 %v4711_v16, %v4184_v30  ;;  %10319 = vmatmul.msk.bf16.gmra.mxu2 %vm5479_vm8, %v13724_v0  ;;  %v4537_v29 = vshrl.u32 %v13852_v50, 16  ;;  %v4541_v16 = vshll.u32 %v13906_v17, 16 }
 0x39b   : > { %v4871_v11 = vadd.f32 %v13487_v33, %v4806_v35  ;;  %10165 = vmatmul.msk.bf16.gmra.mxu3 %vm479_vm1, %v3954_v27  ;;  %v4539_v35 = vor.u32 %v4537_v29, %v4535_v54 }
 0x39c   : > { %v3874_v59 = vpop.f32.mrf.mxu2 }
 0x39d   : > { %v4919_v41 = vmax.f32 %v4871_v11, 0.0  ;;  %v13913_v60 = vadd.f32 %v3874_v59, %v13365_v40  ;;  %v4716_v5 = vpop.f32.mrf.mxu0  ;;  %v11570_v40 = vunpack.c.l.bf16 %v13918_v38  ;;  %v4543_v11 = vrot.slane %v4541_v16, 1 }
 0x39e   : > { %v4092_v0 = vpop.f32.mrf.mxu3  ;;  %v5351_v59 = vshrl.u32 %v13874_v20, 16 }
 0x39f   : > { %v4973_v36 = vsel %vm4846_vm7, %v4919_v41, 0.0  ;;  %v4185_v30 = vadd.f32 %v4092_v0, %v16479_v31  ;;  %v16480_v0 = vld [vmem:[#allocation25_spill] sm:$0xff]  ;;  %v4544_v34 = vsel %vm1288_vm3, %v4539_v35, %v4543_v11 }
 0x3a0   : > { %v5021_v53 = vpack.c.bf16 %v4973_v36, %v4973_v36  ;;  %v13924_v62 = vld [vmem:[#allocation2 + $0x48] sm:$0xff]  ;;  %v3282_v31 = vadd.f32 %v16480_v0, %v13380_v26  ;;  %v4353_v36 = vmax.f32 %v11567_v61, 0.0  ;;  %v5353_v28 = vor.u32 %v5351_v59, %v5349_v45  ;;  %v16484_v59 = vld [vmem:[#allocation15_spill] sm:$0xff] }
 0x3a1   : > { %v13927_v27 = vld [vmem:[#allocation2 + $0x48] sm:$0xff]  ;;  %v4807_v50 = vadd.f32 %v4714_v49, %v4185_v30  ;;  %v5355_v41 = vshll.u32 %v13924_v62, 16  ;;  %v16241_v51 = vrot.slane %v13924_v62, 1  ;;  %v4354_v49 = vmax.f32 %v11570_v40, 0.0 }
 0x3a2   : > { %5077 = vst.msk [vmem:[#allocation2 + $0x50] sm:$0xf] %vm5052_vm5, %v5021_v53  ;;  %v8585_v54 = vrot.slane %v13927_v27, 1  ;;  %v16482_v27 = vld [vmem:[#allocation10_spill] sm:$0xff] }
 0x3a3   : > { %v4872_v1 = vadd.f32 %v13487_v33, %v4807_v50  ;;  %v5357_v39 = vrot.slane %v5355_v41, 1  ;;  %v13945_v26 = vsel %vm5871_vm9, %v5887_v12, %v16241_v51  ;;  %v16483_v50 = vld [vmem:[#allocation41_spill] sm:$0xff]  ;;  %v13955_v35 = vpack.c.bf16 %v4354_v49, %v4353_v36 }
 0x3a4   : > { %v3876_v47 = vpop.f32.mrf.mxu2  ;;  %v13939_v30 = vpop.f32.mrf.mxu1  ;;  %16481 = vst [vmem:[#allocation49_spill] sm:$0xff] %v13945_v26  ;;  %v3955_v41 = vpack.c.bf16 %v16484_v59, %v16483_v50  ;;  %v16485_v12 = vrot.slane %v13876_v46, 1  ;;  %v13970_v49 = vld [vmem:[%s11856_s12 + $0xc8] sm:$0xff]  }
 0x3a5   : > { %v4920_v29 = vmax.f32 %v4872_v1, 0.0  ;;  %v13937_v16 = vadd.f32 %v3876_v47, %v3282_v31  ;;  %v4719_v53 = vpop.f32.mrf.mxu0  ;;  %v5358_v45 = vsel %vm1288_vm3, %v5353_v28, %v5357_v39  ;;  %v4549_v36 = vshll.u32 %v13955_v35, 16 }
 0x3a6   : > { %v4094_v61 = vpop.f32.mrf.mxu3  ;;  %v13960_v28 = vsel %vm5871_vm9, %v16485_v12, %v8585_v54  ;;  %v11574_v50 = vunpack.c.l.bf16 %v13970_v49  ;;  %v16488_v12 = vld [vmem:[#allocation31_spill] sm:$0xff] }
 0x3a7   : > { %v4974_v40 = vsel %vm4841_vm6, %v4920_v29, 0.0  ;;  %v4186_v47 = vadd.f32 %v4094_v61, %v16482_v27  ;;  %10298 = vmatmul.msk.bf16.gmra.mxu1 %vm5479_vm8, %v5358_v45  ;;  %16486 = vst [vmem:[#allocation37_spill] sm:$0xff] %v13960_v28  ;;  %v16487_v27 = vld [vmem:[#allocation26_spill] sm:$0xff]  ;;  %v4551_v59 = vrot.slane %v4549_v36, 1 }
 0x3a8   : > { %v5022_v0 = vpack.c.bf16 %v4974_v40, %v4974_v40  ;;  %10191 = vmatmul.msk.bf16.gmra.mxu0 %vm479_vm1, %v4544_v34  ;;  %v4545_v34 = vshrl.u32 %v13906_v17, 16  ;;  %v11571_v40 = vunpack.c.h.bf16 %v13918_v38 }
 0x3a9   : > { %v4808_v31 = vadd.f32 %v4716_v5, %v4186_v47  ;;  %10320 = vmatmul.msk.bf16.gmra.mxu2 %vm5479_vm8, %v13775_v23 }
 0x3aa   : > { %5078 = vst.msk [vmem:[#allocation2 + $0x54] sm:$0xf] %vm5052_vm5, %v5022_v0  ;;  %v4547_v17 = vor.u32 %v4545_v34, %v4543_v11  ;;  %v4355_v38 = vmax.f32 %v11571_v40, 0.0 }
 0x3ab   : > { %v4873_v1 = vadd.f32 %v13487_v33, %v4808_v31  ;;  %10166 = vmatmul.msk.bf16.gmra.mxu3 %vm479_vm1, %v3955_v41  ;;  %v16489_v31 = vld [vmem:[#allocation30_spill] sm:$0xff] }
 0x3ac   : > { %v3879_v29 = vpop.f32.mrf.mxu2  ;;  %v13975_v5 = vpop.f32.mrf.mxu1 }
 0x3ad   : > { %v4921_v46 = vmax.f32 %v4873_v1, 0.0  ;;  %v13973_v61 = vadd.f32 %v3879_v29, %v13402_v44  ;;  %v4721_v23 = vpop.f32.mrf.mxu0  ;;  %v3284_v1 = vadd.f32 %v16489_v31, %v16488_v12  ;;  %v5359_v29 = vshrl.u32 %v13924_v62, 16 }
 0x3ae   : > { %v4097_v45 = vpop.f32.mrf.mxu3 }
 0x3af   : > { %v5023_v33 = vpack.c.bf16 %v4921_v46, %v4921_v46  ;;  %v4187_v47 = vadd.f32 %v4097_v45, %v16487_v27  ;;  %v13991_v46 = vld [vmem:[%s16195_s2] ss:$0 sm:$0xff]  ;;  %v4552_v27 = vsel %vm1288_vm3, %v4547_v17, %v4551_v59 }
 0x3b1   : > { %5079 = vst.msk [vmem:[#allocation2 + $0x58] sm:$0xf] %vm5052_vm5, %v5023_v33  ;;  %v4809_v41 = vadd.f32 %v4719_v53, %v4187_v47  ;;  %v13981_v0 = vld [vmem:[#allocation2 + $0x50] sm:$0xff]  ;;  %v4356_v53 = vmax.f32 %v11574_v50, 0.0  ;;  %v5361_v33 = vor.u32 %v5359_v29, %v5357_v39  ;;  %v16493_v29 = vld [vmem:[#allocation16_spill] sm:$0xff] }
 0x3b2   : > { %v13983_v44 = vld [vmem:[#allocation2 + $0x50] sm:$0xff]  ;;  %v5363_v34 = vshll.u32 %v13981_v0, 16  ;;  %v16243_v36 = vrot.slane %v13981_v0, 1 }
 0x3b3   : > { %v4874_v11 = vadd.f32 %v13991_v46, %v4809_v41  ;;  %v8587_v47 = vrot.slane %v13983_v44, 1  ;;  %v16490_v41 = vrot.slane %v13924_v62, 1  ;;  %v16492_v39 = vld [vmem:[#allocation23_spill] sm:$0xff]  ;;  %v14018_v26 = vpack.c.bf16 %v4356_v53, %v4355_v38 }
 0x3b4   : > { %v3881_v45 = vpop.f32.mrf.mxu2  ;;  %v14000_v31 = vpop.f32.mrf.mxu1  ;;  %v5365_v28 = vrot.slane %v5363_v34, 1  ;;  %v3956_v17 = vpack.c.bf16 %v16493_v29, %v16492_v39  ;;  %v14035_v39 = vld [vmem:[%s11856_s12 + $0xd0] sm:$0xff]  }
 0x3b5   : > { %v4922_v12 = vmax.f32 %v4874_v11, 0.0  ;;  %v13998_v40 = vadd.f32 %v3881_v45, %v3284_v1  ;;  %v4724_v51 = vpop.f32.mrf.mxu0  ;;  %v14007_v50 = vsel %vm5871_vm9, %v16490_v41, %v16243_v36  ;;  %v14012_v44 = vsel %vm5871_vm9, %v8585_v54, %v8587_v47  ;;  %v16495_v11 = vld [vmem:[#allocation29_spill] sm:$0xff]  ;;  %v16497_v29 = vld [vmem:[#allocation7_spill] sm:$0xff] }
 0x3b6   : > { %16491 = vst [vmem:[#allocation38_spill] sm:$0xff] %v14007_v50  ;;  %v4099_v37 = vpop.f32.mrf.mxu3  ;;  %v5366_v34 = vsel %vm1288_vm3, %v5361_v33, %v5365_v28  ;;  %v4557_v38 = vshll.u32 %v14018_v26, 16 }
 0x3b7   : > { %16494 = vst [vmem:[#allocation44_spill] sm:$0xff] %v14012_v44  ;;  %v4976_v1 = vsel %vm4846_vm7, %v4922_v12, 0.0  ;;  %v4188_v45 = vadd.f32 %v4099_v37, %v16495_v11  ;;  %10299 = vmatmul.msk.bf16.gmra.mxu1 %vm5479_vm8, %v5366_v34  ;;  %v4553_v37 = vshrl.u32 %v13955_v35, 16  ;;  %v11578_v34 = vunpack.c.l.bf16 %v14035_v39 }
 0x3b8   : > { %v5024_v7 = vpack.c.bf16 %v4976_v1, %v4976_v1  ;;  %10192 = vmatmul.msk.bf16.gmra.mxu0 %vm479_vm1, %v4552_v27  ;;  %v4559_v35 = vrot.slane %v4557_v38, 1 }
 0x3b9   : > { %v4810_v41 = vadd.f32 %v4721_v23, %v4188_v45  ;;  %10321 = vmatmul.msk.bf16.gmra.mxu2 %vm5479_vm8, %v13826_v25  ;;  %v4555_v1 = vor.u32 %v4553_v37, %v4551_v59  ;;  %v11575_v45 = vunpack.c.h.bf16 %v13970_v49 }
 0x3ba   : > { %5080 = vst.msk [vmem:[#allocation2 + $0x5c] sm:$0xf] %vm5052_vm5, %v5024_v7 }
 0x3bb   : > { %v4875_v54 = vadd.f32 %v13991_v46, %v4810_v41  ;;  %10167 = vmatmul.msk.bf16.gmra.mxu3 %vm479_vm1, %v3956_v17  ;;  %v4560_v49 = vsel %vm1288_vm3, %v4555_v1, %v4559_v35 }
 0x3bc   : > { %v3884_v53 = vpop.f32.mrf.mxu2  ;;  %v14032_v27 = vpop.f32.mrf.mxu1 }
 0x3bd   : > { %v4923_v33 = vmax.f32 %v4875_v54, 0.0  ;;  %v14030_v12 = vadd.f32 %v3884_v53, %v13449_v10  ;;  %v4726_v23 = vpop.f32.mrf.mxu0  ;;  %v16498_v53 = vld [vmem:[#allocation13_spill] sm:$0xff] }
 0x3be   : > { %v4102_v25 = vpop.f32.mrf.mxu3  ;;  %v3286_v36 = vadd.f32 %v13910_v56, %v16498_v53 }
 0x3bf   : > { %16496 = vst [vmem:[#allocation54_spill] sm:$0xff] %v14030_v12  ;;  %v4977_v7 = vsel %vm4841_vm6, %v4923_v33, 0.0  ;;  %v4189_v17 = vadd.f32 %v4102_v25, %v16497_v29  ;;  %v5367_v33 = vshrl.u32 %v13981_v0, 16  ;;  %v4358_v29 = vmax.f32 %v11578_v34, 0.0 }
 0x3c0   : > { %v5025_v11 = vpack.c.bf16 %v4977_v7, %v4977_v7  ;;  %v4357_v7 = vmax.f32 %v11575_v45, 0.0 }
 0x3c1   : > { %v4811_v10 = vadd.f32 %v4724_v51, %v4189_v17  ;;  %v14042_v41 = vld [vmem:[#allocation2 + $0x58] sm:$0xff]  ;;  %v5369_v25 = vor.u32 %v5367_v33, %v5365_v28 }
 0x3c2   : > { %v14044_v54 = vld [vmem:[#allocation2 + $0x58] sm:$0xff]  ;;  %5081 = vst.msk [vmem:[#allocation2 + $0x60] sm:$0xf] %vm5052_vm5, %v5025_v11  ;;  %v5371_v37 = vshll.u32 %v14042_v41, 16  ;;  %v16245_v38 = vrot.slane %v14042_v41, 1 }
 0x3c3   : > { %v4876_v59 = vadd.f32 %v13991_v46, %v4811_v10  ;;  %v16244_v17 = vrot.slane %v14044_v54, 1  ;;  %v16499_v10 = vrot.slane %v13981_v0, 1 }
 0x3c4   : > { %v3886_v51 = vpop.f32.mrf.mxu2  ;;  %v14057_v11 = vpop.f32.mrf.mxu1  ;;  %v5373_v50 = vrot.slane %v5371_v37, 1  ;;  %v16504_v37 = vld [vmem:[#allocation5_spill] sm:$0xff] }
 0x3c5   : > { %v4924_v44 = vmax.f32 %v4876_v59, 0.0  ;;  %v14055_v56 = vadd.f32 %v3886_v51, %v3286_v36  ;;  %v4729_v53 = vpop.f32.mrf.mxu0  ;;  %v14064_v1 = vsel %vm5871_vm9, %v16499_v10, %v16245_v38  ;;  %v14069_v28 = vsel %vm5871_vm9, %v8587_v47, %v16244_v17  ;;  %v16502_v36 = vld [vmem:[#allocation35_spill] sm:$0xff] }
 0x3c6   : > { %16500 = vst [vmem:[#allocation55_spill] sm:$0xff] %v14064_v1  ;;  %v4104_v12 = vpop.f32.mrf.mxu3  ;;  %v5374_v33 = vsel %vm1288_vm3, %v5369_v25, %v5373_v50  ;;  %v16503_v59 = vld [vmem:[#allocation27_spill] sm:$0xff]  ;;  %v14080_v47 = vpack.c.bf16 %v4358_v29, %v4357_v7  ;;  %v16506_v29 = vld [vmem:[#allocation9_spill] sm:$0xff]  ;;  %v5375_v38 = vshrl.u32 %v14042_v41, 16 }
 0x3c7   : > { %16501 = vst [vmem:[#allocation39_spill] sm:$0xff] %v14069_v28  ;;  %v5026_v45 = vpack.c.bf16 %v4924_v44, %v4924_v44  ;;  %v4190_v34 = vadd.f32 %v4104_v12, %v16502_v36  ;;  %v3957_v51 = vpack.c.bf16 %v16504_v37, %v16503_v59  ;;  %10300 = vmatmul.msk.bf16.gmra.mxu1 %vm5479_vm8, %v5374_v33  ;;  %v11579_v37 = vunpack.c.h.bf16 %v14035_v39 }
 0x3c8   : > { %10193 = vmatmul.msk.bf16.gmra.mxu0 %vm479_vm1, %v4560_v49 }
 0x3c9   : > { %5082 = vst.msk [vmem:[#allocation2 + $0x64] sm:$0xf] %vm5052_vm5, %v5026_v45  ;;  %v4812_v10 = vadd.f32 %v4726_v23, %v4190_v34  ;;  %10322 = vmatmul.msk.bf16.gmra.mxu2 %vm5479_vm8, %v13874_v20  ;;  %v4561_v45 = vshrl.u32 %v14018_v26, 16  ;;  %v4565_v23 = vshll.u32 %v14080_v47, 16  ;;  %v4262_v34 = vld [vmem:[%s11856_s12 + $0xd8] sm:$0xf] }
 0x3cb   : > { %v4877_v44 = vadd.f32 %v13991_v46, %v4812_v10  ;;  %10168 = vmatmul.msk.bf16.gmra.mxu3 %vm479_vm1, %v3957_v51  ;;  %v4563_v17 = vor.u32 %v4561_v45, %v4559_v35  ;;  %v4567_v26 = vrot.slane %v4565_v23, 1  ;;  %v5377_v35 = vor.u32 %v5375_v38, %v5373_v50 }
 0x3cc   : > { %v5745_v12 = vpop.f32.mrf.mxu2  ;;  %v14084_v36 = vpop.f32.mrf.mxu1 }
 0x3cd   : > { %v4925_v25 = vmax.f32 %v4877_v44, 0.0  ;;  %v14087_v33 = vadd.f32 %v5745_v12, %v13939_v30  ;;  %v4731_v49 = vpop.f32.mrf.mxu0  ;;  %v4311_v44 = vunpack.c.l.bf16 %v4262_v34  ;;  %v4359_v34 = vmax.f32 %v11579_v37, 0.0 }
 0x3ce   : > { %v4107_v20 = vpop.f32.mrf.mxu3  ;;  %v16508_v37 = vrot.slane %v14042_v41, 1 }
 0x3cf   : > { %16505 = vst [vmem:[#allocation50_spill] sm:$0xff] %v14087_v33  ;;  %v4979_v7 = vsel %vm4846_vm7, %v4925_v25, 0.0  ;;  %v4191_v59 = vadd.f32 %v4107_v20, %v16506_v29  ;;  %v10601_v25 = vld [vmem:[%s16196_s3 + $0x14] sm:$0xf]  ;;  %v4360_v23 = vmax.f32 %v4311_v44, 0.0  ;;  %v16510_v44 = vld [vmem:[#allocation57_spill] sm:$0xff] }
 0x3d0   : > { %v5027_v51 = vpack.c.bf16 %v4979_v7, %v4979_v7  ;;  %v14096_v10 = vld [vmem:[#allocation2 + $0x60] sm:$0xff]  ;;  %v7345_v20 = vsel %vm5552_vm4, %v10601_v25, 0 }
 0x3d1   : > { %v14098_v30 = vld [vmem:[#allocation2 + $0x60] sm:$0xff]  ;;  %v4813_v12 = vadd.f32 %v4729_v53, %v4191_v59  ;;  %v5379_v28 = vshll.u32 %v14096_v10, 16  ;;  %v5895_v7 = vrot.slane %v14096_v10, 1  ;;  %7354 = vmatpush.bf16.msra.mxu2 %v7345_v20 }
 0x3d2   : > { %5083 = vst.msk [vmem:[#allocation2 + $0x68] sm:$0xf] %vm5052_vm5, %v5027_v51  ;;  %v8591_v29 = vrot.slane %v14098_v30, 1  ;;  %v16512_v20 = vld [vmem:[#allocation24_spill] sm:$0xff] }
 0x3d3   : > { %v4878_v39 = vadd.f32 %v13991_v46, %v4813_v12  ;;  %v5381_v45 = vrot.slane %v5379_v28, 1  ;;  %v4568_v12 = vsel %vm1288_vm3, %v4563_v17, %v4567_v26  ;;  %v14119_v25 = vsel %vm5871_vm9, %v16508_v37, %v5895_v7 }
 0x3d4   : > { %v5747_v53 = vpop.f32.mrf.mxu2  ;;  %v14110_v51 = vpop.f32.mrf.mxu1  ;;  %16509 = vst [vmem:[#allocation4_spill] sm:$0xff] %v14119_v25 }
 0x3d5   : > { %v4926_v59 = vmax.f32 %v4878_v39, 0.0  ;;  %v14113_v1 = vadd.f32 %v5747_v53, %v13975_v5  ;;  %v4734_v33 = vpop.f32.mrf.mxu0  ;;  %v5382_v38 = vsel %vm1288_vm3, %v5377_v35, %v5381_v45  ;;  %v16511_v39 = vld [vmem:[#allocation20_spill] sm:$0xff]  ;;  %v16513_v53 = vrot.slane %v14044_v54, 1 }
 0x3d6   : > { %v4109_v50 = vpop.f32.mrf.mxu3  ;;  %v3958_v5 = vpack.c.bf16 %v16512_v20, %v16511_v39  ;;  %v14134_v35 = vpack.c.bf16 %v4360_v23, %v4359_v34  ;;  %v4263_v23 = vld [vmem:[%s11856_s12 + $0xdc] sm:$0x1] }
 0x3d7   : > { %16507 = vst [vmem:[#allocation19_spill] sm:$0xff] %v14113_v1  ;;  %v4980_v28 = vsel %vm4841_vm6, %v4926_v59, 0.0  ;;  %v4192_v30 = vadd.f32 %v4109_v50, %v16510_v44  ;;  %v14130_v17 = vsel %vm5871_vm9, %v16513_v53, %v8591_v29  ;;  %10301 = vmatmul.msk.bf16.gmra.mxu1 %vm5479_vm8, %v5382_v38  ;;  %v4569_v50 = vshrl.u32 %v14080_v47, 16 }
 0x3d8   : > { %16514 = vst [vmem:[#allocation18_spill] sm:$0xff] %v14130_v17  ;;  %v5028_v1 = vpack.c.bf16 %v4980_v28, %v4980_v28  ;;  %10194 = vmatmul.msk.bf16.gmra.mxu0 %vm479_vm1, %v4568_v12  ;;  %v4573_v28 = vshll.u32 %v14134_v35, 16 }
 0x3d9   : > { %v4814_v37 = vadd.f32 %v4731_v49, %v4192_v30  ;;  %10323 = vmatmul.msk.bf16.gmra.mxu2 %vm5479_vm8, %v13924_v62  ;;  %v4571_v39 = vor.u32 %v4569_v50, %v4567_v26 }
 0x3da   : > { %5084 = vst.msk [vmem:[#allocation2 + $0x6c] sm:$0xf] %vm5052_vm5, %v5028_v1  ;;  %v16516_v1 = vld [vmem:[#allocation11_spill] sm:$0xff]  ;;  %v4575_v20 = vrot.slane %v4573_v28, 1 }
 0x3db   : > { %v4879_v59 = vadd.f32 %v13991_v46, %v4814_v37  ;;  %10169 = vmatmul.msk.bf16.gmra.mxu3 %vm479_vm1, %v3958_v5  ;;  %v4312_v5 = vunpack.c.l.bf16 %v4263_v23 }
 0x3dc   : > { %v5750_v54 = vpop.f32.mrf.mxu2  ;;  %v14143_v44 = vpop.f32.mrf.mxu1  ;;  %v4576_v26 = vsel %vm1288_vm3, %v4571_v39, %v4575_v20 }
 0x3dd   : > { %v4927_v38 = vmax.f32 %v4879_v59, 0.0  ;;  %v14146_v34 = vadd.f32 %v5750_v54, %v14000_v31  ;;  %v4736_v49 = vpop.f32.mrf.mxu0  ;;  %v5383_v59 = vshrl.u32 %v14096_v10, 16  ;;  %v4361_v50 = vmax.f32 %v4312_v5, 0.0 }
 0x3de   : > { %v4112_v62 = vpop.f32.mrf.mxu3 }
 0x3df   : > { %16515 = vst [vmem:[#allocation17_spill] sm:$0xff] %v14146_v34  ;;  %v5029_v12 = vpack.c.bf16 %v4927_v38, %v4927_v38  ;;  %v4193_v30 = vadd.f32 %v4112_v62, %v16516_v1  ;;  %v5385_v62 = vor.u32 %v5383_v59, %v5381_v45  ;;  %v16519_v59 = vld [vmem:[#allocation28_spill] sm:$0xff] }
 0x3e1   : > { %5085 = vst.msk [vmem:[#allocation2 + $0x70] sm:$0xf] %vm5052_vm5, %v5029_v12  ;;  %v4815_v47 = vadd.f32 %v4734_v33, %v4193_v30  ;;  %v14151_v53 = vld [vmem:[#allocation2 + $0x68] sm:$0xff] }
 0x3e2   : > { %v14153_v37 = vld [vmem:[#allocation2 + $0x68] sm:$0xff]  ;;  %v5387_v54 = vshll.u32 %v14151_v53, 16  ;;  %v5897_v38 = vrot.slane %v14151_v53, 1 }
 0x3e3   : > { %v4880_v31 = vadd.f32 %v13991_v46, %v4815_v47  ;;  %v8593_v28 = vrot.slane %v14153_v37, 1  ;;  %v16518_v37 = vld [vmem:[#allocation12_spill] sm:$0xff] }
 0x3e4   : > { %v5752_v17 = vpop.f32.mrf.mxu2  ;;  %v14161_v23 = vpop.f32.mrf.mxu1  ;;  %v5389_v30 = vrot.slane %v5387_v54, 1  ;;  %v14167_v47 = vsel %vm5871_vm9, %v5895_v7, %v5897_v38  ;;  %v4386_v7 = vpack.c.bf16 %v4361_v50, %v4361_v50 }
 0x3e5   : > { %v4928_v33 = vmax.f32 %v4880_v31, 0.0  ;;  %v14164_v12 = vadd.f32 %v5752_v17, %v14032_v27  ;;  %v4739_v1 = vpop.f32.mrf.mxu0  ;;  %v14170_v34 = vsel %vm5871_vm9, %v8591_v29, %v8593_v28  ;;  %v3959_v27 = vpack.c.bf16 %v16519_v59, %v16518_v37 }
 0x3e6   : > { %v4114_v25 = vpop.f32.mrf.mxu3  ;;  %16517 = vst [vmem:[#allocation51_spill] sm:$0xff] %v14170_v34  ;;  %v5390_v5 = vsel %vm1288_vm3, %v5385_v62, %v5389_v30  ;;  %v4581_v54 = vshll.u32 %v4386_v7, 16  ;;  %v5391_v7 = vshrl.u32 %v14151_v53, 16 }
 0x3e7   : > { %v4982_v45 = vsel %vm4846_vm7, %v4928_v33, 0.0  ;;  %v4194_v39 = vadd.f32 %v4114_v25, %v13566_v4  ;;  %10302 = vmatmul.msk.bf16.gmra.mxu1 %vm5479_vm8, %v5390_v5  ;;  %v4577_v25 = vshrl.u32 %v14134_v35, 16 }
 0x3e8   : > { %v5030_v17 = vpack.c.bf16 %v4982_v45, %v4982_v45  ;;  %10195 = vmatmul.msk.bf16.gmra.mxu0 %vm479_vm1, %v4576_v26  ;;  %v16520_v45 = vld [vmem:[#allocation45_spill] sm:$0xff]  ;;  %v4583_v59 = vrot.slane %v4581_v54, 1 }
 0x3e9   : > { %v4816_v31 = vadd.f32 %v4736_v49, %v4194_v39  ;;  %10324 = vmatmul.msk.bf16.gmra.mxu2 %vm5479_vm8, %v13981_v0  ;;  %v4579_v37 = vor.u32 %v4577_v25, %v4575_v20 }
 0x3ea   : > { %5086 = vst.msk [vmem:[#allocation2 + $0x74] sm:$0xf] %vm5052_vm5, %v5030_v17 }
 0x3eb   : > { %v4881_v29 = vadd.f32 %v13991_v46, %v4816_v31  ;;  %10170 = vmatmul.msk.bf16.gmra.mxu3 %vm479_vm1, %v3959_v27 }
 0x3ec   : > { %v5755_v4 = vpop.f32.mrf.mxu2  ;;  %v14186_v33 = vpop.f32.mrf.mxu1 }
 0x3ed   : > { %v4929_v62 = vmax.f32 %v4881_v29, 0.0  ;;  %v14189_v26 = vadd.f32 %v5755_v4, %v14057_v11  ;;  %v4741_v49 = vpop.f32.mrf.mxu0 }
 0x3ee   : > { %v4117_v50 = vpop.f32.mrf.mxu3 }
 0x3ef   : > { %v4983_v0 = vsel %vm4841_vm6, %v4929_v62, 0.0  ;;  %v4195_v39 = vadd.f32 %v4117_v50, %v16520_v45  ;;  %v5393_v62 = vor.u32 %v5391_v7, %v5389_v30  ;;  %v4584_v50 = vsel %vm1288_vm3, %v4579_v37, %v4583_v59  ;;  %v16522_v59 = vld [vmem:[#allocation34_spill] sm:$0xff] }
 0x3f0   : > { %v5031_v5 = vpack.c.bf16 %v4983_v0, %v4983_v0 }
 0x3f1   : > { %v4817_v27 = vadd.f32 %v4739_v1, %v4195_v39  ;;  %v14194_v17 = vld [vmem:[#allocation2 + $0x70] sm:$0xff] }
 0x3f2   : > { %v11007_v35 = vld [vmem:[#allocation2 + $0x70] sm:$0xff]  ;;  %5087 = vst.msk [vmem:[#allocation2 + $0x78] sm:$0xf] %vm5052_vm5, %v5031_v5  ;;  %v5395_v31 = vshll.u32 %v14194_v17, 16  ;;  %v5899_v29 = vrot.slane %v14194_v17, 1 }
 0x3f3   : > { %v4882_v11 = vadd.f32 %v13991_v46, %v4817_v27  ;;  %v8595_v20 = vrot.slane %v11007_v35, 1  ;;  %v16523_v35 = vld [vmem:[#allocation33_spill] sm:$0xff] }
 0x3f4   : > { %v5757_v4 = vpop.f32.mrf.mxu2  ;;  %v14202_v1 = vpop.f32.mrf.mxu1  ;;  %v5397_v45 = vrot.slane %v5395_v31, 1  ;;  %v14208_v39 = vsel %vm5871_vm9, %v5897_v38, %v5899_v29  ;;  %v3960_v7 = vpack.c.bf16 %v16523_v35, %v16522_v59  ;;  %v5399_v59 = vshrl.u32 %v14194_v17, 16 }
 0x3f5   : > { %v4930_v25 = vmax.f32 %v4882_v11, 0.0  ;;  %v14205_v54 = vadd.f32 %v5757_v4, %v14084_v36  ;;  %v4744_v0 = vpop.f32.mrf.mxu0  ;;  %v14211_v27 = vsel %vm5871_vm9, %v8593_v28, %v8595_v20 }
 0x3f6   : > { %v4119_v5 = vpop.f32.mrf.mxu3  ;;  %16521 = vst [vmem:[#allocation52_spill] sm:$0xff] %v14211_v27  ;;  %v5398_v37 = vsel %vm1288_vm3, %v5393_v62, %v5397_v45  ;;  %v10926_v27 = vld [vmem:[#allocation2 + $0xc] sm:$0xff] }
 0x3f7   : > { %v5032_v34 = vpack.c.bf16 %v4930_v25, %v4930_v25  ;;  %v4196_v30 = vadd.f32 %v4119_v5, %v13612_v3  ;;  %10303 = vmatmul.msk.bf16.gmra.mxu1 %vm5479_vm8, %v5398_v37 }
 0x3f8   : > { %10196 = vmatmul.msk.bf16.gmra.mxu0 %vm479_vm1, %v4584_v50  ;;  %v11728_v50 = vld [vmem:[#allocation2] sm:$0xf0] }
 0x3f9   : > { %5088 = vst.msk [vmem:[#allocation2 + $0x7c] sm:$0xf] %vm5052_vm5, %v5032_v34  ;;  %v4818_v36 = vadd.f32 %v4741_v49, %v4196_v30  ;;  %10325 = vmatmul.msk.bf16.gmra.mxu2 %vm5479_vm8, %v14042_v41  ;;  %v11729_v41 = vld [vmem:[#allocation2] sm:$0xe] }
 0x3fa   : > { %v11730_v35 = vor.u32 %v11729_v41, %v11728_v50 }
 0x3fb   : > { %v4883_v38 = vadd.f32 %v13991_v46, %v4818_v36  ;;  %10171 = vmatmul.msk.bf16.gmra.mxu3 %vm479_vm1, %v3960_v7 }
 0x3fc   : > { %v5760_v3 = vpop.f32.mrf.mxu2  ;;  %v14224_v11 = vpop.f32.mrf.mxu1 }
 0x3fd   : > { %v4931_v28 = vmax.f32 %v4883_v38, 0.0  ;;  %v14227_v31 = vadd.f32 %v5760_v3, %v14110_v51  ;;  %v4746_v4 = vpop.f32.mrf.mxu0  ;;  %v5401_v3 = vor.u32 %v5399_v59, %v5397_v45 }
 0x3fe   : > { %v4122_v62 = vpop.f32.mrf.mxu3 }
 0x3ff   : > { %v4985_v34 = vsel %vm4846_vm7, %v4931_v28, 0.0  ;;  %v4197_v49 = vadd.f32 %v4122_v62, %v13634_v32 }
 0x400   : > { %v5033_v25 = vpack.c.bf16 %v4985_v34, %v4985_v34  ;;  %v14232_v5 = vld [vmem:[#allocation2 + $0x78] sm:$0xff] }
 0x401   : > { %v11008_v30 = vld [vmem:[#allocation2 + $0x78] sm:$0xff]  ;;  %v4819_v37 = vadd.f32 %v4744_v0, %v4197_v49  ;;  %v5403_v51 = vshll.u32 %v14232_v5, 16  ;;  %v5901_v7 = vrot.slane %v14232_v5, 1 }
 0x402   : > { %5089 = vst.msk [vmem:[#allocation2 + $0x80] sm:$0xf] %vm5052_vm5, %v5033_v25  ;;  %v8597_v38 = vrot.slane %v11008_v30, 1  ;;  %v5872_v30 = vrot.slane %v11730_v35, 1 }
 0x403   : > { %v4884_v36 = vadd.f32 %v13991_v46, %v4819_v37  ;;  %v5405_v28 = vrot.slane %v5403_v51, 1  ;;  %v14240_v62 = vsel %vm5871_vm9, %v5899_v29, %v5901_v7 }
 0x404   : > { %v5762_v32 = vpop.f32.mrf.mxu2  ;;  %v14242_v0 = vpop.f32.mrf.mxu1  ;;  %v14248_v50 = vsel %vm5871_vm9, %v8595_v20, %v8597_v38  ;;  %v16525_v20 = vrot.slane %v13554_v57, 1 }
 0x405   : > { %v4932_v34 = vmax.f32 %v4884_v36, 0.0  ;;  %v14245_v49 = vadd.f32 %v5762_v32, %v14143_v44  ;;  %v4749_v25 = vpop.f32.mrf.mxu0  ;;  %16524 = vst [vmem:[#allocation6_spill] sm:$0xff] %v14248_v50  ;;  %v5406_v37 = vsel %vm1288_vm3, %v5401_v3, %v5405_v28 }
 0x406   : > { %v4124_v41 = vpop.f32.mrf.mxu3  ;;  %v5874_v51 = vsel %vm5871_vm9, %v5872_v30, %v16525_v20  ;;  %v5407_v30 = vshrl.u32 %v14232_v5, 16 }
 0x407   : > { %v4986_v45 = vsel %vm4841_vm6, %v4932_v34, 0.0  ;;  %v4198_v29 = vadd.f32 %v4124_v41, %v13652_v55  ;;  %10304 = vmatmul.msk.bf16.gmra.mxu1 %vm5479_vm8, %v5406_v37 }
 0x408   : > { %v5034_v59 = vpack.c.bf16 %v4986_v45, %v4986_v45  ;;  %10460 = vmatmul.msk.bf16.vlgmr.msrb.gmra.mxu0 %vm5479_vm8, %v10926_v27 }
 0x409   : > { %v4820_v44 = vadd.f32 %v4746_v4, %v4198_v29  ;;  %10326 = vmatmul.msk.bf16.gmra.mxu2 %vm5479_vm8, %v14096_v10 }
 0x40a   : > { %5090 = vst.msk [vmem:[#allocation2 + $0x84] sm:$0xf] %vm5052_vm5, %v5034_v59 }
 0x40b   : > { %v4885_v35 = vadd.f32 %v13991_v46, %v4820_v44  ;;  %10339 = vmatmul.msk.bf16.vlgmr.msra.gmra.mxu3 %vm5479_vm8, %v5874_v51  ;;  %v5409_v44 = vor.u32 %v5407_v30, %v5405_v28 }
 0x40c   : > { %v5765_v55 = vpop.f32.mrf.mxu2  ;;  %v14264_v32 = vpop.f32.mrf.mxu1 }
 0x40d   : > { %v4933_v36 = vmax.f32 %v4885_v35, 0.0  ;;  %v14267_v27 = vadd.f32 %v5765_v55, %v14161_v23  ;;  %v4751_v4 = vpop.f32.mrf.mxu0 }
 0x40e   : > { %v4127_v3 = vpop.f32.mrf.mxu3 }
 0x40f   : > { %v5035_v10 = vpack.c.bf16 %v4933_v36, %v4933_v36  ;;  %v4199_v34 = vadd.f32 %v4127_v3, %v13676_v19 }
 0x411   : > { %5091 = vst.msk [vmem:[#allocation2 + $0x88] sm:$0xf] %vm5052_vm5, %v5035_v10  ;;  %v4821_v57 = vadd.f32 %v4749_v25, %v4199_v34  ;;  %v14271_v41 = vld [vmem:[#allocation2 + $0x80] sm:$0xff]  ;;  %v10927_v10 = vld [vmem:[#allocation2 + $0x14] sm:$0xff] }
 0x412   : > { %v11009_v37 = vld [vmem:[#allocation2 + $0x80] sm:$0xff]  ;;  %v5411_v29 = vshll.u32 %v14271_v41, 16  ;;  %v5903_v23 = vrot.slane %v14271_v41, 1 }
 0x413   : > { %v4886_v45 = vadd.f32 %v13991_v46, %v4821_v57  ;;  %v8599_v20 = vrot.slane %v11009_v37, 1 }
 0x414   : > { %v5767_v59 = vpop.f32.mrf.mxu2  ;;  %v14277_v35 = vpop.f32.mrf.mxu1  ;;  %v5413_v55 = vrot.slane %v5411_v29, 1  ;;  %v14283_v36 = vsel %vm5871_vm9, %v5901_v7, %v5903_v23 }
 0x415   : > { %v4934_v51 = vmax.f32 %v4886_v45, 0.0  ;;  %v14280_v19 = vadd.f32 %v5767_v59, %v14186_v33  ;;  %v4754_v25 = vpop.f32.mrf.mxu0  ;;  %v14286_v34 = vsel %vm5871_vm9, %v8597_v38, %v8599_v20 }
 0x416   : > { %v4129_v3 = vpop.f32.mrf.mxu3  ;;  %16526 = vst [vmem:[#allocation21_spill] sm:$0xff] %v14286_v34  ;;  %v5414_v37 = vsel %vm1288_vm3, %v5409_v44, %v5413_v55 }
 0x417   : > { %v4988_v28 = vsel %vm4846_vm7, %v4934_v51, 0.0  ;;  %v4200_v57 = vadd.f32 %v4129_v3, %v13690_v43  ;;  %10305 = vmatmul.msk.bf16.gmra.mxu1 %vm5479_vm8, %v5414_v37 }
 0x418   : > { %v5036_v30 = vpack.c.bf16 %v4988_v28, %v4988_v28  ;;  %10461 = vmatmul.msk.bf16.gmra.mxu0 %vm5479_vm8, %v10927_v10 }
 0x419   : > { %v4822_v33 = vadd.f32 %v4751_v4, %v4200_v57  ;;  %10327 = vmatmul.msk.bf16.gmra.mxu2 %vm5479_vm8, %v14151_v53 }
 0x41a   : > { %5092 = vst.msk [vmem:[#allocation2 + $0x8c] sm:$0xf] %vm5052_vm5, %v5036_v30 }
 0x41b   : > { %v4887_v7 = vadd.f32 %v13991_v46, %v4822_v33  ;;  %10340 = vmatmul.msk.bf16.gmra.mxu3 %vm5479_vm8, %v13617_v42  ;;  %v5415_v42 = vshrl.u32 %v14271_v41, 16 }
 0x41c   : > { %v5770_v38 = vpop.f32.mrf.mxu2  ;;  %v14300_v45 = vpop.f32.mrf.mxu1 }
 0x41d   : > { %v4935_v43 = vmax.f32 %v4887_v7, 0.0  ;;  %v14303_v29 = vadd.f32 %v5770_v38, %v14202_v1  ;;  %v4756_v59 = vpop.f32.mrf.mxu0  ;;  %v5417_v33 = vor.u32 %v5415_v42, %v5413_v55 }
 0x41e   : > { %v4132_v44 = vpop.f32.mrf.mxu3 }
 0x41f   : > { %v4989_v4 = vsel %vm4841_vm6, %v4935_v43, 0.0  ;;  %v4201_v53 = vadd.f32 %v4132_v44, %v13712_v22 }
 0x420   : > { %v5037_v51 = vpack.c.bf16 %v4989_v4, %v4989_v4 }
 0x421   : > { %v4823_v3 = vadd.f32 %v4754_v25, %v4201_v53  ;;  %v14308_v10 = vld [vmem:[#allocation2 + $0x88] sm:$0xff] }
 0x422   : > { %v11010_v28 = vld [vmem:[#allocation2 + $0x88] sm:$0xff]  ;;  %5093 = vst.msk [vmem:[#allocation2 + $0x90] sm:$0xf] %vm5052_vm5, %v5037_v51  ;;  %v5419_v1 = vshll.u32 %v14308_v10, 16  ;;  %v5905_v37 = vrot.slane %v14308_v10, 1  ;;  %v10928_v51 = vld [vmem:[#allocation2 + $0x1c] sm:$0xff] }
 0x423   : > { %v4888_v57 = vadd.f32 %v13991_v46, %v4823_v3  ;;  %v8601_v7 = vrot.slane %v11010_v28, 1 }
 0x424   : > { %v5772_v30 = vpop.f32.mrf.mxu2  ;;  %v14315_v22 = vpop.f32.mrf.mxu1  ;;  %v5421_v44 = vrot.slane %v5419_v1, 1  ;;  %v14321_v4 = vsel %vm5871_vm9, %v5903_v23, %v5905_v37 }
 0x425   : > { %v4936_v38 = vmax.f32 %v4888_v57, 0.0  ;;  %v14318_v25 = vadd.f32 %v5772_v30, %v14224_v11  ;;  %v4759_v43 = vpop.f32.mrf.mxu0  ;;  %v14324_v3 = vsel %vm5871_vm9, %v8599_v20, %v8601_v7 }
 0x426   : > { %v4134_v53 = vpop.f32.mrf.mxu3  ;;  %16527 = vst [vmem:[#allocation42_spill] sm:$0xff] %v14324_v3  ;;  %v5422_v28 = vsel %vm1288_vm3, %v5417_v33, %v5421_v44 }
 0x427   : > { %v5038_v34 = vpack.c.bf16 %v4936_v38, %v4936_v38  ;;  %v4202_v55 = vadd.f32 %v4134_v53, %v13738_v13  ;;  %10306 = vmatmul.msk.bf16.gmra.mxu1 %vm5479_vm8, %v5422_v28 }
 0x428   : > { %10462 = vmatmul.msk.bf16.gmra.mxu0 %vm5479_vm8, %v10928_v51 }
 0x429   : > { %5094 = vst.msk [vmem:[#allocation2 + $0x94] sm:$0xf] %vm5052_vm5, %v5038_v34  ;;  %v4824_v11 = vadd.f32 %v4756_v59, %v4202_v55  ;;  %10328 = vmatmul.msk.bf16.gmra.mxu2 %vm5479_vm8, %v14194_v17 }
 0x42b   : > { %v4889_v23 = vadd.f32 %v13991_v46, %v4824_v11  ;;  %10341 = vmatmul.msk.bf16.gmra.mxu3 %vm5479_vm8, %v13656_v24  ;;  %v5423_v24 = vshrl.u32 %v14308_v10, 16 }
 0x42c   : > { %v5775_v20 = vpop.f32.mrf.mxu2  ;;  %v14336_v13 = vpop.f32.mrf.mxu1 }
 0x42d   : > { %v4937_v42 = vmax.f32 %v4889_v23, 0.0  ;;  %v14339_v57 = vadd.f32 %v5775_v20, %v14242_v0  ;;  %v4761_v1 = vpop.f32.mrf.mxu0  ;;  %v5425_v23 = vor.u32 %v5423_v24, %v5421_v44 }
 0x42e   : > { %v4137_v30 = vpop.f32.mrf.mxu3 }
 0x42f   : > { %v4991_v34 = vsel %vm4846_vm7, %v4937_v42, 0.0  ;;  %v4203_v59 = vadd.f32 %v4137_v30, %v13764_v48 }
 0x430   : > { %v5039_v17 = vpack.c.bf16 %v4991_v34, %v4991_v34  ;;  %v14344_v33 = vld [vmem:[#allocation2 + $0x90] sm:$0xff] }
 0x431   : > { %v11011_v38 = vld [vmem:[#allocation2 + $0x90] sm:$0xff]  ;;  %v4825_v53 = vadd.f32 %v4759_v43, %v4203_v59  ;;  %v5427_v51 = vshll.u32 %v14344_v33, 16  ;;  %v5907_v0 = vrot.slane %v14344_v33, 1 }
 0x432   : > { %5095 = vst.msk [vmem:[#allocation2 + $0x98] sm:$0xf] %vm5052_vm5, %v5039_v17  ;;  %v8603_v28 = vrot.slane %v11011_v38, 1  ;;  %v10929_v38 = vld [vmem:[#allocation2 + $0x24] sm:$0xff] }
 0x433   : > { %v4890_v55 = vadd.f32 %v13991_v46, %v4825_v53  ;;  %v5429_v20 = vrot.slane %v5427_v51, 1  ;;  %v14352_v48 = vsel %vm5871_vm9, %v5905_v37, %v5907_v0 }
 0x434   : > { %v5777_v11 = vpop.f32.mrf.mxu2  ;;  %v14354_v30 = vpop.f32.mrf.mxu1  ;;  %v14360_v59 = vsel %vm5871_vm9, %v8601_v7, %v8603_v28 }
 0x435   : > { %v4938_v42 = vmax.f32 %v4890_v55, 0.0  ;;  %v14357_v43 = vadd.f32 %v5777_v11, %v14264_v32  ;;  %v4764_v34 = vpop.f32.mrf.mxu0  ;;  %16528 = vst [vmem:[#allocation22_spill] sm:$0xff] %v14360_v59  ;;  %v5430_v53 = vsel %vm1288_vm3, %v5425_v23, %v5429_v20 }
 0x436   : > { %v4139_v17 = vpop.f32.mrf.mxu3 }
 0x437   : > { %v4992_v44 = vsel %vm4841_vm6, %v4938_v42, 0.0  ;;  %v4204_v37 = vadd.f32 %v4139_v17, %v13788_v15  ;;  %10307 = vmatmul.msk.bf16.gmra.mxu1 %vm5479_vm8, %v5430_v53 }
 0x438   : > { %v5040_v24 = vpack.c.bf16 %v4992_v44, %v4992_v44  ;;  %10463 = vmatmul.msk.bf16.gmra.mxu0 %vm5479_vm8, %v10929_v38 }
 0x439   : > { %v4826_v32 = vadd.f32 %v4761_v1, %v4204_v37  ;;  %10329 = vmatmul.msk.bf16.gmra.mxu2 %vm5479_vm8, %v14232_v5 }
 0x43a   : > { %5096 = vst.msk [vmem:[#allocation2 + $0x9c] sm:$0xf] %vm5052_vm5, %v5040_v24 }
 0x43b   : > { %v4891_v7 = vadd.f32 %v13991_v46, %v4826_v32  ;;  %10342 = vmatmul.msk.bf16.gmra.mxu3 %vm5479_vm8, %v13693_v9  ;;  %v5431_v9 = vshrl.u32 %v14344_v33, 16 }
 0x43c   : > { %v5780_v51 = vpop.f32.mrf.mxu2  ;;  %v14374_v11 = vpop.f32.mrf.mxu1 }
 0x43d   : > { %v4939_v55 = vmax.f32 %v4891_v7, 0.0  ;;  %v14377_v15 = vadd.f32 %v5780_v51, %v14277_v35  ;;  %v4766_v23 = vpop.f32.mrf.mxu0  ;;  %v5433_v32 = vor.u32 %v5431_v9, %v5429_v20 }
 0x43e   : > { %v4142_v42 = vpop.f32.mrf.mxu3 }
 0x43f   : > { %v5041_v1 = vpack.c.bf16 %v4939_v55, %v4939_v55  ;;  %v4205_v17 = vadd.f32 %v4142_v42, %v13820_v6 }
 0x441   : > { %5097 = vst.msk [vmem:[#allocation2 + $0xa0] sm:$0xf] %vm5052_vm5, %v5041_v1  ;;  %v4827_v5 = vadd.f32 %v4764_v34, %v4205_v17  ;;  %v14381_v53 = vld [vmem:[#allocation2 + $0x98] sm:$0xff] }
 0x442   : > { %v11012_v38 = vld [vmem:[#allocation2 + $0x98] sm:$0xff]  ;;  %v5435_v37 = vshll.u32 %v14381_v53, 16  ;;  %v5909_v35 = vrot.slane %v14381_v53, 1 }
 0x443   : > { %v4892_v44 = vadd.f32 %v13991_v46, %v4827_v5  ;;  %v8605_v7 = vrot.slane %v11012_v38, 1  ;;  %v10930_v5 = vld [vmem:[#allocation2 + $0x2c] sm:$0xff] }
 0x444   : > { %v5782_v24 = vpop.f32.mrf.mxu2  ;;  %v14387_v55 = vpop.f32.mrf.mxu1  ;;  %v5437_v42 = vrot.slane %v5435_v37, 1  ;;  %v14393_v1 = vsel %vm5871_vm9, %v5907_v0, %v5909_v35 }
 0x445   : > { %v4940_v51 = vmax.f32 %v4892_v44, 0.0  ;;  %v14390_v6 = vadd.f32 %v5782_v24, %v14300_v45  ;;  %v4769_v34 = vpop.f32.mrf.mxu0  ;;  %v14396_v59 = vsel %vm5871_vm9, %v8603_v28, %v8605_v7 }
 0x446   : > { %v4144_v17 = vpop.f32.mrf.mxu3  ;;  %16529 = vst [vmem:[#allocation56_spill] sm:$0xff] %v14396_v59  ;;  %v5438_v9 = vsel %vm1288_vm3, %v5433_v32, %v5437_v42 }
 0x447   : > { %v4994_v20 = vsel %vm4846_vm7, %v4940_v51, 0.0  ;;  %v4206_v38 = vadd.f32 %v4144_v17, %v13838_v8  ;;  %10308 = vmatmul.msk.bf16.gmra.mxu1 %vm5479_vm8, %v5438_v9 }
 0x448   : > { %v5042_v44 = vpack.c.bf16 %v4994_v20, %v4994_v20  ;;  %10464 = vmatmul.msk.bf16.gmra.mxu0 %vm5479_vm8, %v10930_v5 }
 0x449   : > { %v4828_v45 = vadd.f32 %v4766_v23, %v4206_v38  ;;  %10330 = vmatmul.msk.bf16.gmra.mxu2 %vm5479_vm8, %v14271_v41 }
 0x44a   : > { %5098 = vst.msk [vmem:[#allocation2 + $0xa4] sm:$0xf] %vm5052_vm5, %v5042_v44 }
 0x44b   : > { %v4893_v0 = vadd.f32 %v13991_v46, %v4828_v45  ;;  %10343 = vmatmul.msk.bf16.gmra.mxu3 %vm5479_vm8, %v13741_v21  ;;  %v5439_v21 = vshrl.u32 %v14381_v53, 16 }
 0x44c   : > { %v5785_v28 = vpop.f32.mrf.mxu2  ;;  %v14410_v37 = vpop.f32.mrf.mxu1 }
 0x44d   : > { %v4941_v8 = vmax.f32 %v4893_v0, 0.0  ;;  %v14413_v24 = vadd.f32 %v5785_v28, %v14315_v22  ;;  %v4771_v32 = vpop.f32.mrf.mxu0  ;;  %v5441_v0 = vor.u32 %v5439_v21, %v5437_v42 }
 0x44e   : > { %v4147_v51 = vpop.f32.mrf.mxu3 }
 0x44f   : > { %v4995_v23 = vsel %vm4841_vm6, %v4941_v8, 0.0  ;;  %v4207_v41 = vadd.f32 %v4147_v51, %v13864_v52 }
 0x450   : > { %v5043_v17 = vpack.c.bf16 %v4995_v23, %v4995_v23 }
 0x451   : > { %v4829_v5 = vadd.f32 %v4769_v34, %v4207_v41  ;;  %v14418_v20 = vld [vmem:[#allocation2 + $0xa0] sm:$0xff] }
 0x452   : > { %v11013_v38 = vld [vmem:[#allocation2 + $0xa0] sm:$0xff]  ;;  %5099 = vst.msk [vmem:[#allocation2 + $0xa8] sm:$0xf] %vm5052_vm5, %v5043_v17  ;;  %v5443_v22 = vshll.u32 %v14418_v20, 16  ;;  %v5911_v44 = vrot.slane %v14418_v20, 1 }
 0x453   : > { %v4894_v9 = vadd.f32 %v13991_v46, %v4829_v5  ;;  %v8607_v28 = vrot.slane %v11013_v38, 1  ;;  %v10931_v5 = vld [vmem:[#allocation2 + $0x34] sm:$0xff] }
 0x454   : > { %v5787_v45 = vpop.f32.mrf.mxu2  ;;  %v14425_v52 = vpop.f32.mrf.mxu1  ;;  %v5445_v23 = vrot.slane %v5443_v22, 1  ;;  %v14431_v41 = vsel %vm5871_vm9, %v5909_v35, %v5911_v44 }
 0x455   : > { %v4942_v8 = vmax.f32 %v4894_v9, 0.0  ;;  %v14428_v34 = vadd.f32 %v5787_v45, %v14336_v13  ;;  %v4774_v51 = vpop.f32.mrf.mxu0  ;;  %v14434_v59 = vsel %vm5871_vm9, %v8605_v7, %v8607_v28 }
 0x456   : > { %v4149_v17 = vpop.f32.mrf.mxu3  ;;  %16530 = vst [vmem:[#allocation8_spill] sm:$0xff] %v14434_v59  ;;  %v5446_v38 = vsel %vm1288_vm3, %v5441_v0, %v5445_v23 }
 0x457   : > { %v5044_v3 = vpack.c.bf16 %v4942_v8, %v4942_v8  ;;  %v4208_v42 = vadd.f32 %v4149_v17, %v13887_v2  ;;  %10309 = vmatmul.msk.bf16.gmra.mxu1 %vm5479_vm8, %v5446_v38 }
 0x458   : > { %10465 = vmatmul.msk.bf16.gmra.mxu0 %vm5479_vm8, %v10931_v5 }
 0x459   : > { %5100 = vst.msk [vmem:[#allocation2 + $0xac] sm:$0xf] %vm5052_vm5, %v5044_v3  ;;  %v4830_v13 = vadd.f32 %v4771_v32, %v4208_v42  ;;  %10331 = vmatmul.msk.bf16.gmra.mxu2 %vm5479_vm8, %v14308_v10 }
 0x45b   : > { %v4895_v35 = vadd.f32 %v13991_v46, %v4830_v13  ;;  %10344 = vmatmul.msk.bf16.gmra.mxu3 %vm5479_vm8, %v13792_v63  ;;  %v5447_v63 = vshrl.u32 %v14418_v20, 16 }
 0x45c   : > { %v5790_v7 = vpop.f32.mrf.mxu2  ;;  %v14446_v2 = vpop.f32.mrf.mxu1 }
 0x45d   : > { %v4943_v21 = vmax.f32 %v4895_v35, 0.0  ;;  %v14449_v9 = vadd.f32 %v5790_v7, %v14354_v30  ;;  %v4776_v22 = vpop.f32.mrf.mxu0  ;;  %v5449_v35 = vor.u32 %v5447_v63, %v5445_v23 }
 0x45e   : > { %v4152_v45 = vpop.f32.mrf.mxu3 }
 0x45f   : > { %v4997_v3 = vsel %vm4846_vm7, %v4943_v21, 0.0  ;;  %v4209_v32 = vadd.f32 %v4152_v45, %v13913_v60 }
 0x460   : > { %v5045_v10 = vpack.c.bf16 %v4997_v3, %v4997_v3  ;;  %v14454_v0 = vld [vmem:[#allocation2 + $0xa8] sm:$0xff] }
 0x461   : > { %v11014_v8 = vld [vmem:[#allocation2 + $0xa8] sm:$0xff]  ;;  %v4831_v17 = vadd.f32 %v4774_v51, %v4209_v32  ;;  %v5451_v5 = vshll.u32 %v14454_v0, 16  ;;  %v5913_v30 = vrot.slane %v14454_v0, 1 }
 0x462   : > { %5101 = vst.msk [vmem:[#allocation2 + $0xb0] sm:$0xf] %vm5052_vm5, %v5045_v10  ;;  %v8609_v38 = vrot.slane %v11014_v8, 1  ;;  %v10932_v8 = vld [vmem:[#allocation2 + $0x3c] sm:$0xff] }
 0x463   : > { %v4896_v42 = vadd.f32 %v13991_v46, %v4831_v17  ;;  %v5453_v7 = vrot.slane %v5451_v5, 1  ;;  %v14462_v60 = vsel %vm5871_vm9, %v5911_v44, %v5913_v30 }
 0x464   : > { %v5792_v13 = vpop.f32.mrf.mxu2  ;;  %v14464_v45 = vpop.f32.mrf.mxu1  ;;  %v14470_v32 = vsel %vm5871_vm9, %v8607_v28, %v8609_v38 }
 0x465   : > { %v4944_v21 = vmax.f32 %v4896_v42, 0.0  ;;  %v14467_v51 = vadd.f32 %v5792_v13, %v14374_v11  ;;  %v4779_v3 = vpop.f32.mrf.mxu0  ;;  %16531 = vst [vmem:[#allocation53_spill] sm:$0xff] %v14470_v32  ;;  %v5454_v17 = vsel %vm1288_vm3, %v5449_v35, %v5453_v7 }
 0x466   : > { %v4154_v10 = vpop.f32.mrf.mxu3 }
 0x467   : > { %v4998_v23 = vsel %vm4841_vm6, %v4944_v21, 0.0  ;;  %v4210_v44 = vadd.f32 %v4154_v10, %v13937_v16  ;;  %10310 = vmatmul.msk.bf16.gmra.mxu1 %vm5479_vm8, %v5454_v17 }
 0x468   : > { %v5046_v63 = vpack.c.bf16 %v4998_v23, %v4998_v23  ;;  %10466 = vmatmul.msk.bf16.gmra.mxu0 %vm5479_vm8, %v10932_v8  ;;  %v14497_v8 = vld [vmem:[%s16195_s2] ss:$0 sm:$0xff] }
 0x469   : > { %v4832_v11 = vadd.f32 %v4776_v22, %v4210_v44  ;;  %10332 = vmatmul.msk.bf16.gmra.mxu2 %vm5479_vm8, %v14344_v33 }
 0x46a   : > { %5102 = vst.msk [vmem:[#allocation2 + $0xb4] sm:$0xf] %vm5052_vm5, %v5046_v63 }
 0x46b   : > { %v4897_v28 = vadd.f32 %v13991_v46, %v4832_v11  ;;  %10345 = vmatmul.msk.bf16.gmra.mxu3 %vm5479_vm8, %v13841_v18  ;;  %v5455_v18 = vshrl.u32 %v14454_v0, 16 }
 0x46c   : > { %v5795_v5 = vpop.f32.mrf.mxu2  ;;  %v14484_v13 = vpop.f32.mrf.mxu1 }
 0x46d   : > { %v4945_v42 = vmax.f32 %v4897_v28, 0.0  ;;  %v14487_v16 = vadd.f32 %v5795_v5, %v14387_v55  ;;  %v4781_v35 = vpop.f32.mrf.mxu0  ;;  %v5457_v63 = vor.u32 %v5455_v18, %v5453_v7 }
 0x46e   : > { %v4157_v21 = vpop.f32.mrf.mxu3 }
 0x46f   : > { %v5047_v22 = vpack.c.bf16 %v4945_v42, %v4945_v42  ;;  %v4211_v10 = vadd.f32 %v4157_v21, %v13973_v61 }
 0x471   : > { %5103 = vst.msk [vmem:[#allocation2 + $0xb8] sm:$0xf] %vm5052_vm5, %v5047_v22  ;;  %v4833_v33 = vadd.f32 %v4779_v3, %v4211_v10  ;;  %v14491_v17 = vld [vmem:[#allocation2 + $0xb0] sm:$0xff] }
 0x472   : > { %v11015_v46 = vld [vmem:[#allocation2 + $0xb0] sm:$0xff]  ;;  %v5459_v23 = vshll.u32 %v14491_v17, 16  ;;  %v5915_v44 = vrot.slane %v14491_v17, 1 }
 0x473   : > { %v4898_v55 = vadd.f32 %v14497_v8, %v4833_v33  ;;  %v8611_v11 = vrot.slane %v11015_v46, 1  ;;  %v10933_v33 = vld [vmem:[#allocation2 + $0x44] sm:$0xff] }
 0x474   : > { %v5797_v61 = vpop.f32.mrf.mxu2  ;;  %v14502_v28 = vpop.f32.mrf.mxu1  ;;  %v5461_v21 = vrot.slane %v5459_v23, 1  ;;  %v14508_v22 = vsel %vm5871_vm9, %v5913_v30, %v5915_v44 }
 0x475   : > { %v4946_v3 = vmax.f32 %v4898_v55, 0.0  ;;  %v14505_v5 = vadd.f32 %v5797_v61, %v14410_v37  ;;  %v4784_v42 = vpop.f32.mrf.mxu0  ;;  %16532 = vst [vmem:[#allocation40_spill] sm:$0xff] %v14508_v22  ;;  %v14511_v32 = vsel %vm5871_vm9, %v8609_v38, %v8611_v11  ;;  %v16534_v38 = vld [vmem:[#allocation32_spill] sm:$0xff] }
 0x476   : > { %v4159_v10 = vpop.f32.mrf.mxu3  ;;  %16533 = vst [vmem:[#allocation43_spill] sm:$0xff] %v14511_v32  ;;  %v5462_v18 = vsel %vm1288_vm3, %v5457_v63, %v5461_v21 }
 0x477   : > { %v5000_v7 = vsel %vm4846_vm7, %v4946_v3, 0.0  ;;  %v4212_v46 = vadd.f32 %v4159_v10, %v13998_v40  ;;  %10311 = vmatmul.msk.bf16.gmra.mxu1 %vm5479_vm8, %v5462_v18 }
 0x478   : > { %v5048_v55 = vpack.c.bf16 %v5000_v7, %v5000_v7  ;;  %10467 = vmatmul.msk.bf16.gmra.mxu0 %vm5479_vm8, %v10933_v33  ;;  %v10626_v7 = vld [vmem:[%s16196_s3 + $0x18] sm:$0xf] }
 0x479   : > { %v4834_v37 = vadd.f32 %v4781_v35, %v4212_v46  ;;  %10333 = vmatmul.msk.bf16.gmra.mxu2 %vm5479_vm8, %v14381_v53  ;;  %v16535_v53 = vld [vmem:[#allocation54_spill] sm:$0xff]  ;;  %v7767_v18 = vsel %vm5552_vm4, %v10626_v7, 0 }
 0x47a   : > { %5104 = vst.msk [vmem:[#allocation2 + $0xbc] sm:$0xf] %vm5052_vm5, %v5048_v55  ;;  %7776 = vmatpush.bf16.msrb.mxu3 %v7767_v18 }
 0x47b   : > { %v4899_v30 = vadd.f32 %v14497_v8, %v4834_v37  ;;  %10346 = vmatmul.msk.bf16.gmra.mxu3 %vm5479_vm8, %v16534_v38 }
 0x47c   : > { %v5800_v23 = vpop.f32.mrf.mxu2  ;;  %v14525_v61 = vpop.f32.mrf.mxu1 }
 0x47d   : > { %v4947_v40 = vmax.f32 %v4899_v30, 0.0  ;;  %v14528_v63 = vadd.f32 %v5800_v23, %v14425_v52  ;;  %v4786_v3 = vpop.f32.mrf.mxu0  ;;  %v5463_v30 = vshrl.u32 %v14491_v17, 16 }
 0x47e   : > { %v4162_v10 = vpop.f32.mrf.mxu3 }
 0x47f   : > { %v5001_v35 = vsel %vm4841_vm6, %v4947_v40, 0.0  ;;  %v4213_v33 = vadd.f32 %v4162_v10, %v16535_v53  ;;  %v5465_v10 = vor.u32 %v5463_v30, %v5461_v21 }
 0x480   : > { %v5049_v46 = vpack.c.bf16 %v5001_v35, %v5001_v35 }
 0x481   : > { %v4835_v55 = vadd.f32 %v4784_v42, %v4213_v33  ;;  %v14537_v37 = vld [vmem:[#allocation2 + $0xb8] sm:$0xff] }
 0x482   : > { %v11016_v52 = vld [vmem:[#allocation2 + $0xb8] sm:$0xff]  ;;  %5105 = vst.msk [vmem:[#allocation2 + $0xc0] sm:$0xf] %vm5052_vm5, %v5049_v46  ;;  %v5467_v38 = vshll.u32 %v14537_v37, 16  ;;  %v5917_v23 = vrot.slane %v14537_v37, 1 }
 0x483   : > { %v4900_v14 = vadd.f32 %v14497_v8, %v4835_v55  ;;  %v8613_v35 = vrot.slane %v11016_v52, 1  ;;  %v10934_v55 = vld [vmem:[#allocation2 + $0x4c] sm:$0xff] }
 0x484   : > { %v5802_v40 = vpop.f32.mrf.mxu2  ;;  %v14544_v7 = vpop.f32.mrf.mxu1  ;;  %v5469_v18 = vrot.slane %v5467_v38, 1  ;;  %v14550_v46 = vsel %vm5871_vm9, %v5915_v44, %v5917_v23 }
 0x485   : > { %v4948_v53 = vmax.f32 %v4900_v14, 0.0  ;;  %v14547_v42 = vadd.f32 %v5802_v40, %v14446_v2  ;;  %v6427_v33 = vpop.f32.mrf.mxu0  ;;  %16536 = vst [vmem:[#allocation25_spill] sm:$0xff] %v14550_v46  ;;  %v14553_v59 = vsel %vm5871_vm9, %v8611_v11, %v8613_v35  ;;  %v10747_v2 = vld [vmem:[%s16196_s3 + $0x1c] sm:$0xf]  ;;  %v10864_v11 = vld [vmem:[%s16196_s3 + $0x20] sm:$0xf] }
 0x486   : > { %v4164_v32 = vpop.f32.mrf.mxu3  ;;  %16537 = vst [vmem:[#allocation10_spill] sm:$0xff] %v14553_v59  ;;  %v5470_v52 = vsel %vm1288_vm3, %v5465_v10, %v5469_v18  ;;  %v8389_v44 = vsel %vm5552_vm4, %v10747_v2, 0  ;;  %v16538_v40 = vld [vmem:[#allocation49_spill] sm:$0xff] }
 0x487   : > { %v5050_v50 = vpack.c.bf16 %v4948_v53, %v4948_v53  ;;  %v4214_v21 = vadd.f32 %v4164_v32, %v14055_v56  ;;  %10312 = vmatmul.msk.bf16.gmra.mxu1 %vm5479_vm8, %v5470_v52  ;;  %8398 = vmatpush.bf16.msra.mxu0 %v8389_v44  ;;  %v8696_v32 = vsel %vm5552_vm4, %v10864_v11, 0  ;;  %v16539_v44 = vld [vmem:[#allocation50_spill] sm:$0xff] }
 0x488   : > { %10468 = vmatmul.msk.bf16.gmra.mxu0 %vm5479_vm8, %v10934_v55  ;;  %8705 = vmatpush.bf16.msra.mxu1 %v8696_v32 }
 0x489   : > { %5106 = vst.msk [vmem:[#allocation2 + $0xc4] sm:$0xf] %vm5052_vm5, %v5050_v50  ;;  %v4836_v30 = vadd.f32 %v4786_v3, %v4214_v21  ;;  %10334 = vmatmul.msk.bf16.gmra.mxu2 %vm5479_vm8, %v14418_v20  ;;  %v5157_v56 = vld [vmem:[#allocation2 + $0xc0] sm:$0x1] }
 0x48a   : > { %v5257_v14 = vunpack.c.l.b16 %v5157_v56 }
 0x48b   : > { %v4901_v38 = vadd.f32 %v14497_v8, %v4836_v30  ;;  %10347 = vmatmul.msk.bf16.gmra.mxu3 %vm5479_vm8, %v16538_v40 }
 0x48c   : > { %v5805_v10 = vpop.f32.mrf.mxu2  ;;  %v5282_v53 = vpack.c.b16 %v5257_v14, %v5257_v14  ;;  %v14573_v52 = vpop.f32.mrf.mxu1 }
 0x48d   : > { %v4949_v55 = vmax.f32 %v4901_v38, 0.0  ;;  %v14576_v50 = vadd.f32 %v5805_v10, %v14464_v45  ;;  %v6429_v20 = vpop.f32.mrf.mxu0  ;;  %v6595_v45 = vld [vmem:[#allocation2 + $0xc] sm:$0xff]   ;;  %v5471_v10 = vshrl.u32 %v14537_v37, 16 }
 0x48e   : > { %v6005_v3 = vpop.f32.mrf.mxu3  ;;  %v5919_v21 = vrot.slane %v5282_v53, 1  ;;  %v5475_v8 = vshll.u32 %v5282_v53, 16  ;;  %v14587_v38 = vld [vmem:[#allocation2 + $0xc] sm:$0xf0]  ;;  %v6770_v59 = vshrl.u32 %v6595_v45, 16 }
 0x48f   : > { %v5003_v2 = vsel %vm4846_vm7, %v4949_v55, 0.0  ;;  %v6125_v11 = vadd.f32 %v6005_v3, %v16539_v44  ;;  %v10935_v44 = vld [vmem:[#allocation2 + $0x54] sm:$0xff] }
 0x490   : > { %v5051_v30 = vpack.c.bf16 %v5003_v2, %v5003_v2  ;;  %v14582_v56 = vsel %vm5871_vm9, %v5917_v23, %v5919_v21  ;;  %v11017_v32 = vld [vmem:[#allocation2 + $0xc0] sm:$0xff]  ;;  %v5477_v58 = vrot.slane %v5475_v8, 1  ;;  %v5473_v21 = vor.u32 %v5471_v10, %v5469_v18  ;;  %v14610_v18 = vld [vmem:[#allocation2 + $0x14] sm:$0xff] }
 0x491   : > { %16540 = vst [vmem:[#allocation41_spill] sm:$0xff] %v14582_v56  ;;  %v14584_v14 = vadd.f32 %v6427_v33, %v6125_v11  ;;  %v8615_v40 = vrot.slane %v11017_v32, 1  ;;  %v16542_v11 = vld [vmem:[#allocation19_spill] sm:$0xff] }
 0x492   : > { %5107 = vst.msk [vmem:[#allocation2 + $0xc8] sm:$0xf] %vm5052_vm5, %v5051_v30  ;;  %v5478_v32 = vsel %vm1288_vm3, %v5473_v21, %v5477_v58 }
 0x493   : > { %v14591_v3 = vsel %vm5871_vm9, %v8613_v35, %v8615_v40 }
 0x494   : > { %v5807_v55 = vpop.f32.mrf.mxu2  ;;  %16541 = vst [vmem:[#allocation15_spill] sm:$0xff] %v14591_v3  ;;  %v14593_v53 = vpop.f32.mrf.mxu1 }
 0x495   : > { %v14596_v23 = vadd.f32 %v5807_v55, %v14484_v13  ;;  %v6432_v33 = vpop.f32.mrf.mxu0  ;;  %v16544_v13 = vld [vmem:[#allocation38_spill] sm:$0xff] }
 0x496   : > { %v6007_v2 = vpop.f32.mrf.mxu3 }
 0x497   : > { %v6126_v30 = vadd.f32 %v6007_v2, %v16542_v11  ;;  %10313 = vmatmul.msk.bf16.gmra.mxu1 %vm5479_vm8, %v5478_v32  ;;  %v16547_v11 = vld [vmem:[#allocation17_spill] sm:$0xff]  ;;  %v6777_v32 = vshll.u32 %v14610_v18, 16 }
 0x498   : > { %10469 = vmatmul.msk.bf16.gmra.mxu0 %vm5479_vm8, %v10935_v44  ;;  %v6772_v44 = vshll.u32 %v6595_v45, 16 }
 0x499   : > { %10335 = vmatmul.msk.bf16.gmra.mxu2 %vm5479_vm8, %v14454_v0  ;;  %v14604_v35 = vadd.f32 %v6429_v20, %v6126_v30  ;;  %v14606_v8 = vld [vmem:[#allocation2 + $0xc8] sm:$0xff]  ;;  %v6779_v56 = vrot.slane %v6777_v32, 1 }
 0x49a   : > { %16543 = vst [vmem:[#allocation26_spill] sm:$0xff] %v14606_v8  ;;  %v16247_v55 = vrot.slane %v14606_v8, 1 }
 0x49b   : > { %10348 = vmatmul.msk.bf16.gmra.mxu3 %vm5479_vm8, %v16544_v13  ;;  %v6774_v13 = vrot.slane %v6772_v44, 1 }
 0x49c   : > { %v5810_v10 = vpop.f32.mrf.mxu2  ;;  %v14613_v58 = vpop.f32.mrf.mxu1  ;;  %v14621_v20 = vsel %vm5871_vm9, %v8615_v40, %v16247_v55  ;;  %v10936_v40 = vld [vmem:[#allocation2 + $0x5c] sm:$0xff] }
 0x49d   : > { %v14616_v21 = vadd.f32 %v5810_v10, %v14502_v28  ;;  %v6434_v2 = vpop.f32.mrf.mxu0  ;;  %16546 = vst [vmem:[#allocation30_spill] sm:$0xff] %v14621_v20  ;;  %v6775_v8 = vor.u32 %v6774_v13, %v6770_v59 }
 0x49e   : > { %v6010_v0 = vpop.f32.mrf.mxu3 }
 0x49f   : > { %16545 = vst [vmem:[#allocation31_spill] sm:$0xff] %v14616_v21  ;;  %v6127_v30 = vadd.f32 %v6010_v0, %v16547_v11  ;;  %v6780_v0 = vsel %vm1288_vm3, %v6775_v8, %v6779_v56 }
 0x4a1   : > { %v14625_v3 = vadd.f32 %v6432_v33, %v6127_v30  ;;  %v16548_v33 = vld [vmem:[#allocation55_spill] sm:$0xff] }
 0x4a4   : > { %v5812_v46 = vpop.f32.mrf.mxu2  ;;  %v14627_v28 = vpop.f32.mrf.mxu1 }
 0x4a5   : > { %v14630_v10 = vadd.f32 %v5812_v46, %v14525_v61  ;;  %v6437_v21 = vpop.f32.mrf.mxu0  ;;  %v14642_v61 = vld [vmem:[#allocation2 + $0x1c] sm:$0xff] }
 0x4a6   : > { %v6012_v22 = vpop.f32.mrf.mxu3  ;;  %v6785_v11 = vshll.u32 %v14642_v61, 16 }
 0x4a7   : > { %v6128_v55 = vadd.f32 %v6012_v22, %v14164_v12  ;;  %10577 = vmatmul.msk.bf16.vlgmr.msrb.gmra.mxu1 %vm5479_vm8, %v6780_v0 }
 0x4a8   : > { %10470 = vmatmul.msk.bf16.gmra.mxu0 %vm5479_vm8, %v10936_v40 }
 0x4a9   : > { %10336 = vmatmul.msk.bf16.gmra.mxu2 %vm5479_vm8, %v14491_v17  ;;  %v14638_v45 = vadd.f32 %v6434_v2, %v6128_v55  ;;  %v6781_v55 = vshrl.u32 %v14610_v18, 16  ;;  %v6787_v2 = vrot.slane %v6785_v11, 1 }
 0x4ab   : > { %10349 = vmatmul.msk.bf16.gmra.mxu3 %vm5479_vm8, %v16548_v33  ;;  %v10937_v33 = vld [vmem:[#allocation2 + $0x64] sm:$0xff] }
 0x4ac   : > { %v5815_v59 = vpop.f32.mrf.mxu2  ;;  %v14644_v46 = vpop.f32.mrf.mxu1 }
 0x4ad   : > { %v14647_v12 = vadd.f32 %v5815_v59, %v14544_v7  ;;  %v6439_v22 = vpop.f32.mrf.mxu0  ;;  %v6783_v7 = vor.u32 %v6781_v55, %v6779_v56  ;;  %v11779_v55 = vld [vmem:[#allocation2 + $0xc] sm:$0xe] }
 0x4ae   : > { %v6015_v8 = vpop.f32.mrf.mxu3 }
 0x4af   : > { %v6129_v44 = vadd.f32 %v6015_v8, %v14189_v26  ;;  %v6788_v26 = vsel %vm1288_vm3, %v6783_v7, %v6787_v2  ;;  %v16550_v8 = vld [vmem:[#allocation4_spill] sm:$0xff] }
 0x4b1   : > { %v14651_v17 = vadd.f32 %v6437_v21, %v6129_v44 }
 0x4b4   : > { %v5817_v30 = vpop.f32.mrf.mxu2  ;;  %v14654_v32 = vpop.f32.mrf.mxu1 }
 0x4b5   : > { %v14657_v13 = vadd.f32 %v5817_v30, %v14573_v52  ;;  %v6442_v40 = vpop.f32.mrf.mxu0  ;;  %v14669_v52 = vld [vmem:[#allocation2 + $0x24] sm:$0xff] }
 0x4b6   : > { %v6017_v0 = vpop.f32.mrf.mxu3 }
 0x4b7   : > { %16549 = vst [vmem:[#allocation23_spill] sm:$0xff] %v14657_v13  ;;  %v6130_v59 = vadd.f32 %v6017_v0, %v14205_v54  ;;  %10578 = vmatmul.msk.bf16.gmra.mxu1 %vm5479_vm8, %v6788_v26  ;;  %v11780_v0 = vor.u32 %v11779_v55, %v14587_v38 }
 0x4b8   : > { %10471 = vmatmul.msk.bf16.gmra.mxu0 %vm5479_vm8, %v10937_v33  ;;  %v6789_v33 = vshrl.u32 %v14642_v61, 16 }
 0x4b9   : > { %10337 = vmatmul.msk.bf16.gmra.mxu2 %vm5479_vm8, %v14537_v37  ;;  %v14665_v21 = vadd.f32 %v6439_v22, %v6130_v59  ;;  %v6793_v37 = vshll.u32 %v14669_v52, 16  ;;  %v7223_v13 = vrot.slane %v11780_v0, 1 }
 0x4bb   : > { %10350 = vmatmul.msk.bf16.gmra.mxu3 %vm5479_vm8, %v16550_v8  ;;  %v6795_v59 = vrot.slane %v6793_v37, 1  ;;  %v7224_v8 = vrot.slane %v14610_v18, 1 }
 0x4bc   : > { %v5820_v56 = vpop.f32.mrf.mxu2  ;;  %v14671_v44 = vpop.f32.mrf.mxu1 }
 0x4bd   : > { %v14674_v54 = vadd.f32 %v5820_v56, %v14593_v53  ;;  %v6444_v11 = vpop.f32.mrf.mxu0  ;;  %v7225_v18 = vsel %vm5871_vm9, %v7223_v13, %v7224_v8 }
 0x4be   : > { %v6020_v30 = vpop.f32.mrf.mxu3 }
 0x4bf   : > { %16551 = vst [vmem:[#allocation16_spill] sm:$0xff] %v14674_v54  ;;  %v6131_v7 = vadd.f32 %v6020_v30, %v14227_v31  ;;  %v6791_v54 = vor.u32 %v6789_v33, %v6787_v2  ;;  %v10938_v30 = vld [vmem:[#allocation2 + $0x6c] sm:$0xff] }
 0x4c1   : > { %v14678_v22 = vadd.f32 %v6442_v40, %v6131_v7  ;;  %v6796_v38 = vsel %vm1288_vm3, %v6791_v54, %v6795_v59 }
 0x4c4   : > { %v5822_v26 = vpop.f32.mrf.mxu2  ;;  %v14683_v20 = vpop.f32.mrf.mxu1 }
 0x4c5   : > { %v14686_v53 = vadd.f32 %v5822_v26, %v14613_v58  ;;  %v6447_v56 = vpop.f32.mrf.mxu0  ;;  %v14698_v58 = vld [vmem:[#allocation2 + $0x2c] sm:$0xff] }
 0x4c6   : > { %v6022_v31 = vpop.f32.mrf.mxu3  ;;  %v6801_v13 = vshll.u32 %v14698_v58, 16 }
 0x4c7   : > { %v6132_v40 = vadd.f32 %v6022_v31, %v14245_v49  ;;  %10579 = vmatmul.msk.bf16.gmra.mxu1 %vm5479_vm8, %v6796_v38  ;;  %v7226_v31 = vrot.slane %v14642_v61, 1 }
 0x4c8   : > { %10472 = vmatmul.msk.bf16.gmra.mxu0 %vm5479_vm8, %v10938_v30  ;;  %v6803_v26 = vrot.slane %v6801_v13, 1 }
 0x4c9   : > { %10602 = vmatmul.msk.bf16.vlgmr.msra.gmra.mxu2 %vm5479_vm8, %v7225_v18  ;;  %v14694_v55 = vadd.f32 %v6444_v11, %v6132_v40  ;;  %v6797_v11 = vshrl.u32 %v14669_v52, 16 }
 0x4cb   : > { %10351 = vmatmul.msk.bf16.gmra.mxu3 %vm5479_vm8, %v14167_v47  ;;  %v6799_v38 = vor.u32 %v6797_v11, %v6795_v59 }
 0x4cc   : > { %v5825_v2 = vpop.f32.mrf.mxu2  ;;  %v14700_v7 = vpop.f32.mrf.mxu1 }
 0x4cd   : > { %v14703_v49 = vadd.f32 %v5825_v2, %v14627_v28  ;;  %v6449_v54 = vpop.f32.mrf.mxu0  ;;  %v10939_v2 = vld [vmem:[#allocation2 + $0x74] sm:$0xff] }
 0x4ce   : > { %v6025_v37 = vpop.f32.mrf.mxu3 }
 0x4cf   : > { %v6133_v0 = vadd.f32 %v6025_v37, %v14267_v27  ;;  %v7227_v37 = vsel %vm5871_vm9, %v7224_v8, %v7226_v31 }
 0x4d1   : > { %v14707_v33 = vadd.f32 %v6447_v56, %v6133_v0  ;;  %v6804_v56 = vsel %vm1288_vm3, %v6799_v38, %v6803_v26 }
 0x4d4   : > { %v5827_v47 = vpop.f32.mrf.mxu2  ;;  %v14711_v30 = vpop.f32.mrf.mxu1 }
 0x4d5   : > { %v14714_v40 = vadd.f32 %v5827_v47, %v14644_v46  ;;  %v6452_v28 = vpop.f32.mrf.mxu0  ;;  %v14726_v46 = vld [vmem:[#allocation2 + $0x34] sm:$0xff] }
 0x4d6   : > { %v6027_v18 = vpop.f32.mrf.mxu3  ;;  %v6809_v8 = vshll.u32 %v14726_v46, 16 }
 0x4d7   : > { %v6134_v27 = vadd.f32 %v6027_v18, %v14280_v19  ;;  %10580 = vmatmul.msk.bf16.gmra.mxu1 %vm5479_vm8, %v6804_v56 }
 0x4d8   : > { %10473 = vmatmul.msk.bf16.gmra.mxu0 %vm5479_vm8, %v10939_v2  ;;  %v6811_v18 = vrot.slane %v6809_v8, 1  ;;  %v7228_v2 = vrot.slane %v14669_v52, 1 }
 0x4d9   : > { %10603 = vmatmul.msk.bf16.gmra.mxu2 %vm5479_vm8, %v7227_v37  ;;  %v14722_v61 = vadd.f32 %v6449_v54, %v6134_v27  ;;  %v6805_v54 = vshrl.u32 %v14698_v58, 16 }
 0x4db   : > { %10352 = vmatmul.msk.bf16.gmra.mxu3 %vm5479_vm8, %v14208_v39  ;;  %v6807_v37 = vor.u32 %v6805_v54, %v6803_v26 }
 0x4dc   : > { %v5830_v59 = vpop.f32.mrf.mxu2  ;;  %v14728_v0 = vpop.f32.mrf.mxu1 }
 0x4dd   : > { %v14731_v19 = vadd.f32 %v5830_v59, %v14654_v32  ;;  %v6454_v13 = vpop.f32.mrf.mxu0 }
 0x4de   : > { %v6030_v11 = vpop.f32.mrf.mxu3 }
 0x4df   : > { %16552 = vst [vmem:[#allocation29_spill] sm:$0xff] %v14731_v19  ;;  %v6135_v47 = vadd.f32 %v6030_v11, %v14303_v29  ;;  %v10940_v19 = vld [vmem:[#allocation2 + $0x7c] sm:$0xff]  ;;  %v7229_v11 = vsel %vm5871_vm9, %v7226_v31, %v7228_v2 }
 0x4e1   : > { %v14735_v38 = vadd.f32 %v6452_v28, %v6135_v47  ;;  %v6812_v28 = vsel %vm1288_vm3, %v6807_v37, %v6811_v18 }
 0x4e4   : > { %v5832_v39 = vpop.f32.mrf.mxu2  ;;  %v14739_v27 = vpop.f32.mrf.mxu1 }
 0x4e5   : > { %v14742_v56 = vadd.f32 %v5832_v39, %v14671_v44  ;;  %v6457_v32 = vpop.f32.mrf.mxu0  ;;  %v14754_v44 = vld [vmem:[#allocation2 + $0x3c] sm:$0xff] }
 0x4e6   : > { %v6032_v59 = vpop.f32.mrf.mxu3  ;;  %v6817_v31 = vshll.u32 %v14754_v44, 16 }
 0x4e7   : > { %v6136_v29 = vadd.f32 %v6032_v59, %v14318_v25  ;;  %10581 = vmatmul.msk.bf16.gmra.mxu1 %vm5479_vm8, %v6812_v28  ;;  %v7230_v59 = vrot.slane %v14698_v58, 1 }
 0x4e8   : > { %10474 = vmatmul.msk.bf16.gmra.mxu0 %vm5479_vm8, %v10940_v19  ;;  %v6819_v37 = vrot.slane %v6817_v31, 1 }
 0x4e9   : > { %10604 = vmatmul.msk.bf16.gmra.mxu2 %vm5479_vm8, %v7229_v11  ;;  %v14750_v52 = vadd.f32 %v6454_v13, %v6136_v29  ;;  %v6813_v13 = vshrl.u32 %v14726_v46, 16 }
 0x4eb   : > { %10353 = vmatmul.msk.bf16.gmra.mxu3 %vm5479_vm8, %v14240_v62  ;;  %v6815_v11 = vor.u32 %v6813_v13, %v6811_v18 }
 0x4ec   : > { %v5835_v26 = vpop.f32.mrf.mxu2  ;;  %v14756_v47 = vpop.f32.mrf.mxu1 }
 0x4ed   : > { %v14759_v25 = vadd.f32 %v5835_v26, %v14683_v20  ;;  %v6459_v8 = vpop.f32.mrf.mxu0 }
 0x4ee   : > { %v6035_v54 = vpop.f32.mrf.mxu3 }
 0x4ef   : > { %16553 = vst [vmem:[#allocation7_spill] sm:$0xff] %v14759_v25  ;;  %v6137_v19 = vadd.f32 %v6035_v54, %v14339_v57  ;;  %v10941_v25 = vld [vmem:[#allocation2 + $0x84] sm:$0xff]  ;;  %v7231_v54 = vsel %vm5871_vm9, %v7228_v2, %v7230_v59 }
 0x4f1   : > { %v14763_v39 = vadd.f32 %v6457_v32, %v6137_v19  ;;  %v6820_v32 = vsel %vm1288_vm3, %v6815_v11, %v6819_v37 }
 0x4f4   : > { %v5837_v62 = vpop.f32.mrf.mxu2  ;;  %v14767_v29 = vpop.f32.mrf.mxu1 }
 0x4f5   : > { %v14770_v28 = vadd.f32 %v5837_v62, %v14700_v7  ;;  %v6462_v20 = vpop.f32.mrf.mxu0  ;;  %v14782_v7 = vld [vmem:[#allocation2 + $0x44] sm:$0xff] }
 0x4f6   : > { %v6037_v26 = vpop.f32.mrf.mxu3  ;;  %v6825_v2 = vshll.u32 %v14782_v7, 16 }
 0x4f7   : > { %v6138_v57 = vadd.f32 %v6037_v26, %v14357_v43  ;;  %10582 = vmatmul.msk.bf16.gmra.mxu1 %vm5479_vm8, %v6820_v32  ;;  %v7232_v26 = vrot.slane %v14726_v46, 1 }
 0x4f8   : > { %10475 = vmatmul.msk.bf16.gmra.mxu0 %vm5479_vm8, %v10941_v25  ;;  %v6827_v11 = vrot.slane %v6825_v2, 1 }
 0x4f9   : > { %10605 = vmatmul.msk.bf16.gmra.mxu2 %vm5479_vm8, %v7231_v54  ;;  %v14778_v58 = vadd.f32 %v6459_v8, %v6138_v57  ;;  %v6821_v8 = vshrl.u32 %v14754_v44, 16 }
 0x4fb   : > { %10354 = vmatmul.msk.bf16.gmra.mxu3 %vm5479_vm8, %v14283_v36  ;;  %v6823_v54 = vor.u32 %v6821_v8, %v6819_v37 }
 0x4fc   : > { %v5840_v18 = vpop.f32.mrf.mxu2  ;;  %v14784_v19 = vpop.f32.mrf.mxu1 }
 0x4fd   : > { %v14787_v43 = vadd.f32 %v5840_v18, %v14711_v30  ;;  %v6464_v31 = vpop.f32.mrf.mxu0 }
 0x4fe   : > { %v6040_v13 = vpop.f32.mrf.mxu3 }
 0x4ff   : > { %16554 = vst [vmem:[#allocation13_spill] sm:$0xff] %v14787_v43  ;;  %v6139_v25 = vadd.f32 %v6040_v13, %v14377_v15  ;;  %v10942_v43 = vld [vmem:[#allocation2 + $0x8c] sm:$0xff]  ;;  %v7233_v13 = vsel %vm5871_vm9, %v7230_v59, %v7232_v26 }
 0x501   : > { %v14791_v62 = vadd.f32 %v6462_v20, %v6139_v25  ;;  %v6828_v20 = vsel %vm1288_vm3, %v6823_v54, %v6827_v11 }
 0x504   : > { %v5842_v36 = vpop.f32.mrf.mxu2  ;;  %v14795_v57 = vpop.f32.mrf.mxu1 }
 0x505   : > { %v14798_v32 = vadd.f32 %v5842_v36, %v14728_v0  ;;  %v6467_v30 = vpop.f32.mrf.mxu0  ;;  %v14810_v0 = vld [vmem:[#allocation2 + $0x4c] sm:$0xff] }
 0x506   : > { %v6042_v18 = vpop.f32.mrf.mxu3  ;;  %v6833_v59 = vshll.u32 %v14810_v0, 16 }
 0x507   : > { %v6140_v15 = vadd.f32 %v6042_v18, %v14390_v6  ;;  %10583 = vmatmul.msk.bf16.gmra.mxu1 %vm5479_vm8, %v6828_v20  ;;  %v7234_v18 = vrot.slane %v14754_v44, 1 }
 0x508   : > { %10476 = vmatmul.msk.bf16.gmra.mxu0 %vm5479_vm8, %v10942_v43  ;;  %v6835_v54 = vrot.slane %v6833_v59, 1 }
 0x509   : > { %10606 = vmatmul.msk.bf16.gmra.mxu2 %vm5479_vm8, %v7233_v13  ;;  %v14806_v46 = vadd.f32 %v6464_v31, %v6140_v15  ;;  %v6829_v31 = vshrl.u32 %v14782_v7, 16 }
 0x50b   : > { %10355 = vmatmul.msk.bf16.gmra.mxu3 %vm5479_vm8, %v14321_v4  ;;  %v6831_v13 = vor.u32 %v6829_v31, %v6827_v11 }
 0x50c   : > { %v5845_v37 = vpop.f32.mrf.mxu2  ;;  %v14812_v25 = vpop.f32.mrf.mxu1 }
 0x50d   : > { %v14815_v6 = vadd.f32 %v5845_v37, %v14739_v27  ;;  %v6469_v2 = vpop.f32.mrf.mxu0 }
 0x50e   : > { %v6045_v8 = vpop.f32.mrf.mxu3 }
 0x50f   : > { %16555 = vst [vmem:[#allocation35_spill] sm:$0xff] %v14815_v6  ;;  %v6141_v43 = vadd.f32 %v6045_v8, %v14413_v24  ;;  %v10943_v6 = vld [vmem:[#allocation2 + $0x94] sm:$0xff]  ;;  %v7235_v8 = vsel %vm5871_vm9, %v7232_v26, %v7234_v18 }
 0x511   : > { %v14819_v36 = vadd.f32 %v6467_v30, %v6141_v43  ;;  %v6836_v30 = vsel %vm1288_vm3, %v6831_v13, %v6835_v54 }
 0x514   : > { %v5847_v4 = vpop.f32.mrf.mxu2  ;;  %v14823_v15 = vpop.f32.mrf.mxu1 }
 0x515   : > { %v14826_v20 = vadd.f32 %v5847_v4, %v14756_v47  ;;  %v6472_v27 = vpop.f32.mrf.mxu0  ;;  %v14838_v47 = vld [vmem:[#allocation2 + $0x54] sm:$0xff] }
 0x516   : > { %v6047_v37 = vpop.f32.mrf.mxu3  ;;  %v6841_v26 = vshll.u32 %v14838_v47, 16 }
 0x517   : > { %v6142_v24 = vadd.f32 %v6047_v37, %v14428_v34  ;;  %10584 = vmatmul.msk.bf16.gmra.mxu1 %vm5479_vm8, %v6836_v30  ;;  %v7236_v37 = vrot.slane %v14782_v7, 1 }
 0x518   : > { %10477 = vmatmul.msk.bf16.gmra.mxu0 %vm5479_vm8, %v10943_v6  ;;  %v6843_v13 = vrot.slane %v6841_v26, 1 }
 0x519   : > { %10607 = vmatmul.msk.bf16.gmra.mxu2 %vm5479_vm8, %v7235_v8  ;;  %v14834_v44 = vadd.f32 %v6469_v2, %v6142_v24  ;;  %v6837_v2 = vshrl.u32 %v14810_v0, 16  ;;  %v7237_v7 = vsel %vm5871_vm9, %v7234_v18, %v7236_v37 }
 0x51b   : > { %10356 = vmatmul.msk.bf16.gmra.mxu3 %vm5479_vm8, %v14352_v48  ;;  %v6839_v8 = vor.u32 %v6837_v2, %v6835_v54 }
 0x51c   : > { %v5850_v11 = vpop.f32.mrf.mxu2  ;;  %v14840_v43 = vpop.f32.mrf.mxu1 }
 0x51d   : > { %v14843_v34 = vadd.f32 %v5850_v11, %v14767_v29  ;;  %v6474_v59 = vpop.f32.mrf.mxu0 }
 0x51e   : > { %v6050_v31 = vpop.f32.mrf.mxu3 }
 0x51f   : > { %16556 = vst [vmem:[#allocation27_spill] sm:$0xff] %v14843_v34  ;;  %v6143_v6 = vadd.f32 %v6050_v31, %v14449_v9  ;;  %v10944_v9 = vld [vmem:[#allocation2 + $0x9c] sm:$0xff]  ;;  %v6844_v31 = vsel %vm1288_vm3, %v6839_v8, %v6843_v13 }
 0x521   : > { %v14847_v4 = vadd.f32 %v6472_v27, %v6143_v6 }
 0x524   : > { %v5852_v48 = vpop.f32.mrf.mxu2  ;;  %v7049_v30 = vpop.f32.mrf.mxu1 }
 0x525   : > { %v14852_v24 = vadd.f32 %v5852_v48, %v14784_v19  ;;  %v6477_v29 = vpop.f32.mrf.mxu0  ;;  %v14855_v34 = vadd.f32 %v7049_v30, %v14584_v14  ;;  %v14867_v14 = vld [vmem:[#allocation2 + $0x5c] sm:$0xff] }
 0x526   : > { %v6052_v11 = vpop.f32.mrf.mxu3 }
 0x527   : > { %v6144_v27 = vadd.f32 %v6052_v11, %v14467_v51  ;;  %10585 = vmatmul.msk.bf16.gmra.mxu1 %vm5479_vm8, %v6844_v31 }
 0x528   : > { %10478 = vmatmul.msk.bf16.gmra.mxu0 %vm5479_vm8, %v10944_v9  ;;  %v7238_v9 = vrot.slane %v14810_v0, 1 }
 0x529   : > { %10608 = vmatmul.msk.bf16.gmra.mxu2 %vm5479_vm8, %v7237_v7  ;;  %v14863_v19 = vadd.f32 %v6474_v59, %v6144_v27  ;;  %v6849_v59 = vshll.u32 %v14867_v14, 16 }
 0x52a   : > { %v7239_v0 = vsel %vm5871_vm9, %v7236_v37, %v7238_v9 }
 0x52b   : > { %10357 = vmatmul.msk.bf16.gmra.mxu3 %vm5479_vm8, %v14393_v1  ;;  %v6845_v1 = vshrl.u32 %v14838_v47, 16  ;;  %v6851_v8 = vrot.slane %v6849_v59, 1 }
 0x52c   : > { %v5855_v54 = vpop.f32.mrf.mxu2  ;;  %v7051_v6 = vpop.f32.mrf.mxu1 }
 0x52d   : > { %v14870_v51 = vadd.f32 %v5855_v54, %v14795_v57  ;;  %v6479_v26 = vpop.f32.mrf.mxu0  ;;  %v14873_v48 = vadd.f32 %v7051_v6, %v14604_v35  ;;  %v6847_v7 = vor.u32 %v6845_v1, %v6843_v13 }
 0x52e   : > { %v6055_v2 = vpop.f32.mrf.mxu3 }
 0x52f   : > { %v6145_v18 = vadd.f32 %v6055_v2, %v14487_v16  ;;  %v10945_v16 = vld [vmem:[#allocation2 + $0xa4] sm:$0xff]  ;;  %v6852_v6 = vsel %vm1288_vm3, %v6847_v7, %v6851_v8 }
 0x531   : > { %v14877_v30 = vadd.f32 %v6477_v29, %v6145_v18 }
 0x534   : > { %v5857_v11 = vpop.f32.mrf.mxu2  ;;  %v7054_v27 = vpop.f32.mrf.mxu1 }
 0x535   : > { %v14882_v57 = vadd.f32 %v5857_v11, %v14812_v25  ;;  %v6482_v31 = vpop.f32.mrf.mxu0  ;;  %v14885_v54 = vadd.f32 %v7054_v27, %v14625_v3  ;;  %v14897_v3 = vld [vmem:[#allocation2 + $0x64] sm:$0xff] }
 0x536   : > { %v6057_v35 = vpop.f32.mrf.mxu3 }
 0x537   : > { %v6146_v29 = vadd.f32 %v6057_v35, %v14505_v5  ;;  %10586 = vmatmul.msk.bf16.gmra.mxu1 %vm5479_vm8, %v6852_v6  ;;  %v7240_v35 = vrot.slane %v14838_v47, 1 }
 0x538   : > { %10479 = vmatmul.msk.bf16.gmra.mxu0 %vm5479_vm8, %v10945_v16 }
 0x539   : > { %10609 = vmatmul.msk.bf16.gmra.mxu2 %vm5479_vm8, %v7239_v0  ;;  %v14893_v25 = vadd.f32 %v6479_v26, %v6146_v29  ;;  %v6857_v26 = vshll.u32 %v14897_v3, 16  ;;  %v7241_v47 = vsel %vm5871_vm9, %v7238_v9, %v7240_v35 }
 0x53b   : > { %10358 = vmatmul.msk.bf16.gmra.mxu3 %vm5479_vm8, %v14431_v41  ;;  %v6853_v41 = vshrl.u32 %v14867_v14, 16  ;;  %v6859_v27 = vrot.slane %v6857_v26, 1 }
 0x53c   : > { %v5860_v13 = vpop.f32.mrf.mxu2  ;;  %v7056_v2 = vpop.f32.mrf.mxu1 }
 0x53d   : > { %v14900_v5 = vadd.f32 %v5860_v13, %v14823_v15  ;;  %v6484_v18 = vpop.f32.mrf.mxu0  ;;  %v14903_v1 = vadd.f32 %v7056_v2, %v14638_v45  ;;  %v6855_v6 = vor.u32 %v6853_v41, %v6851_v8  ;;  %v9579_v2 = vld [vmem:[%s16198_s5] sm:$0x3] }
 0x53e   : > { %v6060_v59 = vpop.f32.mrf.mxu3 }
 0x53f   : > { %v6147_v37 = vadd.f32 %v6060_v59, %v14528_v63  ;;  %v10946_v63 = vld [vmem:[#allocation2 + $0xac] sm:$0xff]  ;;  %v6860_v13 = vsel %vm1288_vm3, %v6855_v6, %v6859_v27 }
 0x541   : > { %v14907_v11 = vadd.f32 %v6482_v31, %v6147_v37 }
 0x544   : > { %v5862_v7 = vpop.f32.mrf.mxu2  ;;  %v7059_v16 = vpop.f32.mrf.mxu1 }
 0x545   : > { %v14912_v15 = vadd.f32 %v5862_v7, %v14840_v43  ;;  %v6487_v29 = vpop.f32.mrf.mxu0  ;;  %v14915_v0 = vadd.f32 %v7059_v16, %v14651_v17  ;;  %v9677_v43 = vsel %vm552_vm0, %v9579_v2, 0 }
 0x546   : > { %v6062_v45 = vpop.f32.mrf.mxu3  ;;  %9686 = vmatpush.bf16.msrb.mxu2 %v9677_v43 }
 0x547   : > { %v6148_v31 = vadd.f32 %v6062_v45, %v14547_v42  ;;  %10587 = vmatmul.msk.bf16.gmra.mxu1 %vm5479_vm8, %v6860_v13  ;;  %v14931_v42 = vld [vmem:[#allocation2 + $0x6c] sm:$0xff] }
 0x548   : > { %10480 = vmatmul.msk.bf16.gmra.mxu0 %vm5479_vm8, %v10946_v63  ;;  %v7242_v63 = vrot.slane %v14867_v14, 1 }
 0x549   : > { %10610 = vmatmul.msk.bf16.gmra.mxu2 %vm5479_vm8, %v7241_v47  ;;  %v14927_v17 = vadd.f32 %v6484_v18, %v6148_v31  ;;  %v6865_v18 = vshll.u32 %v14931_v42, 16 }
 0x54a   : > { %v7243_v14 = vsel %vm5871_vm9, %v7240_v35, %v7242_v63  ;;  %v16559_v35 = vld [vmem:[#allocation31_spill] sm:$0xff] }
 0x54b   : > { %10359 = vmatmul.msk.bf16.gmra.mxu3 %vm5479_vm8, %v14462_v60  ;;  %v6861_v60 = vshrl.u32 %v14897_v3, 16  ;;  %v6867_v6 = vrot.slane %v6865_v18, 1 }
 0x54c   : > { %v7356_v8 = vpop.f32.mrf.mxu2  ;;  %v7061_v59 = vpop.f32.mrf.mxu1 }
 0x54d   : > { %v14934_v37 = vadd.f32 %v7356_v8, %v14855_v34  ;;  %v6489_v26 = vpop.f32.mrf.mxu0  ;;  %v14937_v9 = vadd.f32 %v7061_v59, %v14665_v21  ;;  %v6863_v2 = vor.u32 %v6861_v60, %v6859_v27  ;;  %v16557_v27 = vld [vmem:[#allocation40_spill] sm:$0xff] }
 0x54e   : > { %v6065_v41 = vpop.f32.mrf.mxu3 }
 0x54f   : > { %v6149_v7 = vadd.f32 %v6065_v41, %v14576_v50  ;;  %v10947_v50 = vld [vmem:[#allocation2 + $0xb4] sm:$0xff]  ;;  %v6868_v43 = vsel %vm1288_vm3, %v6863_v2, %v6867_v6 }
 0x551   : > { %v14941_v16 = vadd.f32 %v6487_v29, %v6149_v7 }
 0x554   : > { %v7358_v45 = vpop.f32.mrf.mxu2  ;;  %v7064_v31 = vpop.f32.mrf.mxu1 }
 0x555   : > { %v14946_v34 = vadd.f32 %v7358_v45, %v14873_v48  ;;  %v6492_v13 = vpop.f32.mrf.mxu0  ;;  %v14949_v47 = vadd.f32 %v7064_v31, %v14678_v22  ;;  %v14961_v22 = vld [vmem:[#allocation2 + $0x74] sm:$0xff]  ;;  %v6869_v31 = vshrl.u32 %v14931_v42, 16 }
 0x556   : > { %v6067_v21 = vpop.f32.mrf.mxu3 }
 0x557   : > { %v6150_v29 = vadd.f32 %v6067_v21, %v14596_v23  ;;  %10588 = vmatmul.msk.bf16.gmra.mxu1 %vm5479_vm8, %v6868_v43 }
 0x558   : > { %10481 = vmatmul.msk.bf16.gmra.mxu0 %vm5479_vm8, %v10947_v50  ;;  %v7244_v50 = vrot.slane %v14897_v3, 1 }
 0x559   : > { %10611 = vmatmul.msk.bf16.gmra.mxu2 %vm5479_vm8, %v7243_v14  ;;  %v14957_v48 = vadd.f32 %v6489_v26, %v6150_v29  ;;  %v6873_v26 = vshll.u32 %v14961_v22, 16  ;;  %v6871_v14 = vor.u32 %v6869_v31, %v6867_v6  ;;  %v16561_v6 = vld [vmem:[#allocation25_spill] sm:$0xff] }
 0x55a   : > { %v7245_v3 = vsel %vm5871_vm9, %v7242_v63, %v7244_v50 }
 0x55b   : > { %10360 = vmatmul.msk.bf16.gmra.mxu3 %vm5479_vm8, %v16557_v27  ;;  %v6875_v2 = vrot.slane %v6873_v26, 1 }
 0x55c   : > { %v7361_v8 = vpop.f32.mrf.mxu2  ;;  %v7066_v59 = vpop.f32.mrf.mxu1 }
 0x55d   : > { %v14964_v23 = vadd.f32 %v7361_v8, %v14885_v54  ;;  %v6494_v41 = vpop.f32.mrf.mxu0  ;;  %v14967_v18 = vadd.f32 %v7066_v59, %v14694_v55  ;;  %v10948_v8 = vld [vmem:[#allocation2 + $0xbc] sm:$0xff]  ;;  %v6876_v59 = vsel %vm1288_vm3, %v6871_v14, %v6875_v2 }
 0x55e   : > { %v6070_v7 = vpop.f32.mrf.mxu3 }
 0x55f   : > { %16558 = vst [vmem:[#allocation5_spill] sm:$0xff] %v14964_v23  ;;  %v6151_v60 = vadd.f32 %v6070_v7, %v16559_v35 }
 0x561   : > { %v14971_v45 = vadd.f32 %v6492_v13, %v6151_v60 }
 0x564   : > { %v7363_v21 = vpop.f32.mrf.mxu2  ;;  %v7069_v29 = vpop.f32.mrf.mxu1 }
 0x565   : > { %v14976_v54 = vadd.f32 %v7363_v21, %v14903_v1  ;;  %v6497_v43 = vpop.f32.mrf.mxu0  ;;  %v14979_v27 = vadd.f32 %v7069_v29, %v14707_v33  ;;  %v14991_v33 = vld [vmem:[#allocation2 + $0x7c] sm:$0xff]  ;;  %v6877_v29 = vshrl.u32 %v14961_v22, 16 }
 0x566   : > { %v6072_v55 = vpop.f32.mrf.mxu3 }
 0x567   : > { %16560 = vst [vmem:[#allocation9_spill] sm:$0xff] %v14976_v54  ;;  %v6152_v13 = vadd.f32 %v6072_v55, %v14630_v10  ;;  %10589 = vmatmul.msk.bf16.gmra.mxu1 %vm5479_vm8, %v6876_v59 }
 0x568   : > { %10482 = vmatmul.msk.bf16.gmra.mxu0 %vm5479_vm8, %v10948_v8  ;;  %v7246_v8 = vrot.slane %v14931_v42, 1 }
 0x569   : > { %10612 = vmatmul.msk.bf16.gmra.mxu2 %vm5479_vm8, %v7245_v3  ;;  %v14987_v1 = vadd.f32 %v6494_v41, %v6152_v13  ;;  %v6881_v41 = vshll.u32 %v14991_v33, 16  ;;  %v6879_v3 = vor.u32 %v6877_v29, %v6875_v2  ;;  %v11731_v2 = vld [vmem:[#allocation2 + $0x18] sm:$0xff]  }
 0x56a   : > { %v7247_v42 = vsel %vm5871_vm9, %v7244_v50, %v7246_v8 }
 0x56b   : > { %10361 = vmatmul.msk.bf16.gmra.mxu3 %vm5479_vm8, %v16561_v6  ;;  %v6883_v14 = vrot.slane %v6881_v41, 1 }
 0x56c   : > { %v7366_v7 = vpop.f32.mrf.mxu2  ;;  %v7071_v35 = vpop.f32.mrf.mxu1 }
 0x56d   : > { %v14994_v10 = vadd.f32 %v7366_v7, %v14915_v0  ;;  %v6499_v60 = vpop.f32.mrf.mxu0  ;;  %v14997_v31 = vadd.f32 %v7071_v35, %v14722_v61  ;;  %v16564_v7 = vld [vmem:[#allocation23_spill] sm:$0xff]  ;;  %v6884_v35 = vsel %vm1288_vm3, %v6879_v3, %v6883_v14 }
 0x56e   : > { %v6075_v26 = vpop.f32.mrf.mxu3 }
 0x56f   : > { %16562 = vst [vmem:[#allocation57_spill] sm:$0xff] %v14994_v10  ;;  %v6153_v63 = vadd.f32 %v6075_v26, %v14647_v12  ;;  %v10949_v12 = vld [vmem:[#allocation2 + $0xc4] sm:$0xff]  ;;  %v7248_v10 = vrot.slane %v14961_v22, 1 }
 0x570   : > { %v16565_v26 = vld [vmem:[#allocation41_spill] sm:$0xff] }
 0x571   : > { %v15001_v21 = vadd.f32 %v6497_v43, %v6153_v63  ;;  %v7249_v22 = vsel %vm5871_vm9, %v7246_v8, %v7248_v10 }
 0x574   : > { %v7368_v55 = vpop.f32.mrf.mxu2  ;;  %v7074_v13 = vpop.f32.mrf.mxu1 }
 0x575   : > { %v15006_v0 = vadd.f32 %v7368_v55, %v14937_v9  ;;  %v6502_v59 = vpop.f32.mrf.mxu0  ;;  %v15009_v6 = vadd.f32 %v7074_v13, %v14735_v38  ;;  %v15021_v38 = vld [vmem:[#allocation2 + $0x84] sm:$0xff]  ;;  %v8123_v13 = vshll.u32 %v11731_v2, 16 }
 0x576   : > { %v6077_v61 = vpop.f32.mrf.mxu3 }
 0x577   : > { %16563 = vst [vmem:[#allocation20_spill] sm:$0xff] %v15006_v0  ;;  %v6154_v43 = vadd.f32 %v6077_v61, %v16564_v7  ;;  %10590 = vmatmul.msk.bf16.gmra.mxu1 %vm5479_vm8, %v6884_v35  ;;  %v16567_v61 = vld [vmem:[#allocation16_spill] sm:$0xff]  ;;  %v8125_v35 = vrot.slane %v8123_v13, 1 }
 0x578   : > { %10483 = vmatmul.msk.bf16.gmra.mxu0 %vm5479_vm8, %v10949_v12  ;;  %v6889_v12 = vshll.u32 %v15021_v38, 16  ;;  %v11754_v7 = vld [vmem:[#allocation2 + $0x20] sm:$0xff] }
 0x579   : > { %10613 = vmatmul.msk.bf16.gmra.mxu2 %vm5479_vm8, %v7247_v42  ;;  %v15017_v9 = vadd.f32 %v6499_v60, %v6154_v43  ;;  %v8128_v43 = vshll.u32 %v11754_v7, 16 }
 0x57a   : > { %v6891_v0 = vrot.slane %v6889_v12, 1 }
 0x57b   : > { %10362 = vmatmul.msk.bf16.gmra.mxu3 %vm5479_vm8, %v16565_v26  ;;  %v6885_v26 = vshrl.u32 %v14991_v33, 16 }
 0x57c   : > { %v7371_v63 = vpop.f32.mrf.mxu2  ;;  %v7076_v41 = vpop.f32.mrf.mxu1 }
 0x57d   : > { %v15024_v29 = vadd.f32 %v7371_v63, %v14949_v47  ;;  %v6504_v55 = vpop.f32.mrf.mxu0  ;;  %v15027_v50 = vadd.f32 %v7076_v41, %v14750_v52  ;;  %v8121_v47 = vshrl.u32 %v11731_v2, 16  ;;  %v8130_v63 = vrot.slane %v8128_v43, 1 }
 0x57e   : > { %v6080_v3 = vpop.f32.mrf.mxu3 }
 0x57f   : > { %16566 = vst [vmem:[#allocation24_spill] sm:$0xff] %v15024_v29  ;;  %v6155_v60 = vadd.f32 %v6080_v3, %v16567_v61  ;;  %v6887_v3 = vor.u32 %v6885_v26, %v6883_v14  ;;  %v8126_v61 = vor.u32 %v8125_v35, %v8121_v47 }
 0x581   : > { %v15031_v42 = vadd.f32 %v6502_v59, %v6155_v60  ;;  %v6892_v60 = vsel %vm1288_vm3, %v6887_v3, %v6891_v0  ;;  %v8131_v2 = vsel %vm1288_vm3, %v8126_v61, %v8130_v63  ;;  %v6893_v3 = vshrl.u32 %v15021_v38, 16 }
 0x584   : > { %v7373_v29 = vpop.f32.mrf.mxu2  ;;  %v7079_v54 = vpop.f32.mrf.mxu1 }
 0x585   : > { %v15036_v52 = vadd.f32 %v7373_v29, %v14967_v18  ;;  %v6507_v41 = vpop.f32.mrf.mxu0  ;;  %v15039_v13 = vadd.f32 %v7079_v54, %v14763_v39  ;;  %v10973_v18 = vld [vmem:[#allocation2 + $0x18] sm:$0xff]  ;;  %v15051_v39 = vld [vmem:[#allocation2 + $0x8c] sm:$0xff] }
 0x586   : > { %v6082_v23 = vpop.f32.mrf.mxu3  ;;  %v6897_v35 = vshll.u32 %v15051_v39, 16 }
 0x587   : > { %v6156_v59 = vadd.f32 %v6082_v23, %v14686_v53  ;;  %10591 = vmatmul.msk.bf16.gmra.mxu1 %vm5479_vm8, %v6892_v60 }
 0x588   : > { %10840 = vmatmul.msk.bf16.vlgmr.msra.gmra.mxu0 %vm5479_vm8, %v8131_v2  ;;  %v6899_v61 = vrot.slane %v6897_v35, 1  ;;  %v7250_v2 = vrot.slane %v14991_v33, 1 }
 0x589   : > { %10614 = vmatmul.msk.bf16.gmra.mxu2 %vm5479_vm8, %v7249_v22  ;;  %v15048_v14 = vadd.f32 %v6504_v55, %v6156_v59  ;;  %v11755_v55 = vld [vmem:[#allocation2 + $0x28] sm:$0xff]  ;;  %v8132_v59 = vshrl.u32 %v11754_v7, 16 }
 0x58a   : > { %v8136_v26 = vshll.u32 %v11755_v55, 16  ;;  %v7251_v33 = vsel %vm5871_vm9, %v7248_v10, %v7250_v2 }
 0x58b   : > { %10723 = vmatmul.msk.bf16.vlgmr.msrb.gmra.mxu3 %vm5479_vm8, %v10973_v18 }
 0x58c   : > { %v7376_v53 = vpop.f32.mrf.mxu2  ;;  %v7081_v23 = vpop.f32.mrf.mxu1  ;;  %v8138_v60 = vrot.slane %v8136_v26, 1 }
 0x58d   : > { %v15054_v54 = vadd.f32 %v7376_v53, %v14979_v27  ;;  %v6509_v29 = vpop.f32.mrf.mxu0  ;;  %v15057_v8 = vadd.f32 %v7081_v23, %v14778_v58  ;;  %v8134_v53 = vor.u32 %v8132_v59, %v8130_v63  ;;  %v16569_v59 = vld [vmem:[#allocation29_spill] sm:$0xff] }
 0x58e   : > { %v6085_v12 = vpop.f32.mrf.mxu3 }
 0x58f   : > { %v6157_v43 = vadd.f32 %v6085_v12, %v14703_v49  ;;  %v6895_v49 = vor.u32 %v6893_v3, %v6891_v0  ;;  %v8139_v7 = vsel %vm1288_vm3, %v8134_v53, %v8138_v60 }
 0x591   : > { %v15061_v47 = vadd.f32 %v6507_v41, %v6157_v43  ;;  %v6900_v43 = vsel %vm1288_vm3, %v6895_v49, %v6899_v61 }
 0x594   : > { %v7378_v27 = vpop.f32.mrf.mxu2  ;;  %v7084_v22 = vpop.f32.mrf.mxu1 }
 0x595   : > { %v15066_v58 = vadd.f32 %v7378_v27, %v14997_v31  ;;  %v6512_v18 = vpop.f32.mrf.mxu0  ;;  %v15069_v12 = vadd.f32 %v7084_v22, %v14791_v62  ;;  %v10974_v31 = vld [vmem:[#allocation2 + $0x20] sm:$0xff]  ;;  %v15081_v62 = vld [vmem:[#allocation2 + $0x94] sm:$0xff] }
 0x596   : > { %v6087_v23 = vpop.f32.mrf.mxu3  ;;  %v6905_v22 = vshll.u32 %v15081_v62, 16 }
 0x597   : > { %v6158_v41 = vadd.f32 %v6087_v23, %v14714_v40  ;;  %10592 = vmatmul.msk.bf16.gmra.mxu1 %vm5479_vm8, %v6900_v43  ;;  %v6901_v23 = vshrl.u32 %v15051_v39, 16  ;;  %v8140_v43 = vshrl.u32 %v11755_v55, 16 }
 0x598   : > { %10841 = vmatmul.msk.bf16.gmra.mxu0 %vm5479_vm8, %v8139_v7 }
 0x599   : > { %10615 = vmatmul.msk.bf16.gmra.mxu2 %vm5479_vm8, %v7251_v33  ;;  %v15078_v0 = vadd.f32 %v6509_v29, %v6158_v41  ;;  %v11756_v29 = vld [vmem:[#allocation2 + $0x30] sm:$0xff]  ;;  %v6907_v41 = vrot.slane %v6905_v22, 1  ;;  %v7252_v33 = vrot.slane %v15021_v38, 1 }
 0x59a   : > { %v8144_v49 = vshll.u32 %v11756_v29, 16 }
 0x59b   : > { %10724 = vmatmul.msk.bf16.gmra.mxu3 %vm5479_vm8, %v10974_v31  ;;  %v7253_v38 = vsel %vm5871_vm9, %v7250_v2, %v7252_v33 }
 0x59c   : > { %v7381_v40 = vpop.f32.mrf.mxu2  ;;  %v7086_v63 = vpop.f32.mrf.mxu1  ;;  %v8146_v7 = vrot.slane %v8144_v49, 1 }
 0x59d   : > { %v15084_v35 = vadd.f32 %v7381_v40, %v15009_v6  ;;  %v6514_v26 = vpop.f32.mrf.mxu0  ;;  %v15087_v10 = vadd.f32 %v7086_v63, %v14806_v46  ;;  %v6903_v63 = vor.u32 %v6901_v23, %v6899_v61 }
 0x59e   : > { %v6090_v3 = vpop.f32.mrf.mxu3 }
 0x59f   : > { %16568 = vst [vmem:[#allocation11_spill] sm:$0xff] %v15084_v35  ;;  %v6159_v27 = vadd.f32 %v6090_v3, %v16569_v59  ;;  %v8142_v3 = vor.u32 %v8140_v43, %v8138_v60  ;;  %v16571_v43 = vld [vmem:[#allocation7_spill] sm:$0xff] }
 0x5a1   : > { %v15091_v53 = vadd.f32 %v6512_v18, %v6159_v27  ;;  %v6908_v27 = vsel %vm1288_vm3, %v6903_v63, %v6907_v41  ;;  %v8147_v55 = vsel %vm1288_vm3, %v8142_v3, %v8146_v7 }
 0x5a4   : > { %v7383_v6 = vpop.f32.mrf.mxu2  ;;  %v7089_v31 = vpop.f32.mrf.mxu1 }
 0x5a5   : > { %v15096_v46 = vadd.f32 %v7383_v6, %v15027_v50  ;;  %v6517_v40 = vpop.f32.mrf.mxu0  ;;  %v15099_v35 = vadd.f32 %v7089_v31, %v14819_v36  ;;  %v10975_v50 = vld [vmem:[#allocation2 + $0x28] sm:$0xff]  ;;  %v15111_v36 = vld [vmem:[#allocation2 + $0x9c] sm:$0xff] }
 0x5a6   : > { %v6092_v59 = vpop.f32.mrf.mxu3  ;;  %v6913_v31 = vshll.u32 %v15111_v36, 16 }
 0x5a7   : > { %v6160_v18 = vadd.f32 %v6092_v59, %v14742_v56  ;;  %10593 = vmatmul.msk.bf16.gmra.mxu1 %vm5479_vm8, %v6908_v27  ;;  %v6909_v59 = vshrl.u32 %v15081_v62, 16  ;;  %v8148_v27 = vshrl.u32 %v11756_v29, 16 }
 0x5a8   : > { %10842 = vmatmul.msk.bf16.gmra.mxu0 %vm5479_vm8, %v8147_v55 }
 0x5a9   : > { %10616 = vmatmul.msk.bf16.gmra.mxu2 %vm5479_vm8, %v7253_v38  ;;  %v15108_v61 = vadd.f32 %v6514_v26, %v6160_v18  ;;  %v11757_v26 = vld [vmem:[#allocation2 + $0x38] sm:$0xff]  ;;  %v6915_v18 = vrot.slane %v6913_v31, 1  ;;  %v7254_v38 = vrot.slane %v15051_v39, 1 }
 0x5aa   : > { %v8152_v63 = vshll.u32 %v11757_v26, 16 }
 0x5ab   : > { %10725 = vmatmul.msk.bf16.gmra.mxu3 %vm5479_vm8, %v10975_v50  ;;  %v7255_v39 = vsel %vm5871_vm9, %v7252_v33, %v7254_v38 }
 0x5ac   : > { %v7386_v56 = vpop.f32.mrf.mxu2  ;;  %v7091_v60 = vpop.f32.mrf.mxu1  ;;  %v8154_v55 = vrot.slane %v8152_v63, 1 }
 0x5ad   : > { %v15114_v22 = vadd.f32 %v7386_v56, %v15039_v13  ;;  %v6519_v49 = vpop.f32.mrf.mxu0  ;;  %v15117_v2 = vadd.f32 %v7091_v60, %v14834_v44  ;;  %v6911_v60 = vor.u32 %v6909_v59, %v6907_v41 }
 0x5ae   : > { %v6095_v23 = vpop.f32.mrf.mxu3 }
 0x5af   : > { %16570 = vst [vmem:[#allocation12_spill] sm:$0xff] %v15114_v22  ;;  %v6161_v6 = vadd.f32 %v6095_v23, %v16571_v43  ;;  %v8150_v23 = vor.u32 %v8148_v27, %v8146_v7  ;;  %v16573_v27 = vld [vmem:[#allocation13_spill] sm:$0xff] }
 0x5b1   : > { %v15121_v3 = vadd.f32 %v6517_v40, %v6161_v6  ;;  %v6916_v6 = vsel %vm1288_vm3, %v6911_v60, %v6915_v18  ;;  %v8155_v29 = vsel %vm1288_vm3, %v8150_v23, %v8154_v55 }
 0x5b4   : > { %v7388_v13 = vpop.f32.mrf.mxu2  ;;  %v7094_v50 = vpop.f32.mrf.mxu1 }
 0x5b5   : > { %v15126_v44 = vadd.f32 %v7388_v13, %v15057_v8  ;;  %v6522_v56 = vpop.f32.mrf.mxu0  ;;  %v15129_v22 = vadd.f32 %v7094_v50, %v14847_v4  ;;  %v10976_v8 = vld [vmem:[#allocation2 + $0x30] sm:$0xff]  ;;  %v15141_v4 = vld [vmem:[#allocation2 + $0xa4] sm:$0xff] }
 0x5b6   : > { %v6097_v43 = vpop.f32.mrf.mxu3  ;;  %v6921_v50 = vshll.u32 %v15141_v4, 16 }
 0x5b7   : > { %v6162_v40 = vadd.f32 %v6097_v43, %v14770_v28  ;;  %10594 = vmatmul.msk.bf16.gmra.mxu1 %vm5479_vm8, %v6916_v6  ;;  %v6917_v43 = vshrl.u32 %v15111_v36, 16  ;;  %v8156_v6 = vshrl.u32 %v11757_v26, 16 }
 0x5b8   : > { %10843 = vmatmul.msk.bf16.gmra.mxu0 %vm5479_vm8, %v8155_v29 }
 0x5b9   : > { %10617 = vmatmul.msk.bf16.gmra.mxu2 %vm5479_vm8, %v7255_v39  ;;  %v15138_v41 = vadd.f32 %v6519_v49, %v6162_v40  ;;  %v11758_v49 = vld [vmem:[#allocation2 + $0x40] sm:$0xff]  ;;  %v6923_v40 = vrot.slane %v6921_v50, 1  ;;  %v7256_v39 = vrot.slane %v15081_v62, 1 }
 0x5ba   : > { %v8160_v60 = vshll.u32 %v11758_v49, 16 }
 0x5bb   : > { %10726 = vmatmul.msk.bf16.gmra.mxu3 %vm5479_vm8, %v10976_v8  ;;  %v7257_v62 = vsel %vm5871_vm9, %v7254_v38, %v7256_v39 }
 0x5bc   : > { %v7391_v28 = vpop.f32.mrf.mxu2  ;;  %v7096_v7 = vpop.f32.mrf.mxu1  ;;  %v8162_v29 = vrot.slane %v8160_v60, 1 }
 0x5bd   : > { %v15144_v31 = vadd.f32 %v7391_v28, %v15069_v12  ;;  %v6524_v63 = vpop.f32.mrf.mxu0  ;;  %v15147_v33 = vadd.f32 %v7096_v7, %v14863_v19  ;;  %v6919_v7 = vor.u32 %v6917_v43, %v6915_v18 }
 0x5be   : > { %v6100_v59 = vpop.f32.mrf.mxu3 }
 0x5bf   : > { %16572 = vst [vmem:[#allocation28_spill] sm:$0xff] %v15144_v31  ;;  %v6163_v13 = vadd.f32 %v6100_v59, %v16573_v27  ;;  %v8158_v59 = vor.u32 %v8156_v6, %v8154_v55  ;;  %v16575_v6 = vld [vmem:[#allocation35_spill] sm:$0xff] }
 0x5c1   : > { %v15151_v23 = vadd.f32 %v6522_v56, %v6163_v13  ;;  %v6924_v13 = vsel %vm1288_vm3, %v6919_v7, %v6923_v40  ;;  %v8163_v26 = vsel %vm1288_vm3, %v8158_v59, %v8162_v29 }
 0x5c4   : > { %v7393_v12 = vpop.f32.mrf.mxu2  ;;  %v7099_v8 = vpop.f32.mrf.mxu1 }
 0x5c5   : > { %v15156_v19 = vadd.f32 %v7393_v12, %v15087_v10  ;;  %v6527_v28 = vpop.f32.mrf.mxu0  ;;  %v15159_v31 = vadd.f32 %v7099_v8, %v14877_v30  ;;  %v10977_v10 = vld [vmem:[#allocation2 + $0x38] sm:$0xff]  ;;  %v15171_v30 = vld [vmem:[#allocation2 + $0xac] sm:$0xff] }
 0x5c6   : > { %v6102_v27 = vpop.f32.mrf.mxu3  ;;  %v6929_v8 = vshll.u32 %v15171_v30, 16 }
 0x5c7   : > { %v6164_v56 = vadd.f32 %v6102_v27, %v14798_v32  ;;  %10595 = vmatmul.msk.bf16.gmra.mxu1 %vm5479_vm8, %v6924_v13  ;;  %v6925_v27 = vshrl.u32 %v15141_v4, 16  ;;  %v8164_v13 = vshrl.u32 %v11758_v49, 16 }
 0x5c8   : > { %10844 = vmatmul.msk.bf16.gmra.mxu0 %vm5479_vm8, %v8163_v26 }
 0x5c9   : > { %10618 = vmatmul.msk.bf16.gmra.mxu2 %vm5479_vm8, %v7257_v62  ;;  %v15168_v18 = vadd.f32 %v6524_v63, %v6164_v56  ;;  %v11759_v63 = vld [vmem:[#allocation2 + $0x48] sm:$0xff]  ;;  %v6931_v56 = vrot.slane %v6929_v8, 1  ;;  %v7258_v62 = vrot.slane %v15111_v36, 1 }
 0x5ca   : > { %v8168_v7 = vshll.u32 %v11759_v63, 16 }
 0x5cb   : > { %10727 = vmatmul.msk.bf16.gmra.mxu3 %vm5479_vm8, %v10977_v10  ;;  %v7259_v36 = vsel %vm5871_vm9, %v7256_v39, %v7258_v62 }
 0x5cc   : > { %v7396_v32 = vpop.f32.mrf.mxu2  ;;  %v7101_v55 = vpop.f32.mrf.mxu1  ;;  %v8170_v26 = vrot.slane %v8168_v7, 1 }
 0x5cd   : > { %v15174_v50 = vadd.f32 %v7396_v32, %v15099_v35  ;;  %v6529_v60 = vpop.f32.mrf.mxu0  ;;  %v15177_v38 = vadd.f32 %v7101_v55, %v14893_v25  ;;  %v6927_v55 = vor.u32 %v6925_v27, %v6923_v40 }
 0x5ce   : > { %v6105_v43 = vpop.f32.mrf.mxu3 }
 0x5cf   : > { %16574 = vst [vmem:[#allocation45_spill] sm:$0xff] %v15174_v50  ;;  %v6165_v12 = vadd.f32 %v6105_v43, %v16575_v6  ;;  %v8166_v43 = vor.u32 %v8164_v13, %v8162_v29  ;;  %v16577_v13 = vld [vmem:[#allocation27_spill] sm:$0xff] }
 0x5d1   : > { %v15181_v59 = vadd.f32 %v6527_v28, %v6165_v12  ;;  %v6932_v12 = vsel %vm1288_vm3, %v6927_v55, %v6931_v56  ;;  %v8171_v49 = vsel %vm1288_vm3, %v8166_v43, %v8170_v26 }
 0x5d4   : > { %v7398_v35 = vpop.f32.mrf.mxu2  ;;  %v7104_v10 = vpop.f32.mrf.mxu1 }
 0x5d5   : > { %v15186_v25 = vadd.f32 %v7398_v35, %v15117_v2  ;;  %v6532_v32 = vpop.f32.mrf.mxu0  ;;  %v15189_v50 = vadd.f32 %v7104_v10, %v14907_v11  ;;  %v10978_v2 = vld [vmem:[#allocation2 + $0x40] sm:$0xff]  ;;  %v15201_v11 = vld [vmem:[#allocation2 + $0xb4] sm:$0xff] }
 0x5d6   : > { %v6107_v6 = vpop.f32.mrf.mxu3  ;;  %v6937_v10 = vshll.u32 %v15201_v11, 16 }
 0x5d7   : > { %v6166_v28 = vadd.f32 %v6107_v6, %v14826_v20  ;;  %10596 = vmatmul.msk.bf16.gmra.mxu1 %vm5479_vm8, %v6932_v12  ;;  %v6933_v6 = vshrl.u32 %v15171_v30, 16  ;;  %v8172_v12 = vshrl.u32 %v11759_v63, 16 }
 0x5d8   : > { %10845 = vmatmul.msk.bf16.gmra.mxu0 %vm5479_vm8, %v8171_v49 }
 0x5d9   : > { %10619 = vmatmul.msk.bf16.gmra.mxu2 %vm5479_vm8, %v7259_v36  ;;  %v15198_v40 = vadd.f32 %v6529_v60, %v6166_v28  ;;  %v11760_v60 = vld [vmem:[#allocation2 + $0x50] sm:$0xff]  ;;  %v6939_v28 = vrot.slane %v6937_v10, 1  ;;  %v7260_v36 = vrot.slane %v15141_v4, 1 }
 0x5da   : > { %v8176_v55 = vshll.u32 %v11760_v60, 16 }
 0x5db   : > { %10728 = vmatmul.msk.bf16.gmra.mxu3 %vm5479_vm8, %v10978_v2  ;;  %v7261_v4 = vsel %vm5871_vm9, %v7258_v62, %v7260_v36 }
 0x5dc   : > { %v7401_v20 = vpop.f32.mrf.mxu2  ;;  %v7106_v29 = vpop.f32.mrf.mxu1  ;;  %v8178_v49 = vrot.slane %v8176_v55, 1 }
 0x5dd   : > { %v15204_v8 = vadd.f32 %v7401_v20, %v15129_v22  ;;  %v6534_v7 = vpop.f32.mrf.mxu0  ;;  %v15207_v39 = vadd.f32 %v7106_v29, %v14927_v17  ;;  %v6935_v29 = vor.u32 %v6933_v6, %v6931_v56 }
 0x5de   : > { %v6110_v27 = vpop.f32.mrf.mxu3 }
 0x5df   : > { %16576 = vst [vmem:[#allocation34_spill] sm:$0xff] %v15204_v8  ;;  %v6167_v35 = vadd.f32 %v6110_v27, %v16577_v13  ;;  %v8174_v27 = vor.u32 %v8172_v12, %v8170_v26 }
 0x5e1   : > { %v15211_v43 = vadd.f32 %v6532_v32, %v6167_v35  ;;  %v6940_v35 = vsel %vm1288_vm3, %v6935_v29, %v6939_v28  ;;  %v8179_v63 = vsel %vm1288_vm3, %v8174_v27, %v8178_v49  ;;  %v6941_v27 = vshrl.u32 %v15201_v11, 16 }
 0x5e4   : > { %v7403_v22 = vpop.f32.mrf.mxu2  ;;  %v7109_v2 = vpop.f32.mrf.mxu1 }
 0x5e5   : > { %v15216_v17 = vadd.f32 %v7403_v22, %v15147_v33  ;;  %v6537_v20 = vpop.f32.mrf.mxu0  ;;  %v15219_v8 = vadd.f32 %v7109_v2, %v14941_v16  ;;  %v10979_v33 = vld [vmem:[#allocation2 + $0x48] sm:$0xff]  ;;  %v15231_v16 = vld [vmem:[#allocation2 + $0xbc] sm:$0xff] }
 0x5e6   : > { %v6112_v13 = vpop.f32.mrf.mxu3  ;;  %v6945_v22 = vshll.u32 %v15231_v16, 16 }
 0x5e7   : > { %16578 = vst [vmem:[#allocation33_spill] sm:$0xff] %v15216_v17  ;;  %v6168_v32 = vadd.f32 %v6112_v13, %v14852_v24  ;;  %10597 = vmatmul.msk.bf16.gmra.mxu1 %vm5479_vm8, %v6940_v35  ;;  %v15416_v17 = vld [vmem:[%s11856_s12 + $0x2c] sm:$0xf] }
 0x5e8   : > { %10846 = vmatmul.msk.bf16.gmra.mxu0 %vm5479_vm8, %v8179_v63  ;;  %v6947_v13 = vrot.slane %v6945_v22, 1  ;;  %v7262_v63 = vrot.slane %v15171_v30, 1 }
 0x5e9   : > { %10620 = vmatmul.msk.bf16.gmra.mxu2 %vm5479_vm8, %v7261_v4  ;;  %v15228_v56 = vadd.f32 %v6534_v7, %v6168_v32  ;;  %v11761_v7 = vld [vmem:[#allocation2 + $0x58] sm:$0xff]  ;;  %v8180_v32 = vshrl.u32 %v11760_v60, 16 }
 0x5ea   : > { %v8184_v2 = vshll.u32 %v11761_v7, 16  ;;  %v7263_v30 = vsel %vm5871_vm9, %v7260_v36, %v7262_v63 }
 0x5eb   : > { %10729 = vmatmul.msk.bf16.gmra.mxu3 %vm5479_vm8, %v10979_v33 }
 0x5ec   : > { %v7406_v24 = vpop.f32.mrf.mxu2  ;;  %v7111_v26 = vpop.f32.mrf.mxu1  ;;  %v8186_v35 = vrot.slane %v8184_v2, 1 }
 0x5ed   : > { %v15234_v10 = vadd.f32 %v7406_v24, %v15159_v31  ;;  %v6539_v55 = vpop.f32.mrf.mxu0  ;;  %v15237_v62 = vadd.f32 %v7111_v26, %v14957_v48  ;;  %v8182_v24 = vor.u32 %v8180_v32, %v8178_v49 }
 0x5ee   : > { %v6115_v6 = vpop.f32.mrf.mxu3 }
 0x5ef   : > { %16579 = vst [vmem:[#allocation32_spill] sm:$0xff] %v15234_v10  ;;  %v6169_v12 = vadd.f32 %v6115_v6, %v14870_v51  ;;  %v6943_v51 = vor.u32 %v6941_v27, %v6939_v28  ;;  %v8187_v60 = vsel %vm1288_vm3, %v8182_v24, %v8186_v35  ;;  %v6949_v24 = vshrl.u32 %v15231_v16, 16 }
 0x5f1   : > { %v15241_v29 = vadd.f32 %v6537_v20, %v6169_v12  ;;  %v6948_v12 = vsel %vm1288_vm3, %v6943_v51, %v6947_v13 }
 0x5f4   : > { %v7408_v31 = vpop.f32.mrf.mxu2  ;;  %v7114_v4 = vpop.f32.mrf.mxu1 }
 0x5f5   : > { %v15246_v48 = vadd.f32 %v7408_v31, %v15177_v38  ;;  %v6542_v33 = vpop.f32.mrf.mxu0  ;;  %v15249_v6 = vadd.f32 %v7114_v4, %v14971_v45  ;;  %v10980_v38 = vld [vmem:[#allocation2 + $0x50] sm:$0xff]  ;;  %v15261_v45 = vld [vmem:[#allocation2 + $0xc4] sm:$0xff] }
 0x5f6   : > { %v6117_v26 = vpop.f32.mrf.mxu3  ;;  %v6953_v31 = vshll.u32 %v15261_v45, 16 }
 0x5f7   : > { %16580 = vst [vmem:[#allocation54_spill] sm:$0xff] %v15246_v48  ;;  %v6170_v20 = vadd.f32 %v6117_v26, %v14882_v57  ;;  %10598 = vmatmul.msk.bf16.gmra.mxu1 %vm5479_vm8, %v6948_v12 }
 0x5f8   : > { %10847 = vmatmul.msk.bf16.gmra.mxu0 %vm5479_vm8, %v8187_v60  ;;  %v6955_v26 = vrot.slane %v6953_v31, 1  ;;  %v7264_v60 = vrot.slane %v15201_v11, 1 }
 0x5f9   : > { %10621 = vmatmul.msk.bf16.gmra.mxu2 %vm5479_vm8, %v7263_v30  ;;  %v15258_v28 = vadd.f32 %v6539_v55, %v6170_v20  ;;  %v11762_v55 = vld [vmem:[#allocation2 + $0x60] sm:$0xff]  ;;  %v8188_v20 = vshrl.u32 %v11761_v7, 16 }
 0x5fa   : > { %v8192_v4 = vshll.u32 %v11762_v55, 16  ;;  %v7265_v11 = vsel %vm5871_vm9, %v7262_v63, %v7264_v60 }
 0x5fb   : > { %10730 = vmatmul.msk.bf16.gmra.mxu3 %vm5479_vm8, %v10980_v38 }
 0x5fc   : > { %v7411_v57 = vpop.f32.mrf.mxu2  ;;  %v7116_v49 = vpop.f32.mrf.mxu1  ;;  %v8194_v12 = vrot.slane %v8192_v4, 1 }
 0x5fd   : > { %v15264_v22 = vadd.f32 %v7411_v57, %v15189_v50  ;;  %v6544_v2 = vpop.f32.mrf.mxu0  ;;  %v15267_v36 = vadd.f32 %v7116_v49, %v14987_v1  ;;  %v8190_v57 = vor.u32 %v8188_v20, %v8186_v35 }
 0x5fe   : > { %v6120_v27 = vpop.f32.mrf.mxu3 }
 0x5ff   : > { %16581 = vst [vmem:[#allocation49_spill] sm:$0xff] %v15264_v22  ;;  %v6171_v32 = vadd.f32 %v6120_v27, %v14900_v5  ;;  %v6951_v5 = vor.u32 %v6949_v24, %v6947_v13  ;;  %v8195_v31 = vsel %vm1288_vm3, %v8190_v57, %v8194_v12 }
 0x601   : > { %v15271_v51 = vadd.f32 %v6542_v33, %v6171_v32  ;;  %v6643_v33 = vld [vmem:[#allocation2 + $0xcc] sm:$0x1]  ;;  %v6956_v7 = vsel %vm1288_vm3, %v6951_v5, %v6955_v26 }
 0x602   : > { %v6743_v13 = vunpack.c.l.b16 %v6643_v33 }
 0x604   : > { %v7413_v50 = vpop.f32.mrf.mxu2  ;;  %v7119_v30 = vpop.f32.mrf.mxu1  ;;  %v15294_v20 = vpack.c.b16 %v6743_v13, %v6743_v13 }
 0x605   : > { %v15276_v1 = vadd.f32 %v7413_v50, %v15207_v39  ;;  %v8400_v38 = vpop.f32.mrf.mxu0  ;;  %v15279_v27 = vadd.f32 %v7119_v30, %v15001_v21  ;;  %v10981_v39 = vld [vmem:[#allocation2 + $0x58] sm:$0xff] }
 0x606   : > { %v6122_v49 = vpop.f32.mrf.mxu3  ;;  %v6961_v5 = vshll.u32 %v15294_v20, 16 }
 0x607   : > { %16582 = vst [vmem:[#allocation50_spill] sm:$0xff] %v15276_v1  ;;  %v6172_v32 = vadd.f32 %v6122_v49, %v14912_v15  ;;  %10599 = vmatmul.msk.bf16.gmra.mxu1 %vm5479_vm8, %v6956_v7  ;;  %v6957_v49 = vshrl.u32 %v15261_v45, 16  ;;  %v8196_v7 = vshrl.u32 %v11762_v55, 16 }
 0x608   : > { %10848 = vmatmul.msk.bf16.gmra.mxu0 %vm5479_vm8, %v8195_v31 }
 0x609   : > { %10622 = vmatmul.msk.bf16.gmra.mxu2 %vm5479_vm8, %v7265_v11  ;;  %v15288_v35 = vadd.f32 %v6544_v2, %v6172_v32  ;;  %v11763_v2 = vld [vmem:[#allocation2 + $0x68] sm:$0xff]  ;;  %v6959_v32 = vor.u32 %v6957_v49, %v6955_v26 }
 0x60a   : > { %v8200_v57 = vshll.u32 %v11763_v2, 16 }
 0x60b   : > { %10731 = vmatmul.msk.bf16.gmra.mxu3 %vm5479_vm8, %v10981_v39  ;;  %v16248_v39 = vrot.slane %v15231_v16, 1 }
 0x60c   : > { %v7416_v21 = vpop.f32.mrf.mxu2  ;;  %v7121_v15 = vpop.f32.mrf.mxu1  ;;  %v8202_v31 = vrot.slane %v8200_v57, 1  ;;  %v8876_v57 = vld [vmem:[%s11856_s12 + $0x14] sm:$0xf] }
 0x60d   : > { %v15292_v4 = vadd.f32 %v7416_v21, %v15219_v8  ;;  %v8402_v24 = vpop.f32.mrf.mxu0  ;;  %v15297_v63 = vadd.f32 %v7121_v15, %v15017_v9  ;;  %v6963_v8 = vrot.slane %v6961_v5, 1  ;;  %v8198_v21 = vor.u32 %v8196_v7, %v8194_v12  ;;  %v8878_v7 = vld [vmem:[%s11856_s12 + $0x1c] sm:$0xf] }
 0x60e   : > { %v7778_v50 = vpop.f32.mrf.mxu3 }
 0x60f   : > { %16583 = vst [vmem:[#allocation19_spill] sm:$0xff] %v15292_v4  ;;  %v7898_v30 = vadd.f32 %v7778_v50, %v14934_v37  ;;  %v6964_v55 = vsel %vm1288_vm3, %v6959_v32, %v6963_v8  ;;  %v8203_v50 = vsel %vm1288_vm3, %v8198_v21, %v8202_v31  ;;  %v15332_v21 = vld [vmem:[#allocation2 + $0x70] sm:$0xff] }
 0x611   : > { %v15302_v33 = vadd.f32 %v8400_v38, %v7898_v30  ;;  %v8875_v30 = vld [vmem:[%s11856_s12 + $0x10] sm:$0xf] }
 0x613   : > { %16584 = vst [vmem:[#allocation38_spill] sm:$0xff] %v15302_v33  ;;  %v15345_v33 = vld [vmem:[%s11856_s12 + $0x18] sm:$0xf] }
 0x614   : > { %v7418_v11 = vpop.f32.mrf.mxu2  ;;  %v7124_v9 = vpop.f32.mrf.mxu1 }
 0x615   : > { %v15306_v13 = vadd.f32 %v7418_v11, %v15237_v62  ;;  %v8405_v37 = vpop.f32.mrf.mxu0  ;;  %v15309_v15 = vadd.f32 %v7124_v9, %v15031_v42  ;;  %v7267_v62 = vsel %vm5871_vm9, %v7264_v60, %v16248_v39  ;;  %v10982_v42 = vld [vmem:[#allocation2 + $0x60] sm:$0xff]  ;;  %v11733_v60 = vld [vmem:[#allocation2 + $0x18] sm:$0xe]  ;;  %v8961_v39 = vshll.u32 %v8876_v57, 16 }
 0x616   : > { %v7780_v38 = vpop.f32.mrf.mxu3 }
 0x617   : > { %16585 = vst [vmem:[#allocation17_spill] sm:$0xff] %v15306_v13  ;;  %v7899_v26 = vadd.f32 %v7780_v38, %v14946_v34  ;;  %10600 = vmatmul.msk.bf16.gmra.mxu1 %vm5479_vm8, %v6964_v55  ;;  %v11732_v34 = vld [vmem:[#allocation2 + $0x18] sm:$0xf0]  ;;  %v8208_v38 = vshll.u32 %v15332_v21, 16  ;;  %v8952_v55 = vshrl.u32 %v8875_v30, 16  ;;  %v15341_v22 = vrot.slane %v8961_v39, 5 }
 0x618   : > { %10849 = vmatmul.msk.bf16.gmra.mxu0 %vm5479_vm8, %v8203_v50  ;;  %v16588_v50 = vld [vmem:[#allocation5_spill] sm:$0xff] }
 0x619   : > { %10623 = vmatmul.msk.bf16.gmra.mxu2 %vm5479_vm8, %v7267_v62  ;;  %v15320_v12 = vadd.f32 %v8402_v24, %v7899_v26  ;;  %v11734_v24 = vor.u32 %v11733_v60, %v11732_v34  ;;  %v8879_v26 = vld [vmem:[%s11856_s12 + $0x20] sm:$0xf]  ;;  %v8204_v34 = vshrl.u32 %v11763_v2, 16  ;;  %v15339_v60 = vrot.slane %v8208_v38, 1  ;;  %v8880_v38 = vld [vmem:[%s11856_s12 + $0x24] sm:$0xf] }
 0x61a   : > { %v8991_v13 = vshll.u32 %v8879_v26, 16  ;;  %v8995_v4 = vshrl.u32 %v8879_v26, 16  ;;  %v8954_v1 = vrot.slane %v8952_v55, 4 }
 0x61b   : > { %16586 = vst [vmem:[#allocation55_spill] sm:$0xff] %v15320_v12  ;;  %10732 = vmatmul.msk.bf16.gmra.mxu3 %vm5479_vm8, %v10982_v42  ;;  %v8955_v42 = vshll.u32 %v8875_v30, 16 }
 0x61c   : > { %v7421_v5 = vpop.f32.mrf.mxu2  ;;  %v7126_v49 = vpop.f32.mrf.mxu1  ;;  %v8993_v55 = vrot.slane %v8991_v13, 5 }
 0x61d   : > { %v15326_v32 = vadd.f32 %v7421_v5, %v15249_v6  ;;  %v8407_v8 = vpop.f32.mrf.mxu0  ;;  %v15330_v11 = vadd.f32 %v7126_v49, %v15048_v14  ;;  %v8965_v6 = vshrl.u32 %v8876_v57, 16  ;;  %v8981_v5 = vshll.u32 %v8878_v7, 16 }
 0x61e   : > { %v7783_v9 = vpop.f32.mrf.mxu3  ;;  %v8574_v49 = vrot.slane %v11734_v24, 1  ;;  %v8957_v12 = vrot.slane %v8955_v42, 5 }
 0x61f   : > { %16587 = vst [vmem:[#allocation4_spill] sm:$0xff] %v15326_v32  ;;  %v7900_v62 = vadd.f32 %v7783_v9, %v16588_v50  ;;  %v8985_v32 = vshrl.u32 %v8878_v7, 16  ;;  %v8967_v9 = vrot.slane %v8965_v6, 4  ;;  %v8206_v50 = vor.u32 %v8204_v34, %v8202_v31  ;;  %v16591_v6 = vld [vmem:[#allocation36_spill] sm:$0xff] }
 0x620   : > { %v15347_v7 = vrot.slane %v8981_v5, 5  ;;  %v16592_v57 = vrot.slane %v16591_v6, 1 }
 0x621   : > { %v15337_v14 = vadd.f32 %v8405_v37, %v7900_v62  ;;  %v8987_v37 = vrot.slane %v8985_v32, 4  ;;  %v8997_v62 = vrot.slane %v8995_v4, 4  ;;  %v8211_v5 = vsel %vm1288_vm3, %v8206_v50, %v15339_v60  ;;  %v16593_v32 = vld [vmem:[#allocation9_spill] sm:$0xff] }
 0x622   : > { %v8576_v31 = vsel %vm5871_vm9, %v8574_v49, %v16592_v57  ;;  %v16595_v4 = vrot.slane %v15231_v16, 1  ;;  %v9001_v57 = vshll.u32 %v8880_v38, 16 }
 0x623   : > { %16589 = vst [vmem:[#allocation40_spill] sm:$0xff] %v15337_v14  ;;  %v8958_v14 = vor.u32 %v8957_v12, %v8954_v1  ;;  %v8988_v49 = vor.u32 %v8987_v37, %v15347_v7  ;;  %v10983_v1 = vld [vmem:[#allocation2 + $0x68] sm:$0xff]  ;;  %v8998_v12 = vor.u32 %v8997_v62, %v8993_v55 }
 0x624   : > { %v7423_v30 = vpop.f32.mrf.mxu2  ;;  %v7129_v26 = vpop.f32.mrf.mxu1 }
 0x625   : > { %v15350_v24 = vadd.f32 %v7423_v30, %v15267_v36  ;;  %v8410_v2 = vpop.f32.mrf.mxu0  ;;  %v15354_v39 = vadd.f32 %v7129_v26, %v15061_v47  ;;  %v8968_v36 = vor.u32 %v8967_v9, %v15341_v22  ;;  %v8971_v30 = vshll.u32 %v15345_v33, 16 }
 0x626   : > { %v7785_v42 = vpop.f32.mrf.mxu3  ;;  %v16594_v47 = vrot.slane %v15261_v45, 1  ;;  %v8959_v50 = vrot.slane %v8958_v14, 4  ;;  %v8989_v6 = vrot.slane %v8988_v49, 4  ;;  %v8212_v49 = vshrl.u32 %v15332_v21, 16 }
 0x627   : > { %16590 = vst [vmem:[#allocation31_spill] sm:$0xff] %v15350_v24  ;;  %v7901_v34 = vadd.f32 %v7785_v42, %v16593_v32  ;;  %10865 = vmatmul.msk.bf16.vlgmr.msra.gmra.mxu1 %vm5479_vm8, %v8576_v31  ;;  %v8969_v16 = vrot.slane %v8968_v36, 4  ;;  %v15376_v26 = vrot.slane %v8971_v30, 5  ;;  %v9003_v32 = vrot.slane %v9001_v57, 5  ;;  %v15389_v30 = vld [vmem:[#allocation2 + $0x78] sm:$0xff] }
 0x628   : > { %v7269_v13 = vsel %vm5871_vm9, %v16595_v4, %v16594_v47  ;;  %10850 = vmatmul.msk.bf16.gmra.mxu0 %vm5479_vm8, %v8211_v5  ;;  %v8216_v47 = vshll.u32 %v15389_v30, 16  ;;  %v8884_v4 = vld [vmem:[%s11856_s12 + $0x34] sm:$0xf] }
 0x629   : > { %10624 = vmatmul.msk.bf16.gmra.mxu2 %vm5479_vm8, %v7269_v13  ;;  %v15373_v9 = vadd.f32 %v8407_v8, %v7901_v34  ;;  %v8999_v8 = vrot.slane %v8998_v12, 4  ;;  %v8881_v34 = vld [vmem:[%s11856_s12 + $0x28] sm:$0xf]  ;;  %v8974_v57 = vsel %vm15378_vm12, %v8969_v16, %v15376_v26  ;;  %v8975_v12 = vshrl.u32 %v15345_v33, 16 }
 0x62a   : > { %v16600_v13 = vld [vmem:[#allocation57_spill] sm:$0xff]  ;;  %v9041_v21 = vshll.u32 %v8884_v4, 16  ;;  %v15408_v24 = vrot.slane %v8216_v47, 1 }
 0x62b   : > { %16596 = vst [vmem:[#allocation25_spill] sm:$0xff] %v15373_v9  ;;  %10733 = vmatmul.msk.bf16.gmra.mxu3 %vm5479_vm8, %v10983_v1  ;;  %v9484_v9 = vunpack.c.l.bf16 %v8974_v57  ;;  %v8977_v48 = vrot.slane %v8975_v12, 4  ;;  %v16601_v57 = vld [vmem:[#allocation20_spill] sm:$0xff]  ;;  %v16602_v12 = vrot.slane %v15261_v45, 1  ;;  %v10984_v45 = vld [vmem:[#allocation2 + $0x70] sm:$0xff] }
 0x62c   : > { %v7426_v42 = vpop.f32.mrf.mxu2  ;;  %v7131_v31 = vpop.f32.mrf.mxu1  ;;  %v15418_v47 = vrot.slane %v9041_v21, 5 }
 0x62d   : > { %v15383_v5 = vadd.f32 %v7426_v42, %v15279_v27  ;;  %v8412_v62 = vpop.f32.mrf.mxu0  ;;  %v15387_v14 = vadd.f32 %v7131_v31, %v15078_v0  ;;  %v8964_v27 = vsel %vm15378_vm12, %v8959_v50, %v15341_v22  ;;  %v8994_v0 = vsel %vm15378_vm12, %v8989_v6, %v8993_v55 }
 0x62e   : > { %v7788_v36 = vpop.f32.mrf.mxu3  ;;  %v9005_v42 = vshrl.u32 %v8880_v38, 16  ;;  %v9011_v31 = vshll.u32 %v8881_v34, 16  ;;  %v7270_v22 = vrot.slane %v15294_v20, 1  ;;  %v8214_v50 = vor.u32 %v8212_v49, %v15339_v60 }
 0x62f   : > { %16599 = vst [vmem:[#allocation23_spill] sm:$0xff] %v15383_v5  ;;  %v7902_v1 = vadd.f32 %v7788_v36, %v16600_v13  ;;  %v9004_v36 = vsel %vm15378_vm12, %v8999_v8, %v9003_v32  ;;  %v9015_v13 = vshrl.u32 %v8881_v34, 16  ;;  %v9045_v5 = vshrl.u32 %v8884_v4, 16 }
 0x630   : > { %v9483_v16 = vunpack.c.l.bf16 %v8964_v27  ;;  %v9507_v55 = vunpack.c.l.bf16 %v8994_v0  ;;  %v9508_v6 = vunpack.c.l.bf16 %v9004_v36  ;;  %v9007_v8 = vrot.slane %v9005_v42, 4  ;;  %v16603_v36 = vld [vmem:[#allocation48_spill] sm:$0xff] }
 0x631   : > { %v15410_v33 = vadd.f32 %v8410_v2, %v7902_v1  ;;  %v9013_v34 = vrot.slane %v9011_v31, 5  ;;  %v9017_v60 = vrot.slane %v9015_v13, 4  ;;  %v9047_v49 = vrot.slane %v9045_v5, 4  ;;  %v15424_v1 = vld [vmem:[%s11856_s12 + $0x38] sm:$0xf] }
 0x632   : > { %v8219_v42 = vsel %vm1288_vm3, %v8214_v50, %v15408_v24  ;;  %v9531_v31 = vadd.f32 %v9507_v55, %v9483_v16  ;;  %v9008_v5 = vor.u32 %v9007_v8, %v9003_v32  ;;  %v9021_v13 = vshll.u32 %v15416_v17, 16 }
 0x633   : > { %v9018_v21 = vor.u32 %v9017_v60, %v9013_v34  ;;  %v9051_v50 = vshll.u32 %v15424_v1, 16 }
 0x634   : > { %v7428_v38 = vpop.f32.mrf.mxu2  ;;  %v7134_v10 = vpop.f32.mrf.mxu1  ;;  %v9555_v55 = vpack.c.bf16 %v9531_v31, %v9531_v31 }
 0x635   : > { %v15413_v4 = vadd.f32 %v7428_v38, %v15297_v63  ;;  %v8415_v20 = vpop.f32.mrf.mxu0  ;;  %v15421_v27 = vadd.f32 %v7134_v10, %v15091_v53  ;;  %v7271_v63 = vsel %vm5871_vm9, %v16602_v12, %v7270_v22  ;;  %v9532_v53 = vadd.f32 %v9508_v6, %v9484_v9  ;;  %v15453_v12 = vld [vmem:[#allocation2 + $0x80] sm:$0xff] }
 0x636   : > { %v7790_v2 = vpop.f32.mrf.mxu3  ;;  %v8978_v10 = vor.u32 %v8977_v48, %v15376_v26  ;;  %v9048_v22 = vor.u32 %v9047_v49, %v15418_v47  ;;  %v9009_v48 = vrot.slane %v9008_v5, 4  ;;  %v15443_v26 = vrot.slane %v9021_v13, 5 }
 0x637   : > { %v7903_v0 = vadd.f32 %v7790_v2, %v16601_v57  ;;  %10866 = vmatmul.msk.bf16.gmra.mxu1 %vm5479_vm8, %v16603_v36  ;;  %v9556_v9 = vpack.c.bf16 %v9532_v53, %v9532_v53  ;;  %v9019_v2 = vrot.slane %v9018_v21, 4  ;;  %v15448_v57 = vrot.slane %v9051_v50, 5 }
 0x638   : > { %10851 = vmatmul.msk.bf16.gmra.mxu0 %vm5479_vm8, %v8219_v42  ;;  %v8979_v6 = vrot.slane %v8978_v10, 4  ;;  %v9049_v49 = vrot.slane %v9048_v22, 4  ;;  %v16604_v42 = vld [vmem:[#allocation24_spill] sm:$0xff]  ;;  %v8220_v36 = vshrl.u32 %v15389_v30, 16  ;;  %v9604_v53 = vunpack.c.l.b16 %v9555_v55 }
 0x639   : > { %10625 = vmatmul.msk.bf16.gmra.mxu2 %vm5479_vm8, %v7271_v63  ;;  %v15440_v16 = vadd.f32 %v8412_v62, %v7903_v0  ;;  %v8224_v63 = vshll.u32 %v15453_v12, 16  ;;  %v9014_v5 = vsel %vm15378_vm12, %v9009_v48, %v9013_v34 }
 0x63a   : > { %v8984_v10 = vsel %vm15378_vm12, %v8979_v6, %v15347_v7  ;;  %v9054_v13 = vsel %vm15378_vm12, %v9049_v49, %v15448_v57  ;;  %v8222_v21 = vor.u32 %v8220_v36, %v15408_v24  ;;  %v9509_v34 = vunpack.c.l.bf16 %v9014_v5 }
 0x63b   : > { %10734 = vmatmul.msk.bf16.gmra.mxu3 %vm5479_vm8, %v10984_v45  ;;  %v15471_v30 = vrot.slane %v8224_v63, 1  ;;  %v9485_v22 = vunpack.c.l.bf16 %v8984_v10  ;;  %v9510_v55 = vunpack.c.l.bf16 %v9054_v13  ;;  %v8886_v63 = vld [vmem:[%s11856_s12 + $0x3c] sm:$0xf] }
 0x63c   : > { %v7431_v38 = vpop.f32.mrf.mxu2  ;;  %v7136_v32 = vpop.f32.mrf.mxu1  ;;  %v9061_v36 = vshll.u32 %v8886_v63, 16 }
 0x63d   : > { %v15446_v8 = vadd.f32 %v7431_v38, %v15309_v15  ;;  %v8417_v60 = vpop.f32.mrf.mxu0  ;;  %v15451_v62 = vadd.f32 %v7136_v32, %v15108_v61  ;;  %v9605_v15 = vunpack.c.l.b16 %v9556_v9  ;;  %v9024_v61 = vsel %vm15378_vm12, %v9019_v2, %v15443_v26 }
 0x63e   : > { %v7793_v0 = vpop.f32.mrf.mxu3  ;;  %v9486_v50 = vunpack.c.l.bf16 %v9024_v61  ;;  %v9055_v32 = vshrl.u32 %v15424_v1, 16  ;;  %v8227_v49 = vsel %vm1288_vm3, %v8222_v21, %v15471_v30  ;;  %v9065_v1 = vshrl.u32 %v8886_v63, 16  ;;  %v15492_v21 = vld [vmem:[%s11856_s12 + $0x40] sm:$0xf] }
 0x63f   : > { %v7904_v31 = vadd.f32 %v7793_v0, %v16604_v42  ;;  %v9628_v48 = vpack.c.b16 %v9605_v15, %v9604_v53  ;;  %v8883_v0 = vld [vmem:[%s11856_s12 + $0x30] sm:$0xf]  ;;  %v10985_v15 = vld [vmem:[#allocation2 + $0x78] sm:$0xff] }
 0x640   : > { %v16605_v53 = vld [vmem:[#allocation46_spill] sm:$0xff]  ;;  %v9057_v13 = vrot.slane %v9055_v32, 4 }
 0x641   : > { %v15469_v45 = vadd.f32 %v8415_v20, %v7904_v31  ;;  %v9025_v20 = vshrl.u32 %v15416_v17, 16  ;;  %v9035_v31 = vshrl.u32 %v8883_v0, 16  ;;  %v9533_v17 = vadd.f32 %v9509_v34, %v9485_v22 }
 0x642   : > { %v9071_v34 = vshll.u32 %v15492_v21, 16 }
 0x643   : > { %v9027_v10 = vrot.slane %v9025_v20, 4  ;;  %v9037_v61 = vrot.slane %v9035_v31, 4 }
 0x644   : > { %v7433_v7 = vpop.f32.mrf.mxu2  ;;  %v7139_v38 = vpop.f32.mrf.mxu1 }
 0x645   : > { %v15475_v9 = vadd.f32 %v7433_v7, %v15330_v11  ;;  %v8420_v6 = vpop.f32.mrf.mxu0  ;;  %v15480_v2 = vadd.f32 %v7139_v38, %v15121_v3  ;;  %v9031_v11 = vshll.u32 %v8883_v0, 16  ;;  %v9534_v3 = vadd.f32 %v9510_v55, %v9486_v50 }
 0x646   : > { %v7795_v24 = vpop.f32.mrf.mxu3  ;;  %v9067_v7 = vrot.slane %v9065_v1, 4  ;;  %v9058_v50 = vor.u32 %v9057_v13, %v15448_v57  ;;  %v15506_v57 = vrot.slane %v9071_v34, 5 }
 0x647   : > { %v7905_v42 = vadd.f32 %v7795_v24, %v15036_v52  ;;  %10867 = vmatmul.msk.bf16.gmra.mxu1 %vm5479_vm8, %v16605_v53  ;;  %v9033_v5 = vrot.slane %v9031_v11, 5  ;;  %v9063_v52 = vrot.slane %v9061_v36, 5  ;;  %v9028_v24 = vor.u32 %v9027_v10, %v15443_v26 }
 0x648   : > { %10852 = vmatmul.msk.bf16.gmra.mxu0 %vm5479_vm8, %v8227_v49  ;;  %v9558_v20 = vpack.c.bf16 %v9534_v3, %v9534_v3  ;;  %v9059_v31 = vrot.slane %v9058_v50, 4 }
 0x649   : > { %10889 = vmatmul.msk.bf16.vlgmr.msrb.gmra.mxu2 %vm479_vm1, %v9628_v48  ;;  %v15494_v38 = vadd.f32 %v8417_v60, %v7905_v42  ;;  %v9038_v22 = vor.u32 %v9037_v61, %v9033_v5  ;;  %v9557_v48 = vpack.c.bf16 %v9533_v17, %v9533_v17  ;;  %v9068_v49 = vor.u32 %v9067_v7, %v9063_v52  ;;  %v11767_v17 = vld [vmem:[#allocation2 + $0x88] sm:$0xff] }
 0x64a   : > { %v9029_v60 = vrot.slane %v9028_v24, 4  ;;  %v8232_v3 = vshll.u32 %v11767_v17, 16  ;;  %v8228_v61 = vshrl.u32 %v15453_v12, 16  ;;  %v9064_v13 = vsel %vm15378_vm12, %v9059_v31, %v9063_v52 }
 0x64b   : > { %10735 = vmatmul.msk.bf16.gmra.mxu3 %vm5479_vm8, %v10985_v15  ;;  %v9039_v42 = vrot.slane %v9038_v22, 4  ;;  %v9069_v36 = vrot.slane %v9068_v49, 4  ;;  %v9606_v1 = vunpack.c.l.b16 %v9557_v48  ;;  %v9607_v15 = vunpack.c.l.b16 %v9558_v20 }
 0x64c   : > { %v7436_v55 = vpop.f32.mrf.mxu2  ;;  %v7141_v32 = vpop.f32.mrf.mxu1  ;;  %v8234_v7 = vrot.slane %v8232_v3, 1  ;;  %v8230_v22 = vor.u32 %v8228_v61, %v15471_v30  ;;  %v10986_v30 = vld [vmem:[#allocation2 + $0x80] sm:$0xff] }
 0x64d   : > { %v15501_v0 = vadd.f32 %v7436_v55, %v15354_v39  ;;  %v8422_v63 = vpop.f32.mrf.mxu0  ;;  %v15504_v11 = vadd.f32 %v7141_v32, %v15138_v41  ;;  %v9034_v39 = vsel %vm15378_vm12, %v9029_v60, %v9033_v5  ;;  %v9044_v41 = vsel %vm15378_vm12, %v9039_v42, %v15418_v47  ;;  %v16607_v60 = vld [vmem:[#allocation47_spill] sm:$0xff] }
 0x64e   : > { %v7798_v26 = vpop.f32.mrf.mxu3  ;;  %v9629_v5 = vpack.c.b16 %v9607_v15, %v9606_v1  ;;  %v9488_v55 = vunpack.c.l.bf16 %v9044_v41  ;;  %v9511_v47 = vunpack.c.l.bf16 %v9064_v13  ;;  %v8235_v32 = vsel %vm1288_vm3, %v8230_v22, %v8234_v7  ;;  %v11768_v41 = vld [vmem:[#allocation2 + $0x90] sm:$0xff] }
 0x64f   : > { %16606 = vst [vmem:[#allocation41_spill] sm:$0xff] %v15504_v11  ;;  %v7906_v53 = vadd.f32 %v7798_v26, %v15054_v54  ;;  %v9074_v54 = vsel %vm15378_vm12, %v9069_v36, %v15506_v57  ;;  %v8240_v13 = vshll.u32 %v11768_v41, 16  ;;  %v8236_v22 = vshrl.u32 %v11767_v17, 16  ;;  %v10987_v17 = vld [vmem:[#allocation2 + $0x88] sm:$0xff] }
 0x650   : > { %v9512_v48 = vunpack.c.l.bf16 %v9074_v54 }
 0x651   : > { %v15511_v10 = vadd.f32 %v8420_v6, %v7906_v53  ;;  %v9487_v6 = vunpack.c.l.bf16 %v9034_v39  ;;  %v16608_v39 = vld [vmem:[#allocation11_spill] sm:$0xff] }
 0x652   : > { %v9536_v42 = vadd.f32 %v9512_v48, %v9488_v55  ;;  %v8238_v55 = vor.u32 %v8236_v22, %v8234_v7 }
 0x654   : > { %v7438_v24 = vpop.f32.mrf.mxu2  ;;  %v7144_v50 = vpop.f32.mrf.mxu1  ;;  %v9560_v3 = vpack.c.bf16 %v9536_v42, %v9536_v42  ;;  %v9075_v42 = vshrl.u32 %v15492_v21, 16 }
 0x655   : > { %v15524_v12 = vadd.f32 %v7438_v24, %v15387_v14  ;;  %v8425_v34 = vpop.f32.mrf.mxu0  ;;  %v15527_v52 = vadd.f32 %v7144_v50, %v15151_v23  ;;  %v9535_v14 = vadd.f32 %v9511_v47, %v9487_v6 }
 0x656   : > { %v7800_v20 = vpop.f32.mrf.mxu3  ;;  %v9609_v54 = vunpack.c.l.b16 %v9560_v3  ;;  %v8890_v3 = vld [vmem:[%s11856_s12 + $0x4c] sm:$0xf] }
 0x657   : > { %v7907_v49 = vadd.f32 %v7800_v20, %v15066_v58  ;;  %10868 = vmatmul.msk.bf16.gmra.mxu1 %vm5479_vm8, %v16607_v60  ;;  %v9559_v53 = vpack.c.bf16 %v9535_v14, %v9535_v14  ;;  %v9105_v22 = vshrl.u32 %v8890_v3, 16 }
 0x658   : > { %10853 = vmatmul.msk.bf16.gmra.mxu0 %vm5479_vm8, %v8235_v32  ;;  %v16609_v32 = vld [vmem:[#allocation14_spill] sm:$0xff] }
 0x659   : > { %10890 = vmatmul.msk.bf16.gmra.mxu2 %vm479_vm1, %v9629_v5  ;;  %v15535_v26 = vadd.f32 %v8422_v63, %v7907_v49  ;;  %v9608_v63 = vunpack.c.l.b16 %v9559_v53  ;;  %v8242_v5 = vrot.slane %v8240_v13, 1  ;;  %v8888_v53 = vld [vmem:[%s11856_s12 + $0x44] sm:$0xf] }
 0x65a   : > { %v9081_v13 = vshll.u32 %v8888_v53, 16 }
 0x65b   : > { %10736 = vmatmul.msk.bf16.gmra.mxu3 %vm5479_vm8, %v10986_v30  ;;  %v9630_v47 = vpack.c.b16 %v9609_v54, %v9608_v63  ;;  %v8243_v49 = vsel %vm1288_vm3, %v8238_v55, %v8242_v5  ;;  %v9085_v63 = vshrl.u32 %v8888_v53, 16  ;;  %v9101_v54 = vshll.u32 %v8890_v3, 16 }
 0x65c   : > { %v7441_v23 = vpop.f32.mrf.mxu2  ;;  %v7146_v31 = vpop.f32.mrf.mxu1  ;;  %v9083_v55 = vrot.slane %v9081_v13, 5 }
 0x65d   : > { %v15539_v58 = vadd.f32 %v7441_v23, %v15421_v27  ;;  %v8427_v36 = vpop.f32.mrf.mxu0  ;;  %v15542_v1 = vadd.f32 %v7146_v31, %v15168_v18  ;;  %v8244_v23 = vshrl.u32 %v11768_v41, 16  ;;  %v9077_v41 = vrot.slane %v9075_v42, 4 }
 0x65e   : > { %v7803_v15 = vpop.f32.mrf.mxu3 }
 0x65f   : > { %v7908_v61 = vadd.f32 %v7803_v15, %v16608_v39  ;;  %v8891_v15 = vld [vmem:[%s11856_s12 + $0x50] sm:$0xf]  ;;  %v16611_v39 = vld [vmem:[#allocation12_spill] sm:$0xff]  ;;  %v8246_v13 = vor.u32 %v8244_v23, %v8242_v5 }
 0x660   : > { %v9115_v21 = vshrl.u32 %v8891_v15, 16 }
 0x661   : > { %v15545_v24 = vadd.f32 %v8425_v34, %v7908_v61  ;;  %v15561_v34 = vld [vmem:[#allocation2 + $0x98] sm:$0xff] }
 0x664   : > { %v15547_v6 = vpop.f32.mrf.mxu2  ;;  %v7149_v27 = vpop.f32.mrf.mxu1 }
 0x665   : > { %v8430_v50 = vpop.f32.mrf.mxu0  ;;  %v15550_v18 = vadd.f32 %v7149_v27, %v15181_v59  ;;  %v9111_v27 = vshll.u32 %v8891_v15, 16 }
 0x666   : > { %v7805_v48 = vpop.f32.mrf.mxu3 }
 0x667   : > { %v7909_v20 = vadd.f32 %v7805_v48, %v15096_v46  ;;  %10869 = vmatmul.msk.bf16.gmra.mxu1 %vm5479_vm8, %v16609_v32  ;;  %v8248_v46 = vshll.u32 %v15561_v34, 16  ;;  %v15580_v48 = vld [vmem:[%s11856_s12 + $0x48] sm:$0xf]  ;;  %v9113_v32 = vrot.slane %v9111_v27, 5 }
 0x668   : > { %10854 = vmatmul.msk.bf16.gmra.mxu0 %vm5479_vm8, %v8243_v49  ;;  %v9107_v49 = vrot.slane %v9105_v22, 4 }
 0x669   : > { %10891 = vmatmul.msk.bf16.gmra.mxu2 %vm479_vm1, %v9630_v47  ;;  %v15558_v7 = vadd.f32 %v8427_v36, %v7909_v20  ;;  %v15577_v47 = vrot.slane %v9101_v54, 5  ;;  %v15583_v20 = vld [vmem:[%s11856_s12 + $0x54] sm:$0xf] }
 0x66a   : > { %v9121_v3 = vshll.u32 %v15583_v20, 16 }
 0x66b   : > { %10737 = vmatmul.msk.bf16.gmra.mxu3 %vm5479_vm8, %v10987_v17  ;;  %v9108_v42 = vor.u32 %v9107_v49, %v15577_v47  ;;  %v16613_v49 = vld [vmem:[#allocation37_spill] sm:$0xff] }
 0x66c   : > { %v7446_v59 = vpop.f32.mrf.mxu2  ;;  %v7151_v60 = vpop.f32.mrf.mxu1 }
 0x66d   : > { %v15565_v30 = vadd.f32 %v7446_v59, %v15480_v2  ;;  %v8432_v14 = vpop.f32.mrf.mxu0  ;;  %v15569_v31 = vadd.f32 %v7151_v60, %v15198_v40  ;;  %v15575_v2 = vrot.slane %v8248_v46, 1  ;;  %v9087_v40 = vrot.slane %v9085_v63, 4 }
 0x66e   : > { %v7808_v36 = vpop.f32.mrf.mxu3  ;;  %v9078_v59 = vor.u32 %v9077_v41, %v15506_v57  ;;  %v9091_v60 = vshll.u32 %v15580_v48, 16 }
 0x66f   : > { %16610 = vst [vmem:[#allocation16_spill] sm:$0xff] %v15569_v31  ;;  %v7910_v61 = vadd.f32 %v7808_v36, %v16611_v39  ;;  %v9088_v46 = vor.u32 %v9087_v40, %v9083_v55  ;;  %v9117_v36 = vrot.slane %v9115_v21, 4  ;;  %v15598_v21 = vrot.slane %v9121_v3, 5 }
 0x670   : > { %v9079_v63 = vrot.slane %v9078_v59, 4  ;;  %v15593_v22 = vrot.slane %v9091_v60, 5  ;;  %v8251_v40 = vsel %vm1288_vm3, %v8246_v13, %v15575_v2 }
 0x671   : > { %v15585_v17 = vadd.f32 %v8430_v50, %v7910_v61  ;;  %v9089_v54 = vrot.slane %v9088_v46, 4  ;;  %v9109_v61 = vrot.slane %v9108_v42, 4  ;;  %v9118_v27 = vor.u32 %v9117_v36, %v9113_v32  ;;  %v10988_v46 = vld [vmem:[#allocation2 + $0x90] sm:$0xff] }
 0x672   : > { %v9084_v5 = vsel %vm15378_vm12, %v9079_v63, %v9083_v55  ;;  %v15615_v55 = vld [vmem:[#allocation2 + $0xa0] sm:$0xff] }
 0x673   : > { %v9094_v23 = vsel %vm15378_vm12, %v9089_v54, %v15593_v22  ;;  %v9119_v59 = vrot.slane %v9118_v27, 4  ;;  %v8256_v3 = vshll.u32 %v15615_v55, 16 }
 0x674   : > { %v15589_v53 = vpop.f32.mrf.mxu2  ;;  %v7154_v15 = vpop.f32.mrf.mxu1  ;;  %v9490_v60 = vunpack.c.l.bf16 %v9094_v23 }
 0x675   : > { %16612 = vst [vmem:[#allocation29_spill] sm:$0xff] %v15589_v53  ;;  %v8435_v39 = vpop.f32.mrf.mxu0  ;;  %v15596_v50 = vadd.f32 %v7154_v15, %v15211_v43  ;;  %v9114_v43 = vsel %vm15378_vm12, %v9109_v61, %v9113_v32  ;;  %v9124_v15 = vsel %vm15378_vm12, %v9119_v59, %v15598_v21  ;;  %v15629_v23 = vrot.slane %v8256_v3, 1  ;;  %v16616_v59 = vld [vmem:[#allocation28_spill] sm:$0xff] }
 0x676   : > { %v7810_v57 = vpop.f32.mrf.mxu3  ;;  %v9513_v36 = vunpack.c.l.bf16 %v9114_v43  ;;  %v9514_v32 = vunpack.c.l.bf16 %v9124_v15  ;;  %v8896_v43 = vld [vmem:[%s11856_s12 + $0x64] sm:$0xf]  ;;  %v15637_v3 = vld [vmem:[%s11856_s12 + $0x5c] sm:$0xf] }
 0x677   : > { %v7911_v41 = vadd.f32 %v7810_v57, %v15126_v44  ;;  %10870 = vmatmul.msk.bf16.gmra.mxu1 %vm5479_vm8, %v16613_v49  ;;  %v9489_v44 = vunpack.c.l.bf16 %v9084_v5  ;;  %v8252_v5 = vshrl.u32 %v15561_v34, 16  ;;  %v8893_v49 = vld [vmem:[%s11856_s12 + $0x58] sm:$0xf] }
 0x678   : > { %10855 = vmatmul.msk.bf16.gmra.mxu0 %vm5479_vm8, %v8251_v40  ;;  %v9538_v61 = vadd.f32 %v9514_v32, %v9490_v60  ;;  %v9131_v15 = vshll.u32 %v8893_v49, 16  ;;  %v9161_v32 = vshll.u32 %v8896_v43, 16 }
 0x679   : > { %v15613_v42 = vadd.f32 %v8432_v14, %v7911_v41  ;;  %v9537_v13 = vadd.f32 %v9513_v36, %v9489_v44 }
 0x67a   : > { %v9562_v60 = vpack.c.bf16 %v9538_v61, %v9538_v61 }
 0x67b   : > { %10738 = vmatmul.msk.bf16.gmra.mxu3 %vm5479_vm8, %v10988_v46  ;;  %v9561_v27 = vpack.c.bf16 %v9537_v13, %v9537_v13  ;;  %v9125_v46 = vshrl.u32 %v15583_v20, 16 }
 0x67c   : > { %v7451_v63 = vpop.f32.mrf.mxu2  ;;  %v7156_v54 = vpop.f32.mrf.mxu1  ;;  %v9611_v13 = vunpack.c.l.b16 %v9562_v60 }
 0x67d   : > { %v15623_v57 = vadd.f32 %v7451_v63, %v15527_v52  ;;  %v8437_v14 = vpop.f32.mrf.mxu0  ;;  %v15626_v41 = vadd.f32 %v7156_v54, %v15228_v56  ;;  %v9095_v52 = vshrl.u32 %v15580_v48, 16  ;;  %v9610_v36 = vunpack.c.l.b16 %v9561_v27 }
 0x67e   : > { %v7813_v40 = vpop.f32.mrf.mxu3  ;;  %v9135_v56 = vshrl.u32 %v8893_v49, 16  ;;  %v9127_v34 = vrot.slane %v9125_v46, 4  ;;  %v9165_v54 = vshrl.u32 %v8896_v43, 16  ;;  %v9141_v27 = vshll.u32 %v15637_v3, 16 }
 0x67f   : > { %16614 = vst [vmem:[#allocation7_spill] sm:$0xff] %v15623_v57  ;;  %v7912_v44 = vadd.f32 %v7813_v40, %v16616_v59  ;;  %v9097_v63 = vrot.slane %v9095_v52, 4  ;;  %v9133_v57 = vrot.slane %v9131_v15, 5  ;;  %v9631_v48 = vpack.c.b16 %v9611_v13, %v9610_v36 }
 0x680   : > { %16615 = vst [vmem:[#allocation13_spill] sm:$0xff] %v15626_v41  ;;  %v15640_v41 = vld [vmem:[%s11856_s12 + $0x68] sm:$0xf]  ;;  %v9137_v31 = vrot.slane %v9135_v56, 4  ;;  %v9128_v61 = vor.u32 %v9127_v34, %v15598_v21  ;;  %v15649_v52 = vrot.slane %v9161_v32, 5  ;;  %v9167_v43 = vrot.slane %v9165_v54, 4 }
 0x681   : > { %v15642_v40 = vadd.f32 %v8435_v39, %v7912_v44  ;;  %v9098_v20 = vor.u32 %v9097_v63, %v15593_v22  ;;  %v9171_v46 = vshll.u32 %v15640_v41, 16  ;;  %v8254_v39 = vor.u32 %v8252_v5, %v15575_v2  ;;  %10892 = vmatmul.msk.bf16.gmra.mxu2 %vm479_vm1, %v9631_v48 }
 0x682   : > { %v9138_v59 = vor.u32 %v9137_v31, %v9133_v57  ;;  %v9129_v22 = vrot.slane %v9128_v61, 4  ;;  %v15654_v36 = vrot.slane %v9141_v27, 5  ;;  %v9168_v32 = vor.u32 %v9167_v43, %v15649_v52  ;;  %v10989_v61 = vld [vmem:[#allocation2 + $0x98] sm:$0xff] }
 0x683   : > { %v9099_v44 = vrot.slane %v9098_v20, 4  ;;  %v15660_v13 = vrot.slane %v9171_v46, 5  ;;  %v8259_v2 = vsel %vm1288_vm3, %v8254_v39, %v15629_v23 }
 0x684   : > { %v15647_v49 = vpop.f32.mrf.mxu2  ;;  %v7159_v60 = vpop.f32.mrf.mxu1  ;;  %v9139_v31 = vrot.slane %v9138_v59, 4  ;;  %v9134_v34 = vsel %vm15378_vm12, %v9129_v22, %v9133_v57 }
 0x685   : > { %v8440_v15 = vpop.f32.mrf.mxu0  ;;  %v15657_v21 = vadd.f32 %v7159_v60, %v15241_v29  ;;  %v9104_v5 = vsel %vm15378_vm12, %v9099_v44, %v15577_v47  ;;  %v16617_v29 = vld [vmem:[#allocation44_spill] sm:$0xff]  ;;  %v9515_v20 = vunpack.c.l.bf16 %v9134_v34 }
 0x686   : > { %v7815_v56 = vpop.f32.mrf.mxu3  ;;  %v9144_v54 = vsel %vm15378_vm12, %v9139_v31, %v15654_v36  ;;  %v9491_v48 = vunpack.c.l.bf16 %v9104_v5 }
 0x687   : > { %v7913_v63 = vadd.f32 %v7815_v56, %v15156_v19  ;;  %10871 = vmatmul.msk.bf16.gmra.mxu1 %vm5479_vm8, %v16617_v29  ;;  %v9169_v19 = vrot.slane %v9168_v32, 4  ;;  %v9492_v27 = vunpack.c.l.bf16 %v9144_v54  ;;  %v16620_v32 = vld [vmem:[#allocation45_spill] sm:$0xff] }
 0x688   : > { %10856 = vmatmul.msk.bf16.gmra.mxu0 %vm5479_vm8, %v8259_v2  ;;  %v9539_v57 = vadd.f32 %v9515_v20, %v9491_v48  ;;  %v11771_v2 = vld [vmem:[#allocation2 + $0xa8] sm:$0xff]  ;;  %v8260_v48 = vshrl.u32 %v15615_v55, 16  ;;  %v10990_v55 = vld [vmem:[#allocation2 + $0xa0] sm:$0xff] }
 0x689   : > { %v15676_v59 = vadd.f32 %v8437_v14, %v7913_v63  ;;  %v9174_v47 = vsel %vm15378_vm12, %v9169_v19, %v15660_v13  ;;  %v8264_v5 = vshll.u32 %v11771_v2, 16 }
 0x68a   : > { %v9516_v43 = vunpack.c.l.bf16 %v9174_v47  ;;  %v9563_v60 = vpack.c.bf16 %v9539_v57, %v9539_v57 }
 0x68b   : > { %10739 = vmatmul.msk.bf16.gmra.mxu3 %vm5479_vm8, %v10989_v61  ;;  %v8266_v20 = vrot.slane %v8264_v5, 1  ;;  %v16625_v5 = vld [vmem:[#allocation34_spill] sm:$0xff] }
 0x68c   : > { %v7456_v46 = vpop.f32.mrf.mxu2  ;;  %v7161_v39 = vpop.f32.mrf.mxu1  ;;  %v9540_v56 = vadd.f32 %v9516_v43, %v9492_v27  ;;  %v9612_v29 = vunpack.c.l.b16 %v9563_v60  ;;  %v16622_v60 = vld [vmem:[#allocation39_spill] sm:$0xff] }
 0x68d   : > { %v15683_v44 = vadd.f32 %v7456_v46, %v15550_v18  ;;  %v8442_v22 = vpop.f32.mrf.mxu0  ;;  %v15686_v31 = vadd.f32 %v7161_v39, %v15258_v28  ;;  %v8262_v28 = vor.u32 %v8260_v48, %v15629_v23 }
 0x68e   : > { %v7818_v14 = vpop.f32.mrf.mxu3  ;;  %v9564_v34 = vpack.c.bf16 %v9540_v56, %v9540_v56 }
 0x68f   : > { %16618 = vst [vmem:[#allocation35_spill] sm:$0xff] %v15683_v44  ;;  %v7914_v63 = vadd.f32 %v7818_v14, %v16620_v32  ;;  %v15713_v32 = vld [vmem:[#allocation2 + $0xb0] sm:$0xff] }
 0x690   : > { %16619 = vst [vmem:[#allocation27_spill] sm:$0xff] %v15686_v31  ;;  %v9613_v54 = vunpack.c.l.b16 %v9564_v34 }
 0x691   : > { %v15689_v19 = vadd.f32 %v8440_v15, %v7914_v63  ;;  %v8267_v15 = vsel %vm1288_vm3, %v8262_v28, %v8266_v20  ;;  %v8272_v63 = vshll.u32 %v15713_v32, 16  ;;  %v9175_v28 = vshrl.u32 %v15640_v41, 16 }
 0x692   : > { %v9632_v18 = vpack.c.b16 %v9613_v54, %v9612_v29  ;;  %v8268_v54 = vshrl.u32 %v11771_v2, 16 }
 0x693   : > { %v8274_v48 = vrot.slane %v8272_v63, 1 }
 0x694   : > { %v15692_v61 = vpop.f32.mrf.mxu2  ;;  %v7164_v27 = vpop.f32.mrf.mxu1  ;;  %10893 = vmatmul.msk.bf16.gmra.mxu2 %vm479_vm1, %v9632_v18 }
 0x695   : > { %16621 = vst [vmem:[#allocation5_spill] sm:$0xff] %v15692_v61  ;;  %v15697_v47 = vadd.f32 %v7164_v27, %v15271_v51  ;;  %v8445_v43 = vpop.f32.mrf.mxu0 }
 0x696   : > { %v7820_v57 = vpop.f32.mrf.mxu3 }
 0x697   : > { %v7915_v46 = vadd.f32 %v7820_v57, %v15186_v25  ;;  %10872 = vmatmul.msk.bf16.gmra.mxu1 %vm5479_vm8, %v16622_v60  ;;  %v8898_v60 = vld [vmem:[%s11856_s12 + $0x6c] sm:$0xf] }
 0x698   : > { %10857 = vmatmul.msk.bf16.gmra.mxu0 %vm5479_vm8, %v8267_v15  ;;  %v8895_v15 = vld [vmem:[%s11856_s12 + $0x60] sm:$0xf] }
 0x699   : > { %v15704_v39 = vadd.f32 %v8442_v22, %v7915_v46  ;;  %v9155_v2 = vshrl.u32 %v8895_v15, 16 }
 0x69b   : > { %10740 = vmatmul.msk.bf16.gmra.mxu3 %vm5479_vm8, %v10990_v55  ;;  %v16627_v55 = vld [vmem:[#allocation33_spill] sm:$0xff] }
 0x69c   : > { %v7461_v23 = vpop.f32.mrf.mxu2  ;;  %v7166_v56 = vpop.f32.mrf.mxu1 }
 0x69d   : > { %v15708_v51 = vadd.f32 %v7461_v23, %v15596_v50  ;;  %v15711_v14 = vadd.f32 %v7166_v56, %v15288_v35  ;;  %v8447_v34 = vpop.f32.mrf.mxu0  ;;  %v8270_v50 = vor.u32 %v8268_v54, %v8266_v20  ;;  %v9145_v35 = vshrl.u32 %v15637_v3, 16  ;;  %v10991_v3 = vld [vmem:[#allocation2 + $0xa8] sm:$0xff] }
 0x69e   : > { %v7823_v25 = vpop.f32.mrf.mxu3  ;;  %v9151_v23 = vshll.u32 %v8895_v15, 16  ;;  %v9181_v56 = vshll.u32 %v8898_v60, 16  ;;  %v9185_v20 = vshrl.u32 %v8898_v60, 16 }
 0x69f   : > { %16623 = vst [vmem:[#allocation36_spill] sm:$0xff] %v15708_v51  ;;  %v7916_v22 = vadd.f32 %v7823_v25, %v16625_v5  ;;  %v8275_v46 = vsel %vm1288_vm3, %v8270_v50, %v8274_v48  ;;  %v16628_v25 = vld [vmem:[#allocation18_spill] sm:$0xff]  ;;  %v9147_v63 = vrot.slane %v9145_v35, 4  ;;  %v9157_v5 = vrot.slane %v9155_v2, 4 }
 0x6a0   : > { %16624 = vst [vmem:[#allocation9_spill] sm:$0xff] %v15711_v14  ;;  %v9153_v41 = vrot.slane %v9151_v23, 5  ;;  %v15733_v50 = vld [vmem:[%s11856_s12 + $0x70] sm:$0xf]  ;;  %v9183_v14 = vrot.slane %v9181_v56, 5 }
 0x6a1   : > { %v15717_v29 = vadd.f32 %v8445_v43, %v7916_v22  ;;  %v9177_v22 = vrot.slane %v9175_v28, 4  ;;  %v9148_v15 = vor.u32 %v9147_v63, %v15654_v36  ;;  %v9191_v60 = vshll.u32 %v15733_v50, 16  ;;  %v16630_v36 = vld [vmem:[#allocation32_spill] sm:$0xff] }
 0x6a3   : > { %v15744_v31 = vrot.slane %v9191_v60, 5 }
 0x6a4   : > { %v15719_v18 = vpop.f32.mrf.mxu2  ;;  %v15721_v27 = vpop.f32.mrf.mxu1 }
 0x6a5   : > { %16626 = vst [vmem:[#allocation57_spill] sm:$0xff] %v15719_v18  ;;  %v8450_v54 = vpop.f32.mrf.mxu0  ;;  %v9187_v18 = vrot.slane %v9185_v20, 4 }
 0x6a6   : > { %v7825_v57 = vpop.f32.mrf.mxu3 }
 0x6a7   : > { %v7917_v43 = vadd.f32 %v7825_v57, %v16627_v55  ;;  %10873 = vmatmul.msk.bf16.gmra.mxu1 %vm5479_vm8, %v16628_v25  ;;  %v9158_v55 = vor.u32 %v9157_v5, %v9153_v41  ;;  %v9188_v23 = vor.u32 %v9187_v18, %v9183_v14  ;;  %v9149_v25 = vrot.slane %v9148_v15, 4 }
 0x6a8   : > { %10858 = vmatmul.msk.bf16.gmra.mxu0 %vm5479_vm8, %v8275_v46  ;;  %v9178_v46 = vor.u32 %v9177_v22, %v15660_v13 }
 0x6a9   : > { %v15735_v57 = vadd.f32 %v8447_v34, %v7917_v43  ;;  %v9159_v56 = vrot.slane %v9158_v55, 4  ;;  %v11773_v43 = vld [vmem:[#allocation2 + $0xb8] sm:$0xff]  ;;  %v9154_v13 = vsel %vm15378_vm12, %v9149_v25, %v9153_v41  ;;  %v8276_v41 = vshrl.u32 %v15713_v32, 16 }
 0x6aa   : > { %v9179_v20 = vrot.slane %v9178_v46, 4  ;;  %v8280_v51 = vshll.u32 %v11773_v43, 16  ;;  %v9493_v22 = vunpack.c.l.bf16 %v9154_v13  ;;  %v16632_v13 = vld [vmem:[#allocation54_spill] sm:$0xff] }
 0x6ab   : > { %10741 = vmatmul.msk.bf16.gmra.mxu3 %vm5479_vm8, %v10991_v3  ;;  %v9189_v3 = vrot.slane %v9188_v23, 4 }
 0x6ac   : > { %v7466_v35 = vpop.f32.mrf.mxu2  ;;  %v8709_v2 = vpop.f32.mrf.mxu1  ;;  %v9184_v18 = vsel %vm15378_vm12, %v9179_v20, %v9183_v14  ;;  %v8282_v23 = vrot.slane %v8280_v51, 1  ;;  %v8278_v20 = vor.u32 %v8276_v41, %v8274_v48  ;;  %v10992_v51 = vld [vmem:[#allocation2 + $0xb0] sm:$0xff]  ;;  %v16636_v41 = vld [vmem:[#allocation25_spill] sm:$0xff] }
 0x6ad   : > { %v15742_v28 = vadd.f32 %v7466_v35, %v15657_v21  ;;  %v9164_v21 = vsel %vm15378_vm12, %v9159_v56, %v15649_v52  ;;  %v9194_v5 = vsel %vm15378_vm12, %v9189_v3, %v15744_v31  ;;  %v9517_v55 = vunpack.c.l.bf16 %v9184_v18 }
 0x6ae   : > { %v7828_v34 = vpop.f32.mrf.mxu3  ;;  %v9494_v15 = vunpack.c.l.bf16 %v9164_v21  ;;  %v9518_v46 = vunpack.c.l.bf16 %v9194_v5  ;;  %v8283_v18 = vsel %vm1288_vm3, %v8278_v20, %v8282_v23 }
 0x6af   : > { %16629 = vst [vmem:[#allocation20_spill] sm:$0xff] %v15742_v28  ;;  %v7918_v63 = vadd.f32 %v7828_v34, %v16630_v36  ;;  %v9541_v35 = vadd.f32 %v9517_v55, %v9493_v22  ;;  %v8452_v34 = vpop.f32.mrf.mxu0 }
 0x6b0   : > { %v9542_v25 = vadd.f32 %v9518_v46, %v9494_v15  ;;  %v16635_v15 = vld [vmem:[#allocation38_spill] sm:$0xff] }
 0x6b1   : > { %v15757_v60 = vadd.f32 %v8450_v54, %v7918_v63  ;;  %v9565_v56 = vpack.c.bf16 %v9541_v35, %v9541_v35  ;;  %v16633_v63 = vld [vmem:[#allocation51_spill] sm:$0xff]  ;;  %v8827_v55 = vadd.f32 %v15721_v27, %v16635_v15  ;;  %v16640_v15 = vld [vmem:[#allocation50_spill] sm:$0xff] }
 0x6b2   : > { %v9566_v36 = vpack.c.bf16 %v9542_v25, %v9542_v25 }
 0x6b3   : > { %v9614_v3 = vunpack.c.l.b16 %v9565_v56  ;;  %v16637_v56 = vld [vmem:[#allocation49_spill] sm:$0xff] }
 0x6b4   : > { %v15760_v52 = vpop.f32.mrf.mxu2  ;;  %v8712_v14 = vpop.f32.mrf.mxu1  ;;  %v9615_v54 = vunpack.c.l.b16 %v9566_v36 }
 0x6b5   : > { %16631 = vst [vmem:[#allocation48_spill] sm:$0xff] %v15760_v52 }
 0x6b6   : > { %v7830_v28 = vpop.f32.mrf.mxu3  ;;  %v9633_v32 = vpack.c.b16 %v9615_v54, %v9614_v3 }
 0x6b7   : > { %v7919_v21 = vadd.f32 %v7830_v28, %v16632_v13  ;;  %10874 = vmatmul.msk.bf16.gmra.mxu1 %vm5479_vm8, %v16633_v63  ;;  %v8455_v46 = vpop.f32.mrf.mxu0 }
 0x6b8   : > { %10859 = vmatmul.msk.bf16.gmra.mxu0 %vm5479_vm8, %v8283_v18  ;;  %10894 = vmatmul.msk.bf16.gmra.mxu2 %vm479_vm1, %v9633_v32 }
 0x6b9   : > { %v15767_v5 = vadd.f32 %v8452_v34, %v7919_v21  ;;  %v11774_v34 = vld [vmem:[#allocation2 + $0xc0] sm:$0xff]  ;;  %v8284_v21 = vshrl.u32 %v11773_v43, 16 }
 0x6ba   : > { %v8288_v36 = vshll.u32 %v11774_v34, 16 }
 0x6bb   : > { %10742 = vmatmul.msk.bf16.gmra.mxu3 %vm5479_vm8, %v10992_v51  ;;  %v8286_v63 = vor.u32 %v8284_v21, %v8282_v23  ;;  %v16639_v51 = vld [vmem:[#allocation55_spill] sm:$0xff]  ;;  %v8292_v21 = vshrl.u32 %v11774_v34, 16 }
 0x6bc   : > { %v7471_v48 = vpop.f32.mrf.mxu2  ;;  %v8714_v28 = vpop.f32.mrf.mxu1  ;;  %v8290_v18 = vrot.slane %v8288_v36, 1  ;;  %v8828_v32 = vadd.f32 %v8709_v2, %v16639_v51  ;;  %v10993_v23 = vld [vmem:[#allocation2 + $0xb8] sm:$0xff]  ;;  %v9195_v36 = vshrl.u32 %v15733_v50, 16 }
 0x6bd   : > { %v15772_v22 = vadd.f32 %v7471_v48, %v15697_v47  ;;  %v8830_v25 = vadd.f32 %v8714_v28, %v16636_v41 }
 0x6be   : > { %v7833_v35 = vpop.f32.mrf.mxu3  ;;  %v8294_v44 = vor.u32 %v8292_v21, %v8290_v18  ;;  %v16643_v21 = vld [vmem:[#allocation6_spill] sm:$0xff] }
 0x6bf   : > { %16634 = vst [vmem:[#allocation24_spill] sm:$0xff] %v15772_v22  ;;  %v7920_v20 = vadd.f32 %v7833_v35, %v16637_v56  ;;  %v8924_v3 = vadd.f32 %v8830_v25, %v8827_v55  ;;  %v8291_v35 = vsel %vm1288_vm3, %v8286_v63, %v8290_v18  ;;  %v8457_v41 = vpop.f32.mrf.mxu0  ;;  %v16641_v56 = vld [vmem:[#allocation52_spill] sm:$0xff] }
 0x6c1   : > { %v15778_v13 = vadd.f32 %v8455_v46, %v7920_v20 }
 0x6c4   : > { %v15780_v54 = vpop.f32.mrf.mxu2  ;;  %v8717_v47 = vpop.f32.mrf.mxu1 }
 0x6c5   : > { %16638 = vst [vmem:[#allocation46_spill] sm:$0xff] %v15780_v54  ;;  %v8831_v48 = vadd.f32 %v8717_v47, %v15410_v33  ;;  %v15792_v33 = vld [vmem:[#allocation2 + $0xc8] sm:$0xff]  ;;  %v16642_v47 = vld [vmem:[#allocation40_spill] sm:$0xff] }
 0x6c6   : > { %v7835_v27 = vpop.f32.mrf.mxu3  ;;  %v8296_v2 = vshll.u32 %v15792_v33, 16  ;;  %v8829_v63 = vadd.f32 %v8712_v14, %v16642_v47  ;;  %v8904_v47 = vld [vmem:[%s11856_s12 + $0x84] sm:$0xf] }
 0x6c7   : > { %v7921_v28 = vadd.f32 %v7835_v27, %v16640_v15  ;;  %10875 = vmatmul.msk.bf16.gmra.mxu1 %vm5479_vm8, %v16641_v56  ;;  %v8925_v43 = vadd.f32 %v8831_v48, %v8828_v32  ;;  %v8900_v32 = vld [vmem:[%s11856_s12 + $0x74] sm:$0xf]  ;;  %v8902_v27 = vld [vmem:[%s11856_s12 + $0x7c] sm:$0xf]  ;;  %v8903_v48 = vld [vmem:[%s11856_s12 + $0x80] sm:$0xf] }
 0x6c8   : > { %10860 = vmatmul.msk.bf16.gmra.mxu0 %vm5479_vm8, %v8291_v35  ;;  %v15802_v15 = vrot.slane %v8296_v2, 1  ;;  %v9205_v35 = vshrl.u32 %v8900_v32, 16  ;;  %v9225_v56 = vshrl.u32 %v8902_v27, 16  ;;  %v9231_v50 = vshll.u32 %v8903_v48, 16 }
 0x6c9   : > { %v15789_v55 = vadd.f32 %v8457_v41, %v7921_v28  ;;  %v9201_v28 = vshll.u32 %v8900_v32, 16  ;;  %v9221_v41 = vshll.u32 %v8902_v27, 16  ;;  %v9235_v34 = vshrl.u32 %v8903_v48, 16 }
 0x6ca   : > { %v9227_v54 = vrot.slane %v9225_v56, 4  ;;  %v9233_v22 = vrot.slane %v9231_v50, 5  ;;  %v10994_v50 = vld [vmem:[#allocation2 + $0xc0] sm:$0xff] }
 0x6cb   : > { %10743 = vmatmul.msk.bf16.gmra.mxu3 %vm5479_vm8, %v10993_v23  ;;  %v9197_v23 = vrot.slane %v9195_v36, 4  ;;  %v9203_v14 = vrot.slane %v9201_v28, 5  ;;  %v9237_v61 = vrot.slane %v9235_v34, 4 }
 0x6cc   : > { %v9688_v46 = vpop.f32.mrf.mxu2  ;;  %v8719_v25 = vpop.f32.mrf.mxu1 }
 0x6cd   : > { %v9748_v20 = vadd.f32 %v9688_v46, %v8924_v3  ;;  %v8832_v51 = vadd.f32 %v8719_v25, %v15440_v16  ;;  %v9207_v46 = vrot.slane %v9205_v35, 4  ;;  %v15804_v16 = vrot.slane %v9221_v41, 5  ;;  %v8901_v25 = vld [vmem:[%s11856_s12 + $0x78] sm:$0xf] }
 0x6ce   : > { %v9211_v52 = vshll.u32 %v8901_v25, 16  ;;  %v9238_v53 = vor.u32 %v9237_v61, %v9233_v22 }
 0x6cf   : > { %9772 = vst.msk [vmem:[#allocation3] sm:$0xff] %vm5479_vm8, %v9748_v20  ;;  %v8926_v3 = vadd.f32 %v8832_v51, %v8829_v63  ;;  %v9198_v20 = vor.u32 %v9197_v23, %v15744_v31  ;;  %v9208_v2 = vor.u32 %v9207_v46, %v9203_v14  ;;  %v9228_v63 = vor.u32 %v9227_v54, %v15804_v16 }
 0x6d0   : > { %v9241_v51 = vshll.u32 %v8904_v47, 16  ;;  %v9213_v35 = vrot.slane %v9211_v52, 5  ;;  %v8299_v31 = vsel %vm1288_vm3, %v8294_v44, %v15802_v15  ;;  %v9239_v52 = vrot.slane %v9238_v53, 4 }
 0x6d1   : > { %v9199_v48 = vrot.slane %v9198_v20, 4  ;;  %v9209_v28 = vrot.slane %v9208_v2, 4  ;;  %v9229_v41 = vrot.slane %v9228_v63, 4 }
 0x6d2   : > { %v9243_v56 = vrot.slane %v9241_v51, 5 }
 0x6d3   : > { %v9204_v18 = vsel %vm15378_vm12, %v9199_v48, %v9203_v14  ;;  %v9214_v54 = vsel %vm15378_vm12, %v9209_v28, %v9213_v35  ;;  %v9234_v61 = vsel %vm15378_vm12, %v9229_v41, %v9233_v22  ;;  %v15827_v14 = vld [vmem:[#allocation2 + $0xd0] sm:$0xff]  ;;  %v8905_v28 = vld [vmem:[%s11856_s12 + $0x88] sm:$0xf] }
 0x6d4   : > { %v9690_v32 = vpop.f32.mrf.mxu2  ;;  %v15810_v27 = vpop.f32.mrf.mxu1  ;;  %v9496_v34 = vunpack.c.l.bf16 %v9214_v54  ;;  %v9519_v44 = vunpack.c.l.bf16 %v9234_v61  ;;  %v9244_v23 = vsel %vm15378_vm12, %v9239_v52, %v9243_v56  ;;  %v8304_v53 = vshll.u32 %v15827_v14, 16 }
 0x6d5   : > { %v9749_v36 = vadd.f32 %v9690_v32, %v8925_v43  ;;  %v9495_v43 = vunpack.c.l.bf16 %v9204_v18  ;;  %v9520_v46 = vunpack.c.l.bf16 %v9244_v23  ;;  %v9215_v18 = vshrl.u32 %v8901_v25, 16 }
 0x6d6   : > { %v9245_v54 = vshrl.u32 %v8904_v47, 16  ;;  %v8306_v47 = vrot.slane %v8304_v53, 1 }
 0x6d7   : > { %9773 = vst.msk [vmem:[#allocation3 + $0x8] sm:$0xff] %vm5479_vm8, %v9749_v36  ;;  %10876 = vmatmul.msk.bf16.gmra.mxu1 %vm5479_vm8, %v16643_v21  ;;  %v9543_v20 = vadd.f32 %v9519_v44, %v9495_v43  ;;  %v9544_v63 = vadd.f32 %v9520_v46, %v9496_v34  ;;  %v8300_v21 = vshrl.u32 %v15792_v33, 16  ;;  %v9251_v43 = vshll.u32 %v8905_v28, 16  ;;  %v7994_v34 = vld [vmem:[#allocation2 + $0xd8] sm:$0x1] }
 0x6d8   : > { %10861 = vmatmul.msk.bf16.gmra.mxu0 %vm5479_vm8, %v8299_v31  ;;  %v15836_v31 = vld [vmem:[%s16197_s4] ss:$0 sm:$0xff]  ;;  %v9217_v44 = vrot.slane %v9215_v18, 4  ;;  %v9247_v23 = vrot.slane %v9245_v54, 4  ;;  %v9255_v46 = vshrl.u32 %v8905_v28, 16  ;;  %v8094_v28 = vunpack.c.l.b16 %v7994_v34 }
 0x6d9   : > { %v9567_v51 = vpack.c.bf16 %v9543_v20, %v9543_v20  ;;  %v9568_v61 = vpack.c.bf16 %v9544_v63, %v9544_v63  ;;  %v8302_v25 = vor.u32 %v8300_v21, %v15802_v15  ;;  %v9253_v63 = vrot.slane %v9251_v43, 5  ;;  %v15861_v18 = vld [vmem:[%s11856_s12 + $0x98] sm:$0xf] }
 0x6da   : > { %v9248_v33 = vor.u32 %v9247_v23, %v9243_v56 }
 0x6db   : > { %10744 = vmatmul.msk.bf16.gmra.mxu3 %vm5479_vm8, %v10994_v50  ;;  %v9616_v52 = vunpack.c.l.b16 %v9567_v51  ;;  %v9617_v20 = vunpack.c.l.b16 %v9568_v61 }
 0x6dc   : > { %v9693_v2 = vpop.f32.mrf.mxu2  ;;  %v15829_v32 = vpop.f32.mrf.mxu1  ;;  %v9249_v21 = vrot.slane %v9248_v33, 4 }
 0x6dd   : > { %v9750_v22 = vadd.f32 %v9693_v2, %v8926_v3  ;;  %v15843_v3 = vld [vmem:[%s16199_s6] ss:$0 sm:$0xff]  ;;  %v15848_v2 = vld [vmem:[%s11856_s12 + $0x8c] sm:$0xf]  ;;  %v9634_v51 = vpack.c.b16 %v9617_v20, %v9616_v52  ;;  %v8307_v52 = vsel %vm1288_vm3, %v8302_v25, %v8306_v47  ;;  %v9291_v25 = vshll.u32 %v15861_v18, 16 }
 0x6de   : > { %v9796_v36 = vld [vmem:[#allocation3] ss:$2 sm:$0xff]  ;;  %v9820_v48 = vld [vmem:[#allocation3 + $0x1] ss:$2 sm:$0xff] }
 0x6df   : > { %v9843_v41 = vadd.f32 %v9820_v48, %v9796_v36  ;;  %9774 = vst.msk [vmem:[#allocation3 + $0x10] sm:$0xff] %vm5479_vm8, %v9750_v22  ;;  %v8908_v36 = vld [vmem:[%s11856_s12 + $0x94] sm:$0xf]  ;;  %v9218_v48 = vor.u32 %v9217_v44, %v9213_v35  ;;  %v9261_v35 = vshll.u32 %v15848_v2, 16  ;;  %10895 = vmatmul.msk.bf16.gmra.mxu2 %vm479_vm1, %v9634_v51  ;;  %v16644_v44 = vld [vmem:[#allocation21_spill] sm:$0xff] }
 0x6e0   : > { %v9281_v61 = vshll.u32 %v8908_v36, 16  ;;  %v9285_v20 = vshrl.u32 %v8908_v36, 16 }
 0x6e1   : > { %v9855_v50 = vmul.f32 0.25, %v9843_v41  ;;  %v9257_v41 = vrot.slane %v9255_v46, 4  ;;  %v9219_v54 = vrot.slane %v9218_v48, 4  ;;  %v15873_v34 = vrot.slane %v9261_v35, 5 }
 0x6e2   : > { %v15878_v46 = vrot.slane %v9281_v61, 5  ;;  %v15881_v48 = vpack.c.b16 %v8094_v28, %v8094_v28  ;;  %v9287_v51 = vrot.slane %v9285_v20, 4 }
 0x6e3   : > { %v9871_v22 = vadd.f32 %v15836_v31, %v9855_v50  ;;  %v9258_v56 = vor.u32 %v9257_v41, %v9253_v63  ;;  %v9224_v43 = vsel %vm15378_vm12, %v9219_v54, %v15804_v16  ;;  %v9254_v50 = vsel %vm15378_vm12, %v9249_v21, %v9253_v63 }
 0x6e4   : > { %v15858_v53 = vpop.f32.mrf.mxu1  ;;  %v9497_v16 = vunpack.c.l.bf16 %v9224_v43  ;;  %v9521_v33 = vunpack.c.l.bf16 %v9254_v50  ;;  %v9695_v63 = vpop.f32.mrf.mxu2  ;;  %v15888_v54 = vrot.slane %v9291_v25, 5  ;;  %v8308_v21 = vshrl.u32 %v15827_v14, 16 }
 0x6e5   : > { %v9887_v15 = vadd.f32 %v15843_v3, %v9871_v22  ;;  %v9259_v23 = vrot.slane %v9258_v56, 4  ;;  %v10995_v22 = vld [vmem:[#allocation2 + $0xc8] sm:$0xff]  ;;  %v8312_v28 = vshll.u32 %v15881_v48, 16  ;;  %v8833_v56 = vadd.f32 %v15810_v27, %v15469_v45 }
 0x6e6   : > { %v9545_v35 = vadd.f32 %v9521_v33, %v9497_v16 }
 0x6e7   : > { %9899 = vst.msk [vmem:[%s15855_s17] sm:$0xff] %vm5479_vm8, %v9887_v15  ;;  %10877 = vmatmul.msk.bf16.gmra.mxu1 %vm5479_vm8, %v16644_v44  ;;  %v9264_v41 = vsel %vm15378_vm12, %v9259_v23, %v15873_v34  ;;  %v9288_v15 = vor.u32 %v9287_v51, %v15878_v46  ;;  %v8310_v23 = vor.u32 %v8308_v21, %v8306_v47  ;;  %v8314_v20 = vrot.slane %v8312_v28, 1  ;;  %v16645_v21 = vld [vmem:[#allocation42_spill] sm:$0xff] }
 0x6e8   : > { %10862 = vmatmul.msk.bf16.gmra.mxu0 %vm5479_vm8, %v8307_v52  ;;  %v9498_v43 = vunpack.c.l.bf16 %v9264_v41  ;;  %v8834_v41 = vadd.f32 %v15829_v32, %v15494_v38 }
 0x6e9   : > { %v9289_v52 = vrot.slane %v9288_v15, 4  ;;  %v8315_v45 = vsel %vm1288_vm3, %v8310_v23, %v8314_v20 }
 0x6eb   : > { %10745 = vmatmul.msk.bf16.gmra.mxu3 %vm5479_vm8, %v10995_v22  ;;  %v9294_v44 = vsel %vm15378_vm12, %v9289_v52, %v15888_v54  ;;  %v9569_v22 = vpack.c.bf16 %v9545_v35, %v9545_v35 }
 0x6ec   : > { %v8729_v36 = vpop.f32.mrf.mxu1  ;;  %v9522_v25 = vunpack.c.l.bf16 %v9294_v44  ;;  %v9698_v33 = vpop.f32.mrf.mxu2 }
 0x6ed   : > { %v8836_v61 = vadd.f32 %v8729_v36, %v15535_v26  ;;  %v9618_v27 = vunpack.c.l.b16 %v9569_v22  ;;  %v10996_v36 = vld [vmem:[#allocation2 + $0xd0] sm:$0xff]  ;;  %v9265_v22 = vshrl.u32 %v15848_v2, 16 }
 0x6ee   : > { %v9546_v11 = vadd.f32 %v9522_v25, %v9498_v43 }
 0x6ef   : > { %v8927_v50 = vadd.f32 %v8836_v61, %v8833_v56 }
 0x6f0   : > { %v9570_v26 = vpack.c.bf16 %v9546_v11, %v9546_v11 }
 0x6f1   : > { %v9751_v51 = vadd.f32 %v9695_v63, %v8927_v50 }
 0x6f2   : > { %v9619_v47 = vunpack.c.l.b16 %v9570_v26 }
 0x6f3   : > { %9775 = vst.msk [vmem:[#allocation3 + $0x18] sm:$0xff] %vm5479_vm8, %v9751_v51  ;;  %v8910_v51 = vld [vmem:[%s11856_s12 + $0x9c] sm:$0xf] }
 0x6f4   : > { %v8732_v16 = vpop.f32.mrf.mxu1  ;;  %v9635_v28 = vpack.c.b16 %v9619_v47, %v9618_v27  ;;  %v9700_v43 = vpop.f32.mrf.mxu2  ;;  %v9305_v26 = vshrl.u32 %v8910_v51, 16  ;;  %v9267_v27 = vrot.slane %v9265_v22, 4  ;;  %v15924_v47 = vld [vmem:[%s11856_s12 + $0xa0] sm:$0xf] }
 0x6f5   : > { %v8837_v15 = vadd.f32 %v8732_v16, %v15545_v24  ;;  %v8835_v24 = vadd.f32 %v15858_v53, %v15511_v10  ;;  %v9295_v10 = vshrl.u32 %v15861_v18, 16  ;;  %v8907_v53 = vld [vmem:[%s11856_s12 + $0x90] sm:$0xf] }
 0x6f6   : > { %10896 = vmatmul.msk.bf16.gmra.mxu2 %vm479_vm1, %v9635_v28  ;;  %v9275_v16 = vshrl.u32 %v8907_v53, 16  ;;  %v9268_v2 = vor.u32 %v9267_v27, %v15873_v34 }
 0x6f7   : > { %10878 = vmatmul.msk.bf16.gmra.mxu1 %vm5479_vm8, %v16645_v21  ;;  %v8928_v63 = vadd.f32 %v8837_v15, %v8834_v41 }
 0x6f8   : > { %10863 = vmatmul.msk.bf16.gmra.mxu0 %vm5479_vm8, %v8315_v45  ;;  %v16646_v45 = vld [vmem:[#allocation22_spill] sm:$0xff]  ;;  %v9277_v15 = vrot.slane %v9275_v16, 4 }
 0x6f9   : > { %v9752_v35 = vadd.f32 %v9698_v33, %v8928_v63  ;;  %v9301_v33 = vshll.u32 %v8910_v51, 16  ;;  %v9307_v63 = vrot.slane %v9305_v26, 4 }
 0x6fa   : > { %v9798_v56 = vld [vmem:[#allocation3 + $0x10] ss:$2 sm:$0xff]  ;;  %v9822_v61 = vld [vmem:[#allocation3 + $0x11] ss:$2 sm:$0xff] }
 0x6fb   : > { %10746 = vmatmul.msk.bf16.gmra.mxu3 %vm5479_vm8, %v10996_v36  ;;  %v9844_v38 = vadd.f32 %v9822_v61, %v9798_v56  ;;  %9776 = vst.msk [vmem:[#allocation3 + $0x20] sm:$0xff] %vm5479_vm8, %v9752_v35  ;;  %v9297_v36 = vrot.slane %v9295_v10, 4  ;;  %v9303_v21 = vrot.slane %v9301_v33, 5  ;;  %v9311_v35 = vshll.u32 %v15924_v47, 16 }
 0x6fc   : > { %v8734_v11 = vpop.f32.mrf.mxu1 }
 0x6fd   : > { %v9856_v32 = vmul.f32 0.25, %v9844_v38  ;;  %v8838_v52 = vadd.f32 %v8734_v11, %v15558_v7  ;;  %v9271_v7 = vshll.u32 %v8907_v53, 16  ;;  %v9298_v28 = vor.u32 %v9297_v36, %v15888_v54 }
 0x6fe   : > { %v9308_v38 = vor.u32 %v9307_v63, %v9303_v21 }
 0x6ff   : > { %v9872_v50 = vadd.f32 %v15836_v31, %v9856_v32  ;;  %v8929_v44 = vadd.f32 %v8838_v52, %v8835_v24  ;;  %v9273_v41 = vrot.slane %v9271_v7, 5  ;;  %v9269_v32 = vrot.slane %v9268_v2, 4 }
 0x701   : > { %v9888_v23 = vadd.f32 %v15843_v3, %v9872_v50  ;;  %v9753_v20 = vadd.f32 %v9700_v43, %v8929_v44  ;;  %v9278_v18 = vor.u32 %v9277_v15, %v9273_v41  ;;  %v9299_v43 = vrot.slane %v9298_v28, 4 }
 0x702   : > { %v9309_v50 = vrot.slane %v9308_v38, 4  ;;  %v15929_v44 = vrot.slane %v9311_v35, 5  ;;  %v9274_v34 = vsel %vm15378_vm12, %v9269_v32, %v9273_v41 }
 0x703   : > { %9900 = vst.msk [vmem:[%s15855_s17 + $0x8] sm:$0xff] %vm5479_vm8, %v9888_v23  ;;  %v9279_v52 = vrot.slane %v9278_v18, 4  ;;  %v9499_v10 = vunpack.c.l.bf16 %v9274_v34 }
 0x704   : > { %9777 = vst.msk [vmem:[#allocation3 + $0x28] sm:$0xff] %vm5479_vm8, %v9753_v20  ;;  %v8737_v25 = vpop.f32.mrf.mxu1  ;;  %v9304_v20 = vsel %vm15378_vm12, %v9299_v43, %v9303_v21  ;;  %v9314_v22 = vsel %vm15378_vm12, %v9309_v50, %v15929_v44  ;;  %v16647_v21 = vld [vmem:[#allocation56_spill] sm:$0xff]  ;;  %v9703_v2 = vpop.f32.mrf.mxu2 }
 0x705   : > { %v9284_v54 = vsel %vm15378_vm12, %v9279_v52, %v15878_v46  ;;  %v9523_v7 = vunpack.c.l.bf16 %v9304_v20  ;;  %v9524_v16 = vunpack.c.l.bf16 %v9314_v22  ;;  %v8839_v28 = vadd.f32 %v8737_v25, %v15585_v17  ;;  %v16648_v43 = vld [vmem:[#allocation8_spill] sm:$0xff]  ;;  %v8914_v20 = vld [vmem:[%s11856_s12 + $0xac] sm:$0xf] }
 0x706   : > { %v9500_v53 = vunpack.c.l.bf16 %v9284_v54  ;;  %v9315_v25 = vshrl.u32 %v15924_v47, 16  ;;  %v8912_v54 = vld [vmem:[%s11856_s12 + $0xa4] sm:$0xf] }
 0x707   : > { %10879 = vmatmul.msk.bf16.gmra.mxu1 %vm5479_vm8, %v16646_v45  ;;  %v9547_v45 = vadd.f32 %v9523_v7, %v9499_v10  ;;  %v9321_v22 = vshll.u32 %v8912_v54, 16  ;;  %v9325_v10 = vshrl.u32 %v8912_v54, 16  ;;  %v9345_v7 = vshrl.u32 %v8914_v20, 16 }
 0x708   : > { %v9548_v26 = vadd.f32 %v9524_v16, %v9500_v53  ;;  %v9341_v53 = vshll.u32 %v8914_v20, 16  ;;  %v9317_v47 = vrot.slane %v9315_v25, 4  ;;  %v16649_v20 = vld [vmem:[#allocation53_spill] sm:$0xff] }
 0x709   : > { %v9571_v27 = vpack.c.bf16 %v9547_v45, %v9547_v45  ;;  %v9323_v45 = vrot.slane %v9321_v22, 5 }
 0x70a   : > { %v9572_v41 = vpack.c.bf16 %v9548_v26, %v9548_v26  ;;  %v15964_v26 = vrot.slane %v9341_v53, 5 }
 0x70b   : > { %v9800_v56 = vld [vmem:[#allocation3 + $0x20] ss:$2 sm:$0xff]  ;;  %v9824_v61 = vld [vmem:[#allocation3 + $0x21] ss:$2 sm:$0xff]  ;;  %v9620_v15 = vunpack.c.l.b16 %v9571_v27  ;;  %v8916_v27 = vld [vmem:[%s11856_s12 + $0xb4] sm:$0xf] }
 0x70c   : > { %v9845_v11 = vadd.f32 %v9824_v61, %v9800_v56  ;;  %v8739_v24 = vpop.f32.mrf.mxu1  ;;  %v9621_v36 = vunpack.c.l.b16 %v9572_v41  ;;  %v9347_v41 = vrot.slane %v9345_v7, 4 }
 0x70d   : > { %v8840_v32 = vadd.f32 %v8739_v24, %v15613_v42  ;;  %v8915_v42 = vld [vmem:[%s11856_s12 + $0xb0] sm:$0xf] }
 0x70e   : > { %v9857_v23 = vmul.f32 0.25, %v9845_v11  ;;  %v9636_v63 = vpack.c.b16 %v9621_v36, %v9620_v15  ;;  %v9705_v11 = vpop.f32.mrf.mxu2  ;;  %v9351_v16 = vshll.u32 %v8915_v42, 16 }
 0x710   : > { %v9873_v51 = vadd.f32 %v15836_v31, %v9857_v23  ;;  %10897 = vmatmul.msk.bf16.gmra.mxu2 %vm479_vm1, %v9636_v63  ;;  %v9353_v15 = vrot.slane %v9351_v16, 5  ;;  %v9318_v63 = vor.u32 %v9317_v47, %v15929_v44 }
 0x712   : > { %v9889_v33 = vadd.f32 %v15843_v3, %v9873_v51 }
 0x714   : > { %9901 = vst.msk [vmem:[%s15855_s17 + $0x10] sm:$0xff] %vm5479_vm8, %v9889_v33  ;;  %v8742_v46 = vpop.f32.mrf.mxu1  ;;  %v9355_v33 = vshrl.u32 %v8915_v42, 16 }
 0x715   : > { %v8841_v23 = vadd.f32 %v8742_v46, %v15642_v40  ;;  %v9327_v40 = vrot.slane %v9325_v10, 4  ;;  %v8913_v46 = vld [vmem:[%s11856_s12 + $0xa8] sm:$0xf] }
 0x717   : > { %10880 = vmatmul.msk.bf16.gmra.mxu1 %vm5479_vm8, %v16647_v21  ;;  %v9708_v24 = vpop.f32.mrf.mxu2 }
 0x71c   : > { %v8744_v18 = vpop.f32.mrf.mxu1 }
 0x71d   : > { %v8842_v35 = vadd.f32 %v8744_v18, %v15676_v59  ;;  %v9331_v18 = vshll.u32 %v8913_v46, 16 }
 0x71f   : > { %v8930_v56 = vadd.f32 %v8842_v35, %v8839_v28  ;;  %v9357_v28 = vrot.slane %v9355_v33, 4  ;;  %v15969_v35 = vpop.f32.mrf.mxu0 }
 0x721   : > { %v9754_v61 = vadd.f32 %v9703_v2, %v8930_v56  ;;  %v9328_v2 = vor.u32 %v9327_v40, %v9323_v45 }
 0x723   : > { %9778 = vst.msk [vmem:[#allocation3 + $0x30] sm:$0xff] %vm5479_vm8, %v9754_v61  ;;  %v9348_v61 = vor.u32 %v9347_v41, %v15964_v26 }
 0x724   : > { %v8747_v38 = vpop.f32.mrf.mxu1 }
 0x725   : > { %v8843_v52 = vadd.f32 %v8747_v38, %v15689_v19  ;;  %v15962_v19 = vpop.f32.mrf.mxu3  ;;  %v9361_v38 = vshll.u32 %v8916_v27, 16 }
 0x727   : > { %10881 = vmatmul.msk.bf16.gmra.mxu1 %vm5479_vm8, %v16648_v43  ;;  %v8931_v50 = vadd.f32 %v8843_v52, %v8840_v32  ;;  %v9319_v32 = vrot.slane %v9318_v63, 4  ;;  %v9329_v52 = vrot.slane %v9328_v2, 4  ;;  %v9333_v43 = vrot.slane %v9331_v18, 5 }
 0x728   : > { %v9363_v44 = vrot.slane %v9361_v38, 5  ;;  %v9365_v63 = vshrl.u32 %v8916_v27, 16 }
 0x729   : > { %v9755_v17 = vadd.f32 %v9705_v11, %v8931_v50  ;;  %v9358_v50 = vor.u32 %v9357_v28, %v9353_v15  ;;  %v9324_v25 = vsel %vm15378_vm12, %v9319_v32, %v9323_v45 }
 0x72a   : > { %v9367_v32 = vrot.slane %v9365_v63, 4 }
 0x72b   : > { %9779 = vst.msk [vmem:[#allocation3 + $0x38] sm:$0xff] %vm5479_vm8, %v9755_v17 }
 0x72c   : > { %v8749_v59 = vpop.f32.mrf.mxu1 }
 0x72d   : > { %v8844_v34 = vadd.f32 %v8749_v59, %v15704_v39  ;;  %v9349_v59 = vrot.slane %v9348_v61, 4  ;;  %v15984_v10 = vpop.f32.mrf.mxu3 }
 0x72f   : > { %v8932_v51 = vadd.f32 %v8844_v34, %v8841_v23  ;;  %v9334_v23 = vsel %vm15378_vm12, %v9329_v52, %v9333_v43  ;;  %v9359_v34 = vrot.slane %v9358_v50, 4  ;;  %v9354_v42 = vsel %vm15378_vm12, %v9349_v59, %v9353_v15  ;;  %v8917_v15 = vld [vmem:[%s11856_s12 + $0xb8] sm:$0xf]  ;;  %v16001_v59 = vld [vmem:[%s11856_s12 + $0xc8] sm:$0xf] }
 0x730   : > { %v9502_v22 = vunpack.c.l.bf16 %v9334_v23  ;;  %v9371_v28 = vshll.u32 %v8917_v15, 16 }
 0x731   : > { %v9756_v39 = vadd.f32 %v9708_v24, %v8932_v51  ;;  %v9501_v24 = vunpack.c.l.bf16 %v9324_v25  ;;  %v9364_v53 = vsel %vm15378_vm12, %v9359_v34, %v9363_v44  ;;  %v9525_v51 = vunpack.c.l.bf16 %v9354_v42 }
 0x732   : > { %v9802_v36 = vld [vmem:[#allocation3 + $0x30] ss:$2 sm:$0xff]  ;;  %v9826_v21 = vld [vmem:[#allocation3 + $0x31] ss:$2 sm:$0xff]  ;;  %v9526_v16 = vunpack.c.l.bf16 %v9364_v53  ;;  %v9373_v25 = vrot.slane %v9371_v28, 5 }
 0x733   : > { %v9846_v56 = vadd.f32 %v9826_v21, %v9802_v36  ;;  %9780 = vst.msk [vmem:[#allocation3 + $0x40] sm:$0xff] %vm5479_vm8, %v9756_v39  ;;  %v9549_v33 = vadd.f32 %v9525_v51, %v9501_v24  ;;  %v15993_v39 = vpop.f32.mrf.mxu0  ;;  %v8920_v36 = vld [vmem:[%s11856_s12 + $0xc4] sm:$0xf]  ;;  %v9335_v21 = vshrl.u32 %v8913_v46, 16  ;;  %v9368_v46 = vor.u32 %v9367_v32, %v9363_v44 }
 0x734   : > { %v15973_v11 = vpop.f32.mrf.mxu1  ;;  %v9550_v47 = vadd.f32 %v9526_v16, %v9502_v22  ;;  %v9401_v61 = vshll.u32 %v8920_v36, 16  ;;  %v9405_v52 = vshrl.u32 %v8920_v36, 16  ;;  %v9411_v22 = vshll.u32 %v16001_v59, 16 }
 0x735   : > { %v9858_v17 = vmul.f32 0.25, %v9846_v56  ;;  %v9573_v40 = vpack.c.bf16 %v9549_v33, %v9549_v33  ;;  %v9375_v56 = vshrl.u32 %v8917_v15, 16  ;;  %v9337_v38 = vrot.slane %v9335_v21, 4  ;;  %v16003_v34 = vpop.f32.mrf.mxu3  ;;  %v16650_v15 = vld [vmem:[#allocation43_spill] sm:$0xff] }
 0x736   : > { %v9574_v41 = vpack.c.bf16 %v9550_v47, %v9550_v47  ;;  %v9407_v24 = vrot.slane %v9405_v52, 4 }
 0x737   : > { %v9874_v54 = vadd.f32 %v15836_v31, %v9858_v17  ;;  %10882 = vmatmul.msk.bf16.gmra.mxu1 %vm5479_vm8, %v16649_v20  ;;  %v9622_v2 = vunpack.c.l.b16 %v9573_v40  ;;  %v15998_v17 = vld [vmem:[%s11856_s12 + $0xbc] sm:$0xf]  ;;  %v9377_v23 = vrot.slane %v9375_v56, 4  ;;  %v16006_v20 = vrot.slane %v9401_v61, 5  ;;  %v9710_v56 = vpop.f32.mrf.mxu2 }
 0x738   : > { %v9623_v18 = vunpack.c.l.b16 %v9574_v41  ;;  %v9381_v27 = vshll.u32 %v15998_v17, 16 }
 0x739   : > { %v9890_v7 = vadd.f32 %v15843_v3, %v9874_v54  ;;  %v9338_v54 = vor.u32 %v9337_v38, %v9333_v43  ;;  %v9378_v42 = vor.u32 %v9377_v23, %v9373_v25  ;;  %v9408_v47 = vor.u32 %v9407_v24, %v16006_v20 }
 0x73a   : > { %v9637_v50 = vpack.c.b16 %v9623_v18, %v9622_v2  ;;  %v16010_v16 = vrot.slane %v9381_v27, 5  ;;  %v16013_v43 = vrot.slane %v9411_v22, 5 }
 0x73b   : > { %9902 = vst.msk [vmem:[%s15855_s17 + $0x18] sm:$0xff] %vm5479_vm8, %v9890_v7  ;;  %v9339_v51 = vrot.slane %v9338_v54, 4  ;;  %v9369_v7 = vrot.slane %v9368_v46, 4  ;;  %v9379_v33 = vrot.slane %v9378_v42, 4  ;;  %v16020_v41 = vpop.f32.mrf.mxu0  ;;  %v9409_v21 = vrot.slane %v9408_v47, 4 }
 0x73c   : > { %v15991_v45 = vpop.f32.mrf.mxu1  ;;  %10898 = vmatmul.msk.bf16.gmra.mxu2 %vm479_vm1, %v9637_v50 }
 0x73d   : > { %v9344_v44 = vsel %vm15378_vm12, %v9339_v51, %v15964_v26  ;;  %v9374_v40 = vsel %vm15378_vm12, %v9369_v7, %v9373_v25  ;;  %v9384_v36 = vsel %vm15378_vm12, %v9379_v33, %v16010_v16  ;;  %v9414_v26 = vsel %vm15378_vm12, %v9409_v21, %v16013_v43  ;;  %v16030_v32 = vpop.f32.mrf.mxu3 }
 0x73e   : > { %v9503_v63 = vunpack.c.l.bf16 %v9344_v44  ;;  %v9527_v2 = vunpack.c.l.bf16 %v9374_v40  ;;  %v9504_v18 = vunpack.c.l.bf16 %v9384_v36  ;;  %v9528_v61 = vunpack.c.l.bf16 %v9414_v26 }
 0x73f   : > { %v8845_v25 = vadd.f32 %v15973_v11, %v15717_v29  ;;  %v9713_v33 = vpop.f32.mrf.mxu2  ;;  %v8846_v47 = vadd.f32 %v15991_v45, %v15735_v57  ;;  %v16651_v11 = vld [vmem:[#allocation10_spill] sm:$0xff]  ;;  %v9385_v57 = vshrl.u32 %v15998_v17, 16 }
 0x740   : > { %v9551_v28 = vadd.f32 %v9527_v2, %v9503_v63  ;;  %v9552_v50 = vadd.f32 %v9528_v61, %v9504_v18 }
 0x742   : > { %v9575_v38 = vpack.c.bf16 %v9551_v28, %v9551_v28  ;;  %v9576_v54 = vpack.c.bf16 %v9552_v50, %v9552_v50  ;;  %v8919_v28 = vld [vmem:[%s11856_s12 + $0xc0] sm:$0xf] }
 0x743   : > { %v16035_v24 = vpop.f32.mrf.mxu0 }
 0x744   : > { %v8757_v53 = vpop.f32.mrf.mxu1  ;;  %v9624_v46 = vunpack.c.l.b16 %v9575_v38  ;;  %v9625_v42 = vunpack.c.l.b16 %v9576_v54  ;;  %v9391_v38 = vshll.u32 %v8919_v28, 16 }
 0x745   : > { %v8847_v45 = vadd.f32 %v8757_v53, %v15757_v60 }
 0x746   : > { %v9638_v51 = vpack.c.b16 %v9625_v42, %v9624_v46  ;;  %v9393_v46 = vrot.slane %v9391_v38, 5  ;;  %v8923_v42 = vld [vmem:[%s11856_s12 + $0xd0] sm:$0x1] }
 0x747   : > { %10883 = vmatmul.msk.bf16.gmra.mxu1 %vm5479_vm8, %v16650_v15  ;;  %v9715_v61 = vpop.f32.mrf.mxu2 }
 0x74b   : > { %v16046_v21 = vpop.f32.mrf.mxu0 }
 0x74c   : > { %v8759_v52 = vpop.f32.mrf.mxu1  ;;  %10899 = vmatmul.msk.bf16.gmra.mxu2 %vm479_vm1, %v9638_v51 }
 0x74d   : > { %v8848_v23 = vadd.f32 %v8759_v52, %v15767_v5  ;;  %v16042_v5 = vpop.f32.mrf.mxu3  ;;  %v9395_v52 = vshrl.u32 %v8919_v28, 16 }
 0x74f   : > { %v8933_v27 = vadd.f32 %v8848_v23, %v8845_v25  ;;  %v9397_v60 = vrot.slane %v9395_v52, 4 }
 0x751   : > { %v9757_v22 = vadd.f32 %v9710_v56, %v8933_v27  ;;  %v8922_v56 = vld [vmem:[%s11856_s12 + $0xcc] sm:$0xf] }
 0x752   : > { %v9421_v50 = vshll.u32 %v8922_v56, 16  ;;  %v9425_v54 = vshrl.u32 %v8922_v56, 16 }
 0x753   : > { %9781 = vst.msk [vmem:[#allocation3 + $0x48] sm:$0xff] %vm5479_vm8, %v9757_v22 }
 0x754   : > { %v8762_v7 = vpop.f32.mrf.mxu1  ;;  %v9423_v22 = vrot.slane %v9421_v50, 5  ;;  %v9427_v51 = vrot.slane %v9425_v54, 4 }
 0x755   : > { %v8849_v29 = vadd.f32 %v8762_v7, %v15778_v13  ;;  %v9415_v13 = vshrl.u32 %v16001_v59, 16  ;;  %v16056_v17 = vpop.f32.mrf.mxu3  ;;  %v9387_v59 = vrot.slane %v9385_v57, 4 }
 0x757   : > { %10884 = vmatmul.msk.bf16.gmra.mxu1 %vm5479_vm8, %v16651_v11  ;;  %v8934_v44 = vadd.f32 %v8849_v29, %v8846_v47  ;;  %v9417_v53 = vrot.slane %v9415_v13, 4  ;;  %v9388_v7 = vor.u32 %v9387_v59, %v16010_v16  ;;  %v9431_v29 = vshll.u32 %v8923_v42, 16 }
 0x758   : > { %v9428_v11 = vor.u32 %v9427_v51, %v9423_v22 }
 0x759   : > { %v9758_v40 = vadd.f32 %v9713_v33, %v8934_v44  ;;  %v9398_v33 = vor.u32 %v9397_v60, %v9393_v46  ;;  %v9418_v47 = vor.u32 %v9417_v53, %v16013_v43 }
 0x75a   : > { %v9804_v15 = vld [vmem:[#allocation3 + $0x40] ss:$2 sm:$0xff]  ;;  %v9828_v36 = vld [vmem:[#allocation3 + $0x41] ss:$2 sm:$0xff]  ;;  %v9429_v57 = vrot.slane %v9428_v11, 4 }
 0x75b   : > { %v9847_v63 = vadd.f32 %v9828_v36, %v9804_v15  ;;  %9782 = vst.msk [vmem:[#allocation3 + $0x50] sm:$0xff] %vm5479_vm8, %v9758_v40  ;;  %v9389_v40 = vrot.slane %v9388_v7, 4  ;;  %v9399_v15 = vrot.slane %v9398_v33, 4  ;;  %v9419_v36 = vrot.slane %v9418_v47, 4  ;;  %v16653_v33 = vld [vmem:[#allocation19_spill] sm:$0xff] }
 0x75c   : > { %v8764_v2 = vpop.f32.mrf.mxu1  ;;  %v7922_v47 = vadd.f32 %v15962_v19, %v16653_v33 }
 0x75d   : > { %v9859_v18 = vmul.f32 0.25, %v9847_v63  ;;  %v8850_v26 = vadd.f32 %v8764_v2, %v15789_v55  ;;  %v9433_v63 = vrot.slane %v9431_v29, 5  ;;  %v16065_v2 = vpop.f32.mrf.mxu0  ;;  %v9394_v16 = vsel %vm15378_vm12, %v9389_v40, %v9393_v46  ;;  %v16078_v52 = vpop.f32.mrf.mxu3  ;;  %v16654_v29 = vld [vmem:[#allocation31_spill] sm:$0xff]  ;;  %v16655_v40 = vld [vmem:[#allocation30_spill] sm:$0xff] }
 0x75e   : > { %v9404_v43 = vsel %vm15378_vm12, %v9399_v15, %v16006_v20  ;;  %v9424_v13 = vsel %vm15378_vm12, %v9419_v36, %v9423_v22  ;;  %v7925_v11 = vadd.f32 %v16030_v32, %v16654_v29 }
 0x75f   : > { %v9875_v25 = vadd.f32 %v15836_v31, %v9859_v18  ;;  %v8935_v23 = vadd.f32 %v8850_v26, %v8847_v45  ;;  %v16652_v45 = vld [vmem:[#allocation15_spill] sm:$0xff]  ;;  %v9434_v18 = vsel %vm15378_vm12, %v9429_v57, %v9433_v63  ;;  %v9505_v26 = vunpack.c.l.bf16 %v9394_v16 }
 0x760   : > { %v9506_v28 = vunpack.c.l.bf16 %v9404_v43  ;;  %v9529_v56 = vunpack.c.l.bf16 %v9424_v13  ;;  %v8544_v63 = vadd.f32 %v15969_v35, %v7922_v47  ;;  %v8547_v57 = vadd.f32 %v16035_v24, %v7925_v11 }
 0x761   : > { %v9891_v55 = vadd.f32 %v15843_v3, %v9875_v25  ;;  %v9759_v27 = vadd.f32 %v9715_v61, %v8935_v23  ;;  %v9530_v61 = vunpack.c.l.bf16 %v9434_v18  ;;  %v16656_v18 = vld [vmem:[#allocation17_spill] sm:$0xff] }
 0x762   : > { %v9553_v38 = vadd.f32 %v9529_v56, %v9505_v26  ;;  %v9718_v36 = vpop.f32.mrf.mxu2  ;;  %v7923_v19 = vadd.f32 %v15984_v10, %v16656_v18  ;;  %v16657_v26 = vld [vmem:[#allocation23_spill] sm:$0xff]  ;;  %v16658_v10 = vld [vmem:[#allocation26_spill] sm:$0xff] }
 0x763   : > { %9903 = vst.msk [vmem:[%s15855_s17 + $0x20] sm:$0xff] %vm5479_vm8, %v9891_v55  ;;  %v9554_v50 = vadd.f32 %v9530_v61, %v9506_v28  ;;  %v7926_v32 = vadd.f32 %v16042_v5, %v16657_v26  ;;  %v8619_v61 = vrot.slane %v15827_v14, 1  ;;  %v7927_v14 = vadd.f32 %v16056_v17, %v15413_v4 }
 0x764   : > { %9783 = vst.msk [vmem:[#allocation3 + $0x58] sm:$0xff] %vm5479_vm8, %v9759_v27  ;;  %v8767_v44 = vpop.f32.mrf.mxu1  ;;  %v9577_v23 = vpack.c.bf16 %v9553_v38, %v9553_v38  ;;  %v8545_v35 = vadd.f32 %v15993_v39, %v7923_v19  ;;  %v8621_v4 = vrot.slane %v15881_v48, 1  ;;  %v7928_v19 = vadd.f32 %v16078_v52, %v15446_v8 }
 0x765   : > { %v9578_v46 = vpack.c.bf16 %v9554_v50, %v9554_v50  ;;  %v16080_v37 = vpop.f32.mrf.mxu0  ;;  %v16085_v51 = vpop.f32.mrf.mxu3  ;;  %v8851_v43 = vadd.f32 %v8767_v44, %v8544_v63  ;;  %v8548_v24 = vadd.f32 %v16046_v21, %v7926_v32 }
 0x766   : > { %v9626_v60 = vunpack.c.l.b16 %v9577_v23  ;;  %v16659_v23 = vrot.slane %v16658_v10, 1 }
 0x767   : > { %10885 = vmatmul.msk.bf16.gmra.mxu1 %vm5479_vm8, %v16652_v45  ;;  %v9627_v55 = vunpack.c.l.b16 %v9578_v46 }
 0x768   : > { %v8620_v5 = vsel %vm5871_vm9, %v16659_v23, %v8619_v61 }
 0x769   : > { %v9639_v42 = vpack.c.b16 %v9627_v55, %v9626_v60 }
 0x76a   : > { %v9720_v50 = vpop.f32.mrf.mxu2 }
 0x76b   : > { %v9806_v25 = vld [vmem:[#allocation3 + $0x50] ss:$2 sm:$0xff]  ;;  %v9830_v20 = vld [vmem:[#allocation3 + $0x51] ss:$2 sm:$0xff]  ;;  %10900 = vmatmul.msk.bf16.gmra.mxu2 %vm479_vm1, %v9639_v42 }
 0x76c   : > { %v9848_v54 = vadd.f32 %v9830_v20, %v9806_v25  ;;  %v8769_v59 = vpop.f32.mrf.mxu1 }
 0x76d   : > { %v16095_v15 = vpop.f32.mrf.mxu0  ;;  %v16099_v45 = vpop.f32.mrf.mxu3  ;;  %v8852_v25 = vadd.f32 %v8769_v59, %v8545_v35  ;;  %v8549_v59 = vadd.f32 %v16065_v2, %v7927_v14 }
 0x76e   : > { %v9860_v53 = vmul.f32 0.25, %v9848_v54  ;;  %v16660_v54 = vld [vmem:[#allocation4_spill] sm:$0xff] }
 0x76f   : > { %v7924_v46 = vadd.f32 %v16003_v34, %v16660_v54 }
 0x770   : > { %v9876_v27 = vadd.f32 %v15836_v31, %v9860_v53 }
 0x771   : > { %v8546_v21 = vadd.f32 %v16020_v41, %v7924_v46 }
 0x772   : > { %v9892_v22 = vadd.f32 %v15843_v3, %v9876_v27 }
 0x774   : > { %9904 = vst.msk [vmem:[%s15855_s17 + $0x28] sm:$0xff] %vm5479_vm8, %v9892_v22  ;;  %v8772_v7 = vpop.f32.mrf.mxu1 }
 0x775   : > { %v16106_v38 = vpop.f32.mrf.mxu0  ;;  %v7860_v60 = vpop.f32.mrf.mxu3  ;;  %v8853_v27 = vadd.f32 %v8772_v7, %v8546_v21 }
 0x776   : > { %v7931_v26 = vadd.f32 %v7860_v60, %v15524_v12 }
 0x777   : > { %10886 = vmatmul.msk.bf16.gmra.mxu1 %vm5479_vm8, %v16655_v40 }
 0x779   : > { %v9723_v33 = vpop.f32.mrf.mxu2 }
 0x77c   : > { %v8774_v16 = vpop.f32.mrf.mxu1 }
 0x77d   : > { %v8854_v13 = vadd.f32 %v8774_v16, %v8547_v57  ;;  %v8482_v22 = vpop.f32.mrf.mxu0  ;;  %v7863_v47 = vpop.f32.mrf.mxu3 }
 0x77f   : > { %v8936_v28 = vadd.f32 %v8854_v13, %v8851_v43 }
 0x781   : > { %v9760_v56 = vadd.f32 %v9718_v36, %v8936_v28  ;;  %v8622_v36 = vsel %vm5871_vm9, %v8619_v61, %v8621_v4  ;;  %v9725_v32 = vpop.f32.mrf.mxu2  ;;  %v8550_v28 = vadd.f32 %v16080_v37, %v7928_v19 }
 0x783   : > { %9784 = vst.msk [vmem:[#allocation3 + $0x60] sm:$0xff] %vm5479_vm8, %v9760_v56  ;;  %v8553_v56 = vadd.f32 %v8482_v22, %v7931_v26 }
 0x784   : > { %v8777_v44 = vpop.f32.mrf.mxu1 }
 0x785   : > { %v8855_v20 = vadd.f32 %v8777_v44, %v8548_v24  ;;  %v8485_v63 = vpop.f32.mrf.mxu0  ;;  %v7865_v48 = vpop.f32.mrf.mxu3 }
 0x787   : > { %10887 = vmatmul.msk.bf16.gmra.mxu1 %vm5479_vm8, %v8620_v5  ;;  %v8937_v39 = vadd.f32 %v8855_v20, %v8852_v25  ;;  %v7932_v25 = vadd.f32 %v7863_v47, %v15539_v58  ;;  %v7511_v5 = vadd.f32 %v15547_v6, %v15451_v62 }
 0x789   : > { %v9761_v53 = vadd.f32 %v9720_v50, %v8937_v39  ;;  %v7929_v50 = vadd.f32 %v16085_v51, %v15475_v9  ;;  %v8554_v12 = vadd.f32 %v8485_v63, %v7932_v25  ;;  %v7930_v9 = vadd.f32 %v16099_v45, %v15501_v0 }
 0x78a   : > { %v7933_v58 = vadd.f32 %v7865_v48, %v7511_v5 }
 0x78b   : > { %9785 = vst.msk [vmem:[#allocation3 + $0x68] sm:$0xff] %vm5479_vm8, %v9761_v53  ;;  %v8551_v8 = vadd.f32 %v16095_v15, %v7929_v50  ;;  %v8552_v21 = vadd.f32 %v16106_v38, %v7930_v9  ;;  %v16666_v9 = vld [vmem:[#allocation7_spill] sm:$0xff] }
 0x78c   : > { %v8779_v55 = vpop.f32.mrf.mxu1 }
 0x78d   : > { %v8856_v42 = vadd.f32 %v8779_v55, %v8549_v59  ;;  %v8487_v43 = vpop.f32.mrf.mxu0  ;;  %v7868_v18 = vpop.f32.mrf.mxu3 }
 0x78e   : > { %v8555_v55 = vadd.f32 %v8487_v43, %v7933_v58  ;;  %v7934_v43 = vadd.f32 %v7868_v18, %v15565_v30 }
 0x78f   : > { %v8938_v34 = vadd.f32 %v8856_v42, %v8853_v27 }
 0x791   : > { %v9762_v17 = vadd.f32 %v9723_v33, %v8938_v34 }
 0x792   : > { %v9808_v29 = vld [vmem:[#allocation3 + $0x60] ss:$2 sm:$0xff]  ;;  %v9832_v11 = vld [vmem:[#allocation3 + $0x61] ss:$2 sm:$0xff] }
 0x793   : > { %v9849_v40 = vadd.f32 %v9832_v11, %v9808_v29  ;;  %9786 = vst.msk [vmem:[#allocation3 + $0x70] sm:$0xff] %vm5479_vm8, %v9762_v17  ;;  %v9728_v37 = vpop.f32.mrf.mxu2 }
 0x794   : > { %v8782_v41 = vpop.f32.mrf.mxu1 }
 0x795   : > { %v9861_v2 = vmul.f32 0.25, %v9849_v40  ;;  %v8490_v61 = vpop.f32.mrf.mxu0  ;;  %v8857_v24 = vadd.f32 %v8782_v41, %v8550_v28  ;;  %v7870_v10 = vpop.f32.mrf.mxu3 }
 0x797   : > { %v9877_v7 = vadd.f32 %v15836_v31, %v9861_v2  ;;  %10888 = vmatmul.msk.bf16.gmra.mxu1 %vm5479_vm8, %v8622_v36 }
 0x799   : > { %v9893_v57 = vadd.f32 %v15843_v3, %v9877_v7 }
 0x79b   : > { %9905 = vst.msk [vmem:[%s15855_s17 + $0x30] sm:$0xff] %vm5479_vm8, %v9893_v57  ;;  %v9730_v22 = vpop.f32.mrf.mxu2 }
 0x79c   : > { %v8784_v16 = vpop.f32.mrf.mxu1 }
 0x79d   : > { %v8858_v54 = vadd.f32 %v8784_v16, %v8551_v8  ;;  %v8492_v14 = vpop.f32.mrf.mxu0  ;;  %v7873_v60 = vpop.f32.mrf.mxu3  ;;  %v7515_v16 = vadd.f32 %v15647_v49, %v15542_v1 }
 0x79e   : > { %v7936_v58 = vadd.f32 %v7873_v60, %v16666_v9 }
 0x7a4   : > { %v8787_v13 = vpop.f32.mrf.mxu1 }
 0x7a5   : > { %v8859_v6 = vadd.f32 %v8787_v13, %v8552_v21  ;;  %v8495_v33 = vpop.f32.mrf.mxu0  ;;  %v7875_v38 = vpop.f32.mrf.mxu3 }
 0x7a6   : > { %v7937_v13 = vadd.f32 %v7875_v38, %v7515_v16  ;;  %v11776_v38 = vld [vmem:[%s16197_s4] ss:$0 sm:$0xff] }
 0x7ac   : > { %v8789_v35 = vpop.f32.mrf.mxu1 }
 0x7ad   : > { %v8860_v44 = vadd.f32 %v8789_v35, %v8553_v56  ;;  %v8497_v47 = vpop.f32.mrf.mxu0  ;;  %v7878_v36 = vpop.f32.mrf.mxu3  ;;  %v16661_v35 = vld [vmem:[#allocation41_spill] sm:$0xff] }
 0x7ae   : > { %v8559_v28 = vadd.f32 %v8497_v47, %v7937_v13  ;;  %v11777_v47 = vld [vmem:[%s16199_s6] ss:$0 sm:$0xff] }
 0x7af   : > { %v8939_v20 = vadd.f32 %v8860_v44, %v8857_v24  ;;  %v16662_v24 = vld [vmem:[#allocation29_spill] sm:$0xff] }
 0x7b1   : > { %v9763_v23 = vadd.f32 %v9725_v32, %v8939_v20  ;;  %v8556_v32 = vadd.f32 %v8490_v61, %v7934_v43  ;;  %v16663_v20 = vld [vmem:[#allocation35_spill] sm:$0xff] }
 0x7b3   : > { %9787 = vst.msk [vmem:[#allocation3 + $0x78] sm:$0xff] %vm5479_vm8, %v9763_v23  ;;  %v7938_v23 = vadd.f32 %v7878_v36, %v16663_v20 }
 0x7b4   : > { %v8792_v52 = vpop.f32.mrf.mxu1 }
 0x7b5   : > { %v8861_v46 = vadd.f32 %v8792_v52, %v8554_v12  ;;  %v8500_v57 = vpop.f32.mrf.mxu0  ;;  %v7880_v19 = vpop.f32.mrf.mxu3  ;;  %v16664_v52 = vld [vmem:[#allocation16_spill] sm:$0xff] }
 0x7b6   : > { %v8560_v30 = vadd.f32 %v8500_v57, %v7938_v23 }
 0x7b7   : > { %v8940_v51 = vadd.f32 %v8861_v46, %v8858_v54 }
 0x7b9   : > { %v9764_v39 = vadd.f32 %v9728_v37, %v8940_v51  ;;  %v16665_v37 = vld [vmem:[#allocation5_spill] sm:$0xff] }
 0x7ba   : > { %v9810_v53 = vld [vmem:[#allocation3 + $0x70] ss:$2 sm:$0xff]  ;;  %v9834_v15 = vld [vmem:[#allocation3 + $0x71] ss:$2 sm:$0xff]  ;;  %v7517_v5 = vadd.f32 %v16665_v37, %v16664_v52 }
 0x7bb   : > { %v9850_v59 = vadd.f32 %v9834_v15, %v9810_v53  ;;  %9788 = vst.msk [vmem:[#allocation3 + $0x80] sm:$0xff] %vm5479_vm8, %v9764_v39  ;;  %v8558_v15 = vadd.f32 %v8495_v33, %v7936_v58 }
 0x7bc   : > { %v8794_v62 = vpop.f32.mrf.mxu1  ;;  %v7939_v51 = vadd.f32 %v7880_v19, %v7517_v5 }
 0x7bd   : > { %v9862_v27 = vmul.f32 0.25, %v9850_v59  ;;  %v8862_v42 = vadd.f32 %v8794_v62, %v8555_v55  ;;  %v8502_v50 = vpop.f32.mrf.mxu0  ;;  %v7883_v1 = vpop.f32.mrf.mxu3 }
 0x7bf   : > { %v9878_v0 = vadd.f32 %v15836_v31, %v9862_v27  ;;  %v8941_v45 = vadd.f32 %v8862_v42, %v8859_v6  ;;  %v9733_v26 = vpop.f32.mrf.mxu2 }
 0x7c1   : > { %v9894_v34 = vadd.f32 %v15843_v3, %v9878_v0  ;;  %v9765_v4 = vadd.f32 %v9730_v22, %v8941_v45 }
 0x7c3   : > { %9906 = vst.msk [vmem:[%s15855_s17 + $0x38] sm:$0xff] %vm5479_vm8, %v9894_v34 }
 0x7c4   : > { %9789 = vst.msk [vmem:[#allocation3 + $0x88] sm:$0xff] %vm5479_vm8, %v9765_v4  ;;  %v8797_v17 = vpop.f32.mrf.mxu1 }
 0x7c5   : > { %v8863_v44 = vadd.f32 %v8797_v17, %v8556_v32  ;;  %v8505_v39 = vpop.f32.mrf.mxu0  ;;  %v7885_v21 = vpop.f32.mrf.mxu3 }
 0x7c7   : > { %v9735_v61 = vpop.f32.mrf.mxu2 }
 0x7cb   : > { %v9812_v29 = vld [vmem:[#allocation3 + $0x80] ss:$2 sm:$0xff]  ;;  %v9836_v11 = vld [vmem:[#allocation3 + $0x81] ss:$2 sm:$0xff] }
 0x7cc   : > { %v9851_v40 = vadd.f32 %v9836_v11, %v9812_v29  ;;  %v8799_v41 = vpop.f32.mrf.mxu1 }
 0x7cd   : > { %v8507_v22 = vpop.f32.mrf.mxu0  ;;  %v7888_v33 = vpop.f32.mrf.mxu3 }
 0x7ce   : > { %v9863_v2 = vmul.f32 0.25, %v9851_v40 }
 0x7cf   : > { %v9738_v6 = vpop.f32.mrf.mxu2 }
 0x7d0   : > { %v9879_v7 = vadd.f32 %v15836_v31, %v9863_v2  ;;  %v7513_v31 = vadd.f32 %v16662_v24, %v16661_v35  ;;  %v16667_v2 = vld [vmem:[#allocation27_spill] sm:$0xff]  ;;  %v16671_v35 = vld [vmem:[#allocation57_spill] sm:$0xff] }
 0x7d2   : > { %v9895_v63 = vadd.f32 %v15843_v3, %v9879_v7  ;;  %v7935_v25 = vadd.f32 %v7870_v10, %v7513_v31  ;;  %v16668_v7 = vld [vmem:[#allocation48_spill] sm:$0xff] }
 0x7d4   : > { %9907 = vst.msk [vmem:[%s15855_s17 + $0x40] sm:$0xff] %vm5479_vm8, %v9895_v63  ;;  %v8802_v48 = vpop.f32.mrf.mxu1  ;;  %v8557_v49 = vadd.f32 %v8492_v14, %v7935_v25  ;;  %v8561_v14 = vadd.f32 %v8502_v50, %v7939_v51  ;;  %v7521_v63 = vadd.f32 %v16668_v7, %v16667_v2  ;;  %v16672_v25 = vld [vmem:[#allocation24_spill] sm:$0xff] }
 0x7d5   : > { %v8865_v55 = vadd.f32 %v8802_v48, %v8558_v15  ;;  %v8510_v11 = vpop.f32.mrf.mxu0  ;;  %v16669_v48 = vld [vmem:[#allocation36_spill] sm:$0xff] }
 0x7d6   : > { %v8864_v54 = vadd.f32 %v8799_v41, %v8557_v49  ;;  %v7890_v41 = vpop.f32.mrf.mxu3  ;;  %v7940_v16 = vadd.f32 %v7883_v1, %v16669_v48 }
 0x7d7   : > { %v7943_v43 = vadd.f32 %v7890_v41, %v7521_v63  ;;  %v9740_v32 = vpop.f32.mrf.mxu2 }
 0x7d8   : > { %v8562_v19 = vadd.f32 %v8505_v39, %v7940_v16 }
 0x7dc   : > { %v8804_v56 = vpop.f32.mrf.mxu1 }
 0x7dd   : > { %v8866_v3 = vadd.f32 %v8804_v56, %v8559_v28  ;;  %v8512_v57 = vpop.f32.mrf.mxu0  ;;  %v16670_v56 = vld [vmem:[#allocation13_spill] sm:$0xff] }
 0x7de   : > { %v7893_v13 = vpop.f32.mrf.mxu3  ;;  %v7519_v24 = vadd.f32 %v16671_v35, %v16670_v56 }
 0x7df   : > { %v8942_v8 = vadd.f32 %v8866_v3, %v8863_v44  ;;  %v7944_v20 = vadd.f32 %v7893_v13, %v16672_v25 }
 0x7e0   : > { %v7941_v50 = vadd.f32 %v7885_v21, %v7519_v24 }
 0x7e1   : > { %v9766_v12 = vadd.f32 %v9733_v26, %v8942_v8  ;;  %v8565_v26 = vadd.f32 %v8512_v57, %v7943_v43 }
 0x7e2   : > { %v8563_v49 = vadd.f32 %v8507_v22, %v7941_v50 }
 0x7e3   : > { %9790 = vst.msk [vmem:[#allocation3 + $0x90] sm:$0xff] %vm5479_vm8, %v9766_v12 }
 0x7e4   : > { %v8807_v18 = vpop.f32.mrf.mxu1 }
 0x7e5   : > { %v8867_v46 = vadd.f32 %v8807_v18, %v8560_v30  ;;  %v8515_v3 = vpop.f32.mrf.mxu0  ;;  %v16673_v18 = vld [vmem:[#allocation9_spill] sm:$0xff] }
 0x7e6   : > { %v8566_v12 = vadd.f32 %v8515_v3, %v7944_v20  ;;  %v7895_v1 = vpop.f32.mrf.mxu3 }
 0x7e7   : > { %v8943_v10 = vadd.f32 %v8867_v46, %v8864_v54  ;;  %v16675_v46 = vld [vmem:[#allocation20_spill] sm:$0xff] }
 0x7e8   : > { %v7942_v9 = vadd.f32 %v7888_v33, %v16675_v46 }
 0x7e9   : > { %v9767_v53 = vadd.f32 %v9735_v61, %v8943_v10  ;;  %v16674_v61 = vld [vmem:[#allocation46_spill] sm:$0xff] }
 0x7ea   : > { %v7523_v52 = vadd.f32 %v16674_v61, %v16673_v18  ;;  %v8564_v21 = vadd.f32 %v8510_v11, %v7942_v9 }
 0x7eb   : > { %9791 = vst.msk [vmem:[#allocation3 + $0x98] sm:$0xff] %vm5479_vm8, %v9767_v53 }
 0x7ec   : > { %v8809_v59 = vpop.f32.mrf.mxu1  ;;  %v7945_v58 = vadd.f32 %v7895_v1, %v7523_v52 }
 0x7ed   : > { %v8868_v62 = vadd.f32 %v8809_v59, %v8561_v14  ;;  %v8517_v10 = vpop.f32.mrf.mxu0 }
 0x7ee   : > { %v9743_v54 = vpop.f32.mrf.mxu2  ;;  %v8567_v14 = vadd.f32 %v8517_v10, %v7945_v58 }
 0x7ef   : > { %v8944_v27 = vadd.f32 %v8868_v62, %v8865_v55 }
 0x7f1   : > { %v9768_v42 = vadd.f32 %v9738_v6, %v8944_v27 }
 0x7f2   : > { %v9814_v0 = vld [vmem:[#allocation3 + $0x90] ss:$2 sm:$0xff]  ;;  %v9838_v45 = vld [vmem:[#allocation3 + $0x91] ss:$2 sm:$0xff] }
 0x7f3   : > { %v9852_v60 = vadd.f32 %v9838_v45, %v9814_v0  ;;  %9792 = vst.msk [vmem:[#allocation3 + $0xa0] sm:$0xff] %vm5479_vm8, %v9768_v42 }
 0x7f4   : > { %v8812_v34 = vpop.f32.mrf.mxu1 }
 0x7f5   : > { %v9864_v4 = vmul.f32 0.25, %v9852_v60  ;;  %v8869_v31 = vadd.f32 %v8812_v34, %v8562_v19 }
 0x7f6   : > { %v9745_v0 = vpop.f32.mrf.mxu2 }
 0x7f7   : > { %v9880_v17 = vadd.f32 %v11776_v38, %v9864_v4 }
 0x7f9   : > { %v9896_v29 = vadd.f32 %v11777_v47, %v9880_v17 }
 0x7fb   : > { %9908 = vst.msk [vmem:[%s15855_s17 + $0x48] sm:$0xff] %vm5479_vm8, %v9896_v29 }
 0x7fc   : > { %v8814_v40 = vpop.f32.mrf.mxu1 }
 0x7fd   : > { %v8870_v37 = vadd.f32 %v8814_v40, %v8563_v49 }
 0x804   : > { %v8817_v36 = vpop.f32.mrf.mxu1 }
 0x805   : > { %v8871_v62 = vadd.f32 %v8817_v36, %v8564_v21 }
 0x80c   : > { %v8819_v28 = vpop.f32.mrf.mxu1 }
 0x80d   : > { %v8872_v44 = vadd.f32 %v8819_v28, %v8565_v26 }
 0x80f   : > { %v8945_v23 = vadd.f32 %v8872_v44, %v8869_v31 }
 0x811   : > { %v9769_v8 = vadd.f32 %v9740_v32, %v8945_v23 }
 0x813   : > { %9793 = vst.msk [vmem:[#allocation3 + $0xa8] sm:$0xff] %vm5479_vm8, %v9769_v8 }
 0x814   : > { %v8822_v30 = vpop.f32.mrf.mxu1 }
 0x815   : > { %v8873_v5 = vadd.f32 %v8822_v30, %v8566_v12 }
 0x817   : > { %v8946_v51 = vadd.f32 %v8873_v5, %v8870_v37 }
 0x819   : > { %v9770_v39 = vadd.f32 %v9743_v54, %v8946_v51 }
 0x81a   : > { %v9816_v53 = vld [vmem:[#allocation3 + $0xa0] ss:$2 sm:$0xff]  ;;  %v9840_v15 = vld [vmem:[#allocation3 + $0xa1] ss:$2 sm:$0xff] }
 0x81b   : > { %v9853_v59 = vadd.f32 %v9840_v15, %v9816_v53  ;;  %9794 = vst.msk [vmem:[#allocation3 + $0xb0] sm:$0xff] %vm5479_vm8, %v9770_v39 }
 0x81c   : > { %v8824_v55 = vpop.f32.mrf.mxu1 }
 0x81d   : > { %v9865_v6 = vmul.f32 0.25, %v9853_v59  ;;  %v8874_v27 = vadd.f32 %v8824_v55, %v8567_v14 }
 0x81f   : > { %v9881_v42 = vadd.f32 %v11776_v38, %v9865_v6  ;;  %v8947_v22 = vadd.f32 %v8874_v27, %v8871_v62 }
 0x821   : > { %v9897_v45 = vadd.f32 %v11777_v47, %v9881_v42  ;;  %v9771_v60 = vadd.f32 %v9745_v0, %v8947_v22 }
 0x823   : > { %9909 = vst.msk [vmem:[%s15855_s17 + $0x50] sm:$0xff] %vm5479_vm8, %v9897_v45 }
 0x824   : > { %9795 = vst.msk [vmem:[#allocation3 + $0xb8] sm:$0xff] %vm5479_vm8, %v9771_v60 }
 0x82b   : > { %v9818_v34 = vld [vmem:[#allocation3 + $0xb0] ss:$2 sm:$0xff]  ;;  %v9842_v4 = vld [vmem:[#allocation3 + $0xb1] ss:$2 sm:$0xff] }
 0x82c   : > { %v9854_v33 = vadd.f32 %v9842_v4, %v9818_v34 }
 0x82e   : > { %v9866_v17 = vmul.f32 0.25, %v9854_v33 }
 0x830   : > { %v9882_v29 = vadd.f32 %v11776_v38, %v9866_v17 }
 0x832   : > { %v9898_v11 = vadd.f32 %v11777_v47, %v9882_v29 }
 0x834   : > { %9910 = vst.msk [vmem:[%s15855_s17 + $0x58] sm:$0xff] %vm5479_vm8, %v9898_v11 }
 0x835 PF: > { %s17_s24 = sadd.s32 1, %s11787_s24  }
 0x836   : > { %p14_p4 = scmp.ge.s32.totalorder %s17_s24, 4  }
 0x838   :  { %16 = sbr.rel (!%p14_p4) target bundleno = 1 (0x1), region = 117 }

</bundles_post_ra>
